<compile_context>
chip_gen: v6e
topology: v6e:2x2x1
jax: 0.10.0
libtpu: 0.0.40
codegen_flags: <defaults>
</compile_context>

<pallas_src>
import jax
import jax.numpy as jnp
from jax.experimental import pallas as pl
from jax.experimental.pallas import tpu as pltpu


def _leaky_relu(x, slope=0.2):
    return jnp.where(x > 0, x, slope * x)


def _round_up(x, m):
    return ((x + m - 1) // m) * m


def discriminator_kernel(x_ref,
                         w1_ref, b1_ref,
                         w2_ref, b2_ref,
                         w3_ref, b3_ref,
                         w4_ref, b4_ref,
                         o_ref):
    """Fused 4-layer MLP for one batch tile, entirely in VMEM.

    x/weights are in the MXU compute dtype (bf16); accumulation, bias add and
    LeakyReLU happen in f32; activations are re-cast to the compute dtype only
    to feed the next matmul.
    """
    cdt = x_ref.dtype  # compute dtype for MXU operands (bf16)

    h = jnp.dot(x_ref[...], w1_ref[...],
                preferred_element_type=jnp.float32) + b1_ref[...]
    h = _leaky_relu(h)

    h = jnp.dot(h.astype(cdt), w2_ref[...],
                preferred_element_type=jnp.float32) + b2_ref[...]
    h = _leaky_relu(h)

    h = jnp.dot(h.astype(cdt), w3_ref[...],
                preferred_element_type=jnp.float32) + b3_ref[...]
    h = _leaky_relu(h)

    out = jnp.dot(h.astype(cdt), w4_ref[...],
                  preferred_element_type=jnp.float32) + b4_ref[...]
    o_ref[...] = out.astype(o_ref.dtype)   # lane-dense [tile_b, 128k] store


def discriminator_forward(image, params, *, tile_b=256,
                          compute_dtype=jnp.bfloat16):
    """image: [B, im_dim] float32. params: dict of (W_t [in,out], b [1,out]).

    Pads batch to a multiple of tile_b and every feature dim to a multiple of
    128 (zeros), runs the fused kernel on a 1-D batch grid, and slices the
    result back to [B, out_dim].
    """
    B, im_dim = image.shape
    ws = [params[f"w{i}"] for i in range(1, 5)]
    bs = [params[f"b{i}"] for i in range(1, 5)]
    dims = [ws[0].shape[0]] + [w.shape[1] for w in ws]
    assert dims[0] == im_dim, "image feature dim must match w1 rows"
    out_dim = dims[-1]

    # Lane/sublane-friendly padded sizes.
    pdims = [_round_up(d, 128) for d in dims]
    tile_b = max(8, _round_up(tile_b, 8))
    B_pad = _round_up(B, tile_b)

    # Zero-padded, bf16 image (extra rows/cols contribute nothing).
    x_p = jnp.zeros((B_pad, pdims[0]), compute_dtype)
    x_p = x_p.at[:B, :im_dim].set(image.astype(compute_dtype))

    # Zero-padded weights (bf16 for the MXU) and biases (kept f32).
    ws_p, bs_p = [], []
    for idx, (w, b) in enumerate(zip(ws, bs)):
        wp = jnp.zeros((pdims[idx], pdims[idx + 1]), jnp.float32)
        wp = wp.at[:w.shape[0], :w.shape[1]].set(w)
        bp = jnp.zeros((1, pdims[idx + 1]), jnp.float32)
        bp = bp.at[:, :b.shape[1]].set(b)
        ws_p.append(wp.astype(compute_dtype))
        bs_p.append(bp)

    grid = (B_pad // tile_b,)

    def _weight_spec(shape):
        # Block index constant across the grid -> single-buffer (no re-fetch).
        return pl.BlockSpec(shape, lambda i: (0,) * len(shape),
                            pipeline_mode=pl.Buffered(1))

    in_specs = [pl.BlockSpec((tile_b, pdims[0]), lambda i: (i, 0))]
    for wp, bp in zip(ws_p, bs_p):
        in_specs.append(_weight_spec(wp.shape))
        in_specs.append(_weight_spec(bp.shape))

    out_padded = pl.pallas_call(
        discriminator_kernel,
        out_shape=jax.ShapeDtypeStruct((B_pad, pdims[-1]), jnp.float32),
        grid_spec=pltpu.PrefetchScalarGridSpec(
            num_scalar_prefetch=0,
            grid=grid,
            in_specs=in_specs,
            out_specs=pl.BlockSpec((tile_b, pdims[-1]), lambda i: (i, 0)),
        ),
        compiler_params=pltpu.CompilerParams(
            dimension_semantics=("parallel",),
        ),
    )(x_p, ws_p[0], bs_p[0], ws_p[1], bs_p[1], ws_p[2], bs_p[2], ws_p[3], bs_p[3])

    return out_padded[:B, :out_dim]


def init_params(key, im_dim, hidden_dim, out_dim):
    """Deterministic synthetic init (PyTorch-style fan_in scaling).

    Weights are created in PyTorch [out, in] convention, then transposed to
    [in, out] for the kernel. Biases are shaped [1, out].
    """
    dims = [im_dim, hidden_dim * 4, hidden_dim * 2, hidden_dim, out_dim]
    params = {}
    for idx in range(4):
        fan_in, fan_out = dims[idx], dims[idx + 1]
        key, kw, kb = jax.random.split(key, 3)
        bound = 1.0 / jnp.sqrt(fan_in)
        w_pt = jax.random.uniform(kw, (fan_out, fan_in), jnp.float32, -bound, bound)
        b_pt = jax.random.uniform(kb, (fan_out,), jnp.float32, -bound, bound)
        params[f"w{idx + 1}"] = jnp.transpose(w_pt)           # [in, out]
        params[f"b{idx + 1}"] = b_pt.reshape(1, fan_out)      # [1, out]
    return params


def reference_forward(image, params):
    """Pure-JAX f32 reference (same semantics as the PyTorch module)."""
    h = image
    for idx in range(1, 4):
        h = h @ params[f"w{idx}"] + params[f"b{idx}"]
        h = jnp.where(h > 0, h, 0.2 * h)
    return h @ params["w4"] + params["b4"]


if __name__ == "__main__":
    # Module-default feature dims (im_dim=1024, hidden_dim=128 -> 1024->512->256->128->1),
    # batch 500 (not a multiple of tile_b on purpose, to exercise the padded path).
    B, IM_DIM, HIDDEN_DIM, OUT_DIM = 500, 1024, 128, 1

    key = jax.random.PRNGKey(0)
    key, kx = jax.random.split(key)
    image = jax.random.normal(kx, (B, IM_DIM), jnp.float32)

    params = init_params(key, IM_DIM, HIDDEN_DIM, OUT_DIM)

    out = discriminator_forward(image, params, tile_b=256)
    out = jax.block_until_ready(out)

    ref = reference_forward(image, params)
    assert out.shape == (B, OUT_DIM)
    # bf16 MXU operands with f32 accumulation -> loose-but-safe tolerance vs f32 ref.
    assert jnp.allclose(out, ref, atol=3e-2, rtol=3e-2), "mismatch vs JAX reference"

    print("KERNEL_OK")
</pallas_src>

<mosaic_0001>
module attributes {stable_mosaic.version = 11 : i64} {
  func.func @discriminator_kernel(%arg0: i32, %arg1: memref<256x1024xbf16, #tpu.memory_space<vmem>>, %arg2: memref<1024x512xbf16, #tpu.memory_space<vmem>>, %arg3: memref<1x512xf32, #tpu.memory_space<vmem>>, %arg4: memref<512x256xbf16, #tpu.memory_space<vmem>>, %arg5: memref<1x256xf32, #tpu.memory_space<vmem>>, %arg6: memref<256x128xbf16, #tpu.memory_space<vmem>>, %arg7: memref<1x128xf32, #tpu.memory_space<vmem>>, %arg8: memref<128x128xbf16, #tpu.memory_space<vmem>>, %arg9: memref<1x128xf32, #tpu.memory_space<vmem>>, %arg10: memref<256x128xf32, #tpu.memory_space<vmem>>) attributes {dimension_semantics = [#tpu.dimension_semantics<parallel>], iteration_bounds = array<i64: 2>, scalar_prefetch = 0 : i64, scratch_operands = 0 : i64, tpu.core_type = #tpu.core_type<tc>, window_params = [{transform_indices = @transform_0, window_bounds = array<i64: 256, 1024>}, {pipeline_mode = #tpu.pipeline_mode<synchronous>, transform_indices = @transform_1, window_bounds = array<i64: 1024, 512>}, {pipeline_mode = #tpu.pipeline_mode<synchronous>, transform_indices = @transform_2, window_bounds = array<i64: 1, 512>}, {pipeline_mode = #tpu.pipeline_mode<synchronous>, transform_indices = @transform_3, window_bounds = array<i64: 512, 256>}, {pipeline_mode = #tpu.pipeline_mode<synchronous>, transform_indices = @transform_4, window_bounds = array<i64: 1, 256>}, {pipeline_mode = #tpu.pipeline_mode<synchronous>, transform_indices = @transform_5, window_bounds = array<i64: 256, 128>}, {pipeline_mode = #tpu.pipeline_mode<synchronous>, transform_indices = @transform_6, window_bounds = array<i64: 1, 128>}, {pipeline_mode = #tpu.pipeline_mode<synchronous>, transform_indices = @transform_7, window_bounds = array<i64: 128, 128>}, {pipeline_mode = #tpu.pipeline_mode<synchronous>, transform_indices = @transform_8, window_bounds = array<i64: 1, 128>}, {transform_indices = @transform_9, window_bounds = array<i64: 256, 128>}]} {
    %c0 = arith.constant 0 : index
    %c0_0 = arith.constant 0 : index
    %0 = vector.load %arg1[%c0, %c0_0] : memref<256x1024xbf16, #tpu.memory_space<vmem>>, vector<256x1024xbf16>
    %c0_1 = arith.constant 0 : index
    %c0_2 = arith.constant 0 : index
    %1 = vector.load %arg2[%c0_1, %c0_2] : memref<1024x512xbf16, #tpu.memory_space<vmem>>, vector<1024x512xbf16>
    %cst = arith.constant dense<0.000000e+00> : vector<256x512xf32>
    %2 = tpu.matmul %0, %1, %cst {dimension_numbers = #tpu.dot_dimension_numbers<[1], [0], [0], [1], [0, 0, 1, 1], [], []>} : vector<256x1024xbf16>, vector<1024x512xbf16>, vector<256x512xf32> -> vector<256x512xf32>
    %c0_3 = arith.constant 0 : index
    %c0_4 = arith.constant 0 : index
    %3 = vector.load %arg3[%c0_3, %c0_4] : memref<1x512xf32, #tpu.memory_space<vmem>>, vector<1x512xf32>
    %4 = vector.broadcast %3 : vector<1x512xf32> to vector<256x512xf32>
    %5 = arith.addf %2, %4 : vector<256x512xf32>
    %cst_5 = arith.constant 0.000000e+00 : f32
    %6 = vector.broadcast %cst_5 : f32 to vector<256x512xf32>
    %7 = arith.cmpf ogt, %5, %6 : vector<256x512xf32>
    %cst_6 = arith.constant 2.000000e-01 : f32
    %8 = vector.broadcast %cst_6 : f32 to vector<256x512xf32>
    %9 = arith.mulf %8, %5 : vector<256x512xf32>
    %10 = arith.select %7, %5, %9 : vector<256x512xi1>, vector<256x512xf32>
    %11 = arith.truncf %10 : vector<256x512xf32> to vector<256x512xbf16>
    %c0_7 = arith.constant 0 : index
    %c0_8 = arith.constant 0 : index
    %12 = vector.load %arg4[%c0_7, %c0_8] : memref<512x256xbf16, #tpu.memory_space<vmem>>, vector<512x256xbf16>
    %cst_9 = arith.constant dense<0.000000e+00> : vector<256x256xf32>
    %13 = tpu.matmul %11, %12, %cst_9 {dimension_numbers = #tpu.dot_dimension_numbers<[1], [0], [0], [1], [0, 0, 1, 1], [], []>} : vector<256x512xbf16>, vector<512x256xbf16>, vector<256x256xf32> -> vector<256x256xf32>
    %c0_10 = arith.constant 0 : index
    %c0_11 = arith.constant 0 : index
    %14 = vector.load %arg5[%c0_10, %c0_11] : memref<1x256xf32, #tpu.memory_space<vmem>>, vector<1x256xf32>
    %15 = vector.broadcast %14 : vector<1x256xf32> to vector<256x256xf32>
    %16 = arith.addf %13, %15 : vector<256x256xf32>
    %cst_12 = arith.constant 0.000000e+00 : f32
    %17 = vector.broadcast %cst_12 : f32 to vector<256x256xf32>
    %18 = arith.cmpf ogt, %16, %17 : vector<256x256xf32>
    %cst_13 = arith.constant 2.000000e-01 : f32
    %19 = vector.broadcast %cst_13 : f32 to vector<256x256xf32>
    %20 = arith.mulf %19, %16 : vector<256x256xf32>
    %21 = arith.select %18, %16, %20 : vector<256x256xi1>, vector<256x256xf32>
    %22 = arith.truncf %21 : vector<256x256xf32> to vector<256x256xbf16>
    %c0_14 = arith.constant 0 : index
    %c0_15 = arith.constant 0 : index
    %23 = vector.load %arg6[%c0_14, %c0_15] : memref<256x128xbf16, #tpu.memory_space<vmem>>, vector<256x128xbf16>
    %cst_16 = arith.constant dense<0.000000e+00> : vector<256x128xf32>
    %24 = tpu.matmul %22, %23, %cst_16 {dimension_numbers = #tpu.dot_dimension_numbers<[1], [0], [0], [1], [0, 0, 1, 1], [], []>} : vector<256x256xbf16>, vector<256x128xbf16>, vector<256x128xf32> -> vector<256x128xf32>
    %c0_17 = arith.constant 0 : index
    %c0_18 = arith.constant 0 : index
    %25 = vector.load %arg7[%c0_17, %c0_18] : memref<1x128xf32, #tpu.memory_space<vmem>>, vector<1x128xf32>
    %26 = vector.broadcast %25 : vector<1x128xf32> to vector<256x128xf32>
    %27 = arith.addf %24, %26 : vector<256x128xf32>
    %cst_19 = arith.constant 0.000000e+00 : f32
    %28 = vector.broadcast %cst_19 : f32 to vector<256x128xf32>
    %29 = arith.cmpf ogt, %27, %28 : vector<256x128xf32>
    %cst_20 = arith.constant 2.000000e-01 : f32
    %30 = vector.broadcast %cst_20 : f32 to vector<256x128xf32>
    %31 = arith.mulf %30, %27 : vector<256x128xf32>
    %32 = arith.select %29, %27, %31 : vector<256x128xi1>, vector<256x128xf32>
    %33 = arith.truncf %32 : vector<256x128xf32> to vector<256x128xbf16>
    %c0_21 = arith.constant 0 : index
    %c0_22 = arith.constant 0 : index
    %34 = vector.load %arg8[%c0_21, %c0_22] : memref<128x128xbf16, #tpu.memory_space<vmem>>, vector<128x128xbf16>
    %cst_23 = arith.constant dense<0.000000e+00> : vector<256x128xf32>
    %35 = tpu.matmul %33, %34, %cst_23 {dimension_numbers = #tpu.dot_dimension_numbers<[1], [0], [0], [1], [0, 0, 1, 1], [], []>} : vector<256x128xbf16>, vector<128x128xbf16>, vector<256x128xf32> -> vector<256x128xf32>
    %c0_24 = arith.constant 0 : index
    %c0_25 = arith.constant 0 : index
    %36 = vector.load %arg9[%c0_24, %c0_25] : memref<1x128xf32, #tpu.memory_space<vmem>>, vector<1x128xf32>
    %37 = vector.broadcast %36 : vector<1x128xf32> to vector<256x128xf32>
    %38 = arith.addf %35, %37 : vector<256x128xf32>
    %c0_26 = arith.constant 0 : index
    %c0_27 = arith.constant 0 : index
    %39 = vector.load %arg10[%c0_26, %c0_27] : memref<256x128xf32, #tpu.memory_space<vmem>>, vector<256x128xf32>
    tpu.vector_store %arg10[%c0_26, %c0_27], %38 {strides = array<i32>} : memref<256x128xf32, #tpu.memory_space<vmem>>, vector<256x128xf32>,
    return
  }
  func.func @transform_0(%arg0: i32) -> (i32, i32) {
    %c0_i32 = arith.constant 0 : i32
    %c0_i32_0 = arith.constant 0 : i32
    return %arg0, %c0_i32 : i32, i32
  }
  func.func @transform_1(%arg0: i32) -> (i32, i32) {
    %c0_i32 = arith.constant 0 : i32
    %c0_i32_0 = arith.constant 0 : i32
    %c0_i32_1 = arith.constant 0 : i32
    return %c0_i32, %c0_i32_0 : i32, i32
  }
  func.func @transform_2(%arg0: i32) -> (i32, i32) {
    %c0_i32 = arith.constant 0 : i32
    %c0_i32_0 = arith.constant 0 : i32
    %c0_i32_1 = arith.constant 0 : i32
    return %c0_i32, %c0_i32_0 : i32, i32
  }
  func.func @transform_3(%arg0: i32) -> (i32, i32) {
    %c0_i32 = arith.constant 0 : i32
    %c0_i32_0 = arith.constant 0 : i32
    %c0_i32_1 = arith.constant 0 : i32
    return %c0_i32, %c0_i32_0 : i32, i32
  }
  func.func @transform_4(%arg0: i32) -> (i32, i32) {
    %c0_i32 = arith.constant 0 : i32
    %c0_i32_0 = arith.constant 0 : i32
    %c0_i32_1 = arith.constant 0 : i32
    return %c0_i32, %c0_i32_0 : i32, i32
  }
  func.func @transform_5(%arg0: i32) -> (i32, i32) {
    %c0_i32 = arith.constant 0 : i32
    %c0_i32_0 = arith.constant 0 : i32
    %c0_i32_1 = arith.constant 0 : i32
    return %c0_i32, %c0_i32_0 : i32, i32
  }
  func.func @transform_6(%arg0: i32) -> (i32, i32) {
    %c0_i32 = arith.constant 0 : i32
    %c0_i32_0 = arith.constant 0 : i32
    %c0_i32_1 = arith.constant 0 : i32
    return %c0_i32, %c0_i32_0 : i32, i32
  }
  func.func @transform_7(%arg0: i32) -> (i32, i32) {
    %c0_i32 = arith.constant 0 : i32
    %c0_i32_0 = arith.constant 0 : i32
    %c0_i32_1 = arith.constant 0 : i32
    return %c0_i32, %c0_i32_0 : i32, i32
  }
  func.func @transform_8(%arg0: i32) -> (i32, i32) {
    %c0_i32 = arith.constant 0 : i32
    %c0_i32_0 = arith.constant 0 : i32
    %c0_i32_1 = arith.constant 0 : i32
    return %c0_i32, %c0_i32_0 : i32, i32
  }
  func.func @transform_9(%arg0: i32) -> (i32, i32) {
    %c0_i32 = arith.constant 0 : i32
    %c0_i32_0 = arith.constant 0 : i32
    return %arg0, %c0_i32 : i32, i32
  }
}

</mosaic_0001>

<bundles_post_ra>
// kernel: tpu_custom_call.1
= control target key start
LH: loop header
LB: loop body
LE: loop exit
PB: predicated region body
PF: predicated region fallthrough
CT: control target
= control target key end

     0   :  { %s10311_s0 = inlined_call_operand.hbm [shape: bf16[512,1024], index: 0, kind: input, shape index: {}]   ;;  %s10312_s1 = inlined_call_operand.hbm [shape: bf16[1024,512], index: 1, kind: input, shape index: {}]   ;;  %s10313_s2 = inlined_call_operand.hbm [shape: f32[1,512], index: 2, kind: input, shape index: {}]   ;;  %s10314_s3 = inlined_call_operand.hbm [shape: bf16[512,256], index: 3, kind: input, shape index: {}]   ;;  %s10315_s4 = inlined_call_operand.vmem [shape: f32[1,256], index: 4, kind: input, shape index: {}]   ;;  %s10316_s5 = inlined_call_operand.hbm [shape: bf16[256,128], index: 5, kind: input, shape index: {}]   ;;  %s10317_s6 = inlined_call_operand.vmem [shape: f32[1,128], index: 6, kind: input, shape index: {}]   ;;  %s10318_s7 = inlined_call_operand.hbm [shape: bf16[128,128], index: 7, kind: input, shape index: {}]   ;;  %s10319_s8 = inlined_call_operand.vmem [shape: f32[1,128], index: 8, kind: input, shape index: {}]   ;;  %s10320_s9 = inlined_call_operand.hbm [shape: f32[512,128], index: 9, kind: output, shape index: {}]  }
   0x1   :  { %10454 = sst [smem:[#allocation135_spill]] %s10312_s1 }
   0x2   :  { %10455 = sst [smem:[#allocation136_spill]] %s10313_s2 }
   0x3   :  { %10456 = sst [smem:[#allocation137_spill]] %s10314_s3 }
   0x4   :  { %14 = vsyncpa [#allocation3], 0 }
   0x5   :  { %16 = vsyncpa [#allocation3 + $0x1], 0 }
   0x6   :  { %17 = vsyncpa [#allocation6], 0 }
   0x7   :  { %18 = vsyncpa [#allocation9], 0 }
   0x8   :  { %19 = vsyncpa [#allocation12], 0 }
   0x9   :  { %20 = vsyncpa [#allocation4], 0 }
   0xa   :  { %22 = vsyncpa [#allocation4 + $0x1], 0  ;;  %s8174_s30 = smov 0   ;;  %s8176_s10 = smov 0  }
   0xb   :  { %s8178_s11 = smov 0   ;;  %s8180_s12 = smov 0  }
   0xc LB: > { %s8107_s13 = smov [#allocation5]   ;;  %s8195_s15 = sadd.s32 4294967295, %s8105_s12   ;;  %s8105_s12 = sphi %s8180_s12, %s10904_s12   ;;  %s8101_s11 = sphi %s8178_s11, %s10903_s11   ;;  %s8097_s10 = sphi %s8176_s10, %s10902_s10   ;;  %s8093_s30 = sphi %s8174_s30, %s10901_s30  }
   0xd   : > { %s265_s14 = sshll.u32 %s8107_s13, 4  ;;  %p6558_p0 = scmp.ge.s32.totalorder %s8105_s12, 1  ;;  %s266_s14 = int_to_ptr.vmem [resolvable:$true] %s265_s14 }
   0xe   : > { %p10321_p1 = scmp.eq.s32.totalorder %s8195_s15, 0  ;;  %p253_p2 = scmp.lt.s32.totalorder %s8105_s12, 3 }
   0xf   : > { %s8108_s17 = smov [#allocation8]   ;;  %s8109_s20 = smov [#allocation7]  }
  0x10   : > { %p8200_p3 = pnand %p6558_p0, %p253_p2  ;;  %s289_s18 = sshll.u32 %s8108_s17, 4  ;;  %s8213_s18 = int_to_ptr.vmem [resolvable:$true] %s289_s18 }
  0x11   : > { %s8215_s21 = sshll.u32 %s8109_s20, 4  ;;  %s7882_s23 = scalar_lea.vmem %s266_s14, 32768  ;;  %s280_s21 = int_to_ptr.vmem [resolvable:$true] %s8215_s21 }
  0x12   : > { %s10457_s16 = scalar_select %p8200_p3, 1, 0 }
  0x13   : > { %p7283_p5 = pneg %p8200_p3  ;;  %p7883_p8 = scmp.ne.s32.totalorder %s266_s14, %s7882_s23 }
  0x14   : > { %p7890_p11 = scmp.lt.s32.totalorder %s266_s14, %s266_s14  ;;  %p7891_p12 = scmp.lt.s32.totalorder %s7882_s23, %s7882_s23 }
  0x15   : > { %p8209_p6 = pnand %p7283_p5, %p10321_p1 }
  0x16   : > { %p7892_p13 = por %p7891_p12, %p7890_p11 }
  0x17   : > { %p8219_p7 = pneg %p8209_p6 }
  0x19   : > { %p7885_p9 = pnand %p7883_p8, %p8219_p7 }
  0x1b   : > { %p7886_p10 = pneg %p7885_p9 }
  0x1d   : > { %p7893_p0 = pnand %p7892_p13, %p7886_p10 }
  0x1f   : > { %7896 = shalt.err (!%p7893_p0)
}
  0x20   : > { %s8110_s24 = smov 256   ;;  %s8111_s25 = smov 16  }
  0x21   : > { %s10460_s1 = sld [smem:[#allocation135_spill]]  ;;  %s7908_s28 = scalar_lea.vmem %s8213_s18, 8192 }
  0x22   : > { %p7909_p2 = scmp.ne.s32.totalorder %s8213_s18, %s7908_s28  ;;  %p7916_p9 = scmp.lt.s32.totalorder %s8213_s18, %s8213_s18 }
  0x23   : > { %p7917_p10 = scmp.lt.s32.totalorder %s7908_s28, %s7908_s28 }
  0x24   : > { %p7911_p5 = pnand %p7909_p2, %p8219_p7 }
  0x25   : > { %p7918_p11 = por %p7917_p10, %p7916_p9 }
  0x26   : > { %p7912_p8 = pneg %p7911_p5 }
  0x27   : > { %7286 = dma.hbm_to_vmem [thread:$0]  (!%p8209_p6), %s10460_s1, 32768, %s266_s14, [#allocation6], %s8110_s24, %s8110_s24, %s8111_s25  }
  0x28   : > { %p7919_p12 = pnand %p7918_p11, %p7912_p8 }
  0x2a   : > { %7922 = shalt.err (!%p7919_p12)
}
  0x2b   : > { %s8112_s29 = smov 128   ;;  %s8113_s13 = smov 8  }
  0x2c   : > { %s10461_s3 = sld [smem:[#allocation137_spill]]  ;;  %s7934_s20 = scalar_lea.vmem %s280_s21, 64 }
  0x2d   : > { %p7935_p13 = scmp.ne.s32.totalorder %s280_s21, %s7934_s20  ;;  %p7942_p5 = scmp.lt.s32.totalorder %s280_s21, %s280_s21 }
  0x2e   : > { %p7943_p8 = scmp.lt.s32.totalorder %s7934_s20, %s7934_s20 }
  0x2f   : > { %p7937_p0 = pnand %p7935_p13, %p8219_p7 }
  0x30   : > { %p7944_p9 = por %p7943_p8, %p7942_p5 }
  0x31   : > { %p7938_p2 = pneg %p7937_p0 }
  0x32   : > { %7292 = dma.hbm_to_vmem [thread:$0]  (!%p8209_p6), %s10461_s3, 8192, %s8213_s18, [#allocation9], %s8112_s29, %s8112_s29, %s8113_s13  }
  0x33   : > { %p7945_p10 = pnand %p7944_p9, %p7938_p2 }
  0x35   : > { %7948 = shalt.err (!%p7945_p10)
}
  0x36   : > { %s10462_s2 = sld [smem:[#allocation136_spill]]  ;;  %s8114_s25 = smov [#allocation10]  }
  0x37   : > { %s305_s18 = sshll.u32 %s8114_s25, 4  ;;  %s306_s18 = int_to_ptr.vmem [resolvable:$true] %s305_s18 }
  0x38   : > { %s7960_s26 = scalar_lea.vmem %s306_s18, 2048  ;;  %p7968_p0 = scmp.lt.s32.totalorder %s306_s18, %s306_s18 }
  0x39   : > { %p7961_p11 = scmp.ne.s32.totalorder %s306_s18, %s7960_s26  ;;  %p7969_p4 = scmp.lt.s32.totalorder %s7960_s26, %s7960_s26 }
  0x3b   : > { %p7963_p12 = pnand %p7961_p11, %p8219_p7  ;;  %p7970_p5 = por %p7969_p4, %p7968_p0 }
  0x3c   : > { %7289 = dma.hbm_to_vmem [thread:$0]  (!%p8209_p6), %s10462_s2, 64, %s280_s21, [#allocation6]  }
  0x3d   : > { %p7964_p13 = pneg %p7963_p12 }
  0x3f   : > { %p7971_p2 = pnand %p7970_p5, %p7964_p13 }
  0x41   : > { %7974 = shalt.err (!%p7971_p2)
}
  0x42   : > { %s8115_s27 = smov 64   ;;  %s8116_s28 = smov 4  }
  0x43   : > { %7295 = dma.hbm_to_vmem [thread:$0]  (!%p8209_p6), %s10316_s5, 2048, %s306_s18, [#allocation9], %s8115_s27, %s8115_s27, %s8116_s28  }
  0x44   : > { %s8117_s13 = smov [#allocation11]  }
  0x45   : > { %s321_s17 = sshll.u32 %s8117_s13, 4  ;;  %s322_s17 = int_to_ptr.vmem [resolvable:$true] %s321_s17 }
  0x46   : > { %s7986_s14 = scalar_lea.vmem %s322_s17, 1024  ;;  %p7994_p4 = scmp.lt.s32.totalorder %s322_s17, %s322_s17 }
  0x47   : > { %p7987_p8 = scmp.ne.s32.totalorder %s322_s17, %s7986_s14  ;;  %p7995_p11 = scmp.lt.s32.totalorder %s7986_s14, %s7986_s14 }
  0x49   : > { %p7989_p9 = pnand %p7987_p8, %p8219_p7  ;;  %p7996_p12 = por %p7995_p11, %p7994_p4 }
  0x4b   : > { %p7990_p10 = pneg %p7989_p9 }
  0x4d   : > { %p7997_p13 = pnand %p7996_p12, %p7990_p10 }
  0x4f   : > { %8000 = shalt.err (!%p7997_p13)
}
  0x50   : > { %7298 = dma.hbm_to_vmem [thread:$0]  (!%p8209_p6), %s10318_s7, 1024, %s322_s17, [#allocation12], %s8115_s27, %s8115_s27, %s8116_s28  }
  0x51   : > { %s6557_s22 = sadd.s32 4294967294, %s8105_s12   ;;  %s8266_s19 = sadd.s32 1, %s8105_s12  }
  0x52   : > { %s35_s24 = sadd.s32 1, %s8101_s11  ;;  %s32_s25 = ssub.s32 %s8105_s12, %s8266_s19 }
  0x53   : > { %p42_p7 = scmp.ne.s32.totalorder %s8101_s11, %s8097_s10  ;;  %p33_p0 = scmp.eq.s32.totalorder %s32_s25, 0 }
  0x54   : > { %p43_p5 = scmp.eq.s32.totalorder %s8105_s12, 0  ;;  %p48_p2 = scmp.ne.s32.totalorder %s8097_s10, %s8093_s30 }
  0x55   : > { %p240_p8 = scmp.eq.s32.totalorder %s8195_s15, 1  ;;  %p246_p4 = scmp.eq.s32.totalorder %s6557_s22, 1 }
  0x56   : > { %s8278_s18 = scalar_select %p33_p0, %s8101_s11, %s35_s24  }
  0x57   : > { %p44_p9 = por %p43_p5, %p42_p7  ;;  %p8282_p10 = por %p10321_p1, %p48_p2 }
  0x58   : > { %p8286_p6 = por %p240_p8, %p42_p7  ;;  %p7312_p11 = scmp.lt.s32.totalorder %s8105_s12, 2 }
  0x59   : > { %s10463_s26 = scalar_select %p8282_p10, 1, 0 }
  0x5a   : > { %s10464_s27 = scalar_select %p8286_p6, 1, 0 }
  0x5b   : > { %s338_s28 = sand.u32 1, %s8101_s11   ;;  %p8292_p12 = por %p246_p4, %p48_p2 }
  0x5c   : > { %s6565_s21 = sshll.u32 %s338_s28, 10  ;;  %s7057_s13 = sshll.u32 %s8105_s12, 14 }
  0x5d   : > { %s10465_s29 = scalar_select %p8292_p12, 1, 0 }
  0x5e   : > { %s8300_s20 = scalar_lea.hbm %s10311_s0, %s7057_s13  ;;  %s342_s23 = scalar_lea.vmem [#allocation2], %s6565_s21 }
  0x5f   : > { %s350_s24 = sshll.u32 %s342_s23, 4  ;;  %p8302_p13 = pnand %p7312_p11, %p44_p9  ;;  %s8306_s24 = int_to_ptr.vmem [resolvable:$true] %s350_s24 }
  0x60   : > { %s8308_s25 = scalar_lea.sflag [#allocation3], %s338_s28  ;;  %s8001_s1 = scalar_lea.hbm %s8300_s20, 16384 }
  0x61   : > { %p8002_p7 = scmp.ne.s32.totalorder %s8300_s20, %s8001_s1  ;;  %p8003_p0 = pneg %p8302_p13 }
  0x62   : > { %s8006_s21 = scalar_lea.hbm %s10311_s0, 32768  ;;  %p8007_p8 = scmp.lt.s32.totalorder %s8300_s20, %s10311_s0 }
  0x63   : > { %p8004_p5 = pnand %p8003_p0, %p8002_p7  ;;  %p8008_p9 = scmp.lt.s32.totalorder %s8006_s21, %s8001_s1 }
  0x65   : > { %p8005_p2 = pneg %p8004_p5  ;;  %p8009_p4 = por %p8008_p9, %p8007_p8 }
  0x67   : > { %p8010_p11 = pnand %p8009_p4, %p8005_p2 }
  0x69   : > { %8013 = shalt.err (!%p8010_p11)
}
  0x6a   : > { %s8014_s28 = scalar_lea.vmem %s8306_s24, 16384  ;;  %s8118_s2 = smov [#allocation2]  }
  0x6b   : > { %p8015_p1 = scmp.ne.s32.totalorder %s8306_s24, %s8014_s28  ;;  %s8019_s3 = sshll.u32 %s8118_s2, 4  ;;  %s8020_s3 = int_to_ptr.vmem [resolvable:$false] %s8019_s3 }
  0x6c   : > { %s8021_s13 = scalar_lea.vmem %s8020_s3, 32768  ;;  %p8022_p5 = scmp.lt.s32.totalorder %s8306_s24, %s8020_s3 }
  0x6d   : > { %p8017_p12 = pnand %p8015_p1, %p8003_p0  ;;  %p8023_p6 = scmp.lt.s32.totalorder %s8021_s13, %s8014_s28 }
  0x6f   : > { %p8018_p7 = pneg %p8017_p12  ;;  %p8024_p10 = por %p8023_p6, %p8022_p5 }
  0x71   : > { %p8025_p3 = pnand %p8024_p10, %p8018_p7 }
  0x73   : > { %8028 = shalt.err (!%p8025_p3)
}
  0x74   : > { %s8119_s1 = smov 512   ;;  %s8120_s17 = smov 32  }
  0x75   : > { %7302 = dma.hbm_to_vmem [thread:$0]  (!%p8302_p13), %s8300_s20, 16384, %s8306_s24, %s8308_s25, %s8119_s1, %s8119_s1, %s8120_s17  }
  0x76   : > { %p10467_p1 = scmp.ne.s32.totalorder %s10457_s16, 0 }
  0x78   : > { %362 = sbr.rel (%p10467_p1) target bundleno = 1548 (0x60c), region = 56 }
  0x7d   : > { %s8332_s2 = sand.u32 1, %s8097_s10   ;;  %p10468_p3 = scmp.ne.s32.totalorder %s10463_s26, 0 }
  0x7e   : > { %s6570_s3 = sshll.u32 %s8332_s2, 10  ;;  %s365_s21 = scalar_lea.sflag [#allocation3], %s8332_s2 }
  0x7f   : > { %s8336_s14 = scalar_lea.vmem [#allocation2], %s6570_s3 }
  0x80   : > { %8072 = dma.done.wait (%p10468_p3), %s365_s21, 16384  }
  0x81   : > { %8074 = vsyncadd (%p10468_p3), %s365_s21, 4294950912  ;;  %p10469_p10 = scmp.eq.s32.totalorder %s8195_s15, 0 }
  0x83   : > { %8076 = dma.done.wait (%p10469_p10), [#allocation6], 32832   ;;  %p10470_p6 = pmov %p10469_p10 }
  0x85   : > { %8078 = vsyncadd (%p10470_p6), [#allocation6], 4294934464  ;;  %p10471_p12 = pmov %p10470_p6 }
  0x86   : > { %p10472_p13 = pmov %p10470_p6 }
  0x87   : > { %8080 = dma.done.wait (%p10471_p12), [#allocation9], 10240  }
  0x88   : > { %8082 = vsyncadd (%p10472_p13), [#allocation9], 4294957056  ;;  %p10473_p0 = pmov %p10470_p6 }
  0x8a   : > { %8084 = dma.done.wait (%p10473_p0), [#allocation12], 1024   ;;  %p10474_p2 = pmov %p10473_p0 }
  0x8b   : > { %v7366_v0 = vld [vmem:[#allocation5 + $0xe4] ss:$16 sps:$4 sm:$0xff]   ;;  %v7370_v2 = vld [vmem:[#allocation5 + $0xe0] ss:$16 sps:$4 sm:$0xff]   ;;  %v427_v50 = vld [vmem:[%s8336_s14 + $0x8] sm:$0xff]  ;;  %s6576_s22 = sshll.u32 %s8332_s2, 8 }
  0x8c   : > { %8086 = vsyncadd (%p10474_p2), [#allocation12], 4294966272  ;;  %v7368_v1 = vld [vmem:[#allocation5 + $0x2e4] ss:$16 sps:$4 sm:$0xff]   ;;  %2752 = vmatprep.subr.bf16.mxu0 %v7366_v0  ;;  %v7371_v3 = vld [vmem:[#allocation5 + $0x2e0] ss:$16 sps:$4 sm:$0xff]  }
  0x8d   : > { %2945 = vmatprep.subr.bf16.mxu1 %v7368_v1  ;;  %v7372_v4 = vld [vmem:[#allocation5 + $0xc4] ss:$16 sps:$4 sm:$0xff]   ;;  %2753 = vmatpush1.bf16.msra.mxu0 %v7370_v2  ;;  %v7376_v6 = vld [vmem:[#allocation5 + $0xc0] ss:$16 sps:$4 sm:$0xff]   ;;  %v431_v51 = vld [vmem:[%s8336_s14 + $0x28] sm:$0xff]  ;;  %s10196_s28 = scalar_lea.vmem [#allocation13], %s6576_s22 }
  0x8e   : > { %2946 = vmatpush1.bf16.msra.mxu1 %v7371_v3  ;;  %v7374_v5 = vld [vmem:[#allocation5 + $0x2c4] ss:$16 sps:$4 sm:$0xff]   ;;  %2754 = vmatprep.subr.bf16.mxu0 %v7372_v4  ;;  %v7377_v7 = vld [vmem:[#allocation5 + $0x2c0] ss:$16 sps:$4 sm:$0xff]   ;;  %v8360_v55 = vcombine.high %v427_v50, %v431_v51  ;;  %s7058_s13 = sshll.u32 %s8195_s15, 12  ;;  %s6436_s1 = sshll.u32 %s10196_s28, 4  ;;  %s10265_s1 = int_to_ptr.vmem [resolvable:$true] %s6436_s1 }
  0x8f   : > { %2947 = vmatprep.subr.bf16.mxu1 %v7374_v5  ;;  %v7378_v8 = vld [vmem:[#allocation5 + $0xa4] ss:$16 sps:$4 sm:$0xff]   ;;  %v7382_v10 = vld [vmem:[#allocation5 + $0xa0] ss:$16 sps:$4 sm:$0xff]   ;;  %s10263_s21 = scalar_lea.hbm %s10320_s9, %s7058_s13  ;;  %s6423_s15 = scalar_lea.sflag [#allocation4], %s8332_s2 }
  0x90   : > { %v7380_v9 = vld [vmem:[#allocation5 + $0x2a4] ss:$16 sps:$4 sm:$0xff]   ;;  %v7383_v11 = vld [vmem:[#allocation5 + $0x2a0] ss:$16 sps:$4 sm:$0xff]   ;;  %2977 = vmatprep.mubr.bf16.mxu1 %v8360_v55  ;;  %p10898_p9 = scmp.ne.s32.totalorder %s10464_s27, 0  ;;  %s8121_s16 = smov [#allocation13]  }
  0x91   : > { %2755 = vmatpush1.bf16.msra.mxu0 %v7376_v6  ;;  %v7384_v12 = vld [vmem:[#allocation5 + $0x84] ss:$16 sps:$4 sm:$0xff]   ;;  %v7388_v14 = vld [vmem:[#allocation5 + $0x80] ss:$16 sps:$4 sm:$0xff]   ;;  %s8033_s26 = sshll.u32 %s8121_s16, 4  ;;  %s8034_s26 = int_to_ptr.vmem [resolvable:$false] %s8033_s26 }
  0x92   : > { %2948 = vmatpush1.bf16.msra.mxu1 %v7377_v7  ;;  %2756 = vmatprep.subr.bf16.mxu0 %v7378_v8  ;;  %v7386_v13 = vld [vmem:[#allocation5 + $0x284] ss:$16 sps:$4 sm:$0xff]   ;;  %v7389_v15 = vld [vmem:[#allocation5 + $0x280] ss:$16 sps:$4 sm:$0xff]   ;;  %s8035_s20 = scalar_lea.vmem %s8034_s26, 8192  ;;  %p8036_p7 = scmp.lt.s32.totalorder %s10265_s1, %s8034_s26 }
  0x93   : > { %2949 = vmatprep.subr.bf16.mxu1 %v7380_v9  ;;  %v7390_v16 = vld [vmem:[#allocation5 + $0x64] ss:$16 sps:$4 sm:$0xff]   ;;  %v7394_v18 = vld [vmem:[#allocation5 + $0x60] ss:$16 sps:$4 sm:$0xff]  }
  0x94   : > { %v7392_v17 = vld [vmem:[#allocation5 + $0x264] ss:$16 sps:$4 sm:$0xff]   ;;  %v7395_v19 = vld [vmem:[#allocation5 + $0x260] ss:$16 sps:$4 sm:$0xff]  }
  0x95   : > { %2757 = vmatpush1.bf16.msra.mxu0 %v7382_v10  ;;  %v7396_v20 = vld [vmem:[#allocation5 + $0x44] ss:$16 sps:$4 sm:$0xff]   ;;  %v7400_v22 = vld [vmem:[#allocation5 + $0x40] ss:$16 sps:$4 sm:$0xff]   ;;  %v435_v10 = vld [vmem:[%s8336_s14 + $0x48] sm:$0xff] }
  0x96   : > { %2950 = vmatpush1.bf16.msra.mxu1 %v7383_v11  ;;  %2758 = vmatprep.subr.bf16.mxu0 %v7384_v12  ;;  %v7398_v21 = vld [vmem:[#allocation5 + $0x244] ss:$16 sps:$4 sm:$0xff]   ;;  %v7401_v23 = vld [vmem:[#allocation5 + $0x240] ss:$16 sps:$4 sm:$0xff]   ;;  %v439_v11 = vld [vmem:[%s8336_s14 + $0x68] sm:$0xff] }
  0x97   : > { %2951 = vmatprep.subr.bf16.mxu1 %v7386_v13  ;;  %v7402_v24 = vld [vmem:[#allocation5 + $0x24] ss:$16 sps:$4 sm:$0xff]   ;;  %v7406_v26 = vld [vmem:[#allocation5 + $0x20] ss:$16 sps:$4 sm:$0xff]   ;;  %v8370_v13 = vcombine.low %v427_v50, %v431_v51 }
  0x98   : > { %v7404_v25 = vld [vmem:[#allocation5 + $0x224] ss:$16 sps:$4 sm:$0xff]   ;;  %v7407_v27 = vld [vmem:[#allocation5 + $0x220] ss:$16 sps:$4 sm:$0xff]  }
  0x99   : > { %2759 = vmatpush1.bf16.msra.mxu0 %v7388_v14  ;;  %v7408_v28 = vld [vmem:[#allocation5 + $0x4] ss:$16 sps:$4 sm:$0xff]   ;;  %v7412_v30 = vld [vmem:[#allocation5] ss:$16 sps:$4 sm:$0xff]  }
  0x9a   : > { %2952 = vmatpush1.bf16.msra.mxu1 %v7389_v15  ;;  %2760 = vmatprep.subr.bf16.mxu0 %v7390_v16  ;;  %v7410_v29 = vld [vmem:[#allocation5 + $0x204] ss:$16 sps:$4 sm:$0xff]   ;;  %v7413_v31 = vld [vmem:[#allocation5 + $0x200] ss:$16 sps:$4 sm:$0xff]  }
  0x9b   : > { %2953 = vmatprep.subr.bf16.mxu1 %v7392_v17  ;;  %v7414_v32 = vld [vmem:[#allocation5 + $0x1e4] ss:$16 sps:$4 sm:$0xff]   ;;  %v7418_v34 = vld [vmem:[#allocation5 + $0x1e0] ss:$16 sps:$4 sm:$0xff]   ;;  %v8374_v17 = vcombine.high %v435_v10, %v439_v11 }
  0x9c   : > { %v7416_v33 = vld [vmem:[#allocation5 + $0x3e4] ss:$16 sps:$4 sm:$0xff]   ;;  %v7419_v35 = vld [vmem:[#allocation5 + $0x3e0] ss:$16 sps:$4 sm:$0xff]  }
  0x9d   : > { %2761 = vmatpush1.bf16.msra.mxu0 %v7394_v18  ;;  %v7420_v36 = vld [vmem:[#allocation5 + $0x1c4] ss:$16 sps:$4 sm:$0xff]   ;;  %v7424_v38 = vld [vmem:[#allocation5 + $0x1c0] ss:$16 sps:$4 sm:$0xff]  }
  0x9e   : > { %2954 = vmatpush1.bf16.msra.mxu1 %v7395_v19  ;;  %2762 = vmatprep.subr.bf16.mxu0 %v7396_v20  ;;  %v7422_v37 = vld [vmem:[#allocation5 + $0x3c4] ss:$16 sps:$4 sm:$0xff]   ;;  %v7425_v39 = vld [vmem:[#allocation5 + $0x3c0] ss:$16 sps:$4 sm:$0xff]  }
  0x9f   : > { %2955 = vmatprep.subr.bf16.mxu1 %v7398_v21  ;;  %v7426_v40 = vld [vmem:[#allocation5 + $0x1a4] ss:$16 sps:$4 sm:$0xff]   ;;  %v7430_v42 = vld [vmem:[#allocation5 + $0x1a0] ss:$16 sps:$4 sm:$0xff]  }
  0xa0   : > { %v7428_v41 = vld [vmem:[#allocation5 + $0x3a4] ss:$16 sps:$4 sm:$0xff]   ;;  %v7431_v43 = vld [vmem:[#allocation5 + $0x3a0] ss:$16 sps:$4 sm:$0xff]  }
  0xa1   : > { %2763 = vmatpush1.bf16.msra.mxu0 %v7400_v22  ;;  %v7432_v44 = vld [vmem:[#allocation5 + $0x184] ss:$16 sps:$4 sm:$0xff]   ;;  %v7436_v46 = vld [vmem:[#allocation5 + $0x180] ss:$16 sps:$4 sm:$0xff]  }
  0xa2   : > { %2956 = vmatpush1.bf16.msra.mxu1 %v7401_v23  ;;  %2764 = vmatprep.subr.bf16.mxu0 %v7402_v24  ;;  %v7434_v45 = vld [vmem:[#allocation5 + $0x384] ss:$16 sps:$4 sm:$0xff]   ;;  %v7437_v47 = vld [vmem:[#allocation5 + $0x380] ss:$16 sps:$4 sm:$0xff]   ;;  %v443_v24 = vld [vmem:[%s8336_s14 + $0x88] sm:$0xff] }
  0xa3   : > { %2957 = vmatprep.subr.bf16.mxu1 %v7404_v25  ;;  %v426_v48 = vld [vmem:[%s8336_s14] sm:$0xff]  ;;  %v447_v25 = vld [vmem:[%s8336_s14 + $0xa8] sm:$0xff] }
  0xa4   : > { %v430_v49 = vld [vmem:[%s8336_s14 + $0x20] sm:$0xff] }
  0xa5   : > { %2765 = vmatpush1.bf16.msra.mxu0 %v7406_v26  ;;  %v7438_v52 = vld [vmem:[#allocation5 + $0x164] ss:$16 sps:$4 sm:$0xff]   ;;  %v8358_v53 = vcombine.high %v426_v48, %v430_v49  ;;  %v7442_v56 = vld [vmem:[#allocation5 + $0x160] ss:$16 sps:$4 sm:$0xff]   ;;  %v8368_v12 = vcombine.low %v426_v48, %v430_v49 }
  0xa6   : > { %2958 = vmatpush1.bf16.msra.mxu1 %v7407_v27  ;;  %2766 = vmatprep.subr.bf16.mxu0 %v7408_v28  ;;  %v7440_v54 = vld [vmem:[#allocation5 + $0x364] ss:$16 sps:$4 sm:$0xff]   ;;  %v7443_v57 = vld [vmem:[#allocation5 + $0x360] ss:$16 sps:$4 sm:$0xff]  }
  0xa7   : > { %2959 = vmatprep.subr.bf16.mxu1 %v7410_v29  ;;  %2784 = vmatprep.mubr.bf16.mxu0 %v8358_v53  ;;  %v7444_v58 = vld [vmem:[#allocation5 + $0x144] ss:$16 sps:$4 sm:$0xff]   ;;  %v7448_v60 = vld [vmem:[#allocation5 + $0x140] ss:$16 sps:$4 sm:$0xff]   ;;  %v8386_v29 = vcombine.low %v435_v10, %v439_v11 }
  0xa8   : > { %v7446_v59 = vld [vmem:[#allocation5 + $0x344] ss:$16 sps:$4 sm:$0xff]   ;;  %v7449_v61 = vld [vmem:[#allocation5 + $0x340] ss:$16 sps:$4 sm:$0xff]  }
  0xa9   : > { %2767 = vmatpush1.bf16.msra.mxu0 %v7412_v30  ;;  %v7450_v62 = vld [vmem:[#allocation5 + $0x124] ss:$16 sps:$4 sm:$0xff]   ;;  %v7454_v0 = vld [vmem:[#allocation5 + $0x120] ss:$16 sps:$4 sm:$0xff]  }
  0xaa   : > { %2960 = vmatpush1.bf16.msra.mxu1 %v7413_v31  ;;  %2768 = vmatprep.subr.bf16.mxu0 %v7414_v32  ;;  %v7452_v63 = vld [vmem:[#allocation5 + $0x324] ss:$16 sps:$4 sm:$0xff]   ;;  %v7455_v1 = vld [vmem:[#allocation5 + $0x320] ss:$16 sps:$4 sm:$0xff]   ;;  %v8390_v31 = vcombine.high %v443_v24, %v447_v25 }
  0xab   : > { %2961 = vmatprep.subr.bf16.mxu1 %v7416_v33  ;;  %v7456_v2 = vld [vmem:[#allocation5 + $0x104] ss:$16 sps:$4 sm:$0xff]   ;;  %v7460_v4 = vld [vmem:[#allocation5 + $0x100] ss:$16 sps:$4 sm:$0xff]  }
  0xac   : > { %v7458_v3 = vld [vmem:[#allocation5 + $0x304] ss:$16 sps:$4 sm:$0xff]   ;;  %v7461_v5 = vld [vmem:[#allocation5 + $0x300] ss:$16 sps:$4 sm:$0xff]  }
  0xad   : > { %2769 = vmatpush2.bf16.msra.mxu0 %v7418_v34  ;;  %v7464_v6 = vld [vmem:[#allocation5 + $0x4e4] ss:$16 sps:$4 sm:$0xff]   ;;  %v7462_v14 = vld [vmem:[#allocation5 + $0x4e0] ss:$16 sps:$4 sm:$0xff]  }
  0xae   : > { %2962 = vmatpush2.bf16.msra.mxu1 %v7419_v35  ;;  %2770 = vmatprep.subr.bf16.mxu0 %v7420_v36  ;;  %v7467_v7 = vld [vmem:[#allocation5 + $0x6e4] ss:$16 sps:$4 sm:$0xff]   ;;  %v7465_v15 = vld [vmem:[#allocation5 + $0x6e0] ss:$16 sps:$4 sm:$0xff]  }
  0xaf   : > { %2963 = vmatprep.subr.bf16.mxu1 %v7422_v37  ;;  %v434_v8 = vld [vmem:[%s8336_s14 + $0x40] sm:$0xff] }
  0xb0   : > { %v438_v9 = vld [vmem:[%s8336_s14 + $0x60] sm:$0xff] }
  0xb1   : > { %2771 = vmatpush2.bf16.msra.mxu0 %v7424_v38  ;;  %v8372_v16 = vcombine.high %v434_v8, %v438_v9  ;;  %v7468_v18 = vld [vmem:[#allocation5 + $0x4c0] ss:$16 sps:$4 sm:$0xff]   ;;  %v7470_v19 = vld [vmem:[#allocation5 + $0x4c4] ss:$16 sps:$4 sm:$0xff]   ;;  %v8384_v28 = vcombine.low %v434_v8, %v438_v9  ;;  %v451_v38 = vld [vmem:[%s8336_s14 + $0xc8] sm:$0xff] }
  0xb2   : > { %2964 = vmatpush2.bf16.msra.mxu1 %v7425_v39  ;;  %2772 = vmatprep.subr.bf16.mxu0 %v7426_v40  ;;  %v7471_v20 = vld [vmem:[#allocation5 + $0x6c0] ss:$16 sps:$4 sm:$0xff]   ;;  %v7473_v21 = vld [vmem:[#allocation5 + $0x6c4] ss:$16 sps:$4 sm:$0xff]   ;;  %v455_v39 = vld [vmem:[%s8336_s14 + $0xe8] sm:$0xff] }
  0xb3   : > { %2965 = vmatprep.subr.bf16.mxu1 %v7428_v41  ;;  %v442_v22 = vld [vmem:[%s8336_s14 + $0x80] sm:$0xff]  ;;  %v467_v8 = vld [vmem:[%s8336_s14 + $0x148] sm:$0xff] }
  0xb4   : > { %v446_v23 = vld [vmem:[%s8336_s14 + $0xa0] sm:$0xff]  ;;  %v471_v9 = vld [vmem:[%s8336_s14 + $0x168] sm:$0xff] }
  0xb5   : > { %2773 = vmatpush2.bf16.msra.mxu0 %v7430_v42  ;;  %v7476_v26 = vld [vmem:[#allocation5 + $0x4a4] ss:$16 sps:$4 sm:$0xff]   ;;  %v8388_v30 = vcombine.high %v442_v22, %v446_v23  ;;  %v7474_v32 = vld [vmem:[#allocation5 + $0x4a0] ss:$16 sps:$4 sm:$0xff]  }
  0xb6   : > { %2966 = vmatpush2.bf16.msra.mxu1 %v7431_v43  ;;  %2774 = vmatprep.subr.bf16.mxu0 %v7432_v44  ;;  %v7479_v27 = vld [vmem:[#allocation5 + $0x6a4] ss:$16 sps:$4 sm:$0xff]   ;;  %v7477_v33 = vld [vmem:[#allocation5 + $0x6a0] ss:$16 sps:$4 sm:$0xff]   ;;  %v8400_v44 = vcombine.low %v442_v22, %v446_v23 }
  0xb7   : > { %2967 = vmatprep.subr.bf16.mxu1 %v7434_v45  ;;  %v7482_v34 = vld [vmem:[#allocation5 + $0x484] ss:$16 sps:$4 sm:$0xff]   ;;  %v7480_v40 = vld [vmem:[#allocation5 + $0x480] ss:$16 sps:$4 sm:$0xff]   ;;  %v8402_v45 = vcombine.low %v443_v24, %v447_v25 }
  0xb8   : > { %v7485_v35 = vld [vmem:[#allocation5 + $0x684] ss:$16 sps:$4 sm:$0xff]   ;;  %v7483_v41 = vld [vmem:[#allocation5 + $0x680] ss:$16 sps:$4 sm:$0xff]  }
  0xb9   : > { %2775 = vmatpush2.bf16.msra.mxu0 %v7436_v46  ;;  %v450_v36 = vld [vmem:[%s8336_s14 + $0xc0] sm:$0xff] }
  0xba   : > { %2968 = vmatpush2.bf16.msra.mxu1 %v7437_v47  ;;  %2776 = vmatprep.subr.bf16.mxu0 %v7438_v52  ;;  %v454_v37 = vld [vmem:[%s8336_s14 + $0xe0] sm:$0xff]  ;;  %v8406_v47 = vcombine.high %v451_v38, %v455_v39 }
  0xbb   : > { %2969 = vmatprep.subr.bf16.mxu1 %v7440_v54  ;;  %v7488_v42 = vld [vmem:[#allocation5 + $0x464] ss:$16 sps:$4 sm:$0xff]   ;;  %v8404_v46 = vcombine.high %v450_v36, %v454_v37  ;;  %v7486_v48 = vld [vmem:[#allocation5 + $0x460] ss:$16 sps:$4 sm:$0xff]  }
  0xbc   : > { %v7491_v43 = vld [vmem:[#allocation5 + $0x664] ss:$16 sps:$4 sm:$0xff]   ;;  %v7489_v49 = vld [vmem:[#allocation5 + $0x660] ss:$16 sps:$4 sm:$0xff]  }
  0xbd   : > { %2777 = vmatpush2.bf16.msra.mxu0 %v7442_v56  ;;  %v7494_v50 = vld [vmem:[#allocation5 + $0x444] ss:$16 sps:$4 sm:$0xff]   ;;  %v459_v56 = vld [vmem:[%s8336_s14 + $0x108] sm:$0xff]  ;;  %v7504_v10 = vld [vmem:[#allocation5 + $0x400] ss:$16 sps:$4 sm:$0xff]  }
  0xbe   : > { %2970 = vmatpush2.bf16.msra.mxu1 %v7443_v57  ;;  %2778 = vmatprep.subr.bf16.mxu0 %v7444_v58  ;;  %v7497_v51 = vld [vmem:[#allocation5 + $0x644] ss:$16 sps:$4 sm:$0xff]   ;;  %v463_v57 = vld [vmem:[%s8336_s14 + $0x128] sm:$0xff]  ;;  %v7492_v58 = vld [vmem:[#allocation5 + $0x440] ss:$16 sps:$4 sm:$0xff]  }
  0xbf   : > { %2971 = vmatprep.subr.bf16.mxu1 %v7446_v59  ;;  %v458_v52 = vld [vmem:[%s8336_s14 + $0x100] sm:$0xff] }
  0xc0   : > { %v462_v54 = vld [vmem:[%s8336_s14 + $0x120] sm:$0xff] }
  0xc1   : > { %2779 = vmatpush2.bf16.msra.mxu0 %v7448_v60  ;;  %v7495_v59 = vld [vmem:[#allocation5 + $0x640] ss:$16 sps:$4 sm:$0xff]   ;;  %v7500_v60 = vld [vmem:[#allocation5 + $0x424] ss:$16 sps:$4 sm:$0xff]  }
  0xc2   : > { %2972 = vmatpush2.bf16.msra.mxu1 %v7449_v61  ;;  %2780 = vmatprep.subr.bf16.mxu0 %v7450_v62  ;;  %v7503_v61 = vld [vmem:[#allocation5 + $0x624] ss:$16 sps:$4 sm:$0xff]   ;;  %v8416_v62 = vcombine.low %v450_v36, %v454_v37  ;;  %v7507_v11 = vld [vmem:[#allocation5 + $0x600] ss:$16 sps:$4 sm:$0xff]  }
  0xc3   : > { %2973 = vmatprep.subr.bf16.mxu1 %v7452_v63  ;;  %v8418_v63 = vcombine.low %v451_v38, %v455_v39  ;;  %v7510_v22 = vld [vmem:[#allocation5 + $0x5e0] ss:$16 sps:$4 sm:$0xff]   ;;  %v7518_v24 = vld [vmem:[#allocation5 + $0x5c4] ss:$16 sps:$4 sm:$0xff]   ;;  %v8450_v39 = vcombine.low %v467_v8, %v471_v9 }
  0xc4   : > { %v7513_v23 = vld [vmem:[#allocation5 + $0x7e0] ss:$16 sps:$4 sm:$0xff]   ;;  %v7521_v25 = vld [vmem:[#allocation5 + $0x7c4] ss:$16 sps:$4 sm:$0xff]  }
  0xc5   : > { %2781 = vmatpush2.bf16.msra.mxu0 %v7454_v0  ;;  %v8420_v0 = vcombine.high %v458_v52, %v462_v54  ;;  %v7524_v36 = vld [vmem:[#allocation5 + $0x5a4] ss:$16 sps:$4 sm:$0xff]  }
  0xc6   : > { %2974 = vmatpush2.bf16.msra.mxu1 %v7455_v1  ;;  %2782 = vmatprep.subr.bf16.mxu0 %v7456_v2  ;;  %v8422_v1 = vcombine.high %v459_v56, %v463_v57  ;;  %v7498_v2 = vld [vmem:[#allocation5 + $0x420] ss:$16 sps:$4 sm:$0xff]   ;;  %v7527_v37 = vld [vmem:[#allocation5 + $0x7a4] ss:$16 sps:$4 sm:$0xff]  }
  0xc7   : > { %2975 = vmatprep.subr.bf16.mxu1 %v7458_v3  ;;  %v7501_v3 = vld [vmem:[#allocation5 + $0x620] ss:$16 sps:$4 sm:$0xff]  }
  0xc9   : > { %2783 = vmatpush2.bf16.msra.mxu0 %v7460_v4  ;;  %v7506_v4 = vld [vmem:[#allocation5 + $0x404] ss:$16 sps:$4 sm:$0xff]  }
  0xca   : > { %2976 = vmatpush2.bf16.msra.mxu1 %v7461_v5  ;;  %3138 = vmatprep.subr.bf16.mxu0 %v7464_v6  ;;  %v7509_v5 = vld [vmem:[#allocation5 + $0x604] ss:$16 sps:$4 sm:$0xff]  }
  0xcb   : > { %3331 = vmatprep.subr.bf16.mxu1 %v7467_v7  ;;  %v466_v6 = vld [vmem:[%s8336_s14 + $0x140] sm:$0xff] }
  0xcc   : > { %2785 = vmatmul.mubr.bf16.vlgmr.msra.gmra.mxu0 %v8368_v12  ;;  %v470_v7 = vld [vmem:[%s8336_s14 + $0x160] sm:$0xff] }
  0xcd   : > { %2978 = vmatmul.mubr.bf16.vlgmr.msra.gmra.mxu1 %v8370_v13  ;;  %3139 = vmatpush1.bf16.msra.mxu0 %v7462_v14  ;;  %v7512_v14 = vld [vmem:[#allocation5 + $0x5e4] ss:$16 sps:$4 sm:$0xff]   ;;  %v8448_v38 = vcombine.low %v466_v6, %v470_v7 }
  0xce   : > { %3332 = vmatpush1.bf16.msra.mxu1 %v7465_v15  ;;  %2794 = vmatprep.mubr.bf16.mxu0 %v8372_v16  ;;  %v7515_v15 = vld [vmem:[#allocation5 + $0x7e4] ss:$16 sps:$4 sm:$0xff]  }
  0xcf   : > { %2987 = vmatprep.mubr.bf16.mxu1 %v8374_v17  ;;  %3140 = vmatprep.subr.bf16.mxu0 %v7470_v19  ;;  %v8434_v19 = vcombine.low %v459_v56, %v463_v57  ;;  %v7528_v56 = vld [vmem:[#allocation5 + $0x580] ss:$16 sps:$4 sm:$0xff]  }
  0xd0   : > { %3333 = vmatprep.subr.bf16.mxu1 %v7473_v21  ;;  %v8438_v21 = vcombine.high %v467_v8, %v471_v9  ;;  %v7531_v57 = vld [vmem:[#allocation5 + $0x780] ss:$16 sps:$4 sm:$0xff]  }
  0xd1   : > { %3141 = vmatpush1.bf16.msra.mxu0 %v7468_v18  ;;  %v8432_v18 = vcombine.low %v458_v52, %v462_v54  ;;  %v483_v52 = vld [vmem:[%s8336_s14 + $0x1c8] sm:$0xff]  ;;  %v490_v8 = vld [vmem:[%s8336_s14 + $0x200] sm:$0xff] }
  0xd2   : > { %3334 = vmatpush1.bf16.msra.mxu1 %v7471_v20  ;;  %3142 = vmatprep.subr.bf16.mxu0 %v7476_v26  ;;  %v8436_v20 = vcombine.high %v466_v6, %v470_v7  ;;  %v474_v26 = vld [vmem:[%s8336_s14 + $0x180] sm:$0xff]  ;;  %v487_v54 = vld [vmem:[%s8336_s14 + $0x1e8] sm:$0xff] }
  0xd3   : > { %3335 = vmatprep.subr.bf16.mxu1 %v7479_v27  ;;  %v478_v27 = vld [vmem:[%s8336_s14 + $0x1a0] sm:$0xff] }
  0xd4   : > { %2795 = vmatmul.mubr.bf16.gmra.mxu0 %v8384_v28  ;;  %v7542_v6 = vld [vmem:[#allocation5 + $0x544] ss:$16 sps:$4 sm:$0xff]  }
  0xd5   : > { %2988 = vmatmul.mubr.bf16.gmra.mxu1 %v8386_v29  ;;  %2804 = vmatprep.mubr.bf16.mxu0 %v8388_v30  ;;  %v7545_v7 = vld [vmem:[#allocation5 + $0x744] ss:$16 sps:$4 sm:$0xff]  }
  0xd6   : > { %2997 = vmatprep.mubr.bf16.mxu1 %v8390_v31  ;;  %3143 = vmatpush1.bf16.msra.mxu0 %v7474_v32  ;;  %v475_v32 = vld [vmem:[%s8336_s14 + $0x188] sm:$0xff]  ;;  %v494_v9 = vld [vmem:[%s8336_s14 + $0x220] sm:$0xff] }
  0xd7   : > { %3336 = vmatpush1.bf16.msra.mxu1 %v7477_v33  ;;  %3144 = vmatprep.subr.bf16.mxu0 %v7482_v34  ;;  %v479_v33 = vld [vmem:[%s8336_s14 + $0x1a8] sm:$0xff]  ;;  %v7516_v34 = vld [vmem:[#allocation5 + $0x5c0] ss:$16 sps:$4 sm:$0xff]  }
  0xd8   : > { %3337 = vmatprep.subr.bf16.mxu1 %v7485_v35  ;;  %v7519_v35 = vld [vmem:[#allocation5 + $0x7c0] ss:$16 sps:$4 sm:$0xff]  }
  0xda   : > { %3145 = vmatpush1.bf16.msra.mxu0 %v7480_v40  ;;  %v8452_v40 = vcombine.high %v474_v26, %v478_v27 }
  0xdb   : > { %3338 = vmatpush1.bf16.msra.mxu1 %v7483_v41  ;;  %3146 = vmatprep.subr.bf16.mxu0 %v7488_v42  ;;  %v8454_v41 = vcombine.high %v475_v32, %v479_v33  ;;  %v7522_v42 = vld [vmem:[#allocation5 + $0x5a0] ss:$16 sps:$4 sm:$0xff]  }
  0xdc   : > { %3339 = vmatprep.subr.bf16.mxu1 %v7491_v43  ;;  %2805 = vmatmul.mubr.bf16.gmra.mxu0 %v8400_v44  ;;  %v7525_v43 = vld [vmem:[#allocation5 + $0x7a0] ss:$16 sps:$4 sm:$0xff]  }
  0xdd   : > { %2998 = vmatmul.mubr.bf16.gmra.mxu1 %v8402_v45  ;;  %2814 = vmatprep.mubr.bf16.mxu0 %v8404_v46 }
  0xde   : > { %3007 = vmatprep.mubr.bf16.mxu1 %v8406_v47  ;;  %3147 = vmatpush1.bf16.msra.mxu0 %v7486_v48  ;;  %v7530_v48 = vld [vmem:[#allocation5 + $0x584] ss:$16 sps:$4 sm:$0xff]  }
  0xdf   : > { %3340 = vmatpush1.bf16.msra.mxu1 %v7489_v49  ;;  %3148 = vmatprep.subr.bf16.mxu0 %v7494_v50  ;;  %v7533_v49 = vld [vmem:[#allocation5 + $0x784] ss:$16 sps:$4 sm:$0xff]  }
  0xe0   : > { %3341 = vmatprep.subr.bf16.mxu1 %v7497_v51  ;;  %v482_v50 = vld [vmem:[%s8336_s14 + $0x1c0] sm:$0xff] }
  0xe1   : > { %v486_v51 = vld [vmem:[%s8336_s14 + $0x1e0] sm:$0xff] }
  0xe2   : > { %3149 = vmatpush1.bf16.msra.mxu0 %v7492_v58  ;;  %v7536_v58 = vld [vmem:[#allocation5 + $0x564] ss:$16 sps:$4 sm:$0xff]  }
  0xe3   : > { %3342 = vmatpush1.bf16.msra.mxu1 %v7495_v59  ;;  %3150 = vmatprep.subr.bf16.mxu0 %v7500_v60  ;;  %v7539_v59 = vld [vmem:[#allocation5 + $0x764] ss:$16 sps:$4 sm:$0xff]   ;;  %v8464_v60 = vcombine.low %v474_v26, %v478_v27  ;;  %v8484_v26 = vcombine.high %v490_v8, %v494_v9 }
  0xe4   : > { %3343 = vmatprep.subr.bf16.mxu1 %v7503_v61  ;;  %2815 = vmatmul.mubr.bf16.gmra.mxu0 %v8416_v62  ;;  %v8466_v61 = vcombine.low %v475_v32, %v479_v33  ;;  %v7546_v32 = vld [vmem:[#allocation5 + $0x520] ss:$16 sps:$4 sm:$0xff]  }
  0xe5   : > { %3008 = vmatmul.mubr.bf16.gmra.mxu1 %v8418_v63  ;;  %2824 = vmatprep.mubr.bf16.mxu0 %v8420_v0  ;;  %v7549_v33 = vld [vmem:[#allocation5 + $0x720] ss:$16 sps:$4 sm:$0xff]  }
  0xe6   : > { %3017 = vmatprep.mubr.bf16.mxu1 %v8422_v1  ;;  %3151 = vmatpush1.bf16.msra.mxu0 %v7498_v2  ;;  %v8468_v2 = vcombine.high %v482_v50, %v486_v51 }
  0xe7   : > { %3344 = vmatpush1.bf16.msra.mxu1 %v7501_v3  ;;  %3152 = vmatprep.subr.bf16.mxu0 %v7506_v4  ;;  %v8470_v3 = vcombine.high %v483_v52, %v487_v54  ;;  %v7534_v4 = vld [vmem:[#allocation5 + $0x560] ss:$16 sps:$4 sm:$0xff]  }
  0xe8   : > { %3345 = vmatprep.subr.bf16.mxu1 %v7509_v5  ;;  %v7537_v5 = vld [vmem:[#allocation5 + $0x760] ss:$16 sps:$4 sm:$0xff]  }
  0xea   : > { %3153 = vmatpush1.bf16.msra.mxu0 %v7504_v10  ;;  %v491_v10 = vld [vmem:[%s8336_s14 + $0x208] sm:$0xff] }
  0xeb   : > { %3346 = vmatpush1.bf16.msra.mxu1 %v7507_v11  ;;  %3154 = vmatprep.subr.bf16.mxu0 %v7512_v14  ;;  %v495_v11 = vld [vmem:[%s8336_s14 + $0x228] sm:$0xff]  ;;  %v7540_v14 = vld [vmem:[#allocation5 + $0x540] ss:$16 sps:$4 sm:$0xff]  }
  0xec   : > { %3347 = vmatprep.subr.bf16.mxu1 %v7515_v15  ;;  %2825 = vmatmul.mubr.bf16.gmra.mxu0 %v8432_v18  ;;  %v7543_v15 = vld [vmem:[#allocation5 + $0x740] ss:$16 sps:$4 sm:$0xff]   ;;  %v8486_v27 = vcombine.high %v491_v10, %v495_v11 }
  0xed   : > { %3018 = vmatmul.mubr.bf16.gmra.mxu1 %v8434_v19  ;;  %2834 = vmatprep.mubr.bf16.mxu0 %v8436_v20 }
  0xee   : > { %3027 = vmatprep.mubr.bf16.mxu1 %v8438_v21  ;;  %3155 = vmatpush2.bf16.msra.mxu0 %v7510_v22  ;;  %v7548_v22 = vld [vmem:[#allocation5 + $0x524] ss:$16 sps:$4 sm:$0xff]  }
  0xef   : > { %3348 = vmatpush2.bf16.msra.mxu1 %v7513_v23  ;;  %3156 = vmatprep.subr.bf16.mxu0 %v7518_v24  ;;  %v7551_v23 = vld [vmem:[#allocation5 + $0x724] ss:$16 sps:$4 sm:$0xff]   ;;  %v8480_v24 = vcombine.low %v482_v50, %v486_v51  ;;  %v7560_v50 = vld [vmem:[#allocation5 + $0xec] ss:$16 sps:$4 sm:$0xff]  }
  0xf0   : > { %3349 = vmatprep.subr.bf16.mxu1 %v7521_v25  ;;  %v8482_v25 = vcombine.low %v483_v52, %v487_v54  ;;  %v7563_v51 = vld [vmem:[#allocation5 + $0x2ec] ss:$16 sps:$4 sm:$0xff]   ;;  %v8496_v52 = vcombine.low %v490_v8, %v494_v9  ;;  %v8498_v54 = vcombine.low %v491_v10, %v495_v11  ;;  %v514_v10 = vld [vmem:[%s8336_s14 + $0x2c0] sm:$0xff] }
  0xf1   : > { %v518_v11 = vld [vmem:[%s8336_s14 + $0x2e0] sm:$0xff] }
  0xf2   : > { %3157 = vmatpush2.bf16.msra.mxu0 %v7516_v34  ;;  %v7554_v34 = vld [vmem:[#allocation5 + $0x504] ss:$16 sps:$4 sm:$0xff]  }
  0xf3   : > { %3350 = vmatpush2.bf16.msra.mxu1 %v7519_v35  ;;  %3158 = vmatprep.subr.bf16.mxu0 %v7524_v36  ;;  %v7557_v35 = vld [vmem:[#allocation5 + $0x704] ss:$16 sps:$4 sm:$0xff]  }
  0xf4   : > { %3351 = vmatprep.subr.bf16.mxu1 %v7527_v37  ;;  %2835 = vmatmul.mubr.bf16.gmra.mxu0 %v8448_v38  ;;  %v498_v36 = vld [vmem:[%s8336_s14 + $0x240] sm:$0xff] }
  0xf5   : > { %3028 = vmatmul.mubr.bf16.gmra.mxu1 %v8450_v39  ;;  %2844 = vmatprep.mubr.bf16.mxu0 %v8452_v40  ;;  %v502_v37 = vld [vmem:[%s8336_s14 + $0x260] sm:$0xff] }
  0xf6   : > { %3037 = vmatprep.mubr.bf16.mxu1 %v8454_v41  ;;  %3159 = vmatpush2.bf16.msra.mxu0 %v7522_v42  ;;  %v499_v42 = vld [vmem:[%s8336_s14 + $0x248] sm:$0xff] }
  0xf7   : > { %3352 = vmatpush2.bf16.msra.mxu1 %v7525_v43  ;;  %3160 = vmatprep.subr.bf16.mxu0 %v7530_v48  ;;  %v503_v43 = vld [vmem:[%s8336_s14 + $0x268] sm:$0xff]  ;;  %v7552_v48 = vld [vmem:[#allocation5 + $0x500] ss:$16 sps:$4 sm:$0xff]  }
  0xf8   : > { %3353 = vmatprep.subr.bf16.mxu1 %v7533_v49  ;;  %v7555_v49 = vld [vmem:[#allocation5 + $0x700] ss:$16 sps:$4 sm:$0xff]  }
  0xfa   : > { %3161 = vmatpush2.bf16.msra.mxu0 %v7528_v56  ;;  %v8500_v56 = vcombine.high %v498_v36, %v502_v37 }
  0xfb   : > { %3354 = vmatpush2.bf16.msra.mxu1 %v7531_v57  ;;  %3162 = vmatprep.subr.bf16.mxu0 %v7536_v58  ;;  %v8502_v57 = vcombine.high %v499_v42, %v503_v43  ;;  %v506_v58 = vld [vmem:[%s8336_s14 + $0x280] sm:$0xff] }
  0xfc   : > { %3355 = vmatprep.subr.bf16.mxu1 %v7539_v59  ;;  %2845 = vmatmul.mubr.bf16.gmra.mxu0 %v8464_v60  ;;  %v510_v59 = vld [vmem:[%s8336_s14 + $0x2a0] sm:$0xff] }
  0xfd   : > { %3038 = vmatmul.mubr.bf16.gmra.mxu1 %v8466_v61  ;;  %2854 = vmatprep.mubr.bf16.mxu0 %v8468_v2  ;;  %10475 = vst [vmem:[#allocation19_spill] sm:$0xff] %v8502_v57  ;;  %v8516_v8 = vcombine.high %v506_v58, %v510_v59 }
  0xfe   : > { %3047 = vmatprep.mubr.bf16.mxu1 %v8470_v3  ;;  %3163 = vmatpush2.bf16.msra.mxu0 %v7534_v4  ;;  %v507_v4 = vld [vmem:[%s8336_s14 + $0x288] sm:$0xff] }
  0xff   : > { %3356 = vmatpush2.bf16.msra.mxu1 %v7537_v5  ;;  %3164 = vmatprep.subr.bf16.mxu0 %v7542_v6  ;;  %v511_v5 = vld [vmem:[%s8336_s14 + $0x2a8] sm:$0xff]  ;;  %v8512_v6 = vcombine.low %v498_v36, %v502_v37  ;;  %10478 = vst [vmem:[#allocation22_spill] sm:$0xff] %v8516_v8 }
 0x100   : > { %3357 = vmatprep.subr.bf16.mxu1 %v7545_v7  ;;  %v8514_v7 = vcombine.low %v499_v42, %v503_v43  ;;  %v8518_v9 = vcombine.high %v507_v4, %v511_v5  ;;  %v523_v36 = vld [vmem:[%s8336_s14 + $0x308] sm:$0xff]  ;;  %v8544_v42 = vcombine.low %v514_v10, %v518_v11 }
 0x101   : > { %10476 = vst [vmem:[#allocation20_spill] sm:$0xff] %v8512_v6  ;;  %v527_v37 = vld [vmem:[%s8336_s14 + $0x328] sm:$0xff] }
 0x102   : > { %3165 = vmatpush2.bf16.msra.mxu0 %v7540_v14  ;;  %10477 = vst [vmem:[#allocation21_spill] sm:$0xff] %v8514_v7  ;;  %10479 = vst [vmem:[#allocation23_spill] sm:$0xff] %v8518_v9  ;;  %v515_v14 = vld [vmem:[%s8336_s14 + $0x2c8] sm:$0xff] }
 0x103   : > { %3358 = vmatpush2.bf16.msra.mxu1 %v7543_v15  ;;  %3166 = vmatprep.subr.bf16.mxu0 %v7548_v22  ;;  %v519_v15 = vld [vmem:[%s8336_s14 + $0x2e8] sm:$0xff]  ;;  %v8528_v22 = vcombine.low %v506_v58, %v510_v59  ;;  %10484 = vst [vmem:[#allocation28_spill] sm:$0xff] %v8544_v42 }
 0x104   : > { %3359 = vmatprep.subr.bf16.mxu1 %v7551_v23  ;;  %2855 = vmatmul.mubr.bf16.gmra.mxu0 %v8480_v24  ;;  %v8530_v23 = vcombine.low %v507_v4, %v511_v5  ;;  %v8546_v43 = vcombine.low %v515_v14, %v519_v15  ;;  %v531_v58 = vld [vmem:[%s8336_s14 + $0x348] sm:$0xff]  ;;  %v8562_v5 = vcombine.low %v523_v36, %v527_v37 }
 0x105   : > { %3048 = vmatmul.mubr.bf16.gmra.mxu1 %v8482_v25  ;;  %2864 = vmatprep.mubr.bf16.mxu0 %v8484_v26  ;;  %10480 = vst [vmem:[#allocation24_spill] sm:$0xff] %v8528_v22  ;;  %v535_v59 = vld [vmem:[%s8336_s14 + $0x368] sm:$0xff] }
 0x106   : > { %3057 = vmatprep.mubr.bf16.mxu1 %v8486_v27  ;;  %3167 = vmatpush2.bf16.msra.mxu0 %v7546_v32  ;;  %10481 = vst [vmem:[#allocation25_spill] sm:$0xff] %v8530_v23  ;;  %v8532_v32 = vcombine.high %v514_v10, %v518_v11  ;;  %10485 = vst [vmem:[#allocation29_spill] sm:$0xff] %v8546_v43  ;;  %v8566_v11 = vcombine.high %v531_v58, %v535_v59 }
 0x107   : > { %3360 = vmatpush2.bf16.msra.mxu1 %v7549_v33  ;;  %3168 = vmatprep.subr.bf16.mxu0 %v7554_v34  ;;  %v8534_v33 = vcombine.high %v515_v14, %v519_v15  ;;  %v522_v34 = vld [vmem:[%s8336_s14 + $0x300] sm:$0xff]  ;;  %10489 = vst [vmem:[#allocation33_spill] sm:$0xff] %v8562_v5 }
 0x108   : > { %3361 = vmatprep.subr.bf16.mxu1 %v7557_v35  ;;  %10482 = vst [vmem:[#allocation26_spill] sm:$0xff] %v8532_v32  ;;  %v526_v35 = vld [vmem:[%s8336_s14 + $0x320] sm:$0xff]  ;;  %10491 = vst [vmem:[#allocation35_spill] sm:$0xff] %v8566_v11 }
 0x109   : > { %10483 = vst [vmem:[#allocation27_spill] sm:$0xff] %v8534_v33  ;;  %v8560_v4 = vcombine.low %v522_v34, %v526_v35  ;;  %v538_v14 = vld [vmem:[%s8336_s14 + $0x380] sm:$0xff] }
 0x10a   : > { %3169 = vmatpush2.bf16.msra.mxu0 %v7552_v48  ;;  %v8548_v48 = vcombine.high %v522_v34, %v526_v35  ;;  %v542_v15 = vld [vmem:[%s8336_s14 + $0x3a0] sm:$0xff]  ;;  %v8578_v35 = vcombine.low %v531_v58, %v535_v59 }
 0x10b   : > { %3362 = vmatpush2.bf16.msra.mxu1 %v7555_v49  ;;  %3524 = vmatprep.subr.bf16.mxu0 %v7560_v50  ;;  %v8550_v49 = vcombine.high %v523_v36, %v527_v37  ;;  %v530_v50 = vld [vmem:[%s8336_s14 + $0x340] sm:$0xff]  ;;  %10488 = vst [vmem:[#allocation32_spill] sm:$0xff] %v8560_v4  ;;  %v8580_v36 = vcombine.high %v538_v14, %v542_v15 }
 0x10c   : > { %3717 = vmatprep.subr.bf16.mxu1 %v7563_v51  ;;  %2865 = vmatmul.mubr.bf16.gmra.mxu0 %v8496_v52  ;;  %10486 = vst [vmem:[#allocation30_spill] sm:$0xff] %v8548_v48  ;;  %v534_v51 = vld [vmem:[%s8336_s14 + $0x360] sm:$0xff]  ;;  %10493 = vst [vmem:[#allocation37_spill] sm:$0xff] %v8578_v35 }
 0x10d   : > { %3058 = vmatmul.mubr.bf16.gmra.mxu1 %v8498_v54  ;;  %2874 = vmatprep.mubr.bf16.mxu0 %v8500_v56  ;;  %10487 = vst [vmem:[#allocation31_spill] sm:$0xff] %v8550_v49  ;;  %v8564_v10 = vcombine.high %v530_v50, %v534_v51  ;;  %v8576_v34 = vcombine.low %v530_v50, %v534_v51  ;;  %10494 = vst [vmem:[#allocation38_spill] sm:$0xff] %v8580_v36 }
 0x10e   : > { %3067 = vmatprep.mubr.bf16.mxu1 %v8502_v57  ;;  %v8592_v50 = vcombine.low %v538_v14, %v542_v15 }
 0x10f   : > { %10490 = vst [vmem:[#allocation34_spill] sm:$0xff] %v8564_v10  ;;  %10492 = vst [vmem:[#allocation36_spill] sm:$0xff] %v8576_v34 }
 0x110   : > { %10496 = vst [vmem:[#allocation40_spill] sm:$0xff] %v8592_v50 }
 0x114   : > { %2875 = vmatmul.mubr.bf16.gmra.mxu0 %v8512_v6 }
 0x115   : > { %3068 = vmatmul.mubr.bf16.gmra.mxu1 %v8514_v7  ;;  %2884 = vmatprep.mubr.bf16.mxu0 %v8516_v8  ;;  %v517_v7 = vld [vmem:[%s8336_s14 + $0x2d8] sm:$0xff] }
 0x116   : > { %3077 = vmatprep.mubr.bf16.mxu1 %v8518_v9 }
 0x11c   : > { %2885 = vmatmul.mubr.bf16.gmra.mxu0 %v8528_v22  ;;  %v449_v22 = vld [vmem:[%s8336_s14 + $0xb8] sm:$0xff] }
 0x11d   : > { %3078 = vmatmul.mubr.bf16.gmra.mxu1 %v8530_v23  ;;  %2894 = vmatprep.mubr.bf16.mxu0 %v8532_v32  ;;  %v448_v32 = vld [vmem:[%s8336_s14 + $0xb0] sm:$0xff]  ;;  %v445_v23 = vld [vmem:[%s8336_s14 + $0x98] sm:$0xff] }
 0x11e   : > { %3087 = vmatprep.mubr.bf16.mxu1 %v8534_v33  ;;  %v444_v33 = vld [vmem:[%s8336_s14 + $0x90] sm:$0xff] }
 0x124   : > { %2895 = vmatmul.mubr.bf16.gmra.mxu0 %v8544_v42  ;;  %v7567_v42 = vld [vmem:[#allocation5 + $0x2c8] ss:$16 sps:$4 sm:$0xff]  }
 0x125   : > { %3088 = vmatmul.mubr.bf16.gmra.mxu1 %v8546_v43  ;;  %2904 = vmatprep.mubr.bf16.mxu0 %v8548_v48  ;;  %v539_v48 = vld [vmem:[%s8336_s14 + $0x388] sm:$0xff]  ;;  %v429_v43 = vld [vmem:[%s8336_s14 + $0x18] sm:$0xff] }
 0x126   : > { %3097 = vmatprep.mubr.bf16.mxu1 %v8550_v49  ;;  %v543_v49 = vld [vmem:[%s8336_s14 + $0x3a8] sm:$0xff] }
 0x127   : > { %v8582_v37 = vcombine.high %v539_v48, %v543_v49  ;;  %v8594_v51 = vcombine.low %v539_v48, %v543_v49 }
 0x129   : > { %10495 = vst [vmem:[#allocation39_spill] sm:$0xff] %v8582_v37  ;;  %10497 = vst [vmem:[#allocation41_spill] sm:$0xff] %v8594_v51 }
 0x12c   : > { %2905 = vmatmul.mubr.bf16.gmra.mxu0 %v8560_v4  ;;  %v547_v4 = vld [vmem:[%s8336_s14 + $0x3c8] sm:$0xff] }
 0x12d   : > { %3098 = vmatmul.mubr.bf16.gmra.mxu1 %v8562_v5  ;;  %2914 = vmatprep.mubr.bf16.mxu0 %v8564_v10  ;;  %v546_v5 = vld [vmem:[%s8336_s14 + $0x3c0] sm:$0xff] }
 0x12e   : > { %3107 = vmatprep.mubr.bf16.mxu1 %v8566_v11  ;;  %v550_v10 = vld [vmem:[%s8336_s14 + $0x3e0] sm:$0xff]  ;;  %v551_v11 = vld [vmem:[%s8336_s14 + $0x3e8] sm:$0xff] }
 0x12f   : > { %v8596_v58 = vcombine.high %v546_v5, %v550_v10  ;;  %v8598_v59 = vcombine.high %v547_v4, %v551_v11  ;;  %v8608_v48 = vcombine.low %v546_v5, %v550_v10  ;;  %v8610_v49 = vcombine.low %v547_v4, %v551_v11  ;;  %v7558_v5 = vld [vmem:[#allocation5 + $0xe8] ss:$16 sps:$4 sm:$0xff]  }
 0x130   : > { %v7561_v4 = vld [vmem:[#allocation5 + $0x2e8] ss:$16 sps:$4 sm:$0xff]  }
 0x131   : > { %10498 = vst [vmem:[#allocation42_spill] sm:$0xff] %v8596_v58  ;;  %10499 = vst [vmem:[#allocation43_spill] sm:$0xff] %v8598_v59  ;;  %v437_v10 = vld [vmem:[%s8336_s14 + $0x58] sm:$0xff] }
 0x132   : > { %10500 = vst [vmem:[#allocation44_spill] sm:$0xff] %v8608_v48  ;;  %10501 = vst [vmem:[#allocation45_spill] sm:$0xff] %v8610_v49  ;;  %v441_v11 = vld [vmem:[%s8336_s14 + $0x78] sm:$0xff] }
 0x134   : > { %2915 = vmatmul.mubr.bf16.gmra.mxu0 %v8576_v34  ;;  %v432_v34 = vld [vmem:[%s8336_s14 + $0x30] sm:$0xff] }
 0x135   : > { %3108 = vmatmul.mubr.bf16.gmra.mxu1 %v8578_v35  ;;  %2924 = vmatprep.mubr.bf16.mxu0 %v8580_v36  ;;  %v428_v35 = vld [vmem:[%s8336_s14 + $0x10] sm:$0xff]  ;;  %v433_v36 = vld [vmem:[%s8336_s14 + $0x38] sm:$0xff] }
 0x136   : > { %3117 = vmatprep.mubr.bf16.mxu1 %v8582_v37  ;;  %v8612_v14 = vcombine.high %v428_v35, %v432_v34  ;;  %v8614_v15 = vcombine.high %v429_v43, %v433_v36 }
 0x138   : > { %10502 = vst [vmem:[#allocation46_spill] sm:$0xff] %v8612_v14  ;;  %10503 = vst [vmem:[#allocation47_spill] sm:$0xff] %v8614_v15 }
 0x13c   : > { %2925 = vmatmul.mubr.bf16.gmra.mxu0 %v8592_v50  ;;  %v8626_v50 = vcombine.low %v429_v43, %v433_v36  ;;  %v8642_v36 = vcombine.low %v437_v10, %v441_v11 }
 0x13d   : > { %3118 = vmatmul.mubr.bf16.gmra.mxu1 %v8594_v51  ;;  %2934 = vmatprep.mubr.bf16.mxu0 %v8596_v58  ;;  %v436_v51 = vld [vmem:[%s8336_s14 + $0x50] sm:$0xff] }
 0x13e   : > { %3127 = vmatprep.mubr.bf16.mxu1 %v8598_v59  ;;  %v440_v58 = vld [vmem:[%s8336_s14 + $0x70] sm:$0xff]  ;;  %v8624_v59 = vcombine.low %v428_v35, %v432_v34  ;;  %10505 = vst [vmem:[#allocation49_spill] sm:$0xff] %v8626_v50  ;;  %v7572_v34 = vld [vmem:[#allocation5 + $0xac] ss:$16 sps:$4 sm:$0xff]   ;;  %10509 = vst [vmem:[#allocation53_spill] sm:$0xff] %v8642_v36 }
 0x13f   : > { %v8628_v37 = vcombine.high %v436_v51, %v440_v58  ;;  %v7575_v35 = vld [vmem:[#allocation5 + $0x2ac] ss:$16 sps:$4 sm:$0xff]   ;;  %v8640_v43 = vcombine.low %v436_v51, %v440_v58  ;;  %v452_v51 = vld [vmem:[%s8336_s14 + $0xd0] sm:$0xff] }
 0x140   : > { %10504 = vst [vmem:[#allocation48_spill] sm:$0xff] %v8624_v59  ;;  %v456_v58 = vld [vmem:[%s8336_s14 + $0xf0] sm:$0xff] }
 0x141   : > { %10506 = vst [vmem:[#allocation50_spill] sm:$0xff] %v8628_v37  ;;  %10508 = vst [vmem:[#allocation52_spill] sm:$0xff] %v8640_v43  ;;  %v8660_v9 = vcombine.high %v452_v51, %v456_v58 }
 0x143   : > { %10514 = vst [vmem:[#allocation58_spill] sm:$0xff] %v8660_v9 }
 0x144   : > { %2935 = vmatmul.mubr.bf16.gmra.mxu0 %v8608_v48  ;;  %v7566_v48 = vld [vmem:[#allocation5 + $0xcc] ss:$16 sps:$4 sm:$0xff]  }
 0x145   : > { %3128 = vmatmul.mubr.bf16.gmra.mxu1 %v8610_v49  ;;  %3170 = vmatprep.mubr.bf16.mxu0 %v8612_v14  ;;  %v7569_v49 = vld [vmem:[#allocation5 + $0x2cc] ss:$16 sps:$4 sm:$0xff]   ;;  %v8630_v14 = vcombine.high %v437_v10, %v441_v11  ;;  %v7576_v10 = vld [vmem:[#allocation5 + $0x88] ss:$16 sps:$4 sm:$0xff]  }
 0x146   : > { %3363 = vmatprep.mubr.bf16.mxu1 %v8614_v15  ;;  %v7564_v15 = vld [vmem:[#allocation5 + $0xc8] ss:$16 sps:$4 sm:$0xff]  }
 0x147   : > { %10507 = vst [vmem:[#allocation51_spill] sm:$0xff] %v8630_v14  ;;  %v7579_v11 = vld [vmem:[#allocation5 + $0x288] ss:$16 sps:$4 sm:$0xff]  }
 0x14c   : > { %3171 = vmatmul.mubr.bf16.vlgmr.msra.gmra.mxu0 %v8624_v59  ;;  %v7573_v59 = vld [vmem:[#allocation5 + $0x2a8] ss:$16 sps:$4 sm:$0xff]  }
 0x14d   : > { %3364 = vmatmul.mubr.bf16.vlgmr.msra.gmra.mxu1 %v8626_v50  ;;  %3525 = vmatpush1.bf16.msra.mxu0 %v7558_v5  ;;  %v7570_v50 = vld [vmem:[#allocation5 + $0xa8] ss:$16 sps:$4 sm:$0xff]   ;;  %v8644_v5 = vcombine.high %v444_v33, %v448_v32 }
 0x14e   : > { %3718 = vmatpush1.bf16.msra.mxu1 %v7561_v4  ;;  %3180 = vmatprep.mubr.bf16.mxu0 %v8628_v37  ;;  %v8646_v4 = vcombine.high %v445_v23, %v449_v22  ;;  %v7578_v37 = vld [vmem:[#allocation5 + $0x8c] ss:$16 sps:$4 sm:$0xff]  }
 0x14f   : > { %3373 = vmatprep.mubr.bf16.mxu1 %v8630_v14  ;;  %3526 = vmatprep.subr.bf16.mxu0 %v7566_v48  ;;  %10510 = vst [vmem:[#allocation54_spill] sm:$0xff] %v8644_v5  ;;  %v7581_v14 = vld [vmem:[#allocation5 + $0x28c] ss:$16 sps:$4 sm:$0xff]  }
 0x150   : > { %3719 = vmatprep.subr.bf16.mxu1 %v7569_v49  ;;  %10511 = vst [vmem:[#allocation55_spill] sm:$0xff] %v8646_v4  ;;  %v453_v48 = vld [vmem:[%s8336_s14 + $0xd8] sm:$0xff] }
 0x151   : > { %3527 = vmatpush1.bf16.msra.mxu0 %v7564_v15  ;;  %v457_v49 = vld [vmem:[%s8336_s14 + $0xf8] sm:$0xff] }
 0x152   : > { %3720 = vmatpush1.bf16.msra.mxu1 %v7567_v42  ;;  %3528 = vmatprep.subr.bf16.mxu0 %v7572_v34  ;;  %v7584_v42 = vld [vmem:[#allocation5 + $0x6c] ss:$16 sps:$4 sm:$0xff]   ;;  %v8656_v34 = vcombine.low %v444_v33, %v448_v32  ;;  %v460_v32 = vld [vmem:[%s8336_s14 + $0x110] sm:$0xff] }
 0x153   : > { %3721 = vmatprep.subr.bf16.mxu1 %v7575_v35  ;;  %v7587_v15 = vld [vmem:[#allocation5 + $0x26c] ss:$16 sps:$4 sm:$0xff]   ;;  %v8658_v35 = vcombine.low %v445_v23, %v449_v22  ;;  %v464_v22 = vld [vmem:[%s8336_s14 + $0x130] sm:$0xff] }
 0x154   : > { %3181 = vmatmul.mubr.bf16.gmra.mxu0 %v8640_v43  ;;  %10512 = vst [vmem:[#allocation56_spill] sm:$0xff] %v8656_v34  ;;  %v7585_v43 = vld [vmem:[#allocation5 + $0x268] ss:$16 sps:$4 sm:$0xff]  }
 0x155   : > { %3374 = vmatmul.mubr.bf16.gmra.mxu1 %v8642_v36  ;;  %3190 = vmatprep.mubr.bf16.mxu0 %v8644_v5  ;;  %10513 = vst [vmem:[#allocation57_spill] sm:$0xff] %v8658_v35  ;;  %v7582_v36 = vld [vmem:[#allocation5 + $0x68] ss:$16 sps:$4 sm:$0xff]   ;;  %v8662_v5 = vcombine.high %v453_v48, %v457_v49 }
 0x156   : > { %3383 = vmatprep.mubr.bf16.mxu1 %v8646_v4  ;;  %3529 = vmatpush1.bf16.msra.mxu0 %v7570_v50  ;;  %v7590_v50 = vld [vmem:[#allocation5 + $0x4c] ss:$16 sps:$4 sm:$0xff]   ;;  %v8676_v4 = vcombine.high %v460_v32, %v464_v22 }
 0x157   : > { %3722 = vmatpush1.bf16.msra.mxu1 %v7573_v59  ;;  %3530 = vmatprep.subr.bf16.mxu0 %v7578_v37  ;;  %10515 = vst [vmem:[#allocation59_spill] sm:$0xff] %v8662_v5  ;;  %v7593_v59 = vld [vmem:[#allocation5 + $0x24c] ss:$16 sps:$4 sm:$0xff]   ;;  %v7588_v37 = vld [vmem:[#allocation5 + $0x48] ss:$16 sps:$4 sm:$0xff]  }
 0x158   : > { %3723 = vmatprep.subr.bf16.mxu1 %v7581_v14  ;;  %v461_v23 = vld [vmem:[%s8336_s14 + $0x118] sm:$0xff]  ;;  %10518 = vst [vmem:[#allocation62_spill] sm:$0xff] %v8676_v4 }
 0x159   : > { %v465_v33 = vld [vmem:[%s8336_s14 + $0x138] sm:$0xff] }
 0x15a   : > { %3531 = vmatpush1.bf16.msra.mxu0 %v7576_v10  ;;  %v7591_v14 = vld [vmem:[#allocation5 + $0x248] ss:$16 sps:$4 sm:$0xff]   ;;  %v7596_v10 = vld [vmem:[#allocation5 + $0x2c] ss:$16 sps:$4 sm:$0xff]  }
 0x15b   : > { %3724 = vmatpush1.bf16.msra.mxu1 %v7579_v11  ;;  %3532 = vmatprep.subr.bf16.mxu0 %v7584_v42  ;;  %v7599_v11 = vld [vmem:[#allocation5 + $0x22c] ss:$16 sps:$4 sm:$0xff]   ;;  %v8672_v42 = vcombine.low %v452_v51, %v456_v58  ;;  %v468_v51 = vld [vmem:[%s8336_s14 + $0x150] sm:$0xff] }
 0x15c   : > { %3725 = vmatprep.subr.bf16.mxu1 %v7587_v15  ;;  %3191 = vmatmul.mubr.bf16.gmra.mxu0 %v8656_v34  ;;  %v8674_v15 = vcombine.low %v453_v48, %v457_v49  ;;  %v7597_v34 = vld [vmem:[#allocation5 + $0x228] ss:$16 sps:$4 sm:$0xff]   ;;  %v472_v58 = vld [vmem:[%s8336_s14 + $0x170] sm:$0xff] }
 0x15d   : > { %3384 = vmatmul.mubr.bf16.gmra.mxu1 %v8658_v35  ;;  %3200 = vmatprep.mubr.bf16.mxu0 %v8660_v9  ;;  %10516 = vst [vmem:[#allocation60_spill] sm:$0xff] %v8672_v42  ;;  %v7594_v35 = vld [vmem:[#allocation5 + $0x28] ss:$16 sps:$4 sm:$0xff]   ;;  %v8678_v9 = vcombine.high %v461_v23, %v465_v33 }
 0x15e   : > { %3393 = vmatprep.mubr.bf16.mxu1 %v8662_v5  ;;  %3533 = vmatpush1.bf16.msra.mxu0 %v7582_v36  ;;  %10517 = vst [vmem:[#allocation61_spill] sm:$0xff] %v8674_v15  ;;  %v7602_v36 = vld [vmem:[#allocation5 + $0xc] ss:$16 sps:$4 sm:$0xff]   ;;  %v8692_v5 = vcombine.high %v468_v51, %v472_v58 }
 0x15f   : > { %3726 = vmatpush1.bf16.msra.mxu1 %v7585_v43  ;;  %3534 = vmatprep.subr.bf16.mxu0 %v7590_v50  ;;  %10519 = vst [vmem:[#allocation63_spill] sm:$0xff] %v8678_v9  ;;  %v7605_v43 = vld [vmem:[#allocation5 + $0x20c] ss:$16 sps:$4 sm:$0xff]   ;;  %v7600_v50 = vld [vmem:[#allocation5 + $0x8] ss:$16 sps:$4 sm:$0xff]  }
 0x160   : > { %3727 = vmatprep.subr.bf16.mxu1 %v7593_v59  ;;  %v469_v48 = vld [vmem:[%s8336_s14 + $0x158] sm:$0xff]  ;;  %10522 = vst [vmem:[#allocation66_spill] sm:$0xff] %v8692_v5 }
 0x161   : > { %v473_v49 = vld [vmem:[%s8336_s14 + $0x178] sm:$0xff] }
 0x162   : > { %3535 = vmatpush1.bf16.msra.mxu0 %v7588_v37  ;;  %v7603_v59 = vld [vmem:[#allocation5 + $0x208] ss:$16 sps:$4 sm:$0xff]   ;;  %v7608_v37 = vld [vmem:[#allocation5 + $0x1ec] ss:$16 sps:$4 sm:$0xff]  }
 0x163   : > { %3728 = vmatpush1.bf16.msra.mxu1 %v7591_v14  ;;  %3536 = vmatprep.subr.bf16.mxu0 %v7596_v10  ;;  %v7611_v14 = vld [vmem:[#allocation5 + $0x3ec] ss:$16 sps:$4 sm:$0xff]   ;;  %v8688_v10 = vcombine.low %v460_v32, %v464_v22  ;;  %v476_v32 = vld [vmem:[%s8336_s14 + $0x190] sm:$0xff] }
 0x164   : > { %3729 = vmatprep.subr.bf16.mxu1 %v7599_v11  ;;  %3201 = vmatmul.mubr.bf16.gmra.mxu0 %v8672_v42  ;;  %v8690_v11 = vcombine.low %v461_v23, %v465_v33  ;;  %v7609_v42 = vld [vmem:[#allocation5 + $0x3e8] ss:$16 sps:$4 sm:$0xff]   ;;  %v480_v22 = vld [vmem:[%s8336_s14 + $0x1b0] sm:$0xff] }
 0x165   : > { %3394 = vmatmul.mubr.bf16.gmra.mxu1 %v8674_v15  ;;  %3210 = vmatprep.mubr.bf16.mxu0 %v8676_v4  ;;  %10520 = vst [vmem:[#allocation64_spill] sm:$0xff] %v8688_v10  ;;  %v7606_v15 = vld [vmem:[#allocation5 + $0x1e8] ss:$16 sps:$4 sm:$0xff]   ;;  %v8694_v4 = vcombine.high %v469_v48, %v473_v49 }
 0x166   : > { %3403 = vmatprep.mubr.bf16.mxu1 %v8678_v9  ;;  %3537 = vmatpush1.bf16.msra.mxu0 %v7594_v35  ;;  %10521 = vst [vmem:[#allocation65_spill] sm:$0xff] %v8690_v11  ;;  %v7614_v35 = vld [vmem:[#allocation5 + $0x1cc] ss:$16 sps:$4 sm:$0xff]   ;;  %v8708_v9 = vcombine.high %v476_v32, %v480_v22 }
 0x167   : > { %3730 = vmatpush1.bf16.msra.mxu1 %v7597_v34  ;;  %3538 = vmatprep.subr.bf16.mxu0 %v7602_v36  ;;  %10523 = vst [vmem:[#allocation67_spill] sm:$0xff] %v8694_v4  ;;  %v7617_v34 = vld [vmem:[#allocation5 + $0x3cc] ss:$16 sps:$4 sm:$0xff]   ;;  %v7612_v36 = vld [vmem:[#allocation5 + $0x1c8] ss:$16 sps:$4 sm:$0xff]  }
 0x168   : > { %3731 = vmatprep.subr.bf16.mxu1 %v7605_v43  ;;  %v477_v23 = vld [vmem:[%s8336_s14 + $0x198] sm:$0xff]  ;;  %10526 = vst [vmem:[#allocation70_spill] sm:$0xff] %v8708_v9 }
 0x169   : > { %v481_v33 = vld [vmem:[%s8336_s14 + $0x1b8] sm:$0xff] }
 0x16a   : > { %3539 = vmatpush1.bf16.msra.mxu0 %v7600_v50  ;;  %v7615_v43 = vld [vmem:[#allocation5 + $0x3c8] ss:$16 sps:$4 sm:$0xff]   ;;  %v7620_v50 = vld [vmem:[#allocation5 + $0x1ac] ss:$16 sps:$4 sm:$0xff]  }
 0x16b   : > { %3732 = vmatpush1.bf16.msra.mxu1 %v7603_v59  ;;  %3540 = vmatprep.subr.bf16.mxu0 %v7608_v37  ;;  %v7623_v59 = vld [vmem:[#allocation5 + $0x3ac] ss:$16 sps:$4 sm:$0xff]   ;;  %v8704_v37 = vcombine.low %v468_v51, %v472_v58  ;;  %v484_v51 = vld [vmem:[%s8336_s14 + $0x1d0] sm:$0xff] }
 0x16c   : > { %3733 = vmatprep.subr.bf16.mxu1 %v7611_v14  ;;  %3211 = vmatmul.mubr.bf16.gmra.mxu0 %v8688_v10  ;;  %v8706_v14 = vcombine.low %v469_v48, %v473_v49  ;;  %v7621_v10 = vld [vmem:[#allocation5 + $0x3a8] ss:$16 sps:$4 sm:$0xff]   ;;  %v488_v58 = vld [vmem:[%s8336_s14 + $0x1f0] sm:$0xff] }
 0x16d   : > { %3404 = vmatmul.mubr.bf16.gmra.mxu1 %v8690_v11  ;;  %3220 = vmatprep.mubr.bf16.mxu0 %v8692_v5  ;;  %10524 = vst [vmem:[#allocation68_spill] sm:$0xff] %v8704_v37  ;;  %v7618_v11 = vld [vmem:[#allocation5 + $0x1a8] ss:$16 sps:$4 sm:$0xff]   ;;  %v8710_v5 = vcombine.high %v477_v23, %v481_v33 }
 0x16e   : > { %3413 = vmatprep.mubr.bf16.mxu1 %v8694_v4  ;;  %3541 = vmatpush2.bf16.msra.mxu0 %v7606_v15  ;;  %10525 = vst [vmem:[#allocation69_spill] sm:$0xff] %v8706_v14  ;;  %v7626_v15 = vld [vmem:[#allocation5 + $0x18c] ss:$16 sps:$4 sm:$0xff]  }
 0x16f   : > { %3734 = vmatpush2.bf16.msra.mxu1 %v7609_v42  ;;  %3542 = vmatprep.subr.bf16.mxu0 %v7614_v35  ;;  %10527 = vst [vmem:[#allocation71_spill] sm:$0xff] %v8710_v5  ;;  %v7629_v42 = vld [vmem:[#allocation5 + $0x38c] ss:$16 sps:$4 sm:$0xff]   ;;  %v7624_v35 = vld [vmem:[#allocation5 + $0x188] ss:$16 sps:$4 sm:$0xff]  }
 0x170   : > { %3735 = vmatprep.subr.bf16.mxu1 %v7617_v34  ;;  %v485_v48 = vld [vmem:[%s8336_s14 + $0x1d8] sm:$0xff] }
 0x171   : > { %v489_v49 = vld [vmem:[%s8336_s14 + $0x1f8] sm:$0xff] }
 0x172   : > { %3543 = vmatpush2.bf16.msra.mxu0 %v7612_v36  ;;  %v7627_v34 = vld [vmem:[#allocation5 + $0x388] ss:$16 sps:$4 sm:$0xff]   ;;  %v7632_v36 = vld [vmem:[#allocation5 + $0x16c] ss:$16 sps:$4 sm:$0xff]  }
 0x173   : > { %3736 = vmatpush2.bf16.msra.mxu1 %v7615_v43  ;;  %3544 = vmatprep.subr.bf16.mxu0 %v7620_v50  ;;  %v7635_v43 = vld [vmem:[#allocation5 + $0x36c] ss:$16 sps:$4 sm:$0xff]   ;;  %v8720_v50 = vcombine.low %v476_v32, %v480_v22  ;;  %v492_v32 = vld [vmem:[%s8336_s14 + $0x210] sm:$0xff] }
 0x174   : > { %3737 = vmatprep.subr.bf16.mxu1 %v7623_v59  ;;  %3221 = vmatmul.mubr.bf16.gmra.mxu0 %v8704_v37  ;;  %v8722_v59 = vcombine.low %v477_v23, %v481_v33  ;;  %v496_v22 = vld [vmem:[%s8336_s14 + $0x230] sm:$0xff]  ;;  %v493_v23 = vld [vmem:[%s8336_s14 + $0x218] sm:$0xff]  ;;  %v812_v33 = vlaneseq }
 0x175   : > { %3414 = vmatmul.mubr.bf16.gmra.mxu1 %v8706_v14  ;;  %3230 = vmatprep.mubr.bf16.mxu0 %v8708_v9  ;;  %10528 = vst [vmem:[#allocation72_spill] sm:$0xff] %v8720_v50  ;;  %v8724_v9 = vcombine.high %v484_v51, %v488_v58  ;;  %v7647_v14 = vld [vmem:[#allocation5 + $0x32c] ss:$16 sps:$4 sm:$0xff]   ;;  %v8756_v4 = vcombine.low %v492_v32, %v496_v22 }
 0x176   : > { %3423 = vmatprep.mubr.bf16.mxu1 %v8710_v5  ;;  %3545 = vmatpush2.bf16.msra.mxu0 %v7618_v11  ;;  %10529 = vst [vmem:[#allocation73_spill] sm:$0xff] %v8722_v59  ;;  %v8726_v5 = vcombine.high %v485_v48, %v489_v49  ;;  %v7633_v11 = vld [vmem:[#allocation5 + $0x368] ss:$16 sps:$4 sm:$0xff]   ;;  %v8744_v37 = vshrl.u32 %v812_v33, 7 }
 0x177   : > { %3738 = vmatpush2.bf16.msra.mxu1 %v7621_v10  ;;  %3546 = vmatprep.subr.bf16.mxu0 %v7626_v15  ;;  %10530 = vst [vmem:[#allocation74_spill] sm:$0xff] %v8724_v9  ;;  %v7630_v10 = vld [vmem:[#allocation5 + $0x168] ss:$16 sps:$4 sm:$0xff]   ;;  %v7638_v15 = vld [vmem:[#allocation5 + $0x14c] ss:$16 sps:$4 sm:$0xff]   ;;  %10537 = vst [vmem:[#allocation81_spill] sm:$0xff] %v8756_v4 }
 0x178   : > { %3739 = vmatprep.subr.bf16.mxu1 %v7629_v42  ;;  %10531 = vst [vmem:[#allocation75_spill] sm:$0xff] %v8726_v5  ;;  %v7641_v42 = vld [vmem:[#allocation5 + $0x34c] ss:$16 sps:$4 sm:$0xff]   ;;  %10536 = vst [vmem:[#allocation80_spill] sm:$0xff] %v8744_v37 }
 0x179   : > { %v501_v33 = vld [vmem:[%s8336_s14 + $0x258] sm:$0xff] }
 0x17a   : > { %3547 = vmatpush2.bf16.msra.mxu0 %v7624_v35  ;;  %v497_v35 = vld [vmem:[%s8336_s14 + $0x238] sm:$0xff] }
 0x17b   : > { %3740 = vmatpush2.bf16.msra.mxu1 %v7627_v34  ;;  %3548 = vmatprep.subr.bf16.mxu0 %v7632_v36  ;;  %v7636_v34 = vld [vmem:[#allocation5 + $0x148] ss:$16 sps:$4 sm:$0xff]  }
 0x17c   : > { %3741 = vmatprep.subr.bf16.mxu1 %v7635_v43  ;;  %3231 = vmatmul.mubr.bf16.gmra.mxu0 %v8720_v50  ;;  %v7639_v36 = vld [vmem:[#allocation5 + $0x348] ss:$16 sps:$4 sm:$0xff]   ;;  %v7644_v43 = vld [vmem:[#allocation5 + $0x12c] ss:$16 sps:$4 sm:$0xff]   ;;  %v8736_v50 = vcombine.low %v484_v51, %v488_v58 }
 0x17d   : > { %3424 = vmatmul.mubr.bf16.gmra.mxu1 %v8722_v59  ;;  %3240 = vmatprep.mubr.bf16.mxu0 %v8724_v9  ;;  %v8738_v59 = vcombine.low %v485_v48, %v489_v49  ;;  %v8740_v9 = vcombine.high %v492_v32, %v496_v22  ;;  %v7650_v51 = vld [vmem:[#allocation5 + $0x10c] ss:$16 sps:$4 sm:$0xff]   ;;  %v810_v48 = vld [vmem:[#allocation7] sm:$0xf]  ;;  %v10383_v49 = vsub.s32 0, %v8744_v37 }
 0x17e   : > { %3433 = vmatprep.mubr.bf16.mxu1 %v8726_v5  ;;  %3549 = vmatpush2.bf16.msra.mxu0 %v7630_v10  ;;  %10532 = vst [vmem:[#allocation76_spill] sm:$0xff] %v8736_v50  ;;  %v8742_v5 = vcombine.high %v493_v23, %v497_v35  ;;  %v7642_v10 = vld [vmem:[#allocation5 + $0x128] ss:$16 sps:$4 sm:$0xff]   ;;  %v7653_v58 = vld [vmem:[#allocation5 + $0x30c] ss:$16 sps:$4 sm:$0xff]  }
 0x17f   : > { %3742 = vmatpush2.bf16.msra.mxu1 %v7633_v11  ;;  %3550 = vmatprep.subr.bf16.mxu0 %v7638_v15  ;;  %10533 = vst [vmem:[#allocation77_spill] sm:$0xff] %v8738_v59  ;;  %10534 = vst [vmem:[#allocation78_spill] sm:$0xff] %v8740_v9  ;;  %v7645_v11 = vld [vmem:[#allocation5 + $0x328] ss:$16 sps:$4 sm:$0xff]   ;;  %v500_v15 = vld [vmem:[%s8336_s14 + $0x250] sm:$0xff] }
 0x180   : > { %3743 = vmatprep.subr.bf16.mxu1 %v7641_v42  ;;  %10535 = vst [vmem:[#allocation79_spill] sm:$0xff] %v8742_v5  ;;  %v504_v42 = vld [vmem:[%s8336_s14 + $0x270] sm:$0xff] }
 0x181   : > { %v8764_v8 = vcombine.high %v500_v15, %v504_v42 }
 0x182   : > { %3551 = vmatpush2.bf16.msra.mxu0 %v7636_v34  ;;  %v505_v34 = vld [vmem:[%s8336_s14 + $0x278] sm:$0xff] }
 0x183   : > { %3744 = vmatpush2.bf16.msra.mxu1 %v7639_v36  ;;  %3552 = vmatprep.subr.bf16.mxu0 %v7644_v43  ;;  %v7651_v36 = vld [vmem:[#allocation5 + $0x308] ss:$16 sps:$4 sm:$0xff]   ;;  %v10384_v43 = vsub.s32 1, %v8744_v37  ;;  %10539 = vst [vmem:[#allocation83_spill] sm:$0xff] %v8764_v8 }
 0x184   : > { %3745 = vmatprep.subr.bf16.mxu1 %v7647_v14  ;;  %3241 = vmatmul.mubr.bf16.gmra.mxu0 %v8736_v50  ;;  %v7648_v14 = vld [vmem:[#allocation5 + $0x108] ss:$16 sps:$4 sm:$0xff]   ;;  %v7659_v50 = vld [vmem:[#allocation5 + $0x6ec] ss:$16 sps:$4 sm:$0xff]  }
 0x185   : > { %3434 = vmatmul.mubr.bf16.gmra.mxu1 %v8738_v59  ;;  %3250 = vmatprep.mubr.bf16.mxu0 %v8740_v9  ;;  %v7656_v59 = vld [vmem:[#allocation5 + $0x4ec] ss:$16 sps:$4 sm:$0xff]   ;;  %v8758_v9 = vcombine.low %v493_v23, %v497_v35  ;;  %v8770_v32 = vrot.slane %v810_v48, %v10384_v43 }
 0x186   : > { %3443 = vmatprep.mubr.bf16.mxu1 %v8742_v5  ;;  %3553 = vmatpush2.bf16.msra.mxu0 %v7642_v10  ;;  %v8762_v5 = vrot.slane %v810_v48, %v10383_v49  ;;  %v8766_v10 = vcombine.high %v501_v33, %v505_v34  ;;  %v509_v48 = vld [vmem:[%s8336_s14 + $0x298] sm:$0xff] }
 0x187   : > { %3746 = vmatpush2.bf16.msra.mxu1 %v7645_v11  ;;  %3554 = vmatprep.subr.bf16.mxu0 %v7650_v51  ;;  %10538 = vst [vmem:[#allocation82_spill] sm:$0xff] %v8758_v9  ;;  %v508_v11 = vld [vmem:[%s8336_s14 + $0x290] sm:$0xff] }
 0x188   : > { %3747 = vmatprep.subr.bf16.mxu1 %v7653_v58  ;;  %10540 = vst [vmem:[#allocation84_spill] sm:$0xff] %v8766_v10 }
 0x18a   : > { %3555 = vmatpush2.bf16.msra.mxu0 %v7648_v14  ;;  %v512_v14 = vld [vmem:[%s8336_s14 + $0x2b0] sm:$0xff] }
 0x18b   : > { %3748 = vmatpush2.bf16.msra.mxu1 %v7651_v36  ;;  %3910 = vmatprep.subr.bf16.mxu0 %v7656_v59  ;;  %v513_v36 = vld [vmem:[%s8336_s14 + $0x2b8] sm:$0xff] }
 0x18c   : > { %4103 = vmatprep.subr.bf16.mxu1 %v7659_v50  ;;  %v2786_v22 = vpop.f32.mrf.mxu0  ;;  %3251 = vmatmul.mubr.bf16.gmra.mxu0 %v8756_v4  ;;  %v8784_v4 = vcombine.low %v500_v15, %v504_v42  ;;  %v8793_v37 = vcombine.high %v509_v48, %v513_v36 }
 0x18d   : > { %v2979_v23 = vpop.f32.mrf.mxu1  ;;  %3444 = vmatmul.mubr.bf16.gmra.mxu1 %v8758_v9  ;;  %v2787_v35 = vadd.f32 %v2786_v22, %v8762_v5  ;;  %3260 = vmatprep.mubr.bf16.mxu0 %v8764_v8  ;;  %v8786_v9 = vcombine.low %v501_v33, %v505_v34  ;;  %v8791_v8 = vcombine.high %v508_v11, %v512_v14 }
 0x18e   : > { %3453 = vmatprep.mubr.bf16.mxu1 %v8766_v10  ;;  %v2788_v51 = vpop.f32.mrf.mxu0  ;;  %10541 = vst [vmem:[#allocation85_spill] sm:$0xff] %v8784_v4  ;;  %10545 = vst [vmem:[#allocation89_spill] sm:$0xff] %v8793_v37 }
 0x18f   : > { %v2981_v58 = vpop.f32.mrf.mxu1  ;;  %v8781_v59 = vadd.f32 %v2979_v23, %v2787_v35  ;;  %v2789_v50 = vadd.f32 %v2788_v51, %v8770_v32  ;;  %10542 = vst [vmem:[#allocation86_spill] sm:$0xff] %v8786_v9  ;;  %10544 = vst [vmem:[#allocation88_spill] sm:$0xff] %v8791_v8 }
 0x190   : > { %v2790_v49 = vpop.f32.mrf.mxu0 }
 0x191   : > { %v2983_v43 = vpop.f32.mrf.mxu1  ;;  %v8788_v22 = vadd.f32 %v2981_v58, %v2789_v50  ;;  %v2791_v10 = vadd.f32 %v2790_v49, %v8762_v5  ;;  %v516_v58 = vld [vmem:[%s8336_s14 + $0x2d0] sm:$0xff] }
 0x192   : > { %v2792_v23 = vpop.f32.mrf.mxu0 }
 0x193   : > { %10543 = vst [vmem:[#allocation87_spill] sm:$0xff] %v8788_v22  ;;  %v2985_v35 = vpop.f32.mrf.mxu1  ;;  %v8795_v51 = vadd.f32 %v2983_v43, %v2791_v10  ;;  %v2793_v15 = vadd.f32 %v2792_v23, %v8770_v32  ;;  %v520_v10 = vld [vmem:[%s8336_s14 + $0x2f0] sm:$0xff]  ;;  %v521_v23 = vld [vmem:[%s8336_s14 + $0x2f8] sm:$0xff] }
 0x194   : > { %v2796_v42 = vpop.f32.mrf.mxu0  ;;  %3261 = vmatmul.mubr.bf16.gmra.mxu0 %v8784_v4 }
 0x195   : > { %10546 = vst [vmem:[#allocation90_spill] sm:$0xff] %v8795_v51  ;;  %v2989_v33 = vpop.f32.mrf.mxu1  ;;  %3454 = vmatmul.mubr.bf16.gmra.mxu1 %v8786_v9  ;;  %v8800_v49 = vadd.f32 %v2985_v35, %v2793_v15  ;;  %v2797_v34 = vadd.f32 %v2796_v42, %v8762_v5  ;;  %3270 = vmatprep.mubr.bf16.mxu0 %v8791_v8 }
 0x196   : > { %3463 = vmatprep.mubr.bf16.mxu1 %v8793_v37  ;;  %v2798_v50 = vpop.f32.mrf.mxu0  ;;  %v8812_v35 = vcombine.low %v508_v11, %v512_v14  ;;  %v8814_v15 = vcombine.low %v509_v48, %v513_v36  ;;  %v8819_v8 = vcombine.high %v516_v58, %v520_v10 }
 0x197   : > { %10547 = vst [vmem:[#allocation91_spill] sm:$0xff] %v8800_v49  ;;  %v2991_v43 = vpop.f32.mrf.mxu1  ;;  %v8809_v6 = vadd.f32 %v2989_v33, %v2797_v34  ;;  %v2799_v4 = vadd.f32 %v2798_v50, %v8770_v32  ;;  %v8821_v49 = vcombine.high %v517_v7, %v521_v23 }
 0x198   : > { %v2800_v51 = vpop.f32.mrf.mxu0  ;;  %10549 = vst [vmem:[#allocation93_spill] sm:$0xff] %v8812_v35  ;;  %10550 = vst [vmem:[#allocation94_spill] sm:$0xff] %v8814_v15 }
 0x199   : > { %10548 = vst [vmem:[#allocation92_spill] sm:$0xff] %v8809_v6  ;;  %v2993_v9 = vpop.f32.mrf.mxu1  ;;  %v8816_v42 = vadd.f32 %v2991_v43, %v2799_v4  ;;  %v2801_v37 = vadd.f32 %v2800_v51, %v8762_v5  ;;  %10552 = vst [vmem:[#allocation96_spill] sm:$0xff] %v8819_v8  ;;  %v524_v51 = vld [vmem:[%s8336_s14 + $0x310] sm:$0xff] }
 0x19a   : > { %10553 = vst [vmem:[#allocation97_spill] sm:$0xff] %v8821_v49  ;;  %v2802_v33 = vpop.f32.mrf.mxu0 }
 0x19b   : > { %10551 = vst [vmem:[#allocation95_spill] sm:$0xff] %v8816_v42  ;;  %v2995_v34 = vpop.f32.mrf.mxu1  ;;  %v8823_v50 = vadd.f32 %v2993_v9, %v2801_v37  ;;  %v2803_v11 = vadd.f32 %v2802_v33, %v8770_v32  ;;  %v528_v37 = vld [vmem:[%s8336_s14 + $0x330] sm:$0xff]  ;;  %v529_v33 = vld [vmem:[%s8336_s14 + $0x338] sm:$0xff] }
 0x19c   : > { %v2806_v14 = vpop.f32.mrf.mxu0  ;;  %3271 = vmatmul.mubr.bf16.gmra.mxu0 %v8812_v35 }
 0x19d   : > { %10554 = vst [vmem:[#allocation98_spill] sm:$0xff] %v8823_v50  ;;  %v2999_v48 = vpop.f32.mrf.mxu1  ;;  %3464 = vmatmul.mubr.bf16.gmra.mxu1 %v8814_v15  ;;  %v8828_v4 = vadd.f32 %v2995_v34, %v2803_v11  ;;  %v2807_v36 = vadd.f32 %v2806_v14, %v8762_v5  ;;  %3280 = vmatprep.mubr.bf16.mxu0 %v8819_v8  ;;  %v525_v50 = vld [vmem:[%s8336_s14 + $0x318] sm:$0xff] }
 0x19e   : > { %3473 = vmatprep.mubr.bf16.mxu1 %v8821_v49  ;;  %v2808_v43 = vpop.f32.mrf.mxu0  ;;  %v8840_v34 = vcombine.low %v516_v58, %v520_v10  ;;  %v8842_v11 = vcombine.low %v517_v7, %v521_v23  ;;  %v8847_v8 = vcombine.high %v524_v51, %v528_v37 }
 0x19f   : > { %10555 = vst [vmem:[#allocation99_spill] sm:$0xff] %v8828_v4  ;;  %v3001_v9 = vpop.f32.mrf.mxu1  ;;  %v8837_v42 = vadd.f32 %v2999_v48, %v2807_v36  ;;  %v2809_v35 = vadd.f32 %v2808_v43, %v8770_v32  ;;  %v8849_v4 = vcombine.high %v525_v50, %v529_v33 }
 0x1a0   : > { %v2810_v6 = vpop.f32.mrf.mxu0  ;;  %10557 = vst [vmem:[#allocation101_spill] sm:$0xff] %v8840_v34  ;;  %10558 = vst [vmem:[#allocation102_spill] sm:$0xff] %v8842_v11 }
 0x1a1   : > { %10556 = vst [vmem:[#allocation100_spill] sm:$0xff] %v8837_v42  ;;  %v3003_v15 = vpop.f32.mrf.mxu1  ;;  %v8844_v14 = vadd.f32 %v3001_v9, %v2809_v35  ;;  %v2811_v49 = vadd.f32 %v2810_v6, %v8762_v5  ;;  %10560 = vst [vmem:[#allocation104_spill] sm:$0xff] %v8847_v8  ;;  %v532_v35 = vld [vmem:[%s8336_s14 + $0x350] sm:$0xff] }
 0x1a2   : > { %10561 = vst [vmem:[#allocation105_spill] sm:$0xff] %v8849_v4  ;;  %v2812_v48 = vpop.f32.mrf.mxu0 }
 0x1a3   : > { %10559 = vst [vmem:[#allocation103_spill] sm:$0xff] %v8844_v14  ;;  %v3005_v36 = vpop.f32.mrf.mxu1  ;;  %v8851_v43 = vadd.f32 %v3003_v15, %v2811_v49  ;;  %v2813_v58 = vadd.f32 %v2812_v48, %v8770_v32  ;;  %v536_v15 = vld [vmem:[%s8336_s14 + $0x370] sm:$0xff]  ;;  %v537_v48 = vld [vmem:[%s8336_s14 + $0x378] sm:$0xff] }
 0x1a4   : > { %v2816_v7 = vpop.f32.mrf.mxu0  ;;  %3281 = vmatmul.mubr.bf16.gmra.mxu0 %v8840_v34 }
 0x1a5   : > { %10562 = vst [vmem:[#allocation106_spill] sm:$0xff] %v8851_v43  ;;  %v3009_v10 = vpop.f32.mrf.mxu1  ;;  %3474 = vmatmul.mubr.bf16.gmra.mxu1 %v8842_v11  ;;  %v8856_v6 = vadd.f32 %v3005_v36, %v2813_v58  ;;  %v2817_v23 = vadd.f32 %v2816_v7, %v8762_v5  ;;  %3290 = vmatprep.mubr.bf16.mxu0 %v8847_v8  ;;  %v533_v43 = vld [vmem:[%s8336_s14 + $0x358] sm:$0xff] }
 0x1a6   : > { %3483 = vmatprep.mubr.bf16.mxu1 %v8849_v4  ;;  %v2818_v9 = vpop.f32.mrf.mxu0  ;;  %v8868_v36 = vcombine.low %v524_v51, %v528_v37  ;;  %v8870_v58 = vcombine.low %v525_v50, %v529_v33  ;;  %v8875_v8 = vcombine.high %v532_v35, %v536_v15 }
 0x1a7   : > { %10563 = vst [vmem:[#allocation107_spill] sm:$0xff] %v8856_v6  ;;  %v3011_v49 = vpop.f32.mrf.mxu1  ;;  %v8865_v14 = vadd.f32 %v3009_v10, %v2817_v23  ;;  %v2819_v34 = vadd.f32 %v2818_v9, %v8770_v32  ;;  %v8877_v6 = vcombine.high %v533_v43, %v537_v48 }
 0x1a8   : > { %v2820_v42 = vpop.f32.mrf.mxu0  ;;  %10565 = vst [vmem:[#allocation109_spill] sm:$0xff] %v8868_v36  ;;  %10566 = vst [vmem:[#allocation110_spill] sm:$0xff] %v8870_v58 }
 0x1a9   : > { %10564 = vst [vmem:[#allocation108_spill] sm:$0xff] %v8865_v14  ;;  %v3013_v11 = vpop.f32.mrf.mxu1  ;;  %v8872_v7 = vadd.f32 %v3011_v49, %v2819_v34  ;;  %v2821_v4 = vadd.f32 %v2820_v42, %v8762_v5  ;;  %10568 = vst [vmem:[#allocation112_spill] sm:$0xff] %v8875_v8  ;;  %v540_v34 = vld [vmem:[%s8336_s14 + $0x390] sm:$0xff] }
 0x1aa   : > { %10569 = vst [vmem:[#allocation113_spill] sm:$0xff] %v8877_v6  ;;  %v2822_v10 = vpop.f32.mrf.mxu0 }
 0x1ab   : > { %10567 = vst [vmem:[#allocation111_spill] sm:$0xff] %v8872_v7  ;;  %v3015_v23 = vpop.f32.mrf.mxu1  ;;  %v8879_v9 = vadd.f32 %v3013_v11, %v2821_v4  ;;  %v2823_v51 = vadd.f32 %v2822_v10, %v8770_v32  ;;  %v544_v11 = vld [vmem:[%s8336_s14 + $0x3b0] sm:$0xff]  ;;  %v545_v10 = vld [vmem:[%s8336_s14 + $0x3b8] sm:$0xff] }
 0x1ac   : > { %v2826_v50 = vpop.f32.mrf.mxu0  ;;  %3291 = vmatmul.mubr.bf16.gmra.mxu0 %v8868_v36 }
 0x1ad   : > { %10570 = vst [vmem:[#allocation114_spill] sm:$0xff] %v8879_v9  ;;  %v3019_v37 = vpop.f32.mrf.mxu1  ;;  %3484 = vmatmul.mubr.bf16.gmra.mxu1 %v8870_v58  ;;  %v8884_v42 = vadd.f32 %v3015_v23, %v2823_v51  ;;  %v2827_v33 = vadd.f32 %v2826_v50, %v8762_v5  ;;  %3300 = vmatprep.mubr.bf16.mxu0 %v8875_v8  ;;  %v541_v9 = vld [vmem:[%s8336_s14 + $0x398] sm:$0xff] }
 0x1ae   : > { %3493 = vmatprep.mubr.bf16.mxu1 %v8877_v6  ;;  %v2828_v49 = vpop.f32.mrf.mxu0  ;;  %v8896_v23 = vcombine.low %v532_v35, %v536_v15  ;;  %v8898_v51 = vcombine.low %v533_v43, %v537_v48  ;;  %v8903_v8 = vcombine.high %v540_v34, %v544_v11 }
 0x1af   : > { %10571 = vst [vmem:[#allocation115_spill] sm:$0xff] %v8884_v42  ;;  %v3021_v4 = vpop.f32.mrf.mxu1  ;;  %v8893_v7 = vadd.f32 %v3019_v37, %v2827_v33  ;;  %v2829_v36 = vadd.f32 %v2828_v49, %v8770_v32  ;;  %v8905_v42 = vcombine.high %v541_v9, %v545_v10 }
 0x1b0   : > { %v2830_v14 = vpop.f32.mrf.mxu0  ;;  %10573 = vst [vmem:[#allocation117_spill] sm:$0xff] %v8896_v23  ;;  %10574 = vst [vmem:[#allocation118_spill] sm:$0xff] %v8898_v51 }
 0x1b1   : > { %10572 = vst [vmem:[#allocation116_spill] sm:$0xff] %v8893_v7  ;;  %v3023_v58 = vpop.f32.mrf.mxu1  ;;  %v8900_v50 = vadd.f32 %v3021_v4, %v2829_v36  ;;  %v2831_v6 = vadd.f32 %v2830_v14, %v8762_v5  ;;  %10576 = vst [vmem:[#allocation120_spill] sm:$0xff] %v8903_v8  ;;  %v548_v36 = vld [vmem:[%s8336_s14 + $0x3d0] sm:$0xff] }
 0x1b2   : > { %10577 = vst [vmem:[#allocation121_spill] sm:$0xff] %v8905_v42  ;;  %v2832_v37 = vpop.f32.mrf.mxu0 }
 0x1b3   : > { %10575 = vst [vmem:[#allocation119_spill] sm:$0xff] %v8900_v50  ;;  %v3025_v33 = vpop.f32.mrf.mxu1  ;;  %v8907_v49 = vadd.f32 %v3023_v58, %v2831_v6  ;;  %v2833_v35 = vadd.f32 %v2832_v37, %v8770_v32  ;;  %v552_v58 = vld [vmem:[%s8336_s14 + $0x3f0] sm:$0xff]  ;;  %v553_v37 = vld [vmem:[%s8336_s14 + $0x3f8] sm:$0xff] }
 0x1b4   : > { %v2836_v43 = vpop.f32.mrf.mxu0  ;;  %3301 = vmatmul.mubr.bf16.gmra.mxu0 %v8896_v23 }
 0x1b5   : > { %10578 = vst [vmem:[#allocation122_spill] sm:$0xff] %v8907_v49  ;;  %v3029_v15 = vpop.f32.mrf.mxu1  ;;  %3494 = vmatmul.mubr.bf16.gmra.mxu1 %v8898_v51  ;;  %v8912_v14 = vadd.f32 %v3025_v33, %v2833_v35  ;;  %v2837_v48 = vadd.f32 %v2836_v43, %v8762_v5  ;;  %3310 = vmatprep.mubr.bf16.mxu0 %v8903_v8  ;;  %v549_v49 = vld [vmem:[%s8336_s14 + $0x3d8] sm:$0xff]  ;;  %s8029_s14 = scalar_lea.vmem %s10265_s1, 4096 }
 0x1b6   : > { %3503 = vmatprep.mubr.bf16.mxu1 %v8905_v42  ;;  %v2838_v4 = vpop.f32.mrf.mxu0  ;;  %v8924_v33 = vcombine.low %v540_v34, %v544_v11  ;;  %v8926_v35 = vcombine.low %v541_v9, %v545_v10  ;;  %v8931_v8 = vcombine.high %v548_v36, %v552_v58  ;;  %p8030_p8 = scmp.ne.s32.totalorder %s10265_s1, %s8029_s14  ;;  %p8037_p5 = scmp.lt.s32.totalorder %s8035_s20, %s8029_s14 }
 0x1b7   : > { %10579 = vst [vmem:[#allocation123_spill] sm:$0xff] %v8912_v14  ;;  %v3031_v6 = vpop.f32.mrf.mxu1  ;;  %v8921_v50 = vadd.f32 %v3029_v15, %v2837_v48  ;;  %v2839_v23 = vadd.f32 %v2838_v4, %v8770_v32  ;;  %v8933_v14 = vcombine.high %v549_v49, %v553_v37 }
 0x1b8   : > { %v2840_v7 = vpop.f32.mrf.mxu0  ;;  %10581 = vst [vmem:[#allocation125_spill] sm:$0xff] %v8924_v33  ;;  %10582 = vst [vmem:[#allocation126_spill] sm:$0xff] %v8926_v35  ;;  %p8031_p4 = pnand %p8030_p8, %p10898_p9  ;;  %p8038_p1 = por %p8037_p5, %p8036_p7 }
 0x1b9   : > { %10580 = vst [vmem:[#allocation124_spill] sm:$0xff] %v8921_v50  ;;  %v3033_v51 = vpop.f32.mrf.mxu1  ;;  %v8928_v43 = vadd.f32 %v3031_v6, %v2839_v23  ;;  %v2841_v42 = vadd.f32 %v2840_v7, %v8762_v5  ;;  %10583 = vst [vmem:[#allocation127_spill] sm:$0xff] %v8931_v8  ;;  %v8950_v6 = vcombine.low %v549_v49, %v553_v37 }
 0x1ba   : > { %10584 = vst [vmem:[#allocation128_spill] sm:$0xff] %v8933_v14  ;;  %v2842_v22 = vpop.f32.mrf.mxu0  ;;  %p8032_p11 = pneg %p8031_p4 }
 0x1bb   : > { %v3035_v57 = vpop.f32.mrf.mxu1  ;;  %v8935_v15 = vadd.f32 %v3033_v51, %v2841_v42  ;;  %v2843_v48 = vadd.f32 %v2842_v22, %v8770_v32  ;;  %v8948_v51 = vcombine.low %v548_v36, %v552_v58  ;;  %10586 = vst [vmem:[#allocation130_spill] sm:$0xff] %v8950_v6 }
 0x1bc   : > { %v2846_v4 = vpop.f32.mrf.mxu0  ;;  %3311 = vmatmul.mubr.bf16.gmra.mxu0 %v8924_v33  ;;  %v7671_v33 = vld [vmem:[#allocation5 + $0x6ac] ss:$16 sps:$4 sm:$0xff]   ;;  %p8039_p3 = pnand %p8038_p1, %p8032_p11 }
 0x1bd   : > { %v3039_v50 = vpop.f32.mrf.mxu1  ;;  %3504 = vmatmul.mubr.bf16.gmra.mxu1 %v8926_v35  ;;  %v8940_v9 = vadd.f32 %v3035_v57, %v2843_v48  ;;  %v2847_v7 = vadd.f32 %v2846_v4, %v8762_v5  ;;  %3320 = vmatprep.mubr.bf16.mxu0 %v8931_v8  ;;  %10585 = vst [vmem:[#allocation129_spill] sm:$0xff] %v8948_v51 }
 0x1be   : > { %3513 = vmatprep.mubr.bf16.mxu1 %v8933_v14  ;;  %v2848_v34 = vpop.f32.mrf.mxu0 }
 0x1bf   : > { %v3041_v11 = vpop.f32.mrf.mxu1  ;;  %v8945_v42 = vadd.f32 %v3039_v50, %v2847_v7  ;;  %v2849_v22 = vadd.f32 %v2848_v34, %v8770_v32 }
 0x1c0   : > { %v2850_v10 = vpop.f32.mrf.mxu0 }
 0x1c1   : > { %v3043_v23 = vpop.f32.mrf.mxu1  ;;  %v8952_v57 = vadd.f32 %v3041_v11, %v2849_v22  ;;  %v2851_v48 = vadd.f32 %v2850_v10, %v8762_v5 }
 0x1c2   : > { %v2852_v4 = vpop.f32.mrf.mxu0 }
 0x1c3   : > { %v3045_v8 = vpop.f32.mrf.mxu1  ;;  %v8955_v35 = vadd.f32 %v3043_v23, %v2851_v48  ;;  %v2853_v14 = vadd.f32 %v2852_v4, %v8770_v32 }
 0x1c4   : > { %v2856_v50 = vpop.f32.mrf.mxu0  ;;  %3321 = vmatmul.mubr.bf16.gmra.mxu0 %v8948_v51  ;;  %v7665_v51 = vld [vmem:[#allocation5 + $0x6cc] ss:$16 sps:$4 sm:$0xff]  }
 0x1c5   : > { %v3049_v7 = vpop.f32.mrf.mxu1  ;;  %3514 = vmatmul.mubr.bf16.gmra.mxu1 %v8950_v6  ;;  %v8960_v36 = vadd.f32 %v3045_v8, %v2853_v14  ;;  %v2857_v49 = vadd.f32 %v2856_v50, %v8762_v5  ;;  %3556 = vmatprep.mubr.bf16.mxu0 %v8358_v53  ;;  %v7654_v8 = vld [vmem:[#allocation5 + $0x4e8] ss:$16 sps:$4 sm:$0xff]  }
 0x1c6   : > { %3749 = vmatprep.mubr.bf16.mxu1 %v8360_v55  ;;  %v2858_v58 = vpop.f32.mrf.mxu0  ;;  %v7657_v14 = vld [vmem:[#allocation5 + $0x6e8] ss:$16 sps:$4 sm:$0xff]   ;;  %v7662_v55 = vld [vmem:[#allocation5 + $0x4cc] ss:$16 sps:$4 sm:$0xff]  }
 0x1c7   : > { %v3051_v37 = vpop.f32.mrf.mxu1  ;;  %v8965_v34 = vadd.f32 %v3049_v7, %v2857_v49  ;;  %v2859_v11 = vadd.f32 %v2858_v58, %v8770_v32 }
 0x1c8   : > { %v2860_v22 = vpop.f32.mrf.mxu0 }
 0x1c9   : > { %v3053_v10 = vpop.f32.mrf.mxu1  ;;  %v8968_v23 = vadd.f32 %v3051_v37, %v2859_v11  ;;  %v2861_v48 = vadd.f32 %v2860_v22, %v8762_v5  ;;  %v7660_v11 = vld [vmem:[#allocation5 + $0x4c8] ss:$16 sps:$4 sm:$0xff]  }
 0x1ca   : > { %v2862_v4 = vpop.f32.mrf.mxu0  ;;  %v7663_v22 = vld [vmem:[#allocation5 + $0x6c8] ss:$16 sps:$4 sm:$0xff]  }
 0x1cb   : > { %v3055_v50 = vpop.f32.mrf.mxu1  ;;  %v8971_v6 = vadd.f32 %v3053_v10, %v2861_v48  ;;  %v2863_v53 = vadd.f32 %v2862_v4, %v8770_v32  ;;  %v7668_v4 = vld [vmem:[#allocation5 + $0x4ac] ss:$16 sps:$4 sm:$0xff]  }
 0x1cc   : > { %v2866_v7 = vpop.f32.mrf.mxu0  ;;  %3557 = vmatmul.mubr.bf16.vlgmr.msra.gmra.mxu0 %v8368_v12 }
 0x1cd   : > { %10587 = vst [vmem:[#allocation131_spill] sm:$0xff] %v8971_v6  ;;  %v3059_v49 = vpop.f32.mrf.mxu1  ;;  %3750 = vmatmul.mubr.bf16.vlgmr.msra.gmra.mxu1 %v8370_v13  ;;  %v8976_v58 = vadd.f32 %v3055_v50, %v2863_v53  ;;  %v2867_v37 = vadd.f32 %v2866_v7, %v8762_v5  ;;  %3911 = vmatpush1.bf16.msra.mxu0 %v7654_v8  ;;  %v7666_v7 = vld [vmem:[#allocation5 + $0x4a8] ss:$16 sps:$4 sm:$0xff]  }
 0x1ce   : > { %4104 = vmatpush1.bf16.msra.mxu1 %v7657_v14  ;;  %v2868_v10 = vpop.f32.mrf.mxu0  ;;  %3566 = vmatprep.mubr.bf16.mxu0 %v8372_v16 }
 0x1cf   : > { %v3061_v48 = vpop.f32.mrf.mxu1  ;;  %3759 = vmatprep.mubr.bf16.mxu1 %v8374_v17  ;;  %v8981_v6 = vadd.f32 %v3059_v49, %v2867_v37  ;;  %v2869_v12 = vadd.f32 %v2868_v10, %v8770_v32  ;;  %3912 = vmatprep.subr.bf16.mxu0 %v7662_v55  ;;  %v7669_v17 = vld [vmem:[#allocation5 + $0x6a8] ss:$16 sps:$4 sm:$0xff]   ;;  %v7674_v55 = vld [vmem:[#allocation5 + $0x48c] ss:$16 sps:$4 sm:$0xff]  }
 0x1d0   : > { %4105 = vmatprep.subr.bf16.mxu1 %v7665_v51  ;;  %v2870_v13 = vpop.f32.mrf.mxu0  ;;  %v7677_v51 = vld [vmem:[#allocation5 + $0x68c] ss:$16 sps:$4 sm:$0xff]  }
 0x1d1   : > { %10588 = vst [vmem:[#allocation132_spill] sm:$0xff] %v8981_v6  ;;  %v3063_v50 = vpop.f32.mrf.mxu1  ;;  %v8984_v8 = vadd.f32 %v3061_v48, %v2869_v12  ;;  %v2871_v14 = vadd.f32 %v2870_v13, %v8762_v5  ;;  %3913 = vmatpush1.bf16.msra.mxu0 %v7660_v11  ;;  %v7675_v12 = vld [vmem:[#allocation5 + $0x688] ss:$16 sps:$4 sm:$0xff]  }
 0x1d2   : > { %4106 = vmatpush1.bf16.msra.mxu1 %v7663_v22  ;;  %v2872_v53 = vpop.f32.mrf.mxu0  ;;  %3914 = vmatprep.subr.bf16.mxu0 %v7668_v4  ;;  %v7672_v4 = vld [vmem:[#allocation5 + $0x488] ss:$16 sps:$4 sm:$0xff]  }
 0x1d3   : > { %v3065_v16 = vpop.f32.mrf.mxu1  ;;  %4107 = vmatprep.subr.bf16.mxu1 %v7671_v33  ;;  %v8987_v49 = vadd.f32 %v3063_v50, %v2871_v14  ;;  %v2873_v37 = vadd.f32 %v2872_v53, %v8770_v32  ;;  %v7683_v50 = vld [vmem:[#allocation5 + $0x66c] ss:$16 sps:$4 sm:$0xff]  }
 0x1d4   : > { %v2876_v10 = vpop.f32.mrf.mxu0  ;;  %3567 = vmatmul.mubr.bf16.gmra.mxu0 %v8384_v28 }
 0x1d5   : > { %v3069_v6 = vpop.f32.mrf.mxu1  ;;  %3760 = vmatmul.mubr.bf16.gmra.mxu1 %v8386_v29  ;;  %v8992_v11 = vadd.f32 %v3065_v16, %v2873_v37  ;;  %v2877_v22 = vadd.f32 %v2876_v10, %v8762_v5  ;;  %3576 = vmatprep.mubr.bf16.mxu0 %v8388_v30  ;;  %v7680_v29 = vld [vmem:[#allocation5 + $0x46c] ss:$16 sps:$4 sm:$0xff]  }
 0x1d6   : > { %3769 = vmatprep.mubr.bf16.mxu1 %v8390_v31  ;;  %v2878_v33 = vpop.f32.mrf.mxu0  ;;  %3915 = vmatpush1.bf16.msra.mxu0 %v7666_v7  ;;  %v7678_v7 = vld [vmem:[#allocation5 + $0x468] ss:$16 sps:$4 sm:$0xff]  }
 0x1d7   : > { %v3071_v48 = vpop.f32.mrf.mxu1  ;;  %4108 = vmatpush1.bf16.msra.mxu1 %v7669_v17  ;;  %v8997_v13 = vadd.f32 %v3069_v6, %v2877_v22  ;;  %v2879_v28 = vadd.f32 %v2878_v33, %v8770_v32  ;;  %3916 = vmatprep.subr.bf16.mxu0 %v7674_v55  ;;  %v7681_v17 = vld [vmem:[#allocation5 + $0x668] ss:$16 sps:$4 sm:$0xff]   ;;  %v7686_v55 = vld [vmem:[#allocation5 + $0x44c] ss:$16 sps:$4 sm:$0xff]  }
 0x1d8   : > { %4109 = vmatprep.subr.bf16.mxu1 %v7677_v51  ;;  %v2880_v14 = vpop.f32.mrf.mxu0  ;;  %v7689_v51 = vld [vmem:[#allocation5 + $0x64c] ss:$16 sps:$4 sm:$0xff]  }
 0x1d9   : > { %v3073_v53 = vpop.f32.mrf.mxu1  ;;  %v9000_v16 = vadd.f32 %v3071_v48, %v2879_v28  ;;  %v2881_v30 = vadd.f32 %v2880_v14, %v8762_v5 }
 0x1da   : > { %v2882_v31 = vpop.f32.mrf.mxu0  ;;  %3917 = vmatpush1.bf16.msra.mxu0 %v7672_v4 }
 0x1db   : > { %v3075_v37 = vpop.f32.mrf.mxu1  ;;  %4110 = vmatpush1.bf16.msra.mxu1 %v7675_v12  ;;  %v9003_v6 = vadd.f32 %v3073_v53, %v2881_v30  ;;  %v2883_v10 = vadd.f32 %v2882_v31, %v8770_v32  ;;  %3918 = vmatprep.subr.bf16.mxu0 %v7680_v29  ;;  %v7684_v29 = vld [vmem:[#allocation5 + $0x448] ss:$16 sps:$4 sm:$0xff]   ;;  %v7695_v53 = vld [vmem:[#allocation5 + $0x62c] ss:$16 sps:$4 sm:$0xff]  }
 0x1dc   : > { %4111 = vmatprep.subr.bf16.mxu1 %v7683_v50  ;;  %v2886_v22 = vpop.f32.mrf.mxu0  ;;  %3577 = vmatmul.mubr.bf16.gmra.mxu0 %v8400_v44  ;;  %v7687_v50 = vld [vmem:[#allocation5 + $0x648] ss:$16 sps:$4 sm:$0xff]  }
 0x1dd   : > { %v3079_v33 = vpop.f32.mrf.mxu1  ;;  %3770 = vmatmul.mubr.bf16.gmra.mxu1 %v8402_v45  ;;  %v9008_v48 = vadd.f32 %v3075_v37, %v2883_v10  ;;  %v2887_v4 = vadd.f32 %v2886_v22, %v8762_v5  ;;  %3586 = vmatprep.mubr.bf16.mxu0 %v8404_v46  ;;  %v7692_v45 = vld [vmem:[#allocation5 + $0x42c] ss:$16 sps:$4 sm:$0xff]  }
 0x1de   : > { %3779 = vmatprep.mubr.bf16.mxu1 %v8406_v47  ;;  %v2888_v12 = vpop.f32.mrf.mxu0  ;;  %3919 = vmatpush1.bf16.msra.mxu0 %v7678_v7  ;;  %v7690_v7 = vld [vmem:[#allocation5 + $0x428] ss:$16 sps:$4 sm:$0xff]  }
 0x1df   : > { %v3081_v28 = vpop.f32.mrf.mxu1  ;;  %4112 = vmatpush1.bf16.msra.mxu1 %v7681_v17  ;;  %v9013_v14 = vadd.f32 %v3079_v33, %v2887_v4  ;;  %v2889_v44 = vadd.f32 %v2888_v12, %v8770_v32  ;;  %3920 = vmatprep.subr.bf16.mxu0 %v7686_v55  ;;  %v7693_v17 = vld [vmem:[#allocation5 + $0x628] ss:$16 sps:$4 sm:$0xff]   ;;  %v7698_v55 = vld [vmem:[#allocation5 + $0x40c] ss:$16 sps:$4 sm:$0xff]  }
 0x1e0   : > { %4113 = vmatprep.subr.bf16.mxu1 %v7689_v51  ;;  %v2890_v30 = vpop.f32.mrf.mxu0  ;;  %v7701_v51 = vld [vmem:[#allocation5 + $0x60c] ss:$16 sps:$4 sm:$0xff]  }
 0x1e1   : > { %v3083_v31 = vpop.f32.mrf.mxu1  ;;  %v9016_v37 = vadd.f32 %v3081_v28, %v2889_v44  ;;  %v2891_v46 = vadd.f32 %v2890_v30, %v8762_v5 }
 0x1e2   : > { %v2892_v47 = vpop.f32.mrf.mxu0  ;;  %3921 = vmatpush1.bf16.msra.mxu0 %v7684_v29 }
 0x1e3   : > { %v3085_v10 = vpop.f32.mrf.mxu1  ;;  %4114 = vmatpush1.bf16.msra.mxu1 %v7687_v50  ;;  %v9019_v22 = vadd.f32 %v3083_v31, %v2891_v46  ;;  %v2893_v33 = vadd.f32 %v2892_v47, %v8770_v32  ;;  %3922 = vmatprep.subr.bf16.mxu0 %v7692_v45  ;;  %v7696_v45 = vld [vmem:[#allocation5 + $0x408] ss:$16 sps:$4 sm:$0xff]   ;;  %v7707_v31 = vld [vmem:[#allocation5 + $0x7ec] ss:$16 sps:$4 sm:$0xff]  }
 0x1e4   : > { %4115 = vmatprep.subr.bf16.mxu1 %v7695_v53  ;;  %v2896_v4 = vpop.f32.mrf.mxu0  ;;  %3587 = vmatmul.mubr.bf16.gmra.mxu0 %v8416_v62  ;;  %v7699_v53 = vld [vmem:[#allocation5 + $0x608] ss:$16 sps:$4 sm:$0xff]  }
 0x1e5   : > { %v3089_v12 = vpop.f32.mrf.mxu1  ;;  %3780 = vmatmul.mubr.bf16.gmra.mxu1 %v8418_v63  ;;  %v9024_v28 = vadd.f32 %v3085_v10, %v2893_v33  ;;  %v2897_v29 = vadd.f32 %v2896_v4, %v8762_v5  ;;  %3596 = vmatprep.mubr.bf16.mxu0 %v8420_v0  ;;  %v7704_v63 = vld [vmem:[#allocation5 + $0x5ec] ss:$16 sps:$4 sm:$0xff]  }
 0x1e6   : > { %3789 = vmatprep.mubr.bf16.mxu1 %v8422_v1  ;;  %v2898_v50 = vpop.f32.mrf.mxu0  ;;  %3923 = vmatpush1.bf16.msra.mxu0 %v7690_v7  ;;  %v7702_v7 = vld [vmem:[#allocation5 + $0x5e8] ss:$16 sps:$4 sm:$0xff]  }
 0x1e7   : > { %v3091_v44 = vpop.f32.mrf.mxu1  ;;  %4116 = vmatpush1.bf16.msra.mxu1 %v7693_v17  ;;  %v9029_v30 = vadd.f32 %v3089_v12, %v2897_v29  ;;  %v2899_v62 = vadd.f32 %v2898_v50, %v8770_v32  ;;  %3924 = vmatprep.subr.bf16.mxu0 %v7698_v55  ;;  %v7705_v17 = vld [vmem:[#allocation5 + $0x7e8] ss:$16 sps:$4 sm:$0xff]   ;;  %v7710_v55 = vld [vmem:[#allocation5 + $0x5cc] ss:$16 sps:$4 sm:$0xff]  }
 0x1e8   : > { %4117 = vmatprep.subr.bf16.mxu1 %v7701_v51  ;;  %v2900_v46 = vpop.f32.mrf.mxu0  ;;  %v7713_v51 = vld [vmem:[#allocation5 + $0x7cc] ss:$16 sps:$4 sm:$0xff]  }
 0x1e9   : > { %v3093_v47 = vpop.f32.mrf.mxu1  ;;  %v9032_v10 = vadd.f32 %v3091_v44, %v2899_v62  ;;  %v2901_v0 = vadd.f32 %v2900_v46, %v8762_v5 }
 0x1ea   : > { %v2902_v1 = vpop.f32.mrf.mxu0  ;;  %3925 = vmatpush1.bf16.msra.mxu0 %v7696_v45 }
 0x1eb   : > { %v3095_v33 = vpop.f32.mrf.mxu1  ;;  %4118 = vmatpush1.bf16.msra.mxu1 %v7699_v53  ;;  %v9035_v4 = vadd.f32 %v3093_v47, %v2901_v0  ;;  %v2903_v12 = vadd.f32 %v2902_v1, %v8770_v32  ;;  %3926 = vmatprep.subr.bf16.mxu0 %v7704_v63  ;;  %v7708_v63 = vld [vmem:[#allocation5 + $0x5c8] ss:$16 sps:$4 sm:$0xff]   ;;  %v7719_v47 = vld [vmem:[#allocation5 + $0x7ac] ss:$16 sps:$4 sm:$0xff]  }
 0x1ec   : > { %4119 = vmatprep.subr.bf16.mxu1 %v7707_v31  ;;  %v2906_v29 = vpop.f32.mrf.mxu0  ;;  %3597 = vmatmul.mubr.bf16.gmra.mxu0 %v8432_v18  ;;  %v7711_v31 = vld [vmem:[#allocation5 + $0x7c8] ss:$16 sps:$4 sm:$0xff]  }
 0x1ed   : > { %v3099_v50 = vpop.f32.mrf.mxu1  ;;  %3790 = vmatmul.mubr.bf16.gmra.mxu1 %v8434_v19  ;;  %v9040_v44 = vadd.f32 %v3095_v33, %v2903_v12  ;;  %v2907_v45 = vadd.f32 %v2906_v29, %v8762_v5  ;;  %3606 = vmatprep.mubr.bf16.mxu0 %v8436_v20  ;;  %v7716_v19 = vld [vmem:[#allocation5 + $0x5ac] ss:$16 sps:$4 sm:$0xff]  }
 0x1ee   : > { %3799 = vmatprep.mubr.bf16.mxu1 %v8438_v21  ;;  %v2908_v53 = vpop.f32.mrf.mxu0  ;;  %3927 = vmatpush2.bf16.msra.mxu0 %v7702_v7  ;;  %v7714_v7 = vld [vmem:[#allocation5 + $0x5a8] ss:$16 sps:$4 sm:$0xff]  }
 0x1ef   : > { %v3101_v62 = vpop.f32.mrf.mxu1  ;;  %4120 = vmatpush2.bf16.msra.mxu1 %v7705_v17  ;;  %v9045_v46 = vadd.f32 %v3099_v50, %v2907_v45  ;;  %v2909_v18 = vadd.f32 %v2908_v53, %v8770_v32  ;;  %3928 = vmatprep.subr.bf16.mxu0 %v7710_v55  ;;  %v7717_v17 = vld [vmem:[#allocation5 + $0x7a8] ss:$16 sps:$4 sm:$0xff]   ;;  %v7722_v55 = vld [vmem:[#allocation5 + $0x58c] ss:$16 sps:$4 sm:$0xff]  }
 0x1f0   : > { %4121 = vmatprep.subr.bf16.mxu1 %v7713_v51  ;;  %v2910_v0 = vpop.f32.mrf.mxu0  ;;  %v7725_v51 = vld [vmem:[#allocation5 + $0x78c] ss:$16 sps:$4 sm:$0xff]  }
 0x1f1   : > { %v3103_v1 = vpop.f32.mrf.mxu1  ;;  %v9048_v33 = vadd.f32 %v3101_v62, %v2909_v18  ;;  %v2911_v20 = vadd.f32 %v2910_v0, %v8762_v5 }
 0x1f2   : > { %v2912_v21 = vpop.f32.mrf.mxu0  ;;  %3929 = vmatpush2.bf16.msra.mxu0 %v7708_v63 }
 0x1f3   : > { %v3105_v12 = vpop.f32.mrf.mxu1  ;;  %4122 = vmatpush2.bf16.msra.mxu1 %v7711_v31  ;;  %v9051_v29 = vadd.f32 %v3103_v1, %v2911_v20  ;;  %v2913_v50 = vadd.f32 %v2912_v21, %v8770_v32  ;;  %3930 = vmatprep.subr.bf16.mxu0 %v7716_v19  ;;  %v7720_v19 = vld [vmem:[#allocation5 + $0x588] ss:$16 sps:$4 sm:$0xff]   ;;  %v7731_v1 = vld [vmem:[#allocation5 + $0x76c] ss:$16 sps:$4 sm:$0xff]  }
 0x1f4   : > { %4123 = vmatprep.subr.bf16.mxu1 %v7719_v47  ;;  %v2916_v45 = vpop.f32.mrf.mxu0  ;;  %3607 = vmatmul.mubr.bf16.gmra.mxu0 %v8448_v38  ;;  %v7723_v47 = vld [vmem:[#allocation5 + $0x788] ss:$16 sps:$4 sm:$0xff]  }
 0x1f5   : > { %v3109_v53 = vpop.f32.mrf.mxu1  ;;  %3800 = vmatmul.mubr.bf16.gmra.mxu1 %v8450_v39  ;;  %v9056_v62 = vadd.f32 %v3105_v12, %v2913_v50  ;;  %v2917_v63 = vadd.f32 %v2916_v45, %v8762_v5  ;;  %3616 = vmatprep.mubr.bf16.mxu0 %v8452_v40  ;;  %v7728_v39 = vld [vmem:[#allocation5 + $0x56c] ss:$16 sps:$4 sm:$0xff]  }
 0x1f6   : > { %3809 = vmatprep.mubr.bf16.mxu1 %v8454_v41  ;;  %v2918_v31 = vpop.f32.mrf.mxu0  ;;  %3931 = vmatpush2.bf16.msra.mxu0 %v7714_v7  ;;  %v7726_v7 = vld [vmem:[#allocation5 + $0x568] ss:$16 sps:$4 sm:$0xff]  }
 0x1f7   : > { %v3111_v18 = vpop.f32.mrf.mxu1  ;;  %4124 = vmatpush2.bf16.msra.mxu1 %v7717_v17  ;;  %v9061_v0 = vadd.f32 %v3109_v53, %v2917_v63  ;;  %v2919_v38 = vadd.f32 %v2918_v31, %v8770_v32  ;;  %3932 = vmatprep.subr.bf16.mxu0 %v7722_v55  ;;  %v7729_v17 = vld [vmem:[#allocation5 + $0x768] ss:$16 sps:$4 sm:$0xff]   ;;  %v7734_v55 = vld [vmem:[#allocation5 + $0x54c] ss:$16 sps:$4 sm:$0xff]  }
 0x1f8   : > { %4125 = vmatprep.subr.bf16.mxu1 %v7725_v51  ;;  %v2920_v20 = vpop.f32.mrf.mxu0  ;;  %v7737_v51 = vld [vmem:[#allocation5 + $0x74c] ss:$16 sps:$4 sm:$0xff]  }
 0x1f9   : > { %v3113_v21 = vpop.f32.mrf.mxu1  ;;  %v9064_v12 = vadd.f32 %v3111_v18, %v2919_v38  ;;  %v2921_v40 = vadd.f32 %v2920_v20, %v8762_v5 }
 0x1fa   : > { %v2922_v41 = vpop.f32.mrf.mxu0  ;;  %3933 = vmatpush2.bf16.msra.mxu0 %v7720_v19 }
 0x1fb   : > { %v3115_v50 = vpop.f32.mrf.mxu1  ;;  %4126 = vmatpush2.bf16.msra.mxu1 %v7723_v47  ;;  %v9067_v45 = vadd.f32 %v3113_v21, %v2921_v40  ;;  %v2923_v53 = vadd.f32 %v2922_v41, %v8770_v32  ;;  %3934 = vmatprep.subr.bf16.mxu0 %v7728_v39  ;;  %v7732_v39 = vld [vmem:[#allocation5 + $0x548] ss:$16 sps:$4 sm:$0xff]   ;;  %v7743_v21 = vld [vmem:[#allocation5 + $0x72c] ss:$16 sps:$4 sm:$0xff]  }
 0x1fc   : > { %4127 = vmatprep.subr.bf16.mxu1 %v7731_v1  ;;  %v2926_v63 = vpop.f32.mrf.mxu0  ;;  %3617 = vmatmul.mubr.bf16.gmra.mxu0 %v8464_v60  ;;  %v7735_v1 = vld [vmem:[#allocation5 + $0x748] ss:$16 sps:$4 sm:$0xff]  }
 0x1fd   : > { %v3119_v31 = vpop.f32.mrf.mxu1  ;;  %3810 = vmatmul.mubr.bf16.gmra.mxu1 %v8466_v61  ;;  %v9072_v18 = vadd.f32 %v3115_v50, %v2923_v53  ;;  %v2927_v19 = vadd.f32 %v2926_v63, %v8762_v5  ;;  %3626 = vmatprep.mubr.bf16.mxu0 %v8468_v2  ;;  %v7740_v61 = vld [vmem:[#allocation5 + $0x52c] ss:$16 sps:$4 sm:$0xff]  }
 0x1fe   : > { %3819 = vmatprep.mubr.bf16.mxu1 %v8470_v3  ;;  %v2928_v47 = vpop.f32.mrf.mxu0  ;;  %3935 = vmatpush2.bf16.msra.mxu0 %v7726_v7  ;;  %v7738_v7 = vld [vmem:[#allocation5 + $0x528] ss:$16 sps:$4 sm:$0xff]  }
 0x1ff   : > { %v3121_v38 = vpop.f32.mrf.mxu1  ;;  %4128 = vmatpush2.bf16.msra.mxu1 %v7729_v17  ;;  %v9077_v20 = vadd.f32 %v3119_v31, %v2927_v19  ;;  %v2929_v60 = vadd.f32 %v2928_v47, %v8770_v32  ;;  %3936 = vmatprep.subr.bf16.mxu0 %v7734_v55  ;;  %v7741_v17 = vld [vmem:[#allocation5 + $0x728] ss:$16 sps:$4 sm:$0xff]   ;;  %v7746_v55 = vld [vmem:[#allocation5 + $0x50c] ss:$16 sps:$4 sm:$0xff]  }
 0x200   : > { %4129 = vmatprep.subr.bf16.mxu1 %v7737_v51  ;;  %v2930_v40 = vpop.f32.mrf.mxu0  ;;  %v7749_v51 = vld [vmem:[#allocation5 + $0x70c] ss:$16 sps:$4 sm:$0xff]  }
 0x201   : > { %v3123_v41 = vpop.f32.mrf.mxu1  ;;  %v9080_v50 = vadd.f32 %v3121_v38, %v2929_v60  ;;  %v2931_v2 = vadd.f32 %v2930_v40, %v8762_v5 }
 0x202   : > { %v2932_v3 = vpop.f32.mrf.mxu0  ;;  %3937 = vmatpush2.bf16.msra.mxu0 %v7732_v39 }
 0x203   : > { %v3125_v53 = vpop.f32.mrf.mxu1  ;;  %4130 = vmatpush2.bf16.msra.mxu1 %v7735_v1  ;;  %v9083_v63 = vadd.f32 %v3123_v41, %v2931_v2  ;;  %v2933_v31 = vadd.f32 %v2932_v3, %v8770_v32  ;;  %3938 = vmatprep.subr.bf16.mxu0 %v7740_v61  ;;  %v7744_v61 = vld [vmem:[#allocation5 + $0x508] ss:$16 sps:$4 sm:$0xff]  }
 0x204   : > { %4131 = vmatprep.subr.bf16.mxu1 %v7743_v21  ;;  %v2936_v19 = vpop.f32.mrf.mxu0  ;;  %3627 = vmatmul.mubr.bf16.gmra.mxu0 %v8480_v24  ;;  %v7747_v21 = vld [vmem:[#allocation5 + $0x708] ss:$16 sps:$4 sm:$0xff]  }
 0x205   : > { %v3129_v47 = vpop.f32.mrf.mxu1  ;;  %3820 = vmatmul.mubr.bf16.gmra.mxu1 %v8482_v25  ;;  %v9088_v38 = vadd.f32 %v3125_v53, %v2933_v31  ;;  %v2937_v39 = vadd.f32 %v2936_v19, %v8762_v5  ;;  %3636 = vmatprep.mubr.bf16.mxu0 %v8484_v26 }
 0x206   : > { %3829 = vmatprep.mubr.bf16.mxu1 %v8486_v27  ;;  %v2938_v1 = vpop.f32.mrf.mxu0  ;;  %3939 = vmatpush2.bf16.msra.mxu0 %v7738_v7 }
 0x207   : > { %v3131_v60 = vpop.f32.mrf.mxu1  ;;  %4132 = vmatpush2.bf16.msra.mxu1 %v7741_v17  ;;  %v9093_v40 = vadd.f32 %v3129_v47, %v2937_v39  ;;  %v2939_v24 = vadd.f32 %v2938_v1, %v8770_v32  ;;  %3940 = vmatprep.subr.bf16.mxu0 %v7746_v55  ;;  %v7752_v17 = vld [vmem:[#allocation8 + $0x74] ss:$8 sps:$4 sm:$0xff]  }
 0x208   : > { %4133 = vmatprep.subr.bf16.mxu1 %v7749_v51  ;;  %v2940_v25 = vpop.f32.mrf.mxu0 }
 0x209   : > { %v3133_v41 = vpop.f32.mrf.mxu1  ;;  %v9096_v2 = vadd.f32 %v3131_v60, %v2939_v24  ;;  %v2941_v26 = vadd.f32 %v2940_v25, %v8762_v5  ;;  %v10591_v5 = vld [vmem:[#allocation19_spill] sm:$0xff] }
 0x20a   : > { %v2942_v3 = vpop.f32.mrf.mxu0  ;;  %3941 = vmatpush2.bf16.msra.mxu0 %v7744_v61 }
 0x20b   : > { %v3135_v27 = vpop.f32.mrf.mxu1  ;;  %4134 = vmatpush2.bf16.msra.mxu1 %v7747_v21  ;;  %v9099_v53 = vadd.f32 %v3133_v41, %v2941_v26  ;;  %v2943_v7 = vadd.f32 %v2942_v3, %v8770_v32  ;;  %5140 = vmatprep.subr.bf16.mxu0 %v7752_v17  ;;  %v10592_v32 = vld [vmem:[#allocation87_spill] sm:$0xff]  ;;  %v10596_v17 = vld [vmem:[#allocation21_spill] sm:$0xff] }
 0x20c   : > { %v3172_v31 = vpop.f32.mrf.mxu0  ;;  %3637 = vmatmul.mubr.bf16.gmra.mxu0 %v8496_v52  ;;  %v10593_v52 = vld [vmem:[#allocation90_spill] sm:$0xff]  ;;  %v10594_v3 = vld [vmem:[#allocation91_spill] sm:$0xff] }
 0x20d   : > { %10589 = vst [vmem:[#allocation133_spill] sm:$0xff] %v9099_v53  ;;  %v3365_v19 = vpop.f32.mrf.mxu1  ;;  %3830 = vmatmul.mubr.bf16.gmra.mxu1 %v8498_v54  ;;  %v9104_v55 = vadd.f32 %v3135_v27, %v2943_v7  ;;  %v3173_v51 = vadd.f32 %v3172_v31, %v8781_v59  ;;  %3646 = vmatprep.mubr.bf16.mxu0 %v8500_v56  ;;  %v10595_v31 = vld [vmem:[#allocation20_spill] sm:$0xff] }
 0x20e   : > { %3839 = vmatprep.mubr.bf16.mxu1 %v10591_v5  ;;  %v3174_v47 = vpop.f32.mrf.mxu0 }
 0x20f   : > { %10590 = vst [vmem:[#allocation134_spill] sm:$0xff] %v9104_v55  ;;  %v3367_v39 = vpop.f32.mrf.mxu1  ;;  %v3366_v1 = vadd.f32 %v3365_v19, %v3173_v51  ;;  %v3175_v60 = vadd.f32 %v3174_v47, %v10592_v32  ;;  %v10597_v51 = vld [vmem:[#allocation92_spill] sm:$0xff]  ;;  %v10598_v47 = vld [vmem:[#allocation22_spill] sm:$0xff] }
 0x210   : > { %v3176_v61 = vpop.f32.mrf.mxu0 }
 0x211   : > { %v3369_v21 = vpop.f32.mrf.mxu1  ;;  %v3368_v24 = vadd.f32 %v3367_v39, %v3175_v60  ;;  %v3177_v25 = vadd.f32 %v3176_v61, %v10593_v52  ;;  %v4424_v54 = vmul.f32 0.2, %v3366_v1  ;;  %vm4296_vm0 = vcmp.gt.f32.partialorder %v3366_v1, 0.0  ;;  %v10599_v39 = vld [vmem:[#allocation23_spill] sm:$0xff] }
 0x212   : > { %v3178_v41 = vpop.f32.mrf.mxu0 }
 0x213   : > { %v3371_v26 = vpop.f32.mrf.mxu1  ;;  %v3370_v59 = vadd.f32 %v3369_v21, %v3177_v25  ;;  %v3179_v56 = vadd.f32 %v3178_v41, %v10594_v3  ;;  %v9117_v32 = vsel %vm4296_vm0, %v3366_v1, %v4424_v54  ;;  %v4425_v52 = vmul.f32 0.2, %v3368_v24  ;;  %v10602_v3 = vld [vmem:[#allocation95_spill] sm:$0xff]  ;;  %v10603_v1 = vld [vmem:[#allocation98_spill] sm:$0xff] }
 0x214   : > { %v3182_v27 = vpop.f32.mrf.mxu0  ;;  %3647 = vmatmul.mubr.bf16.gmra.mxu0 %v10595_v31  ;;  %10600 = vst [vmem:[#allocation19_spill] sm:$0xff] %v9117_v32  ;;  %vm4297_vm2 = vcmp.gt.f32.partialorder %v3368_v24, 0.0  ;;  %v10608_v32 = vld [vmem:[#allocation25_spill] sm:$0xff] }
 0x215   : > { %v3375_v7 = vpop.f32.mrf.mxu1  ;;  %3840 = vmatmul.mubr.bf16.gmra.mxu1 %v10596_v17  ;;  %vm4300_vm1 = vcmp.gt.f32.partialorder %v3370_v59, 0.0  ;;  %v4428_v19 = vmul.f32 0.2, %v3370_v59  ;;  %v3183_v5 = vadd.f32 %v3182_v27, %v10597_v51  ;;  %3656 = vmatprep.mubr.bf16.mxu0 %v10598_v47  ;;  %v3372_v60 = vadd.f32 %v3371_v26, %v3179_v56  ;;  %v10607_v17 = vld [vmem:[#allocation24_spill] sm:$0xff] }
 0x216   : > { %3849 = vmatprep.mubr.bf16.mxu1 %v10599_v39  ;;  %v3184_v61 = vpop.f32.mrf.mxu0 }
 0x217   : > { %v3377_v21 = vpop.f32.mrf.mxu1  ;;  %v9119_v25 = vsel %vm4300_vm1, %v3370_v59, %v4428_v19  ;;  %v3376_v41 = vadd.f32 %v3375_v7, %v3183_v5  ;;  %v3185_v31 = vadd.f32 %v3184_v61, %v10602_v3  ;;  %vm4301_vm3 = vcmp.gt.f32.partialorder %v3372_v60, 0.0  ;;  %v10606_v19 = vld [vmem:[#allocation99_spill] sm:$0xff] }
 0x218   : > { %10601 = vst [vmem:[#allocation87_spill] sm:$0xff] %v9119_v25  ;;  %v4429_v27 = vmul.f32 0.2, %v3372_v60  ;;  %v3186_v51 = vpop.f32.mrf.mxu0  ;;  %v9127_v7 = vsel %vm4297_vm2, %v3368_v24, %v4425_v52 }
 0x219   : > { %v3379_v47 = vpop.f32.mrf.mxu1  ;;  %v3378_v39 = vadd.f32 %v3377_v21, %v3185_v31  ;;  %v3187_v54 = vadd.f32 %v3186_v51, %v10603_v1  ;;  %v4432_v26 = vmul.f32 0.2, %v3376_v41  ;;  %vm4304_vm4 = vcmp.gt.f32.partialorder %v3376_v41, 0.0  ;;  %10605 = vst [vmem:[#allocation91_spill] sm:$0xff] %v9127_v7  ;;  %v10609_v51 = vld [vmem:[#allocation100_spill] sm:$0xff] }
 0x21a   : > { %v3188_v56 = vpop.f32.mrf.mxu0  ;;  %v9125_v53 = vsel %vm4301_vm3, %v3372_v60, %v4429_v27  ;;  %v10610_v27 = vld [vmem:[#allocation26_spill] sm:$0xff] }
 0x21b   : > { %v3381_v55 = vpop.f32.mrf.mxu1  ;;  %10604 = vst [vmem:[#allocation90_spill] sm:$0xff] %v9125_v53  ;;  %v3380_v59 = vadd.f32 %v3379_v47, %v3187_v54  ;;  %v3189_v5 = vadd.f32 %v3188_v56, %v10606_v19  ;;  %v10611_v47 = vld [vmem:[#allocation27_spill] sm:$0xff]  ;;  %v9137_v24 = vsel %vm4304_vm4, %v3376_v41, %v4432_v26  ;;  %v4433_v56 = vmul.f32 0.2, %v3378_v39  ;;  %v7767_v21 = vld [vmem:[#allocation8 + $0x174] ss:$8 sps:$4 sm:$0xff]  }
 0x21c   : > { %v3192_v61 = vpop.f32.mrf.mxu0  ;;  %3657 = vmatmul.mubr.bf16.gmra.mxu0 %v10607_v17  ;;  %10612 = vst [vmem:[#allocation20_spill] sm:$0xff] %v9137_v24  ;;  %v10614_v19 = vld [vmem:[#allocation103_spill] sm:$0xff]  ;;  %vm4305_vm6 = vcmp.gt.f32.partialorder %v3378_v39, 0.0  ;;  %v10615_v26 = vld [vmem:[#allocation106_spill] sm:$0xff]  ;;  %5333 = vmatprep.subr.bf16.mxu1 %v7767_v21  ;;  %v10620_v53 = vld [vmem:[#allocation29_spill] sm:$0xff] }
 0x21d   : > { %v3385_v3 = vpop.f32.mrf.mxu1  ;;  %3850 = vmatmul.mubr.bf16.gmra.mxu1 %v10608_v32  ;;  %vm4308_vm5 = vcmp.gt.f32.partialorder %v3380_v59, 0.0  ;;  %v4436_v31 = vmul.f32 0.2, %v3380_v59  ;;  %v3193_v60 = vadd.f32 %v3192_v61, %v10609_v51  ;;  %3666 = vmatprep.mubr.bf16.mxu0 %v10610_v27  ;;  %v3382_v52 = vadd.f32 %v3381_v55, %v3189_v5 }
 0x21e   : > { %3859 = vmatprep.mubr.bf16.mxu1 %v10611_v47  ;;  %v3194_v1 = vpop.f32.mrf.mxu0 }
 0x21f   : > { %v3387_v54 = vpop.f32.mrf.mxu1  ;;  %v9139_v17 = vsel %vm4308_vm5, %v3380_v59, %v4436_v31  ;;  %v3386_v32 = vadd.f32 %v3385_v3, %v3193_v60  ;;  %v3195_v25 = vadd.f32 %v3194_v1, %v10614_v19  ;;  %vm4309_vm7 = vcmp.gt.f32.partialorder %v3382_v52, 0.0  ;;  %v10618_v1 = vld [vmem:[#allocation107_spill] sm:$0xff] }
 0x220   : > { %10613 = vst [vmem:[#allocation21_spill] sm:$0xff] %v9139_v17  ;;  %v4437_v51 = vmul.f32 0.2, %v3382_v52  ;;  %v3196_v27 = vpop.f32.mrf.mxu0  ;;  %v9147_v60 = vsel %vm4305_vm6, %v3378_v39, %v4433_v56  ;;  %v10619_v17 = vld [vmem:[#allocation28_spill] sm:$0xff] }
 0x221   : > { %v3389_v47 = vpop.f32.mrf.mxu1  ;;  %v3388_v41 = vadd.f32 %v3387_v54, %v3195_v25  ;;  %v3197_v55 = vadd.f32 %v3196_v27, %v10615_v26  ;;  %v4440_v5 = vmul.f32 0.2, %v3386_v32  ;;  %vm4312_vm8 = vcmp.gt.f32.partialorder %v3386_v32, 0.0  ;;  %10617 = vst [vmem:[#allocation22_spill] sm:$0xff] %v9147_v60  ;;  %v10621_v54 = vld [vmem:[#allocation108_spill] sm:$0xff]  ;;  %v10623_v27 = vld [vmem:[#allocation31_spill] sm:$0xff] }
 0x222   : > { %v3198_v7 = vpop.f32.mrf.mxu0  ;;  %v9145_v31 = vsel %vm4309_vm7, %v3382_v52, %v4437_v51  ;;  %v10622_v51 = vld [vmem:[#allocation30_spill] sm:$0xff]  ;;  %v10631_v25 = vld [vmem:[#allocation32_spill] sm:$0xff] }
 0x223   : > { %v3391_v59 = vpop.f32.mrf.mxu1  ;;  %10616 = vst [vmem:[#allocation92_spill] sm:$0xff] %v9145_v31  ;;  %v3390_v3 = vadd.f32 %v3389_v47, %v3197_v55  ;;  %v3199_v19 = vadd.f32 %v3198_v7, %v10618_v1  ;;  %v9157_v39 = vsel %vm4312_vm8, %v3386_v32, %v4440_v5  ;;  %v4441_v26 = vmul.f32 0.2, %v3388_v41  ;;  %v10626_v55 = vld [vmem:[#allocation111_spill] sm:$0xff]  ;;  %v10627_v32 = vld [vmem:[#allocation114_spill] sm:$0xff] }
 0x224   : > { %v3202_v61 = vpop.f32.mrf.mxu0  ;;  %3667 = vmatmul.mubr.bf16.gmra.mxu0 %v10619_v17  ;;  %10624 = vst [vmem:[#allocation23_spill] sm:$0xff] %v9157_v39  ;;  %vm4313_vm10 = vcmp.gt.f32.partialorder %v3388_v41, 0.0  ;;  %v10632_v39 = vld [vmem:[#allocation33_spill] sm:$0xff] }
 0x225   : > { %v3395_v24 = vpop.f32.mrf.mxu1  ;;  %3860 = vmatmul.mubr.bf16.gmra.mxu1 %v10620_v53  ;;  %vm4316_vm9 = vcmp.gt.f32.partialorder %v3390_v3, 0.0  ;;  %v4444_v21 = vmul.f32 0.2, %v3390_v3  ;;  %v3203_v52 = vadd.f32 %v3202_v61, %v10621_v54  ;;  %3676 = vmatprep.mubr.bf16.mxu0 %v10622_v51  ;;  %v3392_v7 = vadd.f32 %v3391_v59, %v3199_v19 }
 0x226   : > { %3869 = vmatprep.mubr.bf16.mxu1 %v10623_v27  ;;  %v3204_v56 = vpop.f32.mrf.mxu0 }
 0x227   : > { %v3397_v47 = vpop.f32.mrf.mxu1  ;;  %v9159_v17 = vsel %vm4316_vm9, %v3390_v3, %v4444_v21  ;;  %v3396_v53 = vadd.f32 %v3395_v24, %v3203_v52  ;;  %v3205_v1 = vadd.f32 %v3204_v56, %v10626_v55  ;;  %vm4317_vm11 = vcmp.gt.f32.partialorder %v3392_v7, 0.0  ;;  %v10630_v21 = vld [vmem:[#allocation115_spill] sm:$0xff] }
 0x228   : > { %10625 = vst [vmem:[#allocation95_spill] sm:$0xff] %v9159_v17  ;;  %v4445_v61 = vmul.f32 0.2, %v3392_v7  ;;  %v3206_v54 = vpop.f32.mrf.mxu0  ;;  %v9167_v3 = vsel %vm4313_vm10, %v3388_v41, %v4441_v26 }
 0x229   : > { %v3399_v51 = vpop.f32.mrf.mxu1  ;;  %v3398_v27 = vadd.f32 %v3397_v47, %v3205_v1  ;;  %v3207_v5 = vadd.f32 %v3206_v54, %v10627_v32  ;;  %v4448_v59 = vmul.f32 0.2, %v3396_v53  ;;  %vm4320_vm12 = vcmp.gt.f32.partialorder %v3396_v53, 0.0  ;;  %10629 = vst [vmem:[#allocation99_spill] sm:$0xff] %v9167_v3  ;;  %v10633_v54 = vld [vmem:[#allocation116_spill] sm:$0xff] }
 0x22a   : > { %v3208_v19 = vpop.f32.mrf.mxu0  ;;  %v9165_v31 = vsel %vm4317_vm11, %v3392_v7, %v4445_v61  ;;  %v10634_v61 = vld [vmem:[#allocation34_spill] sm:$0xff]  ;;  %v10641_v47 = vld [vmem:[#allocation36_spill] sm:$0xff] }
 0x22b   : > { %v3401_v60 = vpop.f32.mrf.mxu1  ;;  %10628 = vst [vmem:[#allocation98_spill] sm:$0xff] %v9165_v31  ;;  %v3400_v24 = vadd.f32 %v3399_v51, %v3207_v5  ;;  %v3209_v52 = vadd.f32 %v3208_v19, %v10630_v21  ;;  %v10635_v51 = vld [vmem:[#allocation35_spill] sm:$0xff]  ;;  %v9177_v41 = vsel %vm4320_vm12, %v3396_v53, %v4448_v59  ;;  %v4449_v19 = vmul.f32 0.2, %v3398_v27  ;;  %v10639_v53 = vld [vmem:[#allocation122_spill] sm:$0xff] }
 0x22c   : > { %v3212_v56 = vpop.f32.mrf.mxu0  ;;  %3677 = vmatmul.mubr.bf16.gmra.mxu0 %v10631_v25  ;;  %10636 = vst [vmem:[#allocation24_spill] sm:$0xff] %v9177_v41  ;;  %v10638_v21 = vld [vmem:[#allocation119_spill] sm:$0xff]  ;;  %vm4321_vm14 = vcmp.gt.f32.partialorder %v3398_v27, 0.0  ;;  %v10642_v41 = vld [vmem:[#allocation37_spill] sm:$0xff] }
 0x22d   : > { %v3405_v55 = vpop.f32.mrf.mxu1  ;;  %3870 = vmatmul.mubr.bf16.gmra.mxu1 %v10632_v39  ;;  %vm4324_vm13 = vcmp.gt.f32.partialorder %v3400_v24, 0.0  ;;  %v4452_v1 = vmul.f32 0.2, %v3400_v24  ;;  %v3213_v7 = vadd.f32 %v3212_v56, %v10633_v54  ;;  %3686 = vmatprep.mubr.bf16.mxu0 %v10634_v61  ;;  %v3402_v26 = vadd.f32 %v3401_v60, %v3209_v52 }
 0x22e   : > { %3879 = vmatprep.mubr.bf16.mxu1 %v10635_v51  ;;  %v3214_v32 = vpop.f32.mrf.mxu0 }
 0x22f   : > { %v3407_v5 = vpop.f32.mrf.mxu1  ;;  %v9179_v25 = vsel %vm4324_vm13, %v3400_v24, %v4452_v1  ;;  %v3406_v39 = vadd.f32 %v3405_v55, %v3213_v7  ;;  %v3215_v17 = vadd.f32 %v3214_v32, %v10638_v21  ;;  %vm4325_vm15 = vcmp.gt.f32.partialorder %v3402_v26, 0.0  ;;  %v10640_v1 = vld [vmem:[#allocation123_spill] sm:$0xff] }
 0x230   : > { %10637 = vst [vmem:[#allocation25_spill] sm:$0xff] %v9179_v25  ;;  %v4453_v56 = vmul.f32 0.2, %v3402_v26  ;;  %v3216_v54 = vpop.f32.mrf.mxu0  ;;  %v9187_v55 = vsel %vm4321_vm14, %v3398_v27, %v4449_v19 }
 0x231   : > { %v3409_v61 = vpop.f32.mrf.mxu1  ;;  %v3408_v51 = vadd.f32 %v3407_v5, %v3215_v17  ;;  %v3217_v59 = vadd.f32 %v3216_v54, %v10639_v53  ;;  %v4456_v60 = vmul.f32 0.2, %v3406_v39  ;;  %vm4328_vm0 = vcmp.gt.f32.partialorder %v3406_v39, 0.0  ;;  %v10643_v54 = vld [vmem:[#allocation124_spill] sm:$0xff]  ;;  %v10647_v17 = vld [vmem:[#allocation41_spill] sm:$0xff] }
 0x232   : > { %v3218_v52 = vpop.f32.mrf.mxu0  ;;  %v9185_v31 = vsel %vm4325_vm15, %v3402_v26, %v4453_v56  ;;  %v10644_v56 = vld [vmem:[#allocation38_spill] sm:$0xff] }
 0x233   : > { %v3411_v3 = vpop.f32.mrf.mxu1  ;;  %v3410_v24 = vadd.f32 %v3409_v61, %v3217_v59  ;;  %v3219_v7 = vadd.f32 %v3218_v52, %v10640_v1  ;;  %v10645_v61 = vld [vmem:[#allocation39_spill] sm:$0xff]  ;;  %v9197_v27 = vsel %vm4328_vm0, %v3406_v39, %v4456_v60  ;;  %v4457_v52 = vmul.f32 0.2, %v3408_v51 }
 0x234   : > { %v3222_v32 = vpop.f32.mrf.mxu0  ;;  %3687 = vmatmul.mubr.bf16.gmra.mxu0 %v10641_v47  ;;  %vm4329_vm2 = vcmp.gt.f32.partialorder %v3408_v51, 0.0 }
 0x235   : > { %v3415_v21 = vpop.f32.mrf.mxu1  ;;  %3880 = vmatmul.mubr.bf16.gmra.mxu1 %v10642_v41  ;;  %vm4332_vm1 = vcmp.gt.f32.partialorder %v3410_v24, 0.0  ;;  %v4460_v5 = vmul.f32 0.2, %v3410_v24  ;;  %v3223_v26 = vadd.f32 %v3222_v32, %v10643_v54  ;;  %3696 = vmatprep.mubr.bf16.mxu0 %v10644_v56  ;;  %v3412_v19 = vadd.f32 %v3411_v3, %v3219_v7 }
 0x236   : > { %3889 = vmatprep.mubr.bf16.mxu1 %v10645_v61  ;;  %v3224_v53 = vpop.f32.mrf.mxu0 }
 0x237   : > { %v3417_v59 = vpop.f32.mrf.mxu1  ;;  %v9199_v47 = vsel %vm4332_vm1, %v3410_v24, %v4460_v5  ;;  %v3416_v41 = vadd.f32 %v3415_v21, %v3223_v26  ;;  %v3225_v1 = vadd.f32 %v3224_v53, %v8928_v43  ;;  %vm4333_vm3 = vcmp.gt.f32.partialorder %v3412_v19, 0.0  ;;  %v10646_v53 = vld [vmem:[#allocation40_spill] sm:$0xff] }
 0x238   : > { %v4461_v32 = vmul.f32 0.2, %v3412_v19  ;;  %v3226_v54 = vpop.f32.mrf.mxu0  ;;  %v9207_v21 = vsel %vm4329_vm2, %v3408_v51, %v4457_v52 }
 0x239   : > { %v3419_v56 = vpop.f32.mrf.mxu1  ;;  %v3418_v61 = vadd.f32 %v3417_v59, %v3225_v1  ;;  %v3227_v39 = vadd.f32 %v3226_v54, %v8935_v15  ;;  %v4464_v3 = vmul.f32 0.2, %v3416_v41  ;;  %vm4336_vm4 = vcmp.gt.f32.partialorder %v3416_v41, 0.0  ;;  %v10648_v1 = vld [vmem:[#allocation42_spill] sm:$0xff] }
 0x23a   : > { %v3228_v60 = vpop.f32.mrf.mxu0  ;;  %v9205_v25 = vsel %vm4333_vm3, %v3412_v19, %v4461_v32  ;;  %v10649_v32 = vld [vmem:[#allocation43_spill] sm:$0xff] }
 0x23b   : > { %v3421_v7 = vpop.f32.mrf.mxu1  ;;  %v3420_v24 = vadd.f32 %v3419_v56, %v3227_v39  ;;  %v3229_v43 = vadd.f32 %v3228_v60, %v8940_v9  ;;  %v9217_v51 = vsel %vm4336_vm4, %v3416_v41, %v4464_v3  ;;  %v4465_v56 = vmul.f32 0.2, %v3418_v61 }
 0x23c   : > { %v3232_v5 = vpop.f32.mrf.mxu0  ;;  %3697 = vmatmul.mubr.bf16.gmra.mxu0 %v10646_v53  ;;  %10650 = vst [vmem:[#allocation100_spill] sm:$0xff] %v9217_v51  ;;  %vm4337_vm6 = vcmp.gt.f32.partialorder %v3418_v61, 0.0  ;;  %v10652_v53 = vld [vmem:[#allocation45_spill] sm:$0xff]  ;;  %v10664_v51 = vld [vmem:[#allocation51_spill] sm:$0xff] }
 0x23d   : > { %v3425_v26 = vpop.f32.mrf.mxu1  ;;  %3890 = vmatmul.mubr.bf16.gmra.mxu1 %v10647_v17  ;;  %vm4340_vm5 = vcmp.gt.f32.partialorder %v3420_v24, 0.0  ;;  %v4468_v59 = vmul.f32 0.2, %v3420_v24  ;;  %v3233_v19 = vadd.f32 %v3232_v5, %v8945_v42  ;;  %3706 = vmatprep.mubr.bf16.mxu0 %v10648_v1  ;;  %v3422_v9 = vadd.f32 %v3421_v7, %v3229_v43 }
 0x23e   : > { %3899 = vmatprep.mubr.bf16.mxu1 %v10649_v32  ;;  %v3234_v52 = vpop.f32.mrf.mxu0 }
 0x23f   : > { %v3427_v54 = vpop.f32.mrf.mxu1  ;;  %v9219_v39 = vsel %vm4340_vm5, %v3420_v24, %v4468_v59  ;;  %v3426_v17 = vadd.f32 %v3425_v26, %v3233_v19  ;;  %v3235_v60 = vadd.f32 %v3234_v52, %v8952_v57  ;;  %vm4341_vm7 = vcmp.gt.f32.partialorder %v3422_v9, 0.0  ;;  %v10651_v52 = vld [vmem:[#allocation44_spill] sm:$0xff] }
 0x240   : > { %v4469_v42 = vmul.f32 0.2, %v3422_v9  ;;  %v3236_v5 = vpop.f32.mrf.mxu0  ;;  %v9227_v26 = vsel %vm4337_vm6, %v3418_v61, %v4465_v56 }
 0x241   : > { %v3429_v1 = vpop.f32.mrf.mxu1  ;;  %v3428_v32 = vadd.f32 %v3427_v54, %v3235_v60  ;;  %v3237_v41 = vadd.f32 %v3236_v5, %v8955_v35  ;;  %v4472_v3 = vmul.f32 0.2, %v3426_v17  ;;  %vm4344_vm8 = vcmp.gt.f32.partialorder %v3426_v17, 0.0  ;;  %v10653_v60 = vld [vmem:[#allocation46_spill] sm:$0xff] }
 0x242   : > { %v3238_v7 = vpop.f32.mrf.mxu0  ;;  %v9225_v15 = vsel %vm4341_vm7, %v3422_v9, %v4469_v42  ;;  %v10654_v42 = vld [vmem:[#allocation47_spill] sm:$0xff] }
 0x243   : > { %v3431_v43 = vpop.f32.mrf.mxu1  ;;  %v3430_v24 = vadd.f32 %v3429_v1, %v3237_v41  ;;  %v3239_v57 = vadd.f32 %v3238_v7, %v8960_v36  ;;  %v9237_v61 = vsel %vm4344_vm8, %v3426_v17, %v4472_v3  ;;  %v4473_v1 = vmul.f32 0.2, %v3428_v32  ;;  %v10657_v17 = vld [vmem:[#allocation131_spill] sm:$0xff] }
 0x244   : > { %v3242_v59 = vpop.f32.mrf.mxu0  ;;  %3707 = vmatmul.mubr.bf16.gmra.mxu0 %v10651_v52  ;;  %10655 = vst [vmem:[#allocation26_spill] sm:$0xff] %v9237_v61  ;;  %vm4345_vm10 = vcmp.gt.f32.partialorder %v3428_v32, 0.0 }
 0x245   : > { %v3435_v19 = vpop.f32.mrf.mxu1  ;;  %3900 = vmatmul.mubr.bf16.gmra.mxu1 %v10652_v53  ;;  %vm4348_vm9 = vcmp.gt.f32.partialorder %v3430_v24, 0.0  ;;  %v4476_v54 = vmul.f32 0.2, %v3430_v24  ;;  %v3243_v9 = vadd.f32 %v3242_v59, %v8965_v34  ;;  %3942 = vmatprep.mubr.bf16.mxu0 %v10653_v60  ;;  %v3432_v36 = vadd.f32 %v3431_v43, %v3239_v57 }
 0x246   : > { %4135 = vmatprep.mubr.bf16.mxu1 %v10654_v42  ;;  %v3244_v56 = vpop.f32.mrf.mxu0  ;;  %v9250_v52 = vsel %vm4345_vm10, %v3428_v32, %v4473_v1 }
 0x247   : > { %v3437_v5 = vpop.f32.mrf.mxu1  ;;  %v9239_v41 = vsel %vm4348_vm9, %v3430_v24, %v4476_v54  ;;  %v3436_v53 = vadd.f32 %v3435_v19, %v3243_v9  ;;  %v3245_v7 = vadd.f32 %v3244_v56, %v8968_v23  ;;  %vm4349_vm11 = vcmp.gt.f32.partialorder %v3432_v36, 0.0  ;;  %v7750_v24 = vld [vmem:[#allocation8 + $0x70] ss:$8 sps:$4 sm:$0xff]   ;;  %v7755_v9 = vld [vmem:[#allocation8 + $0x64] ss:$8 sps:$4 sm:$0xff]   ;;  %10659 = vst [vmem:[#allocation106_spill] sm:$0xff] %v9250_v52 }
 0x248   : > { %10656 = vst [vmem:[#allocation27_spill] sm:$0xff] %v9239_v41  ;;  %v4477_v34 = vmul.f32 0.2, %v3432_v36  ;;  %v3246_v59 = vpop.f32.mrf.mxu0  ;;  %v7765_v54 = vld [vmem:[#allocation8 + $0x170] ss:$8 sps:$4 sm:$0xff]   ;;  %v10660_v41 = vld [vmem:[#allocation48_spill] sm:$0xff] }
 0x249   : > { %v3439_v60 = vpop.f32.mrf.mxu1  ;;  %v9244_v42 = vadd.f32 %v3437_v5, %v3245_v7  ;;  %v3247_v3 = vadd.f32 %v3246_v59, %v10657_v17  ;;  %v4480_v43 = vmul.f32 0.2, %v3436_v53  ;;  %vm4352_vm12 = vcmp.gt.f32.partialorder %v3436_v53, 0.0  ;;  %v7776_v56 = vld [vmem:[#allocation8 + $0x164] ss:$8 sps:$4 sm:$0xff]   ;;  %v10661_v59 = vld [vmem:[#allocation49_spill] sm:$0xff] }
 0x24a   : > { %v3248_v57 = vpop.f32.mrf.mxu0  ;;  %v9247_v19 = vsel %vm4349_vm11, %v3432_v36, %v4477_v34  ;;  %v10662_v34 = vld [vmem:[#allocation132_spill] sm:$0xff] }
 0x24b   : > { %v3441_v35 = vpop.f32.mrf.mxu1  ;;  %10658 = vst [vmem:[#allocation103_spill] sm:$0xff] %v9247_v19  ;;  %v3440_v23 = vadd.f32 %v3439_v60, %v3247_v3  ;;  %v3249_v61 = vadd.f32 %v3248_v57, %v8976_v58  ;;  %v10663_v3 = vld [vmem:[#allocation50_spill] sm:$0xff]  ;;  %v9261_v32 = vsel %vm4352_vm12, %v3436_v53, %v4480_v43  ;;  %v4481_v17 = vmul.f32 0.2, %v9244_v42 }
 0x24c   : > { %v3252_v5 = vpop.f32.mrf.mxu0  ;;  %3943 = vmatmul.mubr.bf16.vlgmr.msra.gmra.mxu0 %v10660_v41  ;;  %v7753_v41 = vld [vmem:[#allocation8 + $0x60] ss:$8 sps:$4 sm:$0xff]   ;;  %vm4353_vm14 = vcmp.gt.f32.partialorder %v9244_v42, 0.0 }
 0x24d   : > { %v3445_v7 = vpop.f32.mrf.mxu1  ;;  %4136 = vmatmul.mubr.bf16.vlgmr.msra.gmra.mxu1 %v10661_v59  ;;  %vm4356_vm13 = vcmp.gt.f32.partialorder %v3440_v23, 0.0  ;;  %v4484_v36 = vmul.f32 0.2, %v3440_v23  ;;  %v3253_v60 = vadd.f32 %v3252_v5, %v10662_v34  ;;  %3952 = vmatprep.mubr.bf16.mxu0 %v10663_v3  ;;  %v3442_v58 = vadd.f32 %v3441_v35, %v3249_v61  ;;  %v7774_v59 = vld [vmem:[#allocation8 + $0x160] ss:$8 sps:$4 sm:$0xff]  }
 0x24e   : > { %4145 = vmatprep.mubr.bf16.mxu1 %v10664_v51  ;;  %v3254_v1 = vpop.f32.mrf.mxu0  ;;  %5141 = vmatpush1.bf16.msra.mxu0 %v7750_v24  ;;  %v7758_v34 = vld [vmem:[#allocation8 + $0x54] ss:$8 sps:$4 sm:$0xff]   ;;  %v7761_v3 = vld [vmem:[#allocation8 + $0x44] ss:$8 sps:$4 sm:$0xff]  }
 0x24f   : > { %v3447_v57 = vpop.f32.mrf.mxu1  ;;  %5334 = vmatpush1.bf16.msra.mxu1 %v7765_v54  ;;  %v9264_v52 = vsel %vm4356_vm13, %v3440_v23, %v4484_v36  ;;  %v3446_v19 = vadd.f32 %v3445_v7, %v3253_v60  ;;  %v3255_v5 = vadd.f32 %v3254_v1, %v8984_v8  ;;  %5142 = vmatprep.subr.bf16.mxu0 %v7755_v9  ;;  %v7785_v51 = vld [vmem:[#allocation8 + $0x154] ss:$8 sps:$4 sm:$0xff]   ;;  %vm4357_vm15 = vcmp.gt.f32.partialorder %v3442_v58, 0.0  ;;  %v7756_v9 = vld [vmem:[#allocation8 + $0x50] ss:$8 sps:$4 sm:$0xff]  }
 0x250   : > { %5335 = vmatprep.subr.bf16.mxu1 %v7776_v56  ;;  %v4485_v61 = vmul.f32 0.2, %v3442_v58  ;;  %v3256_v53 = vpop.f32.mrf.mxu0  ;;  %v7783_v56 = vld [vmem:[#allocation8 + $0x150] ss:$8 sps:$4 sm:$0xff]   ;;  %v7794_v1 = vld [vmem:[#allocation8 + $0x144] ss:$8 sps:$4 sm:$0xff]  }
 0x251   : > { %v3449_v43 = vpop.f32.mrf.mxu1  ;;  %v9270_v24 = vadd.f32 %v3447_v57, %v3255_v5  ;;  %v3257_v54 = vadd.f32 %v3256_v53, %v8987_v49  ;;  %v4488_v23 = vmul.f32 0.2, %v3446_v19  ;;  %vm4360_vm0 = vcmp.gt.f32.partialorder %v3446_v19, 0.0  ;;  %v10665_v53 = vld [vmem:[#allocation52_spill] sm:$0xff] }
 0x252   : > { %v3258_v7 = vpop.f32.mrf.mxu0  ;;  %5143 = vmatpush1.bf16.msra.mxu0 %v7753_v41  ;;  %v9273_v36 = vsel %vm4357_vm15, %v3442_v58, %v4485_v61  ;;  %v9278_v57 = vsel %vm4353_vm14, %v9244_v42, %v4481_v17  ;;  %v10667_v61 = vld [vmem:[#allocation54_spill] sm:$0xff] }
 0x253   : > { %v3451_v8 = vpop.f32.mrf.mxu1  ;;  %5336 = vmatpush1.bf16.msra.mxu1 %v7774_v59  ;;  %v3450_v60 = vadd.f32 %v3449_v43, %v3257_v54  ;;  %5144 = vmatprep.subr.bf16.mxu0 %v7758_v34  ;;  %v3259_v49 = vadd.f32 %v3258_v7, %v8992_v11  ;;  %v10666_v59 = vld [vmem:[#allocation53_spill] sm:$0xff]  ;;  %v10668_v43 = vld [vmem:[#allocation55_spill] sm:$0xff]  ;;  %v9289_v42 = vsel %vm4360_vm0, %v3446_v19, %v4488_v23  ;;  %vm4361_vm2 = vcmp.gt.f32.partialorder %v9270_v24, 0.0 }
 0x254   : > { %5337 = vmatprep.subr.bf16.mxu1 %v7785_v51  ;;  %v3262_v5 = vpop.f32.mrf.mxu0  ;;  %3953 = vmatmul.mubr.bf16.gmra.mxu0 %v10665_v53  ;;  %v7759_v7 = vld [vmem:[#allocation8 + $0x40] ss:$8 sps:$4 sm:$0xff]  }
 0x255   : > { %v3455_v41 = vpop.f32.mrf.mxu1  ;;  %4146 = vmatmul.mubr.bf16.gmra.mxu1 %v10666_v59  ;;  %vm4364_vm1 = vcmp.gt.f32.partialorder %v3450_v60, 0.0  ;;  %v4492_v34 = vmul.f32 0.2, %v3450_v60  ;;  %v3263_v51 = vadd.f32 %v3262_v5, %v8997_v13  ;;  %3962 = vmatprep.mubr.bf16.mxu0 %v10667_v61  ;;  %v3452_v11 = vadd.f32 %v3451_v8, %v3259_v49  ;;  %v7792_v53 = vld [vmem:[#allocation8 + $0x140] ss:$8 sps:$4 sm:$0xff]  }
 0x256   : > { %4155 = vmatprep.mubr.bf16.mxu1 %v10668_v43  ;;  %v3264_v17 = vpop.f32.mrf.mxu0  ;;  %5145 = vmatpush1.bf16.msra.mxu0 %v7756_v9  ;;  %v4489_v59 = vmul.f32 0.2, %v9270_v24  ;;  %v7764_v5 = vld [vmem:[#allocation8 + $0x34] ss:$8 sps:$4 sm:$0xff]   ;;  %v7770_v43 = vld [vmem:[#allocation8 + $0x24] ss:$8 sps:$4 sm:$0xff]  }
 0x257   : > { %v3457_v54 = vpop.f32.mrf.mxu1  ;;  %5338 = vmatpush1.bf16.msra.mxu1 %v7783_v56  ;;  %v9292_v35 = vsel %vm4364_vm1, %v3450_v60, %v4492_v34  ;;  %v3456_v58 = vadd.f32 %v3455_v41, %v3263_v51  ;;  %v3265_v13 = vadd.f32 %v3264_v17, %v9000_v16  ;;  %5146 = vmatprep.subr.bf16.mxu0 %v7761_v3  ;;  %v7803_v61 = vld [vmem:[#allocation8 + $0x134] ss:$8 sps:$4 sm:$0xff]   ;;  %vm4365_vm3 = vcmp.gt.f32.partialorder %v3452_v11, 0.0  ;;  %v7762_v3 = vld [vmem:[#allocation8 + $0x30] ss:$8 sps:$4 sm:$0xff]  }
 0x258   : > { %5339 = vmatprep.subr.bf16.mxu1 %v7794_v1  ;;  %v4493_v23 = vmul.f32 0.2, %v3452_v11  ;;  %v3266_v8 = vpop.f32.mrf.mxu0  ;;  %v7801_v1 = vld [vmem:[#allocation8 + $0x130] ss:$8 sps:$4 sm:$0xff]   ;;  %v7812_v17 = vld [vmem:[#allocation8 + $0x124] ss:$8 sps:$4 sm:$0xff]  }
 0x259   : > { %v3459_v9 = vpop.f32.mrf.mxu1  ;;  %v9298_v56 = vadd.f32 %v3457_v54, %v3265_v13  ;;  %v3267_v60 = vadd.f32 %v3266_v8, %v9003_v6  ;;  %v4496_v49 = vmul.f32 0.2, %v3456_v58  ;;  %vm4368_vm4 = vcmp.gt.f32.partialorder %v3456_v58, 0.0  ;;  %v10669_v8 = vld [vmem:[#allocation56_spill] sm:$0xff] }
 0x25a   : > { %v3268_v41 = vpop.f32.mrf.mxu0  ;;  %5147 = vmatpush1.bf16.msra.mxu0 %v7759_v7  ;;  %v9301_v34 = vsel %vm4365_vm3, %v3452_v11, %v4493_v23  ;;  %v9306_v54 = vsel %vm4361_vm2, %v9270_v24, %v4489_v59  ;;  %v10671_v23 = vld [vmem:[#allocation58_spill] sm:$0xff] }
 0x25b   : > { %v3461_v16 = vpop.f32.mrf.mxu1  ;;  %5340 = vmatpush1.bf16.msra.mxu1 %v7792_v53  ;;  %v3460_v51 = vadd.f32 %v3459_v9, %v3267_v60  ;;  %5148 = vmatprep.subr.bf16.mxu0 %v7764_v5  ;;  %v3269_v6 = vadd.f32 %v3268_v41, %v9008_v48  ;;  %v10670_v53 = vld [vmem:[#allocation57_spill] sm:$0xff]  ;;  %v10672_v9 = vld [vmem:[#allocation59_spill] sm:$0xff]  ;;  %v9317_v24 = vsel %vm4368_vm4, %v3456_v58, %v4496_v49  ;;  %vm4369_vm6 = vcmp.gt.f32.partialorder %v9298_v56, 0.0 }
 0x25c   : > { %5341 = vmatprep.subr.bf16.mxu1 %v7803_v61  ;;  %v3272_v13 = vpop.f32.mrf.mxu0  ;;  %3963 = vmatmul.mubr.bf16.gmra.mxu0 %v10669_v8  ;;  %v7768_v41 = vld [vmem:[#allocation8 + $0x20] ss:$8 sps:$4 sm:$0xff]  }
 0x25d   : > { %v3465_v7 = vpop.f32.mrf.mxu1  ;;  %4156 = vmatmul.mubr.bf16.gmra.mxu1 %v10670_v53  ;;  %vm4372_vm5 = vcmp.gt.f32.partialorder %v3460_v51, 0.0  ;;  %v4500_v5 = vmul.f32 0.2, %v3460_v51  ;;  %v3273_v61 = vadd.f32 %v3272_v13, %v9013_v14  ;;  %3972 = vmatprep.mubr.bf16.mxu0 %v10671_v23  ;;  %v3462_v48 = vadd.f32 %v3461_v16, %v3269_v6  ;;  %v7810_v8 = vld [vmem:[#allocation8 + $0x120] ss:$8 sps:$4 sm:$0xff]  }
 0x25e   : > { %4165 = vmatprep.mubr.bf16.mxu1 %v10672_v9  ;;  %v3274_v59 = vpop.f32.mrf.mxu0  ;;  %5149 = vmatpush1.bf16.msra.mxu0 %v7762_v3  ;;  %v4497_v53 = vmul.f32 0.2, %v9298_v56  ;;  %v7773_v13 = vld [vmem:[#allocation8 + $0x14] ss:$8 sps:$4 sm:$0xff]   ;;  %v7779_v9 = vld [vmem:[#allocation8 + $0x4] ss:$8 sps:$4 sm:$0xff]  }
 0x25f   : > { %v3467_v60 = vpop.f32.mrf.mxu1  ;;  %5342 = vmatpush1.bf16.msra.mxu1 %v7801_v1  ;;  %v9320_v19 = vsel %vm4372_vm5, %v3460_v51, %v4500_v5  ;;  %v3466_v11 = vadd.f32 %v3465_v7, %v3273_v61  ;;  %v3275_v14 = vadd.f32 %v3274_v59, %v9016_v37  ;;  %5150 = vmatprep.subr.bf16.mxu0 %v7770_v43  ;;  %v7818_v23 = vld [vmem:[#allocation8 + $0x114] ss:$8 sps:$4 sm:$0xff]   ;;  %vm4373_vm7 = vcmp.gt.f32.partialorder %v3462_v48, 0.0  ;;  %v7771_v43 = vld [vmem:[#allocation8 + $0x10] ss:$8 sps:$4 sm:$0xff]  }
 0x260   : > { %5343 = vmatprep.subr.bf16.mxu1 %v7812_v17  ;;  %v4501_v49 = vmul.f32 0.2, %v3462_v48  ;;  %v3276_v16 = vpop.f32.mrf.mxu0  ;;  %v7816_v17 = vld [vmem:[#allocation8 + $0x110] ss:$8 sps:$4 sm:$0xff]   ;;  %v7821_v59 = vld [vmem:[#allocation8 + $0x104] ss:$8 sps:$4 sm:$0xff]  }
 0x261   : > { %v3469_v3 = vpop.f32.mrf.mxu1  ;;  %v9326_v1 = vadd.f32 %v3467_v60, %v3275_v14  ;;  %v3277_v51 = vadd.f32 %v3276_v16, %v9019_v22  ;;  %v4504_v6 = vmul.f32 0.2, %v3466_v11  ;;  %vm4376_vm8 = vcmp.gt.f32.partialorder %v3466_v11, 0.0  ;;  %v10673_v16 = vld [vmem:[#allocation60_spill] sm:$0xff] }
 0x262   : > { %v3278_v7 = vpop.f32.mrf.mxu0  ;;  %5151 = vmatpush1.bf16.msra.mxu0 %v7768_v41  ;;  %v9329_v5 = vsel %vm4373_vm7, %v3462_v48, %v4501_v49  ;;  %v9334_v60 = vsel %vm4369_vm6, %v9298_v56, %v4497_v53  ;;  %v10675_v49 = vld [vmem:[#allocation62_spill] sm:$0xff] }
 0x263   : > { %v3471_v37 = vpop.f32.mrf.mxu1  ;;  %5344 = vmatpush1.bf16.msra.mxu1 %v7810_v8  ;;  %v3470_v61 = vadd.f32 %v3469_v3, %v3277_v51  ;;  %5152 = vmatprep.subr.bf16.mxu0 %v7773_v13  ;;  %v3279_v22 = vadd.f32 %v3278_v7, %v9024_v28  ;;  %v10674_v8 = vld [vmem:[#allocation61_spill] sm:$0xff]  ;;  %v10676_v3 = vld [vmem:[#allocation63_spill] sm:$0xff]  ;;  %v9345_v56 = vsel %vm4376_vm8, %v3466_v11, %v4504_v6  ;;  %vm4377_vm10 = vcmp.gt.f32.partialorder %v9326_v1, 0.0 }
 0x264   : > { %5345 = vmatprep.subr.bf16.mxu1 %v7818_v23  ;;  %v3282_v14 = vpop.f32.mrf.mxu0  ;;  %3973 = vmatmul.mubr.bf16.gmra.mxu0 %v10673_v16  ;;  %v7777_v7 = vld [vmem:[#allocation8] ss:$8 sps:$4 sm:$0xff]  }
 0x265   : > { %v3475_v41 = vpop.f32.mrf.mxu1  ;;  %4166 = vmatmul.mubr.bf16.gmra.mxu1 %v10674_v8  ;;  %vm4380_vm9 = vcmp.gt.f32.partialorder %v3470_v61, 0.0  ;;  %v4508_v13 = vmul.f32 0.2, %v3470_v61  ;;  %v3283_v23 = vadd.f32 %v3282_v14, %v9029_v30  ;;  %3982 = vmatprep.mubr.bf16.mxu0 %v10675_v49  ;;  %v3472_v28 = vadd.f32 %v3471_v37, %v3279_v22  ;;  %v7819_v16 = vld [vmem:[#allocation8 + $0x100] ss:$8 sps:$4 sm:$0xff]  }
 0x266   : > { %4175 = vmatprep.mubr.bf16.mxu1 %v10676_v3  ;;  %v3284_v53 = vpop.f32.mrf.mxu0  ;;  %5153 = vmatpush1.bf16.msra.mxu0 %v7771_v43  ;;  %v4505_v8 = vmul.f32 0.2, %v9326_v1  ;;  %v7782_v14 = vld [vmem:[#allocation8 + $0xf4] ss:$8 sps:$4 sm:$0xff]   ;;  %v7788_v3 = vld [vmem:[#allocation8 + $0xe4] ss:$8 sps:$4 sm:$0xff]  }
 0x267   : > { %v3477_v51 = vpop.f32.mrf.mxu1  ;;  %5346 = vmatpush1.bf16.msra.mxu1 %v7816_v17  ;;  %v9348_v58 = vsel %vm4380_vm9, %v3470_v61, %v4508_v13  ;;  %v3476_v48 = vadd.f32 %v3475_v41, %v3283_v23  ;;  %v3285_v30 = vadd.f32 %v3284_v53, %v9032_v10  ;;  %5154 = vmatprep.subr.bf16.mxu0 %v7779_v9  ;;  %v7824_v49 = vld [vmem:[#allocation8 + $0x1f4] ss:$8 sps:$4 sm:$0xff]   ;;  %vm4381_vm11 = vcmp.gt.f32.partialorder %v3472_v28, 0.0  ;;  %v7780_v9 = vld [vmem:[#allocation8 + $0xf0] ss:$8 sps:$4 sm:$0xff]  }
 0x268   : > { %5347 = vmatprep.subr.bf16.mxu1 %v7821_v59  ;;  %v4509_v6 = vmul.f32 0.2, %v3472_v28  ;;  %v3286_v37 = vpop.f32.mrf.mxu0  ;;  %v7822_v59 = vld [vmem:[#allocation8 + $0x1f0] ss:$8 sps:$4 sm:$0xff]   ;;  %v7827_v53 = vld [vmem:[#allocation8 + $0x1e4] ss:$8 sps:$4 sm:$0xff]  }
 0x269   : > { %v3479_v43 = vpop.f32.mrf.mxu1  ;;  %v9354_v17 = vadd.f32 %v3477_v51, %v3285_v30  ;;  %v3287_v61 = vadd.f32 %v3286_v37, %v9035_v4  ;;  %v4512_v22 = vmul.f32 0.2, %v3476_v48  ;;  %vm4384_vm12 = vcmp.gt.f32.partialorder %v3476_v48, 0.0  ;;  %v10677_v37 = vld [vmem:[#allocation64_spill] sm:$0xff] }
 0x26a   : > { %v3288_v41 = vpop.f32.mrf.mxu0  ;;  %5155 = vmatpush1.bf16.msra.mxu0 %v7777_v7  ;;  %v9357_v13 = vsel %vm4381_vm11, %v3472_v28, %v4509_v6  ;;  %v9362_v51 = vsel %vm4377_vm10, %v9326_v1, %v4505_v8  ;;  %v10679_v6 = vld [vmem:[#allocation66_spill] sm:$0xff] }
 0x26b   : > { %v3481_v10 = vpop.f32.mrf.mxu1  ;;  %5348 = vmatpush1.bf16.msra.mxu1 %v7819_v16  ;;  %v3480_v23 = vadd.f32 %v3479_v43, %v3287_v61  ;;  %5156 = vmatprep.subr.bf16.mxu0 %v7782_v14  ;;  %v3289_v4 = vadd.f32 %v3288_v41, %v9040_v44  ;;  %v10678_v16 = vld [vmem:[#allocation65_spill] sm:$0xff]  ;;  %v10680_v43 = vld [vmem:[#allocation67_spill] sm:$0xff]  ;;  %v9373_v1 = vsel %vm4384_vm12, %v3476_v48, %v4512_v22  ;;  %vm4385_vm14 = vcmp.gt.f32.partialorder %v9354_v17, 0.0 }
 0x26c   : > { %5349 = vmatprep.subr.bf16.mxu1 %v7824_v49  ;;  %v3292_v30 = vpop.f32.mrf.mxu0  ;;  %3983 = vmatmul.mubr.bf16.gmra.mxu0 %v10677_v37  ;;  %v7786_v41 = vld [vmem:[#allocation8 + $0xe0] ss:$8 sps:$4 sm:$0xff]  }
 0x26d   : > { %v3485_v7 = vpop.f32.mrf.mxu1  ;;  %4176 = vmatmul.mubr.bf16.gmra.mxu1 %v10678_v16  ;;  %vm4388_vm13 = vcmp.gt.f32.partialorder %v3480_v23, 0.0  ;;  %v4516_v14 = vmul.f32 0.2, %v3480_v23  ;;  %v3293_v49 = vadd.f32 %v3292_v30, %v9045_v46  ;;  %3992 = vmatprep.mubr.bf16.mxu0 %v10679_v6  ;;  %v3482_v44 = vadd.f32 %v3481_v10, %v3289_v4  ;;  %v7825_v37 = vld [vmem:[#allocation8 + $0x1e0] ss:$8 sps:$4 sm:$0xff]  }
 0x26e   : > { %4185 = vmatprep.mubr.bf16.mxu1 %v10680_v43  ;;  %v3294_v8 = vpop.f32.mrf.mxu0  ;;  %5157 = vmatpush2.bf16.msra.mxu0 %v7780_v9  ;;  %v4513_v16 = vmul.f32 0.2, %v9354_v17  ;;  %v7791_v30 = vld [vmem:[#allocation8 + $0xd4] ss:$8 sps:$4 sm:$0xff]   ;;  %v7797_v43 = vld [vmem:[#allocation8 + $0xc4] ss:$8 sps:$4 sm:$0xff]  }
 0x26f   : > { %v3487_v61 = vpop.f32.mrf.mxu1  ;;  %5350 = vmatpush2.bf16.msra.mxu1 %v7822_v59  ;;  %v9376_v11 = vsel %vm4388_vm13, %v3480_v23, %v4516_v14  ;;  %v3486_v28 = vadd.f32 %v3485_v7, %v3293_v49  ;;  %v3295_v46 = vadd.f32 %v3294_v8, %v9048_v33  ;;  %5158 = vmatprep.subr.bf16.mxu0 %v7788_v3  ;;  %v7830_v6 = vld [vmem:[#allocation8 + $0x1d4] ss:$8 sps:$4 sm:$0xff]   ;;  %vm4389_vm15 = vcmp.gt.f32.partialorder %v3482_v44, 0.0  ;;  %v7789_v3 = vld [vmem:[#allocation8 + $0xd0] ss:$8 sps:$4 sm:$0xff]  }
 0x270   : > { %5351 = vmatprep.subr.bf16.mxu1 %v7827_v53  ;;  %v4517_v22 = vmul.f32 0.2, %v3482_v44  ;;  %v3296_v10 = vpop.f32.mrf.mxu0  ;;  %v7828_v53 = vld [vmem:[#allocation8 + $0x1d0] ss:$8 sps:$4 sm:$0xff]   ;;  %v9390_v8 = vsel %vm4385_vm14, %v9354_v17, %v4513_v16 }
 0x271   : > { %v3489_v9 = vpop.f32.mrf.mxu1  ;;  %v9382_v59 = vadd.f32 %v3487_v61, %v3295_v46  ;;  %v3297_v23 = vadd.f32 %v3296_v10, %v9051_v29  ;;  %v4520_v4 = vmul.f32 0.2, %v3486_v28  ;;  %vm4392_vm0 = vcmp.gt.f32.partialorder %v3486_v28, 0.0  ;;  %v10684_v10 = vld [vmem:[#allocation71_spill] sm:$0xff] }
 0x272   : > { %v3298_v7 = vpop.f32.mrf.mxu0  ;;  %5159 = vmatpush2.bf16.msra.mxu0 %v7786_v41  ;;  %v9385_v14 = vsel %vm4389_vm15, %v3482_v44, %v4517_v22  ;;  %v10681_v41 = vld [vmem:[#allocation68_spill] sm:$0xff]  ;;  %v10683_v22 = vld [vmem:[#allocation70_spill] sm:$0xff] }
 0x273   : > { %v3491_v33 = vpop.f32.mrf.mxu1  ;;  %5352 = vmatpush2.bf16.msra.mxu1 %v7825_v37  ;;  %v3490_v49 = vadd.f32 %v3489_v9, %v3297_v23  ;;  %5160 = vmatprep.subr.bf16.mxu0 %v7791_v30  ;;  %v3299_v29 = vadd.f32 %v3298_v7, %v9056_v62  ;;  %v10682_v37 = vld [vmem:[#allocation69_spill] sm:$0xff]  ;;  %v9401_v17 = vsel %vm4392_vm0, %v3486_v28, %v4520_v4  ;;  %v7795_v23 = vld [vmem:[#allocation8 + $0xc0] ss:$8 sps:$4 sm:$0xff]   ;;  %vm4393_vm2 = vcmp.gt.f32.partialorder %v9382_v59, 0.0 }
 0x274   : > { %5353 = vmatprep.subr.bf16.mxu1 %v7830_v6  ;;  %v3302_v61 = vpop.f32.mrf.mxu0  ;;  %3993 = vmatmul.mubr.bf16.gmra.mxu0 %v10681_v41  ;;  %10685 = vst [vmem:[#allocation107_spill] sm:$0xff] %v9401_v17  ;;  %v7800_v7 = vld [vmem:[#allocation8 + $0xb4] ss:$8 sps:$4 sm:$0xff]   ;;  %v4521_v41 = vmul.f32 0.2, %v9382_v59 }
 0x275   : > { %v3495_v46 = vpop.f32.mrf.mxu1  ;;  %4186 = vmatmul.mubr.bf16.gmra.mxu1 %v10682_v37  ;;  %vm4396_vm1 = vcmp.gt.f32.partialorder %v3490_v49, 0.0  ;;  %v4524_v30 = vmul.f32 0.2, %v3490_v49  ;;  %v3303_v6 = vadd.f32 %v3302_v61, %v9061_v0  ;;  %4002 = vmatprep.mubr.bf16.mxu0 %v10683_v22  ;;  %v3492_v62 = vadd.f32 %v3491_v33, %v3299_v29  ;;  %v7831_v61 = vld [vmem:[#allocation8 + $0x1c0] ss:$8 sps:$4 sm:$0xff]  }
 0x276   : > { %4195 = vmatprep.mubr.bf16.mxu1 %v10684_v10  ;;  %v3304_v16 = vpop.f32.mrf.mxu0  ;;  %5161 = vmatpush2.bf16.msra.mxu0 %v7789_v3  ;;  %v7833_v22 = vld [vmem:[#allocation8 + $0x1c4] ss:$8 sps:$4 sm:$0xff]  }
 0x277   : > { %v3497_v9 = vpop.f32.mrf.mxu1  ;;  %5354 = vmatpush2.bf16.msra.mxu1 %v7828_v53  ;;  %v9404_v37 = vsel %vm4396_vm1, %v3490_v49, %v4524_v30  ;;  %v3496_v48 = vadd.f32 %v3495_v46, %v3303_v6  ;;  %v3305_v0 = vadd.f32 %v3304_v16, %v9064_v12  ;;  %5162 = vmatprep.subr.bf16.mxu0 %v7797_v43  ;;  %vm4397_vm3 = vcmp.gt.f32.partialorder %v3492_v62, 0.0  ;;  %v7798_v12 = vld [vmem:[#allocation8 + $0xb0] ss:$8 sps:$4 sm:$0xff]   ;;  %v7806_v10 = vld [vmem:[#allocation8 + $0xa4] ss:$8 sps:$4 sm:$0xff]  }
 0x278   : > { %10686 = vst [vmem:[#allocation28_spill] sm:$0xff] %v9404_v37  ;;  %v4525_v4 = vmul.f32 0.2, %v3492_v62  ;;  %v3306_v33 = vpop.f32.mrf.mxu0  ;;  %5355 = vmatprep.subr.bf16.mxu1 %v7833_v22  ;;  %v9416_v16 = vsel %vm4393_vm2, %v9382_v59, %v4521_v41  ;;  %v10687_v22 = vld [vmem:[#allocation72_spill] sm:$0xff] }
 0x279   : > { %v3499_v3 = vpop.f32.mrf.mxu1  ;;  %v3498_v53 = vadd.f32 %v3497_v9, %v3305_v0  ;;  %v3307_v29 = vadd.f32 %v3306_v33, %v9067_v45  ;;  %v4528_v49 = vmul.f32 0.2, %v3496_v48  ;;  %vm4400_vm4 = vcmp.gt.f32.partialorder %v3496_v48, 0.0  ;;  %v10690_v33 = vld [vmem:[#allocation75_spill] sm:$0xff] }
 0x27a   : > { %v3308_v46 = vpop.f32.mrf.mxu0  ;;  %5163 = vmatpush2.bf16.msra.mxu0 %v7795_v23  ;;  %v9411_v43 = vsel %vm4397_vm3, %v3492_v62, %v4525_v4  ;;  %v10688_v23 = vld [vmem:[#allocation73_spill] sm:$0xff]  ;;  %v10689_v4 = vld [vmem:[#allocation74_spill] sm:$0xff] }
 0x27b   : > { %v3501_v30 = vpop.f32.mrf.mxu1  ;;  %5356 = vmatpush2.bf16.msra.mxu1 %v7831_v61  ;;  %v3500_v6 = vadd.f32 %v3499_v3, %v3307_v29  ;;  %5164 = vmatprep.subr.bf16.mxu0 %v7800_v7  ;;  %v3309_v45 = vadd.f32 %v3308_v46, %v9072_v18  ;;  %v9427_v59 = vsel %vm4400_vm4, %v3496_v48, %v4528_v49  ;;  %v7804_v29 = vld [vmem:[#allocation8 + $0xa0] ss:$8 sps:$4 sm:$0xff]   ;;  %v7809_v46 = vld [vmem:[#allocation8 + $0x94] ss:$8 sps:$4 sm:$0xff]   ;;  %vm4401_vm6 = vcmp.gt.f32.partialorder %v3498_v53, 0.0 }
 0x27c   : > { %v3312_v9 = vpop.f32.mrf.mxu0  ;;  %4003 = vmatmul.mubr.bf16.gmra.mxu0 %v10687_v22  ;;  %10691 = vst [vmem:[#allocation29_spill] sm:$0xff] %v9427_v59  ;;  %v4529_v22 = vmul.f32 0.2, %v3498_v53  ;;  %v7870_v59 = vld [vmem:[#allocation7] sm:$0xf] }
 0x27d   : > { %v3505_v0 = vpop.f32.mrf.mxu1  ;;  %4196 = vmatmul.mubr.bf16.gmra.mxu1 %v10688_v23  ;;  %vm4404_vm5 = vcmp.gt.f32.partialorder %v3500_v6, 0.0  ;;  %v4532_v61 = vmul.f32 0.2, %v3500_v6  ;;  %v3313_v7 = vadd.f32 %v3312_v9, %v9077_v20  ;;  %4012 = vmatprep.mubr.bf16.mxu0 %v10689_v4  ;;  %v3502_v18 = vadd.f32 %v3501_v30, %v3309_v45  ;;  %v7834_v20 = vld [vmem:[#allocation8 + $0x1b0] ss:$8 sps:$4 sm:$0xff]  }
 0x27e   : > { %4205 = vmatprep.mubr.bf16.mxu1 %v10690_v33  ;;  %v3314_v41 = vpop.f32.mrf.mxu0  ;;  %5165 = vmatpush2.bf16.msra.mxu0 %v7798_v12  ;;  %v7836_v9 = vld [vmem:[#allocation8 + $0x1b4] ss:$8 sps:$4 sm:$0xff]   ;;  %v7815_v33 = vld [vmem:[#allocation8 + $0x84] ss:$8 sps:$4 sm:$0xff]  }
 0x27f   : > { %v3507_v3 = vpop.f32.mrf.mxu1  ;;  %v9429_v23 = vsel %vm4404_vm5, %v3500_v6, %v4532_v61  ;;  %v3506_v28 = vadd.f32 %v3505_v0, %v3313_v7  ;;  %v3315_v62 = vadd.f32 %v3314_v41, %v9080_v50  ;;  %5166 = vmatprep.subr.bf16.mxu0 %v7806_v10  ;;  %vm4405_vm7 = vcmp.gt.f32.partialorder %v3502_v18, 0.0  ;;  %5357 = vmatprep.subr.bf16.mxu1 %v7836_v9  ;;  %v7807_v50 = vld [vmem:[#allocation8 + $0x90] ss:$8 sps:$4 sm:$0xff]   ;;  %v10695_v9 = vld [vmem:[#allocation76_spill] sm:$0xff] }
 0x280   : > { %10692 = vst [vmem:[#allocation108_spill] sm:$0xff] %v9429_v23  ;;  %v4533_v49 = vmul.f32 0.2, %v3502_v18  ;;  %v3316_v30 = vpop.f32.mrf.mxu0  ;;  %5358 = vmatpush2.bf16.msra.mxu1 %v7834_v20  ;;  %v9438_v41 = vsel %vm4401_vm6, %v3498_v53, %v4529_v22  ;;  %v10699_v53 = vld [vmem:[#allocation80_spill] sm:$0xff] }
 0x281   : > { %v3509_v45 = vpop.f32.mrf.mxu1  ;;  %v3508_v12 = vadd.f32 %v3507_v3, %v3315_v62  ;;  %v3317_v4 = vadd.f32 %v3316_v30, %v9083_v63  ;;  %v4536_v6 = vmul.f32 0.2, %v3506_v28  ;;  %vm4408_vm8 = vcmp.gt.f32.partialorder %v3506_v28, 0.0  ;;  %10694 = vst [vmem:[#allocation31_spill] sm:$0xff] %v9438_v41  ;;  %v10696_v30 = vld [vmem:[#allocation77_spill] sm:$0xff] }
 0x282   : > { %v3318_v61 = vpop.f32.mrf.mxu0  ;;  %5167 = vmatpush2.bf16.msra.mxu0 %v7804_v29  ;;  %v9435_v10 = vsel %vm4405_vm7, %v3502_v18, %v4533_v49  ;;  %v10698_v49 = vld [vmem:[#allocation79_spill] sm:$0xff]  ;;  %v822_v22 = vsub.s32 2, %v10699_v53 }
 0x283   : > { %v3511_v0 = vpop.f32.mrf.mxu1  ;;  %10693 = vst [vmem:[#allocation30_spill] sm:$0xff] %v9435_v10  ;;  %v3510_v7 = vadd.f32 %v3509_v45, %v3317_v4  ;;  %5168 = vmatprep.subr.bf16.mxu0 %v7809_v46  ;;  %v3319_v62 = vadd.f32 %v3318_v61, %v9088_v38  ;;  %v10697_v46 = vld [vmem:[#allocation78_spill] sm:$0xff]  ;;  %v9450_v38 = vsel %vm4408_vm8, %v3506_v28, %v4536_v6  ;;  %v4537_v48 = vmul.f32 0.2, %v3508_v12  ;;  %v10727_v10 = vld [vmem:[#allocation109_spill] sm:$0xff] }
 0x284   : > { %v3322_v3 = vpop.f32.mrf.mxu0  ;;  %4013 = vmatmul.mubr.bf16.gmra.mxu0 %v10695_v9  ;;  %10700 = vst [vmem:[#allocation111_spill] sm:$0xff] %v9450_v38  ;;  %v826_v9 = vsub.s32 3, %v10699_v53  ;;  %vm4409_vm10 = vcmp.gt.f32.partialorder %v3508_v12, 0.0 }
 0x285   : > { %v3515_v63 = vpop.f32.mrf.mxu1  ;;  %4206 = vmatmul.mubr.bf16.gmra.mxu1 %v10696_v30  ;;  %vm4412_vm9 = vcmp.gt.f32.partialorder %v3510_v7, 0.0  ;;  %v4540_v18 = vmul.f32 0.2, %v3510_v7  ;;  %v3323_v20 = vadd.f32 %v3322_v3, %v9093_v40  ;;  %4022 = vmatprep.mubr.bf16.mxu0 %v10697_v46  ;;  %v3512_v45 = vadd.f32 %v3511_v0, %v3319_v62  ;;  %v7813_v30 = vld [vmem:[#allocation8 + $0x80] ss:$8 sps:$4 sm:$0xff]  }
 0x286   : > { %4215 = vmatprep.mubr.bf16.mxu1 %v10698_v49  ;;  %v3324_v4 = vpop.f32.mrf.mxu0  ;;  %5169 = vmatpush2.bf16.msra.mxu0 %v7807_v50  ;;  %v7837_v46 = vld [vmem:[#allocation8 + $0x1a0] ss:$8 sps:$4 sm:$0xff]   ;;  %v7839_v49 = vld [vmem:[#allocation8 + $0x1a4] ss:$8 sps:$4 sm:$0xff]   ;;  %v10702_v50 = vld [vmem:[#allocation133_spill] sm:$0xff]  ;;  %v9466_v28 = vsel %vm4409_vm10, %v3508_v12, %v4537_v48 }
 0x287   : > { %v3517_v61 = vpop.f32.mrf.mxu1  ;;  %v9453_v29 = vsel %vm4412_vm9, %v3510_v7, %v4540_v18  ;;  %v3516_v40 = vadd.f32 %v3515_v63, %v3323_v20  ;;  %v3325_v3 = vadd.f32 %v3324_v4, %v9096_v2  ;;  %5170 = vmatprep.subr.bf16.mxu0 %v7815_v33  ;;  %vm4413_vm11 = vcmp.gt.f32.partialorder %v3512_v45, 0.0  ;;  %5359 = vmatprep.subr.bf16.mxu1 %v7839_v49  ;;  %v10707_v49 = vld [vmem:[#allocation82_spill] sm:$0xff] }
 0x288   : > { %10701 = vst [vmem:[#allocation114_spill] sm:$0xff] %v9453_v29  ;;  %v4541_v6 = vmul.f32 0.2, %v3512_v45  ;;  %v3326_v0 = vpop.f32.mrf.mxu0  ;;  %v9459_v7 = vrot.slane %v7870_v59, %v822_v22  ;;  %5360 = vmatpush2.bf16.msra.mxu1 %v7837_v46  ;;  %v9463_v4 = vrot.slane %v7870_v59, %v826_v9  ;;  %10704 = vst [vmem:[#allocation32_spill] sm:$0xff] %v9466_v28  ;;  %v10708_v59 = vld [vmem:[#allocation83_spill] sm:$0xff]  ;;  %v10709_v9 = vld [vmem:[#allocation84_spill] sm:$0xff] }
 0x289   : > { %v3519_v62 = vpop.f32.mrf.mxu1  ;;  %v3518_v44 = vadd.f32 %v3517_v61, %v3325_v3  ;;  %v3327_v53 = vadd.f32 %v3326_v0, %v10702_v50  ;;  %v4544_v63 = vmul.f32 0.2, %v3516_v40  ;;  %vm4416_vm12 = vcmp.gt.f32.partialorder %v3516_v40, 0.0  ;;  %v10705_v61 = vld [vmem:[#allocation134_spill] sm:$0xff]  ;;  %v10706_v50 = vld [vmem:[#allocation81_spill] sm:$0xff] }
 0x28a   : > { %v3328_v2 = vpop.f32.mrf.mxu0  ;;  %5171 = vmatpush2.bf16.msra.mxu0 %v7813_v30  ;;  %v9461_v18 = vsel %vm4413_vm11, %v3512_v45, %v4541_v6 }
 0x28b   : > { %v3521_v33 = vpop.f32.mrf.mxu1  ;;  %10703 = vst [vmem:[#allocation115_spill] sm:$0xff] %v9461_v18  ;;  %v3520_v20 = vadd.f32 %v3519_v62, %v3327_v53  ;;  %v3329_v3 = vadd.f32 %v3328_v2, %v10705_v61  ;;  %v9476_v48 = vsel %vm4416_vm12, %v3516_v40, %v4544_v63  ;;  %v4545_v12 = vmul.f32 0.2, %v3518_v44  ;;  %v10722_v18 = vld [vmem:[#allocation101_spill] sm:$0xff] }
 0x28c   : > { %v3558_v0 = vpop.f32.mrf.mxu0  ;;  %4023 = vmatmul.mubr.bf16.gmra.mxu0 %v10706_v50  ;;  %10710 = vst [vmem:[#allocation33_spill] sm:$0xff] %v9476_v48  ;;  %vm4417_vm14 = vcmp.gt.f32.partialorder %v3518_v44, 0.0 }
 0x28d   : > { %v3751_v22 = vpop.f32.mrf.mxu1  ;;  %4216 = vmatmul.mubr.bf16.gmra.mxu1 %v10707_v49  ;;  %vm4420_vm13 = vcmp.gt.f32.partialorder %v3520_v20, 0.0  ;;  %v4548_v45 = vmul.f32 0.2, %v3520_v20  ;;  %v3559_v53 = vadd.f32 %v3558_v0, %v9459_v7  ;;  %4032 = vmatprep.mubr.bf16.mxu0 %v10708_v59  ;;  %v3522_v46 = vadd.f32 %v3521_v33, %v3329_v3 }
 0x28e   : > { %4225 = vmatprep.mubr.bf16.mxu1 %v10709_v9  ;;  %v3560_v6 = vpop.f32.mrf.mxu0  ;;  %v9488_v30 = vsel %vm4417_vm14, %v3518_v44, %v4545_v12  ;;  %v10716_v12 = vld [vmem:[#allocation88_spill] sm:$0xff] }
 0x28f   : > { %v3753_v62 = vpop.f32.mrf.mxu1  ;;  %v9478_v2 = vsel %vm4420_vm13, %v3520_v20, %v4548_v45  ;;  %v9480_v61 = vadd.f32 %v3751_v22, %v3559_v53  ;;  %v3561_v50 = vadd.f32 %v3560_v6, %v9463_v4  ;;  %vm4421_vm15 = vcmp.gt.f32.partialorder %v3522_v46, 0.0  ;;  %10712 = vst [vmem:[#allocation34_spill] sm:$0xff] %v9488_v30  ;;  %v7840_v53 = vld [vmem:[#allocation8 + $0x190] ss:$8 sps:$4 sm:$0xff]   ;;  %v7842_v6 = vld [vmem:[#allocation8 + $0x194] ss:$8 sps:$4 sm:$0xff]  }
 0x290   : > { %10711 = vst [vmem:[#allocation116_spill] sm:$0xff] %v9478_v2  ;;  %v4549_v49 = vmul.f32 0.2, %v3522_v46  ;;  %v3562_v59 = vpop.f32.mrf.mxu0  ;;  %5361 = vmatprep.subr.bf16.mxu1 %v7842_v6 }
 0x291   : > { %v3755_v9 = vpop.f32.mrf.mxu1  ;;  %v9485_v40 = vadd.f32 %v3753_v62, %v3561_v50  ;;  %v3563_v63 = vadd.f32 %v3562_v59, %v9459_v7  ;;  %v10714_v50 = vld [vmem:[#allocation85_spill] sm:$0xff]  ;;  %v10715_v59 = vld [vmem:[#allocation86_spill] sm:$0xff]  ;;  %5362 = vmatpush2.bf16.msra.mxu1 %v7840_v53 }
 0x292   : > { %v3564_v33 = vpop.f32.mrf.mxu0  ;;  %v9490_v20 = vsel %vm4421_vm15, %v3522_v46, %v4549_v49  ;;  %v10717_v46 = vld [vmem:[#allocation89_spill] sm:$0xff]  ;;  %v10719_v53 = vld [vmem:[#allocation94_spill] sm:$0xff] }
 0x293   : > { %v3757_v3 = vpop.f32.mrf.mxu1  ;;  %10713 = vst [vmem:[#allocation35_spill] sm:$0xff] %v9490_v20  ;;  %v9492_v22 = vadd.f32 %v3755_v9, %v3563_v63  ;;  %v3565_v45 = vadd.f32 %v3564_v33, %v9463_v4 }
 0x294   : > { %v3568_v48 = vpop.f32.mrf.mxu0  ;;  %4033 = vmatmul.mubr.bf16.gmra.mxu0 %v10714_v50 }
 0x295   : > { %v3761_v62 = vpop.f32.mrf.mxu1  ;;  %4226 = vmatmul.mubr.bf16.gmra.mxu1 %v10715_v59  ;;  %v9499_v2 = vadd.f32 %v3757_v3, %v3565_v45  ;;  %v3569_v44 = vadd.f32 %v3568_v48, %v9459_v7  ;;  %4042 = vmatprep.mubr.bf16.mxu0 %v10716_v12  ;;  %v7845_v45 = vld [vmem:[#allocation8 + $0x184] ss:$8 sps:$4 sm:$0xff]   ;;  %v7843_v12 = vld [vmem:[#allocation8 + $0x180] ss:$8 sps:$4 sm:$0xff]  }
 0x296   : > { %4235 = vmatprep.mubr.bf16.mxu1 %v10717_v46  ;;  %v3570_v49 = vpop.f32.mrf.mxu0  ;;  %5363 = vmatprep.subr.bf16.mxu1 %v7845_v45 }
 0x297   : > { %v3763_v9 = vpop.f32.mrf.mxu1  ;;  %v9504_v63 = vadd.f32 %v3761_v62, %v3569_v44  ;;  %v3571_v33 = vadd.f32 %v3570_v49, %v9463_v4  ;;  %v10718_v44 = vld [vmem:[#allocation93_spill] sm:$0xff]  ;;  %5364 = vmatpush2.bf16.msra.mxu1 %v7843_v12  ;;  %v10723_v12 = vld [vmem:[#allocation102_spill] sm:$0xff] }
 0x298   : > { %v3572_v0 = vpop.f32.mrf.mxu0 }
 0x299   : > { %v3765_v50 = vpop.f32.mrf.mxu1  ;;  %v9507_v30 = vadd.f32 %v3763_v9, %v3571_v33  ;;  %v3573_v3 = vadd.f32 %v3572_v0, %v9459_v7  ;;  %v10720_v0 = vld [vmem:[#allocation96_spill] sm:$0xff]  ;;  %v10721_v33 = vld [vmem:[#allocation97_spill] sm:$0xff] }
 0x29a   : > { %v3574_v48 = vpop.f32.mrf.mxu0 }
 0x29b   : > { %v3767_v59 = vpop.f32.mrf.mxu1  ;;  %v9510_v20 = vadd.f32 %v3765_v50, %v3573_v3  ;;  %v3575_v46 = vadd.f32 %v3574_v48, %v9463_v4 }
 0x29c   : > { %v3578_v6 = vpop.f32.mrf.mxu0  ;;  %4043 = vmatmul.mubr.bf16.gmra.mxu0 %v10718_v44 }
 0x29d   : > { %v3771_v62 = vpop.f32.mrf.mxu1  ;;  %4236 = vmatmul.mubr.bf16.gmra.mxu1 %v10719_v53  ;;  %v9515_v49 = vadd.f32 %v3767_v59, %v3575_v46  ;;  %v3579_v9 = vadd.f32 %v3578_v6, %v9459_v7  ;;  %4052 = vmatprep.mubr.bf16.mxu0 %v10720_v0 }
 0x29e   : > { %4245 = vmatprep.mubr.bf16.mxu1 %v10721_v33  ;;  %v3580_v38 = vpop.f32.mrf.mxu0 }
 0x29f   : > { %v3773_v50 = vpop.f32.mrf.mxu1  ;;  %v9520_v3 = vadd.f32 %v3771_v62, %v3579_v9  ;;  %v3581_v45 = vadd.f32 %v3580_v38, %v9463_v4  ;;  %v10724_v9 = vld [vmem:[#allocation104_spill] sm:$0xff] }
 0x2a0   : > { %v3582_v48 = vpop.f32.mrf.mxu0 }
 0x2a1   : > { %v3775_v29 = vpop.f32.mrf.mxu1  ;;  %v9523_v44 = vadd.f32 %v3773_v50, %v3581_v45  ;;  %v3583_v59 = vadd.f32 %v3582_v48, %v9459_v7  ;;  %v10725_v50 = vld [vmem:[#allocation105_spill] sm:$0xff] }
 0x2a2   : > { %v3584_v46 = vpop.f32.mrf.mxu0 }
 0x2a3   : > { %v3777_v53 = vpop.f32.mrf.mxu1  ;;  %v9526_v6 = vadd.f32 %v3775_v29, %v3583_v59  ;;  %v3585_v0 = vadd.f32 %v3584_v46, %v9463_v4 }
 0x2a4   : > { %v3588_v33 = vpop.f32.mrf.mxu0  ;;  %4053 = vmatmul.mubr.bf16.gmra.mxu0 %v10722_v18 }
 0x2a5   : > { %v3781_v28 = vpop.f32.mrf.mxu1  ;;  %4246 = vmatmul.mubr.bf16.gmra.mxu1 %v10723_v12  ;;  %v9531_v62 = vadd.f32 %v3777_v53, %v3585_v0  ;;  %v3589_v38 = vadd.f32 %v3588_v33, %v9459_v7  ;;  %4062 = vmatprep.mubr.bf16.mxu0 %v10724_v9 }
 0x2a6   : > { %4255 = vmatprep.mubr.bf16.mxu1 %v10725_v50  ;;  %v3590_v45 = vpop.f32.mrf.mxu0 }
 0x2a7   : > { %v3783_v48 = vpop.f32.mrf.mxu1  ;;  %v9536_v29 = vadd.f32 %v3781_v28, %v3589_v38  ;;  %v3591_v59 = vadd.f32 %v3590_v45, %v9463_v4  ;;  %v10728_v28 = vld [vmem:[#allocation110_spill] sm:$0xff] }
 0x2a8   : > { %v3592_v46 = vpop.f32.mrf.mxu0 }
 0x2a9   : > { %v3785_v23 = vpop.f32.mrf.mxu1  ;;  %v9539_v41 = vadd.f32 %v3783_v48, %v3591_v59  ;;  %v3593_v18 = vadd.f32 %v3592_v46, %v9459_v7  ;;  %v10730_v48 = vld [vmem:[#allocation112_spill] sm:$0xff]  ;;  %v10731_v59 = vld [vmem:[#allocation113_spill] sm:$0xff] }
 0x2aa   : > { %v3594_v53 = vpop.f32.mrf.mxu0 }
 0x2ab   : > { %v3787_v0 = vpop.f32.mrf.mxu1  ;;  %v9542_v12 = vadd.f32 %v3785_v23, %v3593_v18  ;;  %v3595_v33 = vadd.f32 %v3594_v53, %v9463_v4 }
 0x2ac   : > { %v3598_v9 = vpop.f32.mrf.mxu0  ;;  %4063 = vmatmul.mubr.bf16.gmra.mxu0 %v10727_v10 }
 0x2ad   : > { %10726 = vst [vmem:[#allocation119_spill] sm:$0xff] %v9542_v12  ;;  %v3791_v50 = vpop.f32.mrf.mxu1  ;;  %4256 = vmatmul.mubr.bf16.gmra.mxu1 %v10728_v28  ;;  %v9547_v38 = vadd.f32 %v3787_v0, %v3595_v33  ;;  %v3599_v45 = vadd.f32 %v3598_v9, %v9459_v7  ;;  %4072 = vmatprep.mubr.bf16.mxu0 %v10730_v48 }
 0x2ae   : > { %4265 = vmatprep.mubr.bf16.mxu1 %v10731_v59  ;;  %v3600_v46 = vpop.f32.mrf.mxu0  ;;  %v10737_v59 = vld [vmem:[#allocation117_spill] sm:$0xff] }
 0x2af   : > { %10729 = vst [vmem:[#allocation122_spill] sm:$0xff] %v9547_v38  ;;  %v3793_v17 = vpop.f32.mrf.mxu1  ;;  %v9552_v23 = vadd.f32 %v3791_v50, %v3599_v45  ;;  %v3601_v18 = vadd.f32 %v3600_v46, %v9463_v4  ;;  %v10738_v50 = vld [vmem:[#allocation118_spill] sm:$0xff]  ;;  %v10739_v46 = vld [vmem:[#allocation120_spill] sm:$0xff]  ;;  %v10766_v38 = vld [vmem:[#allocation19_spill] sm:$0xff] }
 0x2b0   : > { %v3602_v53 = vpop.f32.mrf.mxu0 }
 0x2b1   : > { %10732 = vst [vmem:[#allocation123_spill] sm:$0xff] %v9552_v23  ;;  %v3795_v37 = vpop.f32.mrf.mxu1  ;;  %v9555_v12 = vadd.f32 %v3793_v17, %v3601_v18  ;;  %v3603_v10 = vadd.f32 %v3602_v53, %v9459_v7  ;;  %v10740_v17 = vld [vmem:[#allocation121_spill] sm:$0xff] }
 0x2b2   : > { %v9558_v0 = vpop.f32.mrf.mxu0  ;;  %v10746_v23 = vld [vmem:[#allocation125_spill] sm:$0xff] }
 0x2b3   : > { %10733 = vst [vmem:[#allocation36_spill] sm:$0xff] %v9555_v12  ;;  %10734 = vst [vmem:[#allocation37_spill] sm:$0xff] %v9558_v0  ;;  %v9560_v33 = vpop.f32.mrf.mxu1  ;;  %v9562_v9 = vadd.f32 %v3795_v37, %v3603_v10 }
 0x2b4   : > { %10735 = vst [vmem:[#allocation124_spill] sm:$0xff] %v9560_v33  ;;  %v3608_v28 = vpop.f32.mrf.mxu0  ;;  %4073 = vmatmul.mubr.bf16.gmra.mxu0 %v10737_v59 }
 0x2b5   : > { %10736 = vst [vmem:[#allocation38_spill] sm:$0xff] %v9562_v9  ;;  %v3801_v48 = vpop.f32.mrf.mxu1  ;;  %4266 = vmatmul.mubr.bf16.gmra.mxu1 %v10738_v50  ;;  %v3609_v45 = vadd.f32 %v3608_v28, %v9459_v7  ;;  %4082 = vmatprep.mubr.bf16.mxu0 %v10739_v46 }
 0x2b6   : > { %4275 = vmatprep.mubr.bf16.mxu1 %v10740_v17  ;;  %v3610_v18 = vpop.f32.mrf.mxu0 }
 0x2b7   : > { %v3803_v53 = vpop.f32.mrf.mxu1  ;;  %v9569_v12 = vadd.f32 %v3801_v48, %v3609_v45  ;;  %v3611_v33 = vadd.f32 %v3610_v18, %v9463_v4  ;;  %v10747_v48 = vld [vmem:[#allocation126_spill] sm:$0xff]  ;;  %v10748_v18 = vld [vmem:[#allocation127_spill] sm:$0xff] }
 0x2b8   : > { %v3612_v37 = vpop.f32.mrf.mxu0 }
 0x2b9   : > { %10741 = vst [vmem:[#allocation39_spill] sm:$0xff] %v9569_v12  ;;  %v3805_v10 = vpop.f32.mrf.mxu1  ;;  %v9572_v9 = vadd.f32 %v3803_v53, %v3611_v33  ;;  %v3613_v59 = vadd.f32 %v3612_v37, %v9459_v7  ;;  %v10749_v33 = vld [vmem:[#allocation128_spill] sm:$0xff]  ;;  %v10755_v12 = vld [vmem:[#allocation129_spill] sm:$0xff] }
 0x2ba   : > { %v9575_v0 = vpop.f32.mrf.mxu0 }
 0x2bb   : > { %10742 = vst [vmem:[#allocation40_spill] sm:$0xff] %v9572_v9  ;;  %10743 = vst [vmem:[#allocation41_spill] sm:$0xff] %v9575_v0  ;;  %v9577_v50 = vpop.f32.mrf.mxu1  ;;  %v9579_v28 = vadd.f32 %v3805_v10, %v3613_v59 }
 0x2bc   : > { %10744 = vst [vmem:[#allocation42_spill] sm:$0xff] %v9577_v50  ;;  %v3618_v46 = vpop.f32.mrf.mxu0  ;;  %4083 = vmatmul.mubr.bf16.gmra.mxu0 %v10746_v23 }
 0x2bd   : > { %10745 = vst [vmem:[#allocation43_spill] sm:$0xff] %v9579_v28  ;;  %v3811_v17 = vpop.f32.mrf.mxu1  ;;  %4276 = vmatmul.mubr.bf16.gmra.mxu1 %v10747_v48  ;;  %v3619_v45 = vadd.f32 %v3618_v46, %v9459_v7  ;;  %4092 = vmatprep.mubr.bf16.mxu0 %v10748_v18 }
 0x2be   : > { %4285 = vmatprep.mubr.bf16.mxu1 %v10749_v33  ;;  %v3620_v53 = vpop.f32.mrf.mxu0 }
 0x2bf   : > { %v3813_v37 = vpop.f32.mrf.mxu1  ;;  %v9586_v9 = vadd.f32 %v3811_v17, %v3619_v45  ;;  %v3621_v50 = vadd.f32 %v3620_v53, %v9463_v4  ;;  %v10756_v17 = vld [vmem:[#allocation130_spill] sm:$0xff] }
 0x2c0   : > { %v3622_v10 = vpop.f32.mrf.mxu0  ;;  %v10757_v53 = vld [vmem:[#allocation90_spill] sm:$0xff] }
 0x2c1   : > { %10750 = vst [vmem:[#allocation44_spill] sm:$0xff] %v9586_v9  ;;  %v3815_v59 = vpop.f32.mrf.mxu1  ;;  %v9589_v28 = vadd.f32 %v3813_v37, %v3621_v50  ;;  %v3623_v23 = vadd.f32 %v3622_v10, %v9459_v7  ;;  %v10758_v9 = vld [vmem:[#allocation91_spill] sm:$0xff] }
 0x2c2   : > { %v9592_v0 = vpop.f32.mrf.mxu0  ;;  %v10759_v50 = vpack.c.bf16 %v10757_v53, %v10758_v9 }
 0x2c3   : > { %10751 = vst [vmem:[#allocation45_spill] sm:$0xff] %v9589_v28  ;;  %10752 = vst [vmem:[#allocation46_spill] sm:$0xff] %v9592_v0  ;;  %v9594_v48 = vpop.f32.mrf.mxu1  ;;  %v9596_v46 = vadd.f32 %v3815_v59, %v3623_v23 }
 0x2c4   : > { %10753 = vst [vmem:[#allocation47_spill] sm:$0xff] %v9594_v48  ;;  %v3628_v18 = vpop.f32.mrf.mxu0  ;;  %4093 = vmatmul.mubr.bf16.gmra.mxu0 %v10755_v12 }
 0x2c5   : > { %10754 = vst [vmem:[#allocation131_spill] sm:$0xff] %v9596_v46  ;;  %v3821_v33 = vpop.f32.mrf.mxu1  ;;  %4286 = vmatmul.mubr.bf16.gmra.mxu1 %v10756_v17  ;;  %v3629_v45 = vadd.f32 %v3628_v18, %v9459_v7  ;;  %5172 = vmatprep.mubr.bf16.mxu0 %v10759_v50  ;;  %v10765_v50 = vld [vmem:[#allocation87_spill] sm:$0xff] }
 0x2c6   : > { %v3630_v37 = vpop.f32.mrf.mxu0 }
 0x2c7   : > { %v3823_v10 = vpop.f32.mrf.mxu1  ;;  %v9604_v28 = vadd.f32 %v3821_v33, %v3629_v45  ;;  %v3631_v48 = vadd.f32 %v3630_v37, %v9463_v4  ;;  %v10767_v33 = vpack.c.bf16 %v10765_v50, %v10766_v38  ;;  %v10768_v37 = vld [vmem:[#allocation92_spill] sm:$0xff] }
 0x2c8   : > { %v3632_v59 = vpop.f32.mrf.mxu0 }
 0x2c9   : > { %10760 = vst [vmem:[#allocation48_spill] sm:$0xff] %v9604_v28  ;;  %v3825_v23 = vpop.f32.mrf.mxu1  ;;  %v9607_v46 = vadd.f32 %v3823_v10, %v3631_v48  ;;  %v3633_v12 = vadd.f32 %v3632_v59, %v9459_v7  ;;  %v10769_v28 = vld [vmem:[#allocation22_spill] sm:$0xff] }
 0x2ca   : > { %v9610_v0 = vpop.f32.mrf.mxu0  ;;  %v10770_v48 = vpack.c.bf16 %v10768_v37, %v10769_v28  ;;  %v10776_v37 = vld [vmem:[#allocation21_spill] sm:$0xff] }
 0x2cb   : > { %10761 = vst [vmem:[#allocation49_spill] sm:$0xff] %v9607_v46  ;;  %10762 = vst [vmem:[#allocation132_spill] sm:$0xff] %v9610_v0  ;;  %v9612_v17 = vpop.f32.mrf.mxu1  ;;  %v9614_v18 = vadd.f32 %v3825_v23, %v3633_v12 }
 0x2cc   : > { %10763 = vst [vmem:[#allocation50_spill] sm:$0xff] %v9612_v17  ;;  %v3638_v9 = vpop.f32.mrf.mxu0  ;;  %5173 = vmatmul.mubr.bf16.vlgmr.msra.gmra.mxu0 %v10767_v33 }
 0x2cd   : > { %10764 = vst [vmem:[#allocation51_spill] sm:$0xff] %v9614_v18  ;;  %v3831_v53 = vpop.f32.mrf.mxu1  ;;  %v3639_v45 = vadd.f32 %v3638_v9, %v9459_v7  ;;  %5182 = vmatprep.mubr.bf16.mxu0 %v10770_v48  ;;  %v10777_v48 = vld [vmem:[#allocation20_spill] sm:$0xff] }
 0x2ce   : > { %v3640_v10 = vpop.f32.mrf.mxu0 }
 0x2cf   : > { %v3833_v59 = vpop.f32.mrf.mxu1  ;;  %v9623_v46 = vadd.f32 %v3831_v53, %v3639_v45  ;;  %v3641_v17 = vadd.f32 %v3640_v10, %v9463_v4  ;;  %v10778_v53 = vpack.c.bf16 %v10776_v37, %v10777_v48  ;;  %v10779_v10 = vld [vmem:[#allocation98_spill] sm:$0xff] }
 0x2d0   : > { %v3642_v23 = vpop.f32.mrf.mxu0 }
 0x2d1   : > { %10771 = vst [vmem:[#allocation52_spill] sm:$0xff] %v9623_v46  ;;  %v3835_v12 = vpop.f32.mrf.mxu1  ;;  %v9626_v18 = vadd.f32 %v3833_v59, %v3641_v17  ;;  %v3643_v0 = vadd.f32 %v3642_v23, %v9459_v7  ;;  %v10780_v46 = vld [vmem:[#allocation99_spill] sm:$0xff] }
 0x2d2   : > { %v9629_v38 = vpop.f32.mrf.mxu0  ;;  %v10781_v17 = vpack.c.bf16 %v10779_v10, %v10780_v46  ;;  %v10785_v10 = vld [vmem:[#allocation95_spill] sm:$0xff] }
 0x2d3   : > { %10772 = vst [vmem:[#allocation53_spill] sm:$0xff] %v9626_v18  ;;  %10773 = vst [vmem:[#allocation54_spill] sm:$0xff] %v9629_v38  ;;  %v9631_v50 = vpop.f32.mrf.mxu1  ;;  %v9633_v9 = vadd.f32 %v3835_v12, %v3643_v0 }
 0x2d4   : > { %10774 = vst [vmem:[#allocation55_spill] sm:$0xff] %v9631_v50  ;;  %v3648_v28 = vpop.f32.mrf.mxu0  ;;  %5183 = vmatmul.mubr.bf16.gmra.mxu0 %v10778_v53 }
 0x2d5   : > { %10775 = vst [vmem:[#allocation56_spill] sm:$0xff] %v9633_v9  ;;  %v3841_v33 = vpop.f32.mrf.mxu1  ;;  %v3649_v45 = vadd.f32 %v3648_v28, %v9459_v7  ;;  %5192 = vmatprep.mubr.bf16.mxu0 %v10781_v17  ;;  %v10786_v17 = vld [vmem:[#allocation23_spill] sm:$0xff] }
 0x2d6   : > { %v3650_v59 = vpop.f32.mrf.mxu0 }
 0x2d7   : > { %v3843_v23 = vpop.f32.mrf.mxu1  ;;  %v9642_v18 = vadd.f32 %v3841_v33, %v3649_v45  ;;  %v3651_v50 = vadd.f32 %v3650_v59, %v9463_v4  ;;  %v10787_v33 = vpack.c.bf16 %v10785_v10, %v10786_v17 }
 0x2d8   : > { %v3652_v0 = vpop.f32.mrf.mxu0 }
 0x2d9   : > { %v3845_v12 = vpop.f32.mrf.mxu1  ;;  %v9645_v9 = vadd.f32 %v3843_v23, %v3651_v50  ;;  %v3653_v38 = vadd.f32 %v3652_v0, %v9459_v7  ;;  %v10788_v50 = vpack.c.bf16 %v9185_v31, %v9187_v55 }
 0x2da   : > { %v9648_v37 = vpop.f32.mrf.mxu0 }
 0x2db   : > { %10782 = vst [vmem:[#allocation57_spill] sm:$0xff] %v9645_v9  ;;  %v9650_v48 = vpop.f32.mrf.mxu1  ;;  %v9652_v28 = vadd.f32 %v3845_v12, %v3653_v38 }
 0x2dc   : > { %10783 = vst [vmem:[#allocation58_spill] sm:$0xff] %v9650_v48  ;;  %v3658_v46 = vpop.f32.mrf.mxu0  ;;  %5193 = vmatmul.mubr.bf16.gmra.mxu0 %v10787_v33  ;;  %v10792_v33 = vld [vmem:[#allocation25_spill] sm:$0xff] }
 0x2dd   : > { %10784 = vst [vmem:[#allocation59_spill] sm:$0xff] %v9652_v28  ;;  %v3851_v53 = vpop.f32.mrf.mxu1  ;;  %v3659_v45 = vadd.f32 %v3658_v46, %v9459_v7  ;;  %5202 = vmatprep.mubr.bf16.mxu0 %v10788_v50  ;;  %v10793_v50 = vld [vmem:[#allocation24_spill] sm:$0xff] }
 0x2de   : > { %v3660_v59 = vpop.f32.mrf.mxu0 }
 0x2df   : > { %v3853_v23 = vpop.f32.mrf.mxu1  ;;  %v9661_v0 = vadd.f32 %v3851_v53, %v3659_v45  ;;  %v3661_v48 = vadd.f32 %v3660_v59, %v9463_v4  ;;  %v10794_v53 = vpack.c.bf16 %v10792_v33, %v10793_v50 }
 0x2e0   : > { %v3662_v38 = vpop.f32.mrf.mxu0 }
 0x2e1   : > { %v3855_v12 = vpop.f32.mrf.mxu1  ;;  %v9664_v28 = vadd.f32 %v3853_v23, %v3661_v48  ;;  %v3663_v9 = vadd.f32 %v3662_v38, %v9459_v7  ;;  %v10795_v48 = vpack.c.bf16 %v9205_v25, %v9207_v21 }
 0x2e2   : > { %v9667_v10 = vpop.f32.mrf.mxu0 }
 0x2e3   : > { %10789 = vst [vmem:[#allocation60_spill] sm:$0xff] %v9664_v28  ;;  %v9669_v17 = vpop.f32.mrf.mxu1  ;;  %v9671_v46 = vadd.f32 %v3855_v12, %v3663_v9 }
 0x2e4   : > { %10790 = vst [vmem:[#allocation61_spill] sm:$0xff] %v9669_v17  ;;  %v3668_v31 = vpop.f32.mrf.mxu0  ;;  %5203 = vmatmul.mubr.bf16.gmra.mxu0 %v10794_v53 }
 0x2e5   : > { %10791 = vst [vmem:[#allocation62_spill] sm:$0xff] %v9671_v46  ;;  %v3861_v55 = vpop.f32.mrf.mxu1  ;;  %v3669_v45 = vadd.f32 %v3668_v31, %v9459_v7  ;;  %5212 = vmatprep.mubr.bf16.mxu0 %v10795_v48 }
 0x2e6   : > { %v3670_v59 = vpop.f32.mrf.mxu0 }
 0x2e7   : > { %v3863_v23 = vpop.f32.mrf.mxu1  ;;  %v9680_v38 = vadd.f32 %v3861_v55, %v3669_v45  ;;  %v3671_v17 = vadd.f32 %v3670_v59, %v9463_v4  ;;  %v10797_v55 = vpack.c.bf16 %v9199_v47, %v9197_v27 }
 0x2e8   : > { %v3672_v9 = vpop.f32.mrf.mxu0 }
 0x2e9   : > { %v3865_v12 = vpop.f32.mrf.mxu1  ;;  %v9683_v46 = vadd.f32 %v3863_v23, %v3671_v17  ;;  %v3673_v28 = vadd.f32 %v3672_v9, %v9459_v7  ;;  %v10798_v17 = vpack.c.bf16 %v9225_v15, %v9227_v26 }
 0x2ea   : > { %v9686_v33 = vpop.f32.mrf.mxu0 }
 0x2eb   : > { %v9688_v50 = vpop.f32.mrf.mxu1  ;;  %v9690_v31 = vadd.f32 %v3865_v12, %v3673_v28 }
 0x2ec   : > { %10796 = vst [vmem:[#allocation63_spill] sm:$0xff] %v9688_v50  ;;  %v3678_v25 = vpop.f32.mrf.mxu0  ;;  %5213 = vmatmul.mubr.bf16.gmra.mxu0 %v10797_v55  ;;  %v10803_v55 = vld [vmem:[#allocation100_spill] sm:$0xff] }
 0x2ed   : > { %v3871_v21 = vpop.f32.mrf.mxu1  ;;  %v3679_v53 = vadd.f32 %v3678_v25, %v9459_v7  ;;  %5222 = vmatprep.mubr.bf16.mxu0 %v10798_v17  ;;  %v10805_v17 = vld [vmem:[#allocation103_spill] sm:$0xff] }
 0x2ee   : > { %v3680_v45 = vpop.f32.mrf.mxu0 }
 0x2ef   : > { %v3873_v48 = vpop.f32.mrf.mxu1  ;;  %v9699_v59 = vadd.f32 %v3871_v21, %v3679_v53  ;;  %v3681_v23 = vadd.f32 %v3680_v45, %v9463_v4  ;;  %v10804_v21 = vpack.c.bf16 %v9219_v39, %v10803_v55  ;;  %v10806_v45 = vld [vmem:[#allocation106_spill] sm:$0xff] }
 0x2f0   : > { %v3682_v28 = vpop.f32.mrf.mxu0 }
 0x2f1   : > { %v3875_v9 = vpop.f32.mrf.mxu1  ;;  %v9702_v12 = vadd.f32 %v3873_v48, %v3681_v23  ;;  %v3683_v50 = vadd.f32 %v3682_v28, %v9459_v7  ;;  %v10807_v48 = vpack.c.bf16 %v10805_v17, %v10806_v45  ;;  %v10811_v45 = vld [vmem:[#allocation27_spill] sm:$0xff] }
 0x2f2   : > { %v9705_v27 = vpop.f32.mrf.mxu0 }
 0x2f3   : > { %10799 = vst [vmem:[#allocation64_spill] sm:$0xff] %v9702_v12  ;;  %10800 = vst [vmem:[#allocation65_spill] sm:$0xff] %v9705_v27  ;;  %v9707_v47 = vpop.f32.mrf.mxu1  ;;  %v9709_v25 = vadd.f32 %v3875_v9, %v3683_v50 }
 0x2f4   : > { %10801 = vst [vmem:[#allocation66_spill] sm:$0xff] %v9707_v47  ;;  %v3688_v15 = vpop.f32.mrf.mxu0  ;;  %5223 = vmatmul.mubr.bf16.gmra.mxu0 %v10804_v21 }
 0x2f5   : > { %10802 = vst [vmem:[#allocation67_spill] sm:$0xff] %v9709_v25  ;;  %v3881_v26 = vpop.f32.mrf.mxu1  ;;  %v3689_v53 = vadd.f32 %v3688_v15, %v9459_v7  ;;  %5232 = vmatprep.mubr.bf16.mxu0 %v10807_v48  ;;  %v10812_v48 = vld [vmem:[#allocation26_spill] sm:$0xff] }
 0x2f6   : > { %v3690_v23 = vpop.f32.mrf.mxu0 }
 0x2f7   : > { %v3883_v28 = vpop.f32.mrf.mxu1  ;;  %v9718_v12 = vadd.f32 %v3881_v26, %v3689_v53  ;;  %v3691_v47 = vadd.f32 %v3690_v23, %v9463_v4  ;;  %v10813_v26 = vpack.c.bf16 %v10811_v45, %v10812_v48 }
 0x2f8   : > { %v3692_v50 = vpop.f32.mrf.mxu0 }
 0x2f9   : > { %v3885_v9 = vpop.f32.mrf.mxu1  ;;  %v9721_v25 = vadd.f32 %v3883_v28, %v3691_v47  ;;  %v3693_v27 = vadd.f32 %v3692_v50, %v9459_v7  ;;  %v10814_v47 = vpack.c.bf16 %v9273_v36, %v9278_v57  ;;  %v7846_v36 = vld [vmem:[#allocation10 + $0x78] sm:$0xff]  }
 0x2fa   : > { %v9724_v39 = vpop.f32.mrf.mxu0  ;;  %v9749_v57 = vld [vmem:[#allocation10 + $0x38] sm:$0xff]   ;;  %7059 = vmatprep.subr.bf16.mxu0 %v7846_v36  ;;  %7243 = vmatprep.subr.bf16.mxu1 %v7846_v36  ;;  %v10821_v36 = vpack.c.bf16 %v9292_v35, %v9289_v42 }
 0x2fb   : > { %10808 = vst [vmem:[#allocation68_spill] sm:$0xff] %v9721_v25  ;;  %v9726_v55 = vpop.f32.mrf.mxu1  ;;  %v9728_v15 = vadd.f32 %v3885_v9, %v3693_v27  ;;  %7060 = vmatpush3.bf16.msra.mxu0 %v9749_v57 }
 0x2fc   : > { %10809 = vst [vmem:[#allocation69_spill] sm:$0xff] %v9726_v55  ;;  %v3698_v21 = vpop.f32.mrf.mxu0  ;;  %5233 = vmatmul.mubr.bf16.gmra.mxu0 %v10813_v26 }
 0x2fd   : > { %10810 = vst [vmem:[#allocation70_spill] sm:$0xff] %v9728_v15  ;;  %v3891_v17 = vpop.f32.mrf.mxu1  ;;  %v3699_v53 = vadd.f32 %v3698_v21, %v9459_v7  ;;  %5242 = vmatprep.mubr.bf16.mxu0 %v10814_v47  ;;  %v10817_v47 = vpack.c.bf16 %v9301_v34, %v9306_v54 }
 0x2fe   : > { %v3700_v23 = vpop.f32.mrf.mxu0 }
 0x2ff   : > { %v3893_v28 = vpop.f32.mrf.mxu1  ;;  %v9737_v50 = vadd.f32 %v3891_v17, %v3699_v53  ;;  %v3701_v55 = vadd.f32 %v3700_v23, %v9463_v4  ;;  %v10816_v53 = vpack.c.bf16 %v9264_v52, %v9261_v32 }
 0x300   : > { %v3702_v27 = vpop.f32.mrf.mxu0 }
 0x301   : > { %v3895_v9 = vpop.f32.mrf.mxu1  ;;  %v9740_v15 = vadd.f32 %v3893_v28, %v3701_v55  ;;  %v3703_v25 = vadd.f32 %v3702_v27, %v9459_v7 }
 0x302   : > { %v9743_v45 = vpop.f32.mrf.mxu0 }
 0x303   : > { %v9745_v48 = vpop.f32.mrf.mxu1  ;;  %v9747_v21 = vadd.f32 %v3895_v9, %v3703_v25 }
 0x304   : > { %10815 = vst [vmem:[#allocation71_spill] sm:$0xff] %v9745_v48  ;;  %v3708_v26 = vpop.f32.mrf.mxu0  ;;  %5243 = vmatmul.mubr.bf16.gmra.mxu0 %v10816_v53 }
 0x305   : > { %v3901_v17 = vpop.f32.mrf.mxu1  ;;  %v3709_v55 = vadd.f32 %v3708_v26, %v9459_v7  ;;  %5252 = vmatprep.mubr.bf16.mxu0 %v10817_v47 }
 0x306   : > { %v3710_v23 = vpop.f32.mrf.mxu0 }
 0x307   : > { %v3903_v28 = vpop.f32.mrf.mxu1  ;;  %v9759_v25 = vadd.f32 %v3901_v17, %v3709_v55  ;;  %v3711_v27 = vadd.f32 %v3710_v23, %v9463_v4  ;;  %v10822_v55 = vpack.c.bf16 %v9329_v5, %v9334_v60 }
 0x308   : > { %v3712_v9 = vpop.f32.mrf.mxu0 }
 0x309   : > { %v3905_v48 = vpop.f32.mrf.mxu1  ;;  %v9762_v52 = vadd.f32 %v3903_v28, %v3711_v27  ;;  %v3713_v32 = vadd.f32 %v3712_v9, %v9459_v7 }
 0x30a   : > { %v9765_v26 = vpop.f32.mrf.mxu0 }
 0x30b   : > { %10818 = vst [vmem:[#allocation72_spill] sm:$0xff] %v9762_v52  ;;  %v9767_v34 = vpop.f32.mrf.mxu1  ;;  %v9769_v54 = vadd.f32 %v3905_v48, %v3713_v32  ;;  %v9779_v32 = vld [vmem:[#allocation10 + $0x70] sm:$0xff]  }
 0x30c   : > { %10819 = vst [vmem:[#allocation73_spill] sm:$0xff] %v9767_v34  ;;  %v3944_v53 = vpop.f32.mrf.mxu0  ;;  %5253 = vmatmul.mubr.bf16.gmra.mxu0 %v10821_v36  ;;  %v9781_v34 = vld [vmem:[#allocation10 + $0x30] sm:$0xff]   ;;  %7061 = vmatprep.subr.bf16.mxu0 %v9779_v32 }
 0x30d   : > { %10820 = vst [vmem:[#allocation74_spill] sm:$0xff] %v9769_v54  ;;  %v4137_v47 = vpop.f32.mrf.mxu1  ;;  %v3945_v17 = vadd.f32 %v3944_v53, %v9480_v61  ;;  %5262 = vmatprep.mubr.bf16.mxu0 %v10822_v55  ;;  %7062 = vmatpush3.bf16.msra.mxu0 %v9781_v34 }
 0x30e   : > { %v3946_v23 = vpop.f32.mrf.mxu0 }
 0x30f   : > { %v4139_v7 = vpop.f32.mrf.mxu1  ;;  %v4138_v28 = vadd.f32 %v4137_v47, %v3945_v17  ;;  %v3947_v27 = vadd.f32 %v3946_v23, %v9485_v40  ;;  %v10823_v17 = vpack.c.bf16 %v9320_v19, %v9317_v24  ;;  %v10824_v23 = vpack.c.bf16 %v9357_v13, %v9362_v51 }
 0x310   : > { %v3948_v9 = vpop.f32.mrf.mxu0 }
 0x311   : > { %v4141_v48 = vpop.f32.mrf.mxu1  ;;  %v3949_v35 = vadd.f32 %v3948_v9, %v9492_v22  ;;  %v4426_v42 = vmul.f32 0.2, %v4138_v28  ;;  %vm4298_vm0 = vcmp.gt.f32.partialorder %v4138_v28, 0.0  ;;  %v4140_v5 = vadd.f32 %v4139_v7, %v3947_v27 }
 0x312   : > { %v3950_v36 = vpop.f32.mrf.mxu0 }
 0x313   : > { %v4143_v61 = vpop.f32.mrf.mxu1  ;;  %v4142_v60 = vadd.f32 %v4141_v48, %v3949_v35  ;;  %v3951_v40 = vadd.f32 %v3950_v36, %v9499_v2  ;;  %v4554_v7 = vsel %vm4298_vm0, %v4138_v28, %v4426_v42  ;;  %v4427_v35 = vmul.f32 0.2, %v4140_v5 }
 0x314   : > { %v3954_v53 = vpop.f32.mrf.mxu0  ;;  %5263 = vmatmul.mubr.bf16.gmra.mxu0 %v10823_v17  ;;  %vm4299_vm2 = vcmp.gt.f32.partialorder %v4140_v5, 0.0 }
 0x315   : > { %v4147_v47 = vpop.f32.mrf.mxu1  ;;  %vm4302_vm1 = vcmp.gt.f32.partialorder %v4142_v60, 0.0  ;;  %v4430_v22 = vmul.f32 0.2, %v4142_v60  ;;  %v3955_v55 = vadd.f32 %v3954_v53, %v9504_v63  ;;  %5272 = vmatprep.mubr.bf16.mxu0 %v10824_v23  ;;  %v4144_v27 = vadd.f32 %v4143_v61, %v3951_v40 }
 0x316   : > { %v3956_v9 = vpop.f32.mrf.mxu0  ;;  %v4555_v40 = vsel %vm4299_vm2, %v4140_v5, %v4427_v35 }
 0x317   : > { %v4149_v48 = vpop.f32.mrf.mxu1  ;;  %v4558_v2 = vsel %vm4302_vm1, %v4142_v60, %v4430_v22  ;;  %v4148_v36 = vadd.f32 %v4147_v47, %v3955_v55  ;;  %v3957_v54 = vadd.f32 %v3956_v9, %v9507_v30  ;;  %vm4303_vm3 = vcmp.gt.f32.partialorder %v4144_v27, 0.0 }
 0x318   : > { %v4682_v19 = vpack.c.bf16 %v4558_v2, %v4554_v7  ;;  %v4431_v24 = vmul.f32 0.2, %v4144_v27  ;;  %v3958_v17 = vpop.f32.mrf.mxu0  ;;  %v10825_v22 = vpack.c.bf16 %v9348_v58, %v9345_v56  ;;  %v10826_v7 = vpack.c.bf16 %v9385_v14, %v9390_v8 }
 0x319   : > { %v4151_v52 = vpop.f32.mrf.mxu1  ;;  %v3959_v63 = vadd.f32 %v3958_v17, %v9510_v20  ;;  %v4434_v53 = vmul.f32 0.2, %v4148_v36  ;;  %vm4306_vm4 = vcmp.gt.f32.partialorder %v4148_v36, 0.0  ;;  %v4150_v42 = vadd.f32 %v4149_v48, %v3957_v54  ;;  %v7850_v54 = vld [vmem:[#allocation10 + $0x68] sm:$0xff]  }
 0x31a   : > { %v3960_v13 = vpop.f32.mrf.mxu0  ;;  %v4559_v28 = vsel %vm4303_vm3, %v4144_v27, %v4431_v24  ;;  %7063 = vmatprep.subr.bf16.mxu0 %v7850_v54 }
 0x31b   : > { %v4153_v51 = vpop.f32.mrf.mxu1  ;;  %v4152_v61 = vadd.f32 %v4151_v52, %v3959_v63  ;;  %v3961_v60 = vadd.f32 %v3960_v13, %v9515_v49  ;;  %v4683_v55 = vpack.c.bf16 %v4559_v28, %v4555_v40  ;;  %v7851_v52 = vld [vmem:[#allocation10 + $0x28] sm:$0xff]   ;;  %v4562_v5 = vsel %vm4306_vm4, %v4148_v36, %v4434_v53 }
 0x31c   : > { %v3964_v47 = vpop.f32.mrf.mxu0  ;;  %5273 = vmatmul.mubr.bf16.gmra.mxu0 %v10825_v22  ;;  %v4435_v48 = vmul.f32 0.2, %v4150_v42  ;;  %vm4307_vm6 = vcmp.gt.f32.partialorder %v4150_v42, 0.0 }
 0x31d   : > { %v4157_v30 = vpop.f32.mrf.mxu1  ;;  %vm4310_vm5 = vcmp.gt.f32.partialorder %v4152_v61, 0.0  ;;  %v4438_v23 = vmul.f32 0.2, %v4152_v61  ;;  %v3965_v20 = vadd.f32 %v3964_v47, %v9520_v3  ;;  %5282 = vmatprep.mubr.bf16.mxu0 %v10826_v7  ;;  %v4154_v27 = vadd.f32 %v4153_v51, %v3961_v60  ;;  %5365 = vmatprep.mubr.bf16.mxu1 %v4683_v55 }
 0x31e   : > { %v3966_v49 = vpop.f32.mrf.mxu0  ;;  %5366 = vmatmul.mubr.bf16.vlgmr.msra.gmra.mxu1 %v4682_v19  ;;  %7064 = vmatpush3.bf16.msra.mxu0 %v7851_v52  ;;  %v4563_v13 = vsel %vm4307_vm6, %v4150_v42, %v4435_v48  ;;  %v10828_v60 = vpack.c.bf16 %v9411_v43, %v9416_v16  ;;  %v10829_v43 = vld [vmem:[#allocation119_spill] sm:$0xff] }
 0x31f   : > { %v4159_v9 = vpop.f32.mrf.mxu1  ;;  %v4566_v35 = vsel %vm4310_vm5, %v4152_v61, %v4438_v23  ;;  %v4158_v58 = vadd.f32 %v4157_v30, %v3965_v20  ;;  %v3967_v56 = vadd.f32 %v3966_v49, %v9523_v44  ;;  %vm4311_vm7 = vcmp.gt.f32.partialorder %v4154_v27, 0.0  ;;  %7251 = vmatpush3.bf16.msra.mxu1 %v9749_v57 }
 0x320   : > { %v4686_v3 = vpack.c.bf16 %v4566_v35, %v4562_v5  ;;  %v4439_v2 = vmul.f32 0.2, %v4154_v27  ;;  %v3968_v14 = vpop.f32.mrf.mxu0  ;;  %7244 = vmatprep.subr.bf16.mxu1 %v9779_v32  ;;  %v10827_v57 = vpack.c.bf16 %v9376_v11, %v9373_v1  ;;  %v10830_v35 = vld [vmem:[#allocation122_spill] sm:$0xff] }
 0x321   : > { %v4161_v8 = vpop.f32.mrf.mxu1  ;;  %v3969_v36 = vadd.f32 %v3968_v14, %v9526_v6  ;;  %v4442_v24 = vmul.f32 0.2, %v4158_v58  ;;  %vm4314_vm8 = vcmp.gt.f32.partialorder %v4158_v58, 0.0  ;;  %v4160_v44 = vadd.f32 %v4159_v9, %v3967_v56 }
 0x322   : > { %v3970_v17 = vpop.f32.mrf.mxu0  ;;  %v4567_v19 = vsel %vm4311_vm7, %v4154_v27, %v4439_v2  ;;  %v10832_v2 = vld [vmem:[#allocation107_spill] sm:$0xff] }
 0x323   : > { %v4163_v63 = vpop.f32.mrf.mxu1  ;;  %v4162_v53 = vadd.f32 %v4161_v8, %v3969_v36  ;;  %v3971_v51 = vadd.f32 %v3970_v17, %v9531_v62  ;;  %v4687_v6 = vpack.c.bf16 %v4567_v19, %v4563_v13  ;;  %7252 = vmatpush3.bf16.msra.mxu1 %v9781_v34  ;;  %v4570_v42 = vsel %vm4314_vm8, %v4158_v58, %v4442_v24  ;;  %v10834_v36 = vld [vmem:[#allocation123_spill] sm:$0xff]  ;;  %v10835_v17 = vld [vmem:[#allocation30_spill] sm:$0xff] }
 0x324   : > { %v3974_v28 = vpop.f32.mrf.mxu0  ;;  %5283 = vmatmul.mubr.bf16.gmra.mxu0 %v10827_v57  ;;  %7245 = vmatprep.subr.bf16.mxu1 %v7850_v54  ;;  %v4443_v22 = vmul.f32 0.2, %v4160_v44  ;;  %vm4315_vm10 = vcmp.gt.f32.partialorder %v4160_v44, 0.0  ;;  %v7853_v13 = vld [vmem:[#allocation10 + $0x20] sm:$0xff]  }
 0x325   : > { %v4167_v61 = vpop.f32.mrf.mxu1  ;;  %vm4318_vm9 = vcmp.gt.f32.partialorder %v4162_v53, 0.0  ;;  %v4446_v32 = vmul.f32 0.2, %v4162_v53  ;;  %v3975_v40 = vadd.f32 %v3974_v28, %v9536_v29  ;;  %5292 = vmatprep.mubr.bf16.mxu0 %v10828_v60  ;;  %v4164_v62 = vadd.f32 %v4163_v63, %v3971_v51  ;;  %5375 = vmatprep.mubr.bf16.mxu1 %v4687_v6  ;;  %v10836_v63 = vld [vmem:[#allocation31_spill] sm:$0xff] }
 0x326   : > { %v3976_v47 = vpop.f32.mrf.mxu0  ;;  %5376 = vmatmul.mubr.bf16.gmra.mxu1 %v4686_v3  ;;  %v4571_v48 = vsel %vm4315_vm10, %v4160_v44, %v4443_v22  ;;  %v10831_v3 = vld [vmem:[#allocation28_spill] sm:$0xff]  ;;  %v10837_v19 = vpack.c.bf16 %v10835_v17, %v10836_v63  ;;  %v10838_v44 = vld [vmem:[#allocation37_spill] sm:$0xff] }
 0x327   : > { %v4169_v30 = vpop.f32.mrf.mxu1  ;;  %v4574_v11 = vsel %vm4318_vm9, %v4162_v53, %v4446_v32  ;;  %v4168_v1 = vadd.f32 %v4167_v61, %v3975_v40  ;;  %v3977_v34 = vadd.f32 %v3976_v47, %v9539_v41  ;;  %vm4319_vm11 = vcmp.gt.f32.partialorder %v4164_v62, 0.0  ;;  %7253 = vmatpush3.bf16.msra.mxu1 %v7851_v52  ;;  %v7852_v53 = vld [vmem:[#allocation10 + $0x60] sm:$0xff]  }
 0x328   : > { %v4690_v55 = vpack.c.bf16 %v4574_v11, %v4570_v42  ;;  %v4447_v29 = vmul.f32 0.2, %v4164_v62  ;;  %v3978_v23 = vpop.f32.mrf.mxu0  ;;  %v10833_v14 = vpack.c.bf16 %v10831_v3, %v10832_v2  ;;  %v3605_v51 = vadd.f32 %v10838_v44, %v9463_v4  ;;  %v10839_v42 = vld [vmem:[#allocation36_spill] sm:$0xff]  ;;  %7065 = vmatprep.subr.bf16.mxu0 %v7852_v53  ;;  %7246 = vmatprep.subr.bf16.mxu1 %v7852_v53  ;;  %v10845_v2 = vld [vmem:[#allocation39_spill] sm:$0xff] }
 0x329   : > { %v4171_v20 = vpop.f32.mrf.mxu1  ;;  %v3979_v16 = vadd.f32 %v3978_v23, %v10829_v43  ;;  %v4450_v7 = vmul.f32 0.2, %v4168_v1  ;;  %vm4322_vm12 = vcmp.gt.f32.partialorder %v4168_v1, 0.0  ;;  %v4170_v49 = vadd.f32 %v4169_v30, %v3977_v34  ;;  %7066 = vmatpush3.bf16.msra.mxu0 %v7853_v13 }
 0x32a   : > { %v3980_v54 = vpop.f32.mrf.mxu0  ;;  %v4575_v27 = vsel %vm4319_vm11, %v4164_v62, %v4447_v29  ;;  %v10841_v29 = vld [vmem:[#allocation124_spill] sm:$0xff] }
 0x32b   : > { %v4173_v5 = vpop.f32.mrf.mxu1  ;;  %v4172_v9 = vadd.f32 %v4171_v20, %v3979_v16  ;;  %v3981_v58 = vadd.f32 %v3980_v54, %v10830_v35  ;;  %v4691_v8 = vpack.c.bf16 %v4575_v27, %v4571_v48  ;;  %v4578_v28 = vsel %vm4322_vm12, %v4168_v1, %v4450_v7  ;;  %v10840_v1 = vld [vmem:[#allocation38_spill] sm:$0xff]  ;;  %7254 = vmatpush3.bf16.msra.mxu1 %v7853_v13  ;;  %v10842_v35 = vld [vmem:[#allocation108_spill] sm:$0xff] }
 0x32c   : > { %v3984_v41 = vpop.f32.mrf.mxu0  ;;  %5293 = vmatmul.mubr.bf16.gmra.mxu0 %v10833_v14  ;;  %v4451_v32 = vmul.f32 0.2, %v4170_v49  ;;  %vm4323_vm14 = vcmp.gt.f32.partialorder %v4170_v49, 0.0  ;;  %v3798_v23 = vadd.f32 %v10841_v29, %v3605_v51 }
 0x32d   : > { %v4177_v56 = vpop.f32.mrf.mxu1  ;;  %vm4326_vm13 = vcmp.gt.f32.partialorder %v4172_v9, 0.0  ;;  %v4454_v52 = vmul.f32 0.2, %v4172_v9  ;;  %v3985_v24 = vadd.f32 %v3984_v41, %v10834_v36  ;;  %5302 = vmatprep.mubr.bf16.mxu0 %v10837_v19  ;;  %v4174_v61 = vadd.f32 %v4173_v5, %v3981_v58  ;;  %5385 = vmatprep.mubr.bf16.mxu1 %v4691_v8  ;;  %v10843_v58 = vld [vmem:[#allocation29_spill] sm:$0xff]  ;;  %v10846_v8 = vld [vmem:[#allocation115_spill] sm:$0xff] }
 0x32e   : > { %v3986_v57 = vpop.f32.mrf.mxu0  ;;  %5386 = vmatmul.mubr.bf16.gmra.mxu1 %v4690_v55  ;;  %v4579_v5 = vsel %vm4323_vm14, %v4170_v49, %v4451_v32  ;;  %v10844_v41 = vpack.c.bf16 %v10842_v35, %v10843_v58  ;;  %v10857_v58 = vld [vmem:[#allocation35_spill] sm:$0xff] }
 0x32f   : > { %v4179_v6 = vpop.f32.mrf.mxu1  ;;  %v4582_v40 = vsel %vm4326_vm13, %v4172_v9, %v4454_v52  ;;  %v4178_v60 = vadd.f32 %v4177_v56, %v3985_v24  ;;  %v3987_v62 = vadd.f32 %v3986_v57, %v10839_v42  ;;  %vm4327_vm15 = vcmp.gt.f32.partialorder %v4174_v61, 0.0  ;;  %v10847_v52 = vld [vmem:[#allocation32_spill] sm:$0xff]  ;;  %v10849_v24 = vld [vmem:[#allocation41_spill] sm:$0xff]  ;;  %v10851_v42 = vld [vmem:[#allocation43_spill] sm:$0xff] }
 0x330   : > { %v4694_v47 = vpack.c.bf16 %v4582_v40, %v4578_v28  ;;  %v4455_v30 = vmul.f32 0.2, %v4174_v61  ;;  %v3988_v22 = vpop.f32.mrf.mxu0  ;;  %v10848_v36 = vpack.c.bf16 %v10846_v8, %v10847_v52  ;;  %v3615_v17 = vadd.f32 %v10849_v24, %v9463_v4  ;;  %v10850_v28 = vld [vmem:[#allocation40_spill] sm:$0xff] }
 0x331   : > { %v4181_v11 = vpop.f32.mrf.mxu1  ;;  %v3989_v34 = vadd.f32 %v3988_v22, %v10840_v1  ;;  %v4458_v20 = vmul.f32 0.2, %v4178_v60  ;;  %vm4330_vm0 = vcmp.gt.f32.partialorder %v4178_v60, 0.0  ;;  %v4180_v7 = vadd.f32 %v4179_v6, %v3987_v62 }
 0x332   : > { %v3990_v43 = vpop.f32.mrf.mxu0  ;;  %v4583_v55 = vsel %vm4327_vm15, %v4174_v61, %v4455_v30  ;;  %v10852_v30 = vld [vmem:[#allocation42_spill] sm:$0xff] }
 0x333   : > { %v4183_v16 = vpop.f32.mrf.mxu1  ;;  %v4182_v54 = vadd.f32 %v4181_v11, %v3989_v34  ;;  %v3991_v27 = vadd.f32 %v3990_v43, %v3798_v23  ;;  %v4695_v56 = vpack.c.bf16 %v4583_v55, %v4579_v5  ;;  %v4586_v49 = vsel %vm4330_vm0, %v4178_v60, %v4458_v20  ;;  %v10853_v55 = vld [vmem:[#allocation114_spill] sm:$0xff] }
 0x334   : > { %v3994_v9 = vpop.f32.mrf.mxu0  ;;  %5303 = vmatmul.mubr.bf16.gmra.mxu0 %v10844_v41  ;;  %v4459_v13 = vmul.f32 0.2, %v4180_v7  ;;  %vm4331_vm2 = vcmp.gt.f32.partialorder %v4180_v7, 0.0  ;;  %v3808_v60 = vadd.f32 %v10852_v30, %v3615_v17  ;;  %v10858_v41 = vld [vmem:[#allocation34_spill] sm:$0xff] }
 0x335   : > { %v4187_v48 = vpop.f32.mrf.mxu1  ;;  %vm4334_vm1 = vcmp.gt.f32.partialorder %v4182_v54, 0.0  ;;  %v4462_v3 = vmul.f32 0.2, %v4182_v54  ;;  %v3995_v14 = vadd.f32 %v3994_v9, %v10845_v2  ;;  %5312 = vmatprep.mubr.bf16.mxu0 %v10848_v36  ;;  %v4184_v63 = vadd.f32 %v4183_v16, %v3991_v27  ;;  %5395 = vmatprep.mubr.bf16.mxu1 %v4695_v56  ;;  %v7855_v2 = vld [vmem:[#allocation10 + $0x18] sm:$0xff]  }
 0x336   : > { %v3996_v19 = vpop.f32.mrf.mxu0  ;;  %5396 = vmatmul.mubr.bf16.gmra.mxu1 %v4694_v47  ;;  %v4587_v47 = vsel %vm4331_vm2, %v4180_v7, %v4459_v13  ;;  %v10859_v56 = vpack.c.bf16 %v10857_v58, %v10858_v41  ;;  %v10860_v7 = vld [vmem:[#allocation46_spill] sm:$0xff] }
 0x337   : > { %v4189_v53 = vpop.f32.mrf.mxu1  ;;  %v4590_v44 = vsel %vm4334_vm1, %v4182_v54, %v4462_v3  ;;  %v4188_v51 = vadd.f32 %v4187_v48, %v3995_v14  ;;  %v3997_v61 = vadd.f32 %v3996_v19, %v10850_v28  ;;  %vm4335_vm3 = vcmp.gt.f32.partialorder %v4184_v63, 0.0  ;;  %v10854_v54 = vld [vmem:[#allocation111_spill] sm:$0xff]  ;;  %v10856_v48 = vld [vmem:[#allocation44_spill] sm:$0xff]  ;;  %v7854_v3 = vld [vmem:[#allocation10 + $0x58] sm:$0xff]  }
 0x338   : > { %v4698_v57 = vpack.c.bf16 %v4590_v44, %v4586_v49  ;;  %v4463_v6 = vmul.f32 0.2, %v4184_v63  ;;  %v3998_v32 = vpop.f32.mrf.mxu0  ;;  %v10855_v5 = vpack.c.bf16 %v10853_v55, %v10854_v54  ;;  %v3625_v14 = vadd.f32 %v10860_v7, %v9463_v4  ;;  %v10861_v19 = vld [vmem:[#allocation45_spill] sm:$0xff]  ;;  %7067 = vmatprep.subr.bf16.mxu0 %v7854_v3  ;;  %7247 = vmatprep.subr.bf16.mxu1 %v7854_v3  ;;  %v10867_v54 = vld [vmem:[#allocation48_spill] sm:$0xff] }
 0x339   : > { %v4191_v40 = vpop.f32.mrf.mxu1  ;;  %v3999_v62 = vadd.f32 %v3998_v32, %v10851_v42  ;;  %v4466_v22 = vmul.f32 0.2, %v4188_v51  ;;  %vm4338_vm4 = vcmp.gt.f32.partialorder %v4188_v51, 0.0  ;;  %v4190_v29 = vadd.f32 %v4189_v53, %v3997_v61  ;;  %7068 = vmatpush3.bf16.msra.mxu0 %v7855_v2  ;;  %7255 = vmatpush3.bf16.msra.mxu1 %v7855_v2  ;;  %v10863_v32 = vld [vmem:[#allocation47_spill] sm:$0xff]  ;;  %v10869_v2 = vld [vmem:[#allocation49_spill] sm:$0xff] }
 0x33a   : > { %v4000_v11 = vpop.f32.mrf.mxu0  ;;  %v4591_v34 = vsel %vm4335_vm3, %v4184_v63, %v4463_v6 }
 0x33b   : > { %v4193_v1 = vpop.f32.mrf.mxu1  ;;  %v4192_v23 = vadd.f32 %v4191_v40, %v3999_v62  ;;  %v4001_v20 = vadd.f32 %v4000_v11, %v3808_v60  ;;  %v4699_v27 = vpack.c.bf16 %v4591_v34, %v4587_v47  ;;  %v4594_v8 = vsel %vm4338_vm4, %v4188_v51, %v4466_v22  ;;  %v10862_v51 = vld [vmem:[#allocation131_spill] sm:$0xff]  ;;  %v10864_v47 = vld [vmem:[#allocation116_spill] sm:$0xff] }
 0x33c   : > { %v4004_v43 = vpop.f32.mrf.mxu0  ;;  %5313 = vmatmul.mubr.bf16.gmra.mxu0 %v10855_v5  ;;  %v4467_v17 = vmul.f32 0.2, %v4190_v29  ;;  %vm4339_vm6 = vcmp.gt.f32.partialorder %v4190_v29, 0.0  ;;  %v3818_v40 = vadd.f32 %v10863_v32, %v3625_v14 }
 0x33d   : > { %v4197_v16 = vpop.f32.mrf.mxu1  ;;  %vm4342_vm5 = vcmp.gt.f32.partialorder %v4192_v23, 0.0  ;;  %v4470_v9 = vmul.f32 0.2, %v4192_v23  ;;  %v4005_v35 = vadd.f32 %v4004_v43, %v10856_v48  ;;  %5322 = vmatprep.mubr.bf16.mxu0 %v10859_v56  ;;  %v4194_v52 = vadd.f32 %v4193_v1, %v4001_v20  ;;  %5405 = vmatprep.mubr.bf16.mxu1 %v4699_v27  ;;  %v10865_v20 = vld [vmem:[#allocation33_spill] sm:$0xff]  ;;  %v10868_v27 = vld [vmem:[#allocation132_spill] sm:$0xff] }
 0x33e   : > { %v4006_v36 = vpop.f32.mrf.mxu0  ;;  %5406 = vmatmul.mubr.bf16.gmra.mxu1 %v4698_v57  ;;  %v4595_v11 = vsel %vm4339_vm6, %v4190_v29, %v4467_v17  ;;  %v10866_v43 = vpack.c.bf16 %v10864_v47, %v10865_v20 }
 0x33f   : > { %v4199_v24 = vpop.f32.mrf.mxu1  ;;  %v4598_v49 = vsel %vm4342_vm5, %v4192_v23, %v4470_v9  ;;  %v4198_v63 = vadd.f32 %v4197_v16, %v4005_v35  ;;  %v4007_v53 = vadd.f32 %v4006_v36, %v10861_v19  ;;  %vm4343_vm7 = vcmp.gt.f32.partialorder %v4194_v52, 0.0 }
 0x340   : > { %v4702_v13 = vpack.c.bf16 %v4598_v49, %v4594_v8  ;;  %v4471_v44 = vmul.f32 0.2, %v4194_v52  ;;  %v4008_v28 = vpop.f32.mrf.mxu0  ;;  %v3635_v9 = vadd.f32 %v10868_v27, %v9463_v4  ;;  %v10871_v49 = vld [vmem:[#allocation50_spill] sm:$0xff] }
 0x341   : > { %v4201_v61 = vpop.f32.mrf.mxu1  ;;  %v4009_v6 = vadd.f32 %v4008_v28, %v10862_v51  ;;  %v4474_v42 = vmul.f32 0.2, %v4198_v63  ;;  %vm4346_vm8 = vcmp.gt.f32.partialorder %v4198_v63, 0.0  ;;  %v4200_v60 = vadd.f32 %v4199_v24, %v4007_v53  ;;  %v10870_v24 = vld [vmem:[#allocation51_spill] sm:$0xff] }
 0x342   : > { %v4010_v62 = vpop.f32.mrf.mxu0  ;;  %v4599_v57 = vsel %vm4343_vm7, %v4194_v52, %v4471_v44 }
 0x343   : > { %v4203_v30 = vpop.f32.mrf.mxu1  ;;  %v4202_v22 = vadd.f32 %v4201_v61, %v4009_v6  ;;  %v4011_v1 = vadd.f32 %v4010_v62, %v3818_v40  ;;  %v4703_v16 = vpack.c.bf16 %v4599_v57, %v4595_v11  ;;  %v4602_v48 = vsel %vm4346_vm8, %v4198_v63, %v4474_v42  ;;  %v7857_v11 = vld [vmem:[#allocation10 + $0x10] sm:$0xff]  }
 0x344   : > { %v4014_v34 = vpop.f32.mrf.mxu0  ;;  %5323 = vmatmul.mubr.bf16.gmra.mxu0 %v10866_v43  ;;  %v4475_v41 = vmul.f32 0.2, %v4200_v60  ;;  %vm4347_vm10 = vcmp.gt.f32.partialorder %v4200_v60, 0.0  ;;  %v3828_v63 = vadd.f32 %v10871_v49, %v3635_v9 }
 0x345   : > { %v4207_v23 = vpop.f32.mrf.mxu1  ;;  %vm4350_vm9 = vcmp.gt.f32.partialorder %v4202_v22, 0.0  ;;  %v4478_v55 = vmul.f32 0.2, %v4202_v22  ;;  %v4015_v5 = vadd.f32 %v4014_v34, %v10867_v54  ;;  %v4204_v35 = vadd.f32 %v4203_v30, %v4011_v1  ;;  %5415 = vmatprep.mubr.bf16.mxu1 %v4703_v16  ;;  %v10872_v30 = vld [vmem:[#allocation52_spill] sm:$0xff]  ;;  %v10873_v1 = vld [vmem:[#allocation54_spill] sm:$0xff]  ;;  %v10874_v54 = vld [vmem:[#allocation53_spill] sm:$0xff] }
 0x346   : > { %v4016_v58 = vpop.f32.mrf.mxu0  ;;  %5416 = vmatmul.mubr.bf16.gmra.mxu1 %v4702_v13  ;;  %v4603_v13 = vsel %vm4347_vm10, %v4200_v60, %v4475_v41  ;;  %v3645_v34 = vadd.f32 %v10873_v1, %v9463_v4  ;;  %v10876_v41 = vld [vmem:[#allocation55_spill] sm:$0xff] }
 0x347   : > { %v4209_v29 = vpop.f32.mrf.mxu1  ;;  %v4606_v56 = vsel %vm4350_vm9, %v4202_v22, %v4478_v55  ;;  %v4208_v3 = vadd.f32 %v4207_v23, %v4015_v5  ;;  %v4017_v7 = vadd.f32 %v4016_v58, %v10869_v2  ;;  %vm4351_vm11 = vcmp.gt.f32.partialorder %v4204_v35, 0.0  ;;  %v7856_v22 = vld [vmem:[#allocation10 + $0x50] sm:$0xff]   ;;  %v10875_v58 = vld [vmem:[#allocation56_spill] sm:$0xff] }
 0x348   : > { %v4706_v14 = vpack.c.bf16 %v4606_v56, %v4602_v48  ;;  %v4479_v8 = vmul.f32 0.2, %v4204_v35  ;;  %v4018_v52 = vpop.f32.mrf.mxu0  ;;  %7069 = vmatprep.subr.bf16.mxu0 %v7856_v22  ;;  %7248 = vmatprep.subr.bf16.mxu1 %v7856_v22  ;;  %v3838_v56 = vadd.f32 %v10876_v41, %v3645_v34 }
 0x349   : > { %v4211_v36 = vpop.f32.mrf.mxu1  ;;  %v4019_v17 = vadd.f32 %v4018_v52, %v10870_v24  ;;  %v4482_v19 = vmul.f32 0.2, %v4208_v3  ;;  %vm4354_vm12 = vcmp.gt.f32.partialorder %v4208_v3, 0.0  ;;  %v4210_v61 = vadd.f32 %v4209_v29, %v4017_v7  ;;  %7070 = vmatpush3.bf16.msra.mxu0 %v7857_v11  ;;  %7256 = vmatpush3.bf16.msra.mxu1 %v7857_v11  ;;  %v10878_v11 = vld [vmem:[#allocation59_spill] sm:$0xff] }
 0x34a   : > { %v4020_v53 = vpop.f32.mrf.mxu0  ;;  %v4607_v28 = vsel %vm4351_vm11, %v4204_v35, %v4479_v8 }
 0x34b   : > { %v4213_v44 = vpop.f32.mrf.mxu1  ;;  %v4212_v51 = vadd.f32 %v4211_v36, %v4019_v17  ;;  %v4021_v6 = vadd.f32 %v4020_v53, %v3828_v63  ;;  %v4707_v42 = vpack.c.bf16 %v4607_v28, %v4603_v13  ;;  %v4610_v23 = vsel %vm4354_vm12, %v4208_v3, %v4482_v19 }
 0x34c   : > { %v4024_v32 = vpop.f32.mrf.mxu0  ;;  %v4483_v16 = vmul.f32 0.2, %v4210_v61  ;;  %vm4355_vm14 = vcmp.gt.f32.partialorder %v4210_v61, 0.0 }
 0x34d   : > { %v4217_v40 = vpop.f32.mrf.mxu1  ;;  %vm4358_vm13 = vcmp.gt.f32.partialorder %v4212_v51, 0.0  ;;  %v4486_v62 = vmul.f32 0.2, %v4212_v51  ;;  %v4025_v57 = vadd.f32 %v4024_v32, %v10872_v30  ;;  %v4214_v47 = vadd.f32 %v4213_v44, %v4021_v6  ;;  %5425 = vmatprep.mubr.bf16.mxu1 %v4707_v42 }
 0x34e   : > { %v4026_v20 = vpop.f32.mrf.mxu0  ;;  %5426 = vmatmul.mubr.bf16.gmra.mxu1 %v4706_v14  ;;  %v4611_v36 = vsel %vm4355_vm14, %v4210_v61, %v4483_v16  ;;  %v3655_v44 = vadd.f32 %v9648_v37, %v9463_v4  ;;  %v10877_v61 = vld [vmem:[#allocation57_spill] sm:$0xff]  ;;  %v10879_v37 = vld [vmem:[#allocation58_spill] sm:$0xff] }
 0x34f   : > { %v4219_v43 = vpop.f32.mrf.mxu1  ;;  %v4614_v60 = vsel %vm4358_vm13, %v4212_v51, %v4486_v62  ;;  %v4218_v55 = vadd.f32 %v4217_v40, %v4025_v57  ;;  %v4027_v5 = vadd.f32 %v4026_v20, %v10874_v54  ;;  %vm4359_vm15 = vcmp.gt.f32.partialorder %v4214_v47, 0.0 }
 0x350   : > { %v4710_v27 = vpack.c.bf16 %v4614_v60, %v4610_v23  ;;  %v4487_v9 = vmul.f32 0.2, %v4214_v47  ;;  %v4028_v48 = vpop.f32.mrf.mxu0  ;;  %v3848_v34 = vadd.f32 %v10879_v37, %v3655_v44 }
 0x351   : > { %v4221_v35 = vpop.f32.mrf.mxu1  ;;  %v4029_v29 = vadd.f32 %v4028_v48, %v10875_v58  ;;  %v4490_v3 = vmul.f32 0.2, %v4218_v55  ;;  %vm4362_vm0 = vcmp.gt.f32.partialorder %v4218_v55, 0.0  ;;  %v4220_v8 = vadd.f32 %v4219_v43, %v4027_v5  ;;  %v7858_v58 = vld [vmem:[#allocation10 + $0x48] sm:$0xff]  }
 0x352   : > { %v4030_v2 = vpop.f32.mrf.mxu0  ;;  %v4615_v14 = vsel %vm4359_vm15, %v4214_v47, %v4487_v9  ;;  %7071 = vmatprep.subr.bf16.mxu0 %v7858_v58  ;;  %7249 = vmatprep.subr.bf16.mxu1 %v7858_v58 }
 0x353   : > { %v4223_v7 = vpop.f32.mrf.mxu1  ;;  %v4222_v52 = vadd.f32 %v4221_v35, %v4029_v29  ;;  %v4031_v24 = vadd.f32 %v4030_v2, %v3838_v56  ;;  %v4711_v63 = vpack.c.bf16 %v4615_v14, %v4611_v36  ;;  %v4618_v28 = vsel %vm4362_vm0, %v4218_v55, %v4490_v3 }
 0x354   : > { %v4034_v17 = vpop.f32.mrf.mxu0  ;;  %v4491_v32 = vmul.f32 0.2, %v4220_v8  ;;  %vm4363_vm2 = vcmp.gt.f32.partialorder %v4220_v8, 0.0  ;;  %v3665_v29 = vadd.f32 %v9667_v10, %v9463_v4  ;;  %v10881_v10 = vld [vmem:[#allocation62_spill] sm:$0xff] }
 0x355   : > { %v4227_v49 = vpop.f32.mrf.mxu1  ;;  %vm4366_vm1 = vcmp.gt.f32.partialorder %v4222_v52, 0.0  ;;  %v4494_v19 = vmul.f32 0.2, %v4222_v52  ;;  %v4035_v53 = vadd.f32 %v4034_v17, %v9642_v18  ;;  %v4224_v51 = vadd.f32 %v4223_v7, %v4031_v24  ;;  %5435 = vmatprep.mubr.bf16.mxu1 %v4711_v63 }
 0x356   : > { %v4036_v13 = vpop.f32.mrf.mxu0  ;;  %5436 = vmatmul.mubr.bf16.gmra.mxu1 %v4710_v27  ;;  %v4619_v55 = vsel %vm4363_vm2, %v4220_v8, %v4491_v32 }
 0x357   : > { %v4229_v6 = vpop.f32.mrf.mxu1  ;;  %v4622_v40 = vsel %vm4366_vm1, %v4222_v52, %v4494_v19  ;;  %v4228_v42 = vadd.f32 %v4227_v49, %v4035_v53  ;;  %v4037_v62 = vadd.f32 %v4036_v13, %v10877_v61  ;;  %vm4367_vm3 = vcmp.gt.f32.partialorder %v4224_v51, 0.0  ;;  %v10880_v52 = vld [vmem:[#allocation60_spill] sm:$0xff]  ;;  %v10882_v19 = vld [vmem:[#allocation61_spill] sm:$0xff] }
 0x358   : > { %v4714_v30 = vpack.c.bf16 %v4622_v40, %v4618_v28  ;;  %v4495_v57 = vmul.f32 0.2, %v4224_v51  ;;  %v4038_v22 = vpop.f32.mrf.mxu0  ;;  %v3858_v53 = vadd.f32 %v10882_v19, %v3665_v29 }
 0x359   : > { %v4231_v18 = vpop.f32.mrf.mxu1  ;;  %v4039_v1 = vadd.f32 %v4038_v22, %v10878_v11  ;;  %v4498_v23 = vmul.f32 0.2, %v4228_v42  ;;  %vm4370_vm4 = vcmp.gt.f32.partialorder %v4228_v42, 0.0  ;;  %v4230_v16 = vadd.f32 %v4229_v6, %v4037_v62 }
 0x35a   : > { %v4040_v47 = vpop.f32.mrf.mxu0  ;;  %v4623_v43 = vsel %vm4367_vm3, %v4224_v51, %v4495_v57  ;;  %v7859_v57 = vld [vmem:[#allocation10 + $0x8] sm:$0xff]   ;;  %v3675_v11 = vadd.f32 %v9686_v33, %v9463_v4 }
 0x35b   : > { %v4233_v20 = vpop.f32.mrf.mxu1  ;;  %v4232_v60 = vadd.f32 %v4231_v18, %v4039_v1  ;;  %v4041_v54 = vadd.f32 %v4040_v47, %v3848_v34  ;;  %v4715_v9 = vpack.c.bf16 %v4623_v43, %v4619_v55  ;;  %v4626_v41 = vsel %vm4370_vm4, %v4228_v42, %v4498_v23  ;;  %7072 = vmatpush3.bf16.msra.mxu0 %v7859_v57 }
 0x35c   : > { %v4044_v5 = vpop.f32.mrf.mxu0  ;;  %v4499_v7 = vmul.f32 0.2, %v4230_v16  ;;  %vm4371_vm6 = vcmp.gt.f32.partialorder %v4230_v16, 0.0  ;;  %7257 = vmatpush3.bf16.msra.mxu1 %v7859_v57 }
 0x35d   : > { %v4237_v27 = vpop.f32.mrf.mxu1  ;;  %vm4374_vm5 = vcmp.gt.f32.partialorder %v4232_v60, 0.0  ;;  %v4502_v48 = vmul.f32 0.2, %v4232_v60  ;;  %v4045_v35 = vadd.f32 %v4044_v5, %v9661_v0  ;;  %v4234_v56 = vadd.f32 %v4233_v20, %v4041_v54  ;;  %5445 = vmatprep.mubr.bf16.mxu1 %v4715_v9  ;;  %v7860_v5 = vld [vmem:[#allocation10 + $0x40] sm:$0xff]  }
 0x35e   : > { %v4046_v3 = vpop.f32.mrf.mxu0  ;;  %5446 = vmatmul.mubr.bf16.gmra.mxu1 %v4714_v30  ;;  %v4627_v40 = vsel %vm4371_vm6, %v4230_v16, %v4499_v7  ;;  %v10883_v9 = vld [vmem:[#allocation63_spill] sm:$0xff]  ;;  %7073 = vmatprep.subr.bf16.mxu0 %v7860_v5 }
 0x35f   : > { %v4239_v2 = vpop.f32.mrf.mxu1  ;;  %v4630_v14 = vsel %vm4374_vm5, %v4232_v60, %v4502_v48  ;;  %v4238_v8 = vadd.f32 %v4237_v27, %v4045_v35  ;;  %v4047_v36 = vadd.f32 %v4046_v3, %v10880_v52  ;;  %vm4375_vm7 = vcmp.gt.f32.partialorder %v4234_v56, 0.0  ;;  %v7861_v27 = vld [vmem:[#allocation10] sm:$0xff]   ;;  %7250 = vmatprep.subr.bf16.mxu1 %v7860_v5 }
 0x360   : > { %v4718_v24 = vpack.c.bf16 %v4630_v14, %v4626_v41  ;;  %v4503_v0 = vmul.f32 0.2, %v4234_v56  ;;  %v4048_v17 = vpop.f32.mrf.mxu0  ;;  %v3868_v48 = vadd.f32 %v10883_v9, %v3675_v11  ;;  %7074 = vmatpush3.bf16.msra.mxu0 %v7861_v27  ;;  %7258 = vmatpush3.bf16.msra.mxu1 %v7861_v27  ;;  %v10888_v9 = vld [vmem:[#allocation68_spill] sm:$0xff] }
 0x361   : > { %v4241_v49 = vpop.f32.mrf.mxu1  ;;  %v4049_v63 = vadd.f32 %v4048_v17, %v10881_v10  ;;  %v4506_v44 = vmul.f32 0.2, %v4238_v8  ;;  %vm4378_vm8 = vcmp.gt.f32.partialorder %v4238_v8, 0.0  ;;  %v4240_v6 = vadd.f32 %v4239_v2, %v4047_v36  ;;  %v10884_v36 = vld [vmem:[#allocation65_spill] sm:$0xff] }
 0x362   : > { %v4050_v28 = vpop.f32.mrf.mxu0  ;;  %v4631_v13 = vsel %vm4375_vm7, %v4234_v56, %v4503_v0 }
 0x363   : > { %v4243_v51 = vpop.f32.mrf.mxu1  ;;  %v4242_v32 = vadd.f32 %v4241_v49, %v4049_v63  ;;  %v4051_v42 = vadd.f32 %v4050_v28, %v3858_v53  ;;  %v4719_v30 = vpack.c.bf16 %v4631_v13, %v4627_v40  ;;  %v4634_v1 = vsel %vm4378_vm8, %v4238_v8, %v4506_v44  ;;  %v10885_v44 = vld [vmem:[#allocation64_spill] sm:$0xff] }
 0x364   : > { %v4054_v61 = vpop.f32.mrf.mxu0  ;;  %v4507_v47 = vmul.f32 0.2, %v4240_v6  ;;  %vm4379_vm10 = vcmp.gt.f32.partialorder %v4240_v6, 0.0 }
 0x365   : > { %v4247_v62 = vpop.f32.mrf.mxu1  ;;  %vm4382_vm9 = vcmp.gt.f32.partialorder %v4242_v32, 0.0  ;;  %v4510_v22 = vmul.f32 0.2, %v4242_v32  ;;  %v4055_v18 = vadd.f32 %v4054_v61, %v9680_v38  ;;  %v4244_v37 = vadd.f32 %v4243_v51, %v4051_v42  ;;  %5455 = vmatprep.mubr.bf16.mxu1 %v4719_v30  ;;  %v10887_v42 = vld [vmem:[#allocation66_spill] sm:$0xff] }
 0x366   : > { %v4056_v34 = vpop.f32.mrf.mxu0  ;;  %5456 = vmatmul.mubr.bf16.gmra.mxu1 %v4718_v24  ;;  %v4635_v3 = vsel %vm4379_vm10, %v4240_v6, %v4507_v47  ;;  %v3685_v24 = vadd.f32 %v10884_v36, %v9463_v4 }
 0x367   : > { %v4249_v23 = vpop.f32.mrf.mxu1  ;;  %v4638_v20 = vsel %vm4382_vm9, %v4242_v32, %v4510_v22  ;;  %v4248_v43 = vadd.f32 %v4247_v62, %v4055_v18  ;;  %v4057_v16 = vadd.f32 %v4056_v34, %v9683_v46  ;;  %vm4383_vm11 = vcmp.gt.f32.partialorder %v4244_v37, 0.0  ;;  %v10886_v32 = vld [vmem:[#allocation67_spill] sm:$0xff] }
 0x368   : > { %v4722_v60 = vpack.c.bf16 %v4638_v20, %v4634_v1  ;;  %v4511_v55 = vmul.f32 0.2, %v4244_v37  ;;  %v4058_v38 = vpop.f32.mrf.mxu0  ;;  %v3878_v61 = vadd.f32 %v10887_v42, %v3685_v24 }
 0x369   : > { %v4251_v54 = vpop.f32.mrf.mxu1  ;;  %v4059_v33 = vadd.f32 %v4058_v38, %v9690_v31  ;;  %v4514_v35 = vmul.f32 0.2, %v4248_v43  ;;  %vm4386_vm12 = vcmp.gt.f32.partialorder %v4248_v43, 0.0  ;;  %v4250_v46 = vadd.f32 %v4249_v23, %v4057_v16 }
 0x36a   : > { %v4060_v58 = vpop.f32.mrf.mxu0  ;;  %v4639_v41 = vsel %vm4383_vm11, %v4244_v37, %v4511_v55  ;;  %v3695_v16 = vadd.f32 %v9724_v39, %v9463_v4  ;;  %v10890_v39 = vld [vmem:[#allocation69_spill] sm:$0xff] }
 0x36b   : > { %v4253_v29 = vpop.f32.mrf.mxu1  ;;  %v4252_v56 = vadd.f32 %v4251_v54, %v4059_v33  ;;  %v4061_v2 = vadd.f32 %v4060_v58, %v3868_v48  ;;  %v4723_v8 = vpack.c.bf16 %v4639_v41, %v4635_v3  ;;  %v4642_v0 = vsel %vm4386_vm12, %v4248_v43, %v4514_v35  ;;  %v10889_v41 = vld [vmem:[#allocation70_spill] sm:$0xff] }
 0x36c   : > { %v4064_v7 = vpop.f32.mrf.mxu0  ;;  %v4515_v63 = vmul.f32 0.2, %v4250_v46  ;;  %vm4387_vm14 = vcmp.gt.f32.partialorder %v4250_v46, 0.0 }
 0x36d   : > { %v4257_v14 = vpop.f32.mrf.mxu1  ;;  %vm4390_vm13 = vcmp.gt.f32.partialorder %v4252_v56, 0.0  ;;  %v4518_v31 = vmul.f32 0.2, %v4252_v56  ;;  %v4065_v52 = vadd.f32 %v4064_v7, %v9699_v59  ;;  %v4254_v17 = vadd.f32 %v4253_v29, %v4061_v2  ;;  %5465 = vmatprep.mubr.bf16.mxu1 %v4723_v8 }
 0x36e   : > { %v4066_v49 = vpop.f32.mrf.mxu0  ;;  %5466 = vmatmul.mubr.bf16.gmra.mxu1 %v4722_v60  ;;  %v4643_v1 = vsel %vm4387_vm14, %v4250_v46, %v4515_v63  ;;  %v3705_v63 = vadd.f32 %v9743_v45, %v9463_v4  ;;  %v10891_v45 = vld [vmem:[#allocation71_spill] sm:$0xff] }
 0x36f   : > { %v4259_v10 = vpop.f32.mrf.mxu1  ;;  %v4646_v19 = vsel %vm4390_vm13, %v4252_v56, %v4518_v31  ;;  %v4258_v53 = vadd.f32 %v4257_v14, %v4065_v52  ;;  %v4067_v28 = vadd.f32 %v4066_v49, %v10885_v44  ;;  %vm4391_vm15 = vcmp.gt.f32.partialorder %v4254_v17, 0.0 }
 0x370   : > { %v4726_v51 = vpack.c.bf16 %v4646_v19, %v4642_v0  ;;  %v4519_v13 = vmul.f32 0.2, %v4254_v17  ;;  %v4068_v6 = vpop.f32.mrf.mxu0  ;;  %v3888_v56 = vadd.f32 %v10890_v39, %v3695_v16 }
 0x371   : > { %v4261_v59 = vpop.f32.mrf.mxu1  ;;  %v4069_v40 = vadd.f32 %v4068_v6, %v10886_v32  ;;  %v4522_v62 = vmul.f32 0.2, %v4258_v53  ;;  %vm4394_vm0 = vcmp.gt.f32.partialorder %v4258_v53, 0.0  ;;  %v4260_v18 = vadd.f32 %v4259_v10, %v4067_v28 }
 0x372   : > { %v4070_v30 = vpop.f32.mrf.mxu0  ;;  %v4647_v22 = vsel %vm4391_vm15, %v4254_v17, %v4519_v13 }
 0x373   : > { %v4263_v57 = vpop.f32.mrf.mxu1  ;;  %v4262_v11 = vadd.f32 %v4261_v59, %v4069_v40  ;;  %v4071_v37 = vadd.f32 %v4070_v30, %v3878_v61  ;;  %v4727_v47 = vpack.c.bf16 %v4647_v22, %v4643_v1  ;;  %v4650_v60 = vsel %vm4394_vm0, %v4258_v53, %v4522_v62 }
 0x374   : > { %v4074_v34 = vpop.f32.mrf.mxu0  ;;  %v4523_v5 = vmul.f32 0.2, %v4260_v18  ;;  %vm4395_vm2 = vcmp.gt.f32.partialorder %v4260_v18, 0.0  ;;  %v3898_v62 = vadd.f32 %v10891_v45, %v3705_v63 }
 0x375   : > { %v4267_v23 = vpop.f32.mrf.mxu1  ;;  %vm4398_vm1 = vcmp.gt.f32.partialorder %v4262_v11, 0.0  ;;  %v4526_v20 = vmul.f32 0.2, %v4262_v11  ;;  %v4075_v43 = vadd.f32 %v4074_v34, %v9718_v12  ;;  %v4264_v55 = vadd.f32 %v4263_v57, %v4071_v37  ;;  %5475 = vmatprep.mubr.bf16.mxu1 %v4727_v47 }
 0x376   : > { %v4076_v38 = vpop.f32.mrf.mxu0  ;;  %5476 = vmatmul.mubr.bf16.gmra.mxu1 %v4726_v51  ;;  %v4651_v52 = vsel %vm4395_vm2, %v4260_v18, %v4523_v5 }
 0x377   : > { %v4269_v54 = vpop.f32.mrf.mxu1  ;;  %v4654_v33 = vsel %vm4398_vm1, %v4262_v11, %v4526_v20  ;;  %v4268_v27 = vadd.f32 %v4267_v23, %v4075_v43  ;;  %v4077_v48 = vadd.f32 %v4076_v38, %v10888_v9  ;;  %vm4399_vm3 = vcmp.gt.f32.partialorder %v4264_v55, 0.0 }
 0x378   : > { %v4730_v35 = vpack.c.bf16 %v4654_v33, %v4650_v60  ;;  %v4527_v58 = vmul.f32 0.2, %v4264_v55  ;;  %v4078_v29 = vpop.f32.mrf.mxu0 }
 0x379   : > { %v4271_v12 = vpop.f32.mrf.mxu1  ;;  %v4079_v46 = vadd.f32 %v4078_v29, %v10889_v41  ;;  %v4530_v3 = vmul.f32 0.2, %v4268_v27  ;;  %vm4402_vm4 = vcmp.gt.f32.partialorder %v4268_v27, 0.0  ;;  %v4270_v8 = vadd.f32 %v4269_v54, %v4077_v48 }
 0x37a   : > { %v4080_v2 = vpop.f32.mrf.mxu0  ;;  %v4655_v14 = vsel %vm4399_vm3, %v4264_v55, %v4527_v58 }
 0x37b   : > { %v4273_v7 = vpop.f32.mrf.mxu1  ;;  %v4272_v31 = vadd.f32 %v4271_v12, %v4079_v46  ;;  %v4081_v36 = vadd.f32 %v4080_v2, %v3888_v56  ;;  %v4731_v17 = vpack.c.bf16 %v4655_v14, %v4651_v52  ;;  %v4658_v19 = vsel %vm4402_vm4, %v4268_v27, %v4530_v3  ;;  %v10892_v27 = vld [vmem:[#allocation72_spill] sm:$0xff] }
 0x37c   : > { %v4084_v24 = vpop.f32.mrf.mxu0  ;;  %v4531_v51 = vmul.f32 0.2, %v4270_v8  ;;  %vm4403_vm6 = vcmp.gt.f32.partialorder %v4270_v8, 0.0 }
 0x37d   : > { %v4277_v0 = vpop.f32.mrf.mxu1  ;;  %vm4406_vm5 = vcmp.gt.f32.partialorder %v4272_v31, 0.0  ;;  %v4534_v49 = vmul.f32 0.2, %v4272_v31  ;;  %v4085_v10 = vadd.f32 %v4084_v24, %v9737_v50  ;;  %v4274_v53 = vadd.f32 %v4273_v7, %v4081_v36  ;;  %5485 = vmatprep.mubr.bf16.mxu1 %v4731_v17 }
 0x37e   : > { %v4086_v44 = vpop.f32.mrf.mxu0  ;;  %5486 = vmatmul.mubr.bf16.gmra.mxu1 %v4730_v35  ;;  %v4659_v37 = vsel %vm4403_vm6, %v4270_v8, %v4531_v51 }
 0x37f   : > { %v4279_v28 = vpop.f32.mrf.mxu1  ;;  %v4662_v13 = vsel %vm4406_vm5, %v4272_v31, %v4534_v49  ;;  %v4278_v6 = vadd.f32 %v4277_v0, %v4085_v10  ;;  %v4087_v59 = vadd.f32 %v4086_v44, %v9740_v15  ;;  %vm4407_vm7 = vcmp.gt.f32.partialorder %v4274_v53, 0.0 }
 0x380   : > { %v4734_v32 = vpack.c.bf16 %v4662_v13, %v4658_v19  ;;  %v4535_v40 = vmul.f32 0.2, %v4274_v53  ;;  %v4088_v42 = vpop.f32.mrf.mxu0 }
 0x381   : > { %v4281_v50 = vpop.f32.mrf.mxu1  ;;  %v4089_v61 = vadd.f32 %v4088_v42, %v9747_v21  ;;  %v4538_v30 = vmul.f32 0.2, %v4278_v6  ;;  %vm4410_vm8 = vcmp.gt.f32.partialorder %v4278_v6, 0.0  ;;  %v4280_v11 = vadd.f32 %v4279_v28, %v4087_v59 }
 0x382   : > { %v4090_v57 = vpop.f32.mrf.mxu0  ;;  %v4663_v18 = vsel %vm4407_vm7, %v4274_v53, %v4535_v40  ;;  %v3715_v21 = vadd.f32 %v9765_v26, %v9463_v4  ;;  %v10894_v4 = vld [vmem:[#allocation73_spill] sm:$0xff] }
 0x383   : > { %v4283_v22 = vpop.f32.mrf.mxu1  ;;  %v4282_v1 = vadd.f32 %v4281_v50, %v4089_v61  ;;  %v4091_v34 = vadd.f32 %v4090_v57, %v3898_v62  ;;  %v4735_v47 = vpack.c.bf16 %v4663_v18, %v4659_v37  ;;  %v4666_v16 = vsel %vm4410_vm8, %v4278_v6, %v4538_v30 }
 0x384   : > { %v4094_v15 = vpop.f32.mrf.mxu0  ;;  %v4539_v54 = vmul.f32 0.2, %v4280_v11  ;;  %vm4411_vm10 = vcmp.gt.f32.partialorder %v4280_v11, 0.0  ;;  %v3908_v26 = vadd.f32 %v10894_v4, %v3715_v21 }
 0x385   : > { %v4287_v23 = vpop.f32.mrf.mxu1  ;;  %vm4414_vm9 = vcmp.gt.f32.partialorder %v4282_v1, 0.0  ;;  %v4542_v20 = vmul.f32 0.2, %v4282_v1  ;;  %v4095_v43 = vadd.f32 %v4094_v15, %v9759_v25  ;;  %v4284_v60 = vadd.f32 %v4283_v22, %v4091_v34  ;;  %5495 = vmatprep.mubr.bf16.mxu1 %v4735_v47  ;;  %v10893_v25 = vld [vmem:[#allocation74_spill] sm:$0xff] }
 0x386   : > { %v4096_v55 = vpop.f32.mrf.mxu0  ;;  %5496 = vmatmul.mubr.bf16.gmra.mxu1 %v4734_v32  ;;  %v4667_v2 = vsel %vm4411_vm10, %v4280_v11, %v4539_v54  ;;  %v4808_v54 = vld [vmem:[%s10315_s4] sm:$0x3] }
 0x387   : > { %v4289_v38 = vpop.f32.mrf.mxu1  ;;  %v4670_v5 = vsel %vm4414_vm9, %v4282_v1, %v4542_v20  ;;  %v4288_v33 = vadd.f32 %v4287_v23, %v4095_v43  ;;  %v4097_v9 = vadd.f32 %v4096_v55, %v10892_v27  ;;  %vm4415_vm11 = vcmp.gt.f32.partialorder %v4284_v60, 0.0 }
 0x388   : > { %v4738_v48 = vpack.c.bf16 %v4670_v5, %v4666_v16  ;;  %v4543_v35 = vmul.f32 0.2, %v4284_v60  ;;  %v4098_v58 = vpop.f32.mrf.mxu0  ;;  %v10895_v5 = vld [vmem:[#allocation80_spill] sm:$0xff] }
 0x389   : > { %v4099_v29 = vadd.f32 %v4098_v58, %v10893_v25  ;;  %v4291_v12 = vpop.f32.mrf.mxu1  ;;  %v4290_v41 = vadd.f32 %v4289_v38, %v4097_v9  ;;  %v4546_v56 = vmul.f32 0.2, %v4288_v33  ;;  %vm4418_vm12 = vcmp.gt.f32.partialorder %v4288_v33, 0.0 }
 0x38a   : > { %v4100_v46 = vpop.f32.mrf.mxu0  ;;  %v4671_v39 = vsel %vm4415_vm11, %v4284_v60, %v4543_v35  ;;  %v10897_v9 = vsub.s32 0, %v10895_v5 }
 0x38b   : > { %v4292_v3 = vadd.f32 %v4291_v12, %v4099_v29  ;;  %v4101_v7 = vadd.f32 %v4100_v46, %v3908_v26  ;;  %v4739_v8 = vpack.c.bf16 %v4671_v39, %v4667_v2  ;;  %v4293_v52 = vpop.f32.mrf.mxu1  ;;  %v4547_v36 = vmul.f32 0.2, %v4290_v41 }
 0x38c   : > { %v5174_v14 = vpop.f32.mrf.mxu0  ;;  %v4674_v17 = vsel %vm4418_vm12, %v4288_v33, %v4546_v56  ;;  %vm4419_vm14 = vcmp.gt.f32.partialorder %v4290_v41, 0.0  ;;  %v10896_v33 = vsub.s32 1, %v10895_v5 }
 0x38d   : > { %vm4422_vm13 = vcmp.gt.f32.partialorder %v4292_v3, 0.0  ;;  %v4550_v31 = vmul.f32 0.2, %v4292_v3  ;;  %v4294_v24 = vadd.f32 %v4293_v52, %v4101_v7  ;;  %5505 = vmatprep.mubr.bf16.mxu1 %v4739_v8  ;;  %v4675_v44 = vsel %vm4419_vm14, %v4290_v41, %v4547_v36  ;;  %v9992_v36 = vld [vmem:[#allocation11 + $0x38] sm:$0xff]  }
 0x38e   : > { %v5176_v0 = vpop.f32.mrf.mxu0  ;;  %5506 = vmatmul.mubr.bf16.gmra.mxu1 %v4738_v48  ;;  %v9976_v27 = vrot.slane %v4808_v54, %v10896_v33  ;;  %v9980_v48 = vrot.slane %v4808_v54, %v10897_v9  ;;  %7195 = vmatprep.subr.bf16.mxu1 %v9992_v36 }
 0x38f   : > { %v4678_v49 = vsel %vm4422_vm13, %v4292_v3, %v4550_v31  ;;  %vm4423_vm15 = vcmp.gt.f32.partialorder %v4294_v24, 0.0  ;;  %v4551_v63 = vmul.f32 0.2, %v4294_v24 }
 0x390   : > { %v4742_v10 = vpack.c.bf16 %v4678_v49, %v4674_v17  ;;  %v5178_v19 = vpop.f32.mrf.mxu0  ;;  %v5177_v25 = vadd.f32 %v5176_v0, %v9976_v27  ;;  %v5175_v29 = vadd.f32 %v5174_v14, %v9980_v48 }
 0x391   : > { %v4679_v28 = vsel %vm4423_vm15, %v4294_v24, %v4551_v63  ;;  %v5179_v26 = vadd.f32 %v5178_v19, %v9980_v48 }
 0x392   : > { %v5180_v53 = vpop.f32.mrf.mxu0  ;;  %v4743_v51 = vpack.c.bf16 %v4679_v28, %v4675_v44 }
 0x393   : > { %v5181_v56 = vadd.f32 %v5180_v53, %v9976_v27 }
 0x394   : > { %v5184_v13 = vpop.f32.mrf.mxu0  ;;  %5515 = vmatprep.mubr.bf16.mxu1 %v4743_v51 }
 0x395   : > { %v5185_v49 = vadd.f32 %v5184_v13, %v9980_v48 }
 0x396   : > { %v5186_v6 = vpop.f32.mrf.mxu0  ;;  %5516 = vmatmul.mubr.bf16.gmra.mxu1 %v4742_v10 }
 0x397   : > { %v5187_v0 = vadd.f32 %v5186_v6, %v9976_v27 }
 0x398   : > { %v5188_v59 = vpop.f32.mrf.mxu0 }
 0x399   : > { %v5189_v53 = vadd.f32 %v5188_v59, %v9980_v48 }
 0x39a   : > { %v9921_v32 = vpop.f32.mrf.mxu0 }
 0x39b   : > { %v5191_v9 = vadd.f32 %v9921_v32, %v9976_v27 }
 0x39c   : > { %v9923_v40 = vpop.f32.mrf.mxu0 }
 0x39e   : > { %v9925_v42 = vpop.f32.mrf.mxu0 }
 0x3a0   : > { %v9927_v50 = vpop.f32.mrf.mxu0 }
 0x3a2   : > { %v9929_v61 = vpop.f32.mrf.mxu0 }
 0x3a4   : > { %v9931_v45 = vpop.f32.mrf.mxu0 }
 0x3a6   : > { %v9933_v62 = vpop.f32.mrf.mxu0 }
 0x3a8   : > { %v9935_v30 = vpop.f32.mrf.mxu0 }
 0x3aa   : > { %v9937_v57 = vpop.f32.mrf.mxu0 }
 0x3ac   : > { %v9939_v22 = vpop.f32.mrf.mxu0 }
 0x3ae   : > { %v9941_v18 = vpop.f32.mrf.mxu0 }
 0x3b0   : > { %v9943_v11 = vpop.f32.mrf.mxu0 }
 0x3b2   : > { %v9945_v1 = vpop.f32.mrf.mxu0 }
 0x3b4   : > { %v9947_v37 = vpop.f32.mrf.mxu0 }
 0x3b6   : > { %v9949_v34 = vpop.f32.mrf.mxu0 }
 0x3b8   : > { %v9951_v15 = vpop.f32.mrf.mxu0 }
 0x3ba   : > { %v9953_v23 = vpop.f32.mrf.mxu0 }
 0x3bc   : > { %v9955_v47 = vpop.f32.mrf.mxu0 }
 0x3be   : > { %v9957_v20 = vpop.f32.mrf.mxu0 }
 0x3c0   : > { %v9959_v43 = vpop.f32.mrf.mxu0 }
 0x3c2   : > { %v9961_v21 = vpop.f32.mrf.mxu0 }
 0x3c4   : > { %v9963_v16 = vpop.f32.mrf.mxu0 }
 0x3c6   : > { %v9965_v60 = vpop.f32.mrf.mxu0 }
 0x3c8   : > { %v9967_v55 = vpop.f32.mrf.mxu0 }
 0x3ca   : > { %v9969_v38 = vpop.f32.mrf.mxu0 }
 0x3cc   : > { %v9982_v35 = vpop.f32.mrf.mxu0 }
 0x3ce   : > { %v9986_v12 = vpop.f32.mrf.mxu0 }
 0x3d0   : > { %v9990_v2 = vpop.f32.mrf.mxu0 }
 0x3d2   : > { %v9997_v10 = vpop.f32.mrf.mxu0 }
 0x3de   : > { %v5367_v58 = vpop.f32.mrf.mxu1 }
 0x3df   : > { %v5368_v46 = vadd.f32 %v5367_v58, %v5175_v29  ;;  %v10002_v29 = vpop.f32.mrf.mxu0 }
 0x3e0   : > { %v5369_v4 = vpop.f32.mrf.mxu1 }
 0x3e1   : > { %v5370_v41 = vadd.f32 %v5369_v4, %v5177_v25  ;;  %v5590_v14 = vmul.f32 0.2, %v5368_v46  ;;  %vm5526_vm2 = vcmp.gt.f32.partialorder %v5368_v46, 0.0 }
 0x3e2   : > { %v5371_v39 = vpop.f32.mrf.mxu1 }
 0x3e3   : > { %v5372_v3 = vadd.f32 %v5371_v39, %v5179_v26  ;;  %v5591_v8 = vmul.f32 0.2, %v5370_v41  ;;  %vm5527_vm1 = vcmp.gt.f32.partialorder %v5370_v41, 0.0  ;;  %v5654_v54 = vsel %vm5526_vm2, %v5368_v46, %v5590_v14 }
 0x3e4   : > { %v5373_v7 = vpop.f32.mrf.mxu1  ;;  %v5197_v39 = vadd.f32 %v9925_v42, %v9976_v27 }
 0x3e5   : > { %vm5528_vm0 = vcmp.gt.f32.partialorder %v5372_v3, 0.0  ;;  %v5592_v31 = vmul.f32 0.2, %v5372_v3  ;;  %v5374_v52 = vadd.f32 %v5373_v7, %v5181_v56  ;;  %v5655_v28 = vsel %vm5527_vm1, %v5370_v41, %v5591_v8 }
 0x3e6   : > { %v5377_v24 = vpop.f32.mrf.mxu1  ;;  %v5195_v56 = vadd.f32 %v9923_v40, %v9980_v48 }
 0x3e7   : > { %vm5529_vm3 = vcmp.gt.f32.partialorder %v5374_v52, 0.0  ;;  %v5593_v17 = vmul.f32 0.2, %v5374_v52  ;;  %v5656_v63 = vsel %vm5528_vm0, %v5372_v3, %v5592_v31  ;;  %v5378_v5 = vadd.f32 %v5377_v24, %v5185_v49  ;;  %v10008_v3 = vpop.f32.mrf.mxu0 }
 0x3e8   : > { %v5379_v19 = vpop.f32.mrf.mxu1  ;;  %v5718_v58 = vpack.c.bf16 %v5656_v63, %v5654_v54  ;;  %v5199_v31 = vadd.f32 %v9927_v50, %v9980_v48  ;;  %v5201_v63 = vadd.f32 %v9929_v61, %v9976_v27 }
 0x3e9   : > { %v5380_v44 = vadd.f32 %v5379_v19, %v5187_v0  ;;  %v5657_v51 = vsel %vm5529_vm3, %v5374_v52, %v5593_v17  ;;  %v5594_v41 = vmul.f32 0.2, %v5378_v5  ;;  %vm5530_vm6 = vcmp.gt.f32.partialorder %v5378_v5, 0.0  ;;  %v10014_v40 = vpop.f32.mrf.mxu0 }
 0x3ea   : > { %v5381_v33 = vpop.f32.mrf.mxu1  ;;  %v5719_v6 = vpack.c.bf16 %v5657_v51, %v5655_v28 }
 0x3eb   : > { %v5382_v25 = vadd.f32 %v5381_v33, %v5189_v53  ;;  %v5595_v4 = vmul.f32 0.2, %v5380_v44  ;;  %vm5531_vm5 = vcmp.gt.f32.partialorder %v5380_v44, 0.0  ;;  %v5658_v0 = vsel %vm5530_vm6, %v5378_v5, %v5594_v41 }
 0x3ec   : > { %v5383_v13 = vpop.f32.mrf.mxu1  ;;  %5917 = vmatprep.mubr.bf16.mxu0 %v5719_v6  ;;  %v5207_v33 = vadd.f32 %v9933_v62, %v9976_v27  ;;  %v5205_v6 = vadd.f32 %v9931_v45, %v9980_v48 }
 0x3ed   : > { %vm5532_vm4 = vcmp.gt.f32.partialorder %v5382_v25, 0.0  ;;  %v5596_v26 = vmul.f32 0.2, %v5382_v25  ;;  %v5384_v59 = vadd.f32 %v5383_v13, %v5191_v9  ;;  %5918 = vmatmul.mubr.bf16.vlgmr.msra.gmra.mxu0 %v5718_v58  ;;  %v5659_v14 = vsel %vm5531_vm5, %v5380_v44, %v5595_v4  ;;  %v10020_v9 = vpop.f32.mrf.mxu0 }
 0x3ee   : > { %v5387_v46 = vpop.f32.mrf.mxu1  ;;  %v5209_v13 = vadd.f32 %v9935_v30, %v9980_v48 }
 0x3ef   : > { %vm5533_vm7 = vcmp.gt.f32.partialorder %v5384_v59, 0.0  ;;  %v5597_v32 = vmul.f32 0.2, %v5384_v59  ;;  %v5660_v7 = vsel %vm5532_vm4, %v5382_v25, %v5596_v26  ;;  %v5388_v17 = vadd.f32 %v5387_v46, %v5195_v56  ;;  %v10026_v45 = vpop.f32.mrf.mxu0 }
 0x3f0   : > { %v5389_v8 = vpop.f32.mrf.mxu1  ;;  %v5720_v19 = vpack.c.bf16 %v5660_v7, %v5658_v0  ;;  %v5217_v0 = vadd.f32 %v9941_v18, %v9976_v27 }
 0x3f1   : > { %v5390_v52 = vadd.f32 %v5389_v8, %v5197_v39  ;;  %v5661_v24 = vsel %vm5533_vm7, %v5384_v59, %v5597_v32  ;;  %v5598_v44 = vmul.f32 0.2, %v5388_v17  ;;  %vm5534_vm10 = vcmp.gt.f32.partialorder %v5388_v17, 0.0 }
 0x3f2   : > { %v5391_v49 = vpop.f32.mrf.mxu1  ;;  %v5721_v42 = vpack.c.bf16 %v5661_v24, %v5659_v14  ;;  %v5211_v32 = vadd.f32 %v9937_v57, %v9976_v27 }
 0x3f3   : > { %v5392_v53 = vadd.f32 %v5391_v49, %v5199_v31  ;;  %v5599_v51 = vmul.f32 0.2, %v5390_v52  ;;  %vm5535_vm9 = vcmp.gt.f32.partialorder %v5390_v52, 0.0  ;;  %v5662_v41 = vsel %vm5534_vm10, %v5388_v17, %v5598_v44  ;;  %v10032_v49 = vpop.f32.mrf.mxu0 }
 0x3f4   : > { %v5393_v28 = vpop.f32.mrf.mxu1  ;;  %5925 = vmatprep.mubr.bf16.mxu0 %v5721_v42  ;;  %v5215_v17 = vadd.f32 %v9939_v22, %v9980_v48 }
 0x3f5   : > { %vm5536_vm8 = vcmp.gt.f32.partialorder %v5392_v53, 0.0  ;;  %v5600_v54 = vmul.f32 0.2, %v5392_v53  ;;  %v5394_v50 = vadd.f32 %v5393_v28, %v5201_v63  ;;  %5926 = vmatmul.mubr.bf16.gmra.mxu0 %v5720_v19  ;;  %v5663_v26 = vsel %vm5535_vm9, %v5390_v52, %v5599_v51  ;;  %v10038_v22 = vpop.f32.mrf.mxu0 }
 0x3f6   : > { %v5397_v5 = vpop.f32.mrf.mxu1  ;;  %v5219_v19 = vadd.f32 %v9943_v11, %v9980_v48 }
 0x3f7   : > { %vm5537_vm11 = vcmp.gt.f32.partialorder %v5394_v50, 0.0  ;;  %v5601_v61 = vmul.f32 0.2, %v5394_v50  ;;  %v5664_v58 = vsel %vm5536_vm8, %v5392_v53, %v5600_v54  ;;  %v5398_v46 = vadd.f32 %v5397_v5, %v5205_v6 }
 0x3f8   : > { %v5399_v25 = vpop.f32.mrf.mxu1  ;;  %v5722_v56 = vpack.c.bf16 %v5664_v58, %v5662_v41  ;;  %v5221_v5 = vadd.f32 %v9945_v1, %v9976_v27  ;;  %v10044_v41 = vpop.f32.mrf.mxu0 }
 0x3f9   : > { %v5400_v4 = vadd.f32 %v5399_v25, %v5207_v33  ;;  %v5665_v59 = vsel %vm5537_vm11, %v5394_v50, %v5601_v61  ;;  %v5602_v52 = vmul.f32 0.2, %v5398_v46  ;;  %vm5538_vm14 = vcmp.gt.f32.partialorder %v5398_v46, 0.0 }
 0x3fa   : > { %v5401_v39 = vpop.f32.mrf.mxu1  ;;  %v5723_v62 = vpack.c.bf16 %v5665_v59, %v5663_v26  ;;  %v5227_v26 = vadd.f32 %v9949_v34, %v9976_v27  ;;  %v5225_v59 = vadd.f32 %v9947_v37, %v9980_v48  ;;  %v10050_v37 = vpop.f32.mrf.mxu0 }
 0x3fb   : > { %v5402_v7 = vadd.f32 %v5401_v39, %v5209_v13  ;;  %v5603_v31 = vmul.f32 0.2, %v5400_v4  ;;  %vm5539_vm13 = vcmp.gt.f32.partialorder %v5400_v4, 0.0  ;;  %v5666_v54 = vsel %vm5538_vm14, %v5398_v46, %v5602_v52 }
 0x3fc   : > { %v5403_v8 = vpop.f32.mrf.mxu1  ;;  %5933 = vmatprep.mubr.bf16.mxu0 %v5723_v62  ;;  %v5229_v62 = vadd.f32 %v9951_v15, %v9980_v48 }
 0x3fd   : > { %vm5540_vm12 = vcmp.gt.f32.partialorder %v5402_v7, 0.0  ;;  %v5604_v14 = vmul.f32 0.2, %v5402_v7  ;;  %v5404_v30 = vadd.f32 %v5403_v8, %v5211_v32  ;;  %5934 = vmatmul.mubr.bf16.gmra.mxu0 %v5722_v56  ;;  %v5667_v28 = vsel %vm5539_vm13, %v5400_v4, %v5603_v31 }
 0x3fe   : > { %v5407_v24 = vpop.f32.mrf.mxu1 }
 0x3ff   : > { %vm5541_vm15 = vcmp.gt.f32.partialorder %v5404_v30, 0.0  ;;  %v5605_v57 = vmul.f32 0.2, %v5404_v30  ;;  %v5668_v42 = vsel %vm5540_vm12, %v5402_v7, %v5604_v14  ;;  %v5408_v50 = vadd.f32 %v5407_v24, %v5215_v17 }
 0x400   : > { %v5409_v63 = vpop.f32.mrf.mxu1  ;;  %v5724_v33 = vpack.c.bf16 %v5668_v42, %v5666_v54 }
 0x401   : > { %v5410_v53 = vadd.f32 %v5409_v63, %v5217_v0  ;;  %v5669_v51 = vsel %vm5541_vm15, %v5404_v30, %v5605_v57  ;;  %v5606_v13 = vmul.f32 0.2, %v5408_v50  ;;  %vm5542_vm2 = vcmp.gt.f32.partialorder %v5408_v50, 0.0 }
 0x402   : > { %v5411_v44 = vpop.f32.mrf.mxu1  ;;  %v5725_v18 = vpack.c.bf16 %v5669_v51, %v5667_v28  ;;  %v5231_v30 = vadd.f32 %v9953_v23, %v9976_v27  ;;  %v10056_v28 = vpop.f32.mrf.mxu0 }
 0x403   : > { %v5412_v61 = vadd.f32 %v5411_v44, %v5219_v19  ;;  %v5607_v58 = vmul.f32 0.2, %v5410_v53  ;;  %vm5543_vm1 = vcmp.gt.f32.partialorder %v5410_v53, 0.0  ;;  %v5670_v8 = vsel %vm5542_vm2, %v5408_v50, %v5606_v13 }
 0x404   : > { %v5413_v6 = vpop.f32.mrf.mxu1  ;;  %5941 = vmatprep.mubr.bf16.mxu0 %v5725_v18  ;;  %v5237_v19 = vadd.f32 %v9957_v20, %v9976_v27  ;;  %v5239_v50 = vadd.f32 %v9959_v43, %v9980_v48 }
 0x405   : > { %vm5544_vm0 = vcmp.gt.f32.partialorder %v5412_v61, 0.0  ;;  %v5608_v25 = vmul.f32 0.2, %v5412_v61  ;;  %v5414_v11 = vadd.f32 %v5413_v6, %v5221_v5  ;;  %5942 = vmatmul.mubr.bf16.gmra.mxu0 %v5724_v33  ;;  %v5671_v56 = vsel %vm5543_vm1, %v5410_v53, %v5607_v58 }
 0x406   : > { %v5417_v4 = vpop.f32.mrf.mxu1  ;;  %v5235_v53 = vadd.f32 %v9955_v47, %v9980_v48  ;;  %v5241_v58 = vadd.f32 %v9961_v21, %v9976_v27  ;;  %v10062_v47 = vpop.f32.mrf.mxu0 }
 0x407   : > { %vm5545_vm3 = vcmp.gt.f32.partialorder %v5414_v11, 0.0  ;;  %v5609_v1 = vmul.f32 0.2, %v5414_v11  ;;  %v5672_v46 = vsel %vm5544_vm0, %v5412_v61, %v5608_v25  ;;  %v5418_v31 = vadd.f32 %v5417_v4, %v5225_v59 }
 0x408   : > { %v5419_v39 = vpop.f32.mrf.mxu1  ;;  %v5726_v52 = vpack.c.bf16 %v5672_v46, %v5670_v8  ;;  %v5247_v46 = vadd.f32 %v9965_v60, %v9976_v27 }
 0x409   : > { %v5420_v32 = vadd.f32 %v5419_v39, %v5227_v26  ;;  %v5673_v7 = vsel %vm5545_vm3, %v5414_v11, %v5609_v1  ;;  %v5610_v42 = vmul.f32 0.2, %v5418_v31  ;;  %vm5546_vm6 = vcmp.gt.f32.partialorder %v5418_v31, 0.0 }
 0x40a   : > { %v5421_v14 = vpop.f32.mrf.mxu1  ;;  %v5727_v34 = vpack.c.bf16 %v5673_v7, %v5671_v56  ;;  %v5245_v39 = vadd.f32 %v9963_v16, %v9980_v48  ;;  %v5249_v7 = vadd.f32 %v9967_v55, %v9980_v48 }
 0x40b   : > { %v5422_v24 = vadd.f32 %v5421_v14, %v5229_v62  ;;  %v5611_v57 = vmul.f32 0.2, %v5420_v32  ;;  %vm5547_vm5 = vcmp.gt.f32.partialorder %v5420_v32, 0.0  ;;  %v5674_v33 = vsel %vm5546_vm6, %v5418_v31, %v5610_v42  ;;  %v10068_v62 = vpop.f32.mrf.mxu0 }
 0x40c   : > { %v5423_v0 = vpop.f32.mrf.mxu1  ;;  %5949 = vmatprep.mubr.bf16.mxu0 %v5727_v34 }
 0x40d   : > { %vm5548_vm4 = vcmp.gt.f32.partialorder %v5422_v24, 0.0  ;;  %v5612_v17 = vmul.f32 0.2, %v5422_v24  ;;  %v5424_v15 = vadd.f32 %v5423_v0, %v5231_v30  ;;  %5950 = vmatmul.mubr.bf16.gmra.mxu0 %v5726_v52  ;;  %v5675_v18 = vsel %vm5547_vm5, %v5420_v32, %v5611_v57  ;;  %v10074_v16 = vpop.f32.mrf.mxu0 }
 0x40e   : > { %v5427_v63 = vpop.f32.mrf.mxu1 }
 0x40f   : > { %vm5549_vm7 = vcmp.gt.f32.partialorder %v5424_v15, 0.0  ;;  %v5613_v23 = vmul.f32 0.2, %v5424_v15  ;;  %v5676_v51 = vsel %vm5548_vm4, %v5422_v24, %v5612_v17  ;;  %v5428_v61 = vadd.f32 %v5427_v63, %v5235_v53 }
 0x410   : > { %v5429_v54 = vpop.f32.mrf.mxu1  ;;  %v5728_v25 = vpack.c.bf16 %v5676_v51, %v5674_v33  ;;  %v5251_v24 = vadd.f32 %v9969_v38, %v9976_v27  ;;  %v5255_v53 = vadd.f32 %v9982_v35, %v9980_v48  ;;  %v10080_v51 = vpop.f32.mrf.mxu0 }
 0x411   : > { %v5430_v44 = vadd.f32 %v5429_v54, %v5237_v19  ;;  %v5677_v5 = vsel %vm5549_vm7, %v5424_v15, %v5613_v23  ;;  %v5614_v1 = vmul.f32 0.2, %v5428_v61  ;;  %vm5550_vm10 = vcmp.gt.f32.partialorder %v5428_v61, 0.0 }
 0x412   : > { %v5431_v6 = vpop.f32.mrf.mxu1  ;;  %v5729_v20 = vpack.c.bf16 %v5677_v5, %v5675_v18  ;;  %v5257_v23 = vadd.f32 %v9986_v12, %v9976_v27  ;;  %v10086_v35 = vpop.f32.mrf.mxu0 }
 0x413   : > { %v5432_v11 = vadd.f32 %v5431_v6, %v5239_v50  ;;  %v5615_v4 = vmul.f32 0.2, %v5430_v44  ;;  %vm5551_vm9 = vcmp.gt.f32.partialorder %v5430_v44, 0.0  ;;  %v5678_v34 = vsel %vm5550_vm10, %v5428_v61, %v5614_v1 }
 0x414   : > { %v5433_v13 = vpop.f32.mrf.mxu1  ;;  %5957 = vmatprep.mubr.bf16.mxu0 %v5729_v20 }
 0x415   : > { %vm5552_vm8 = vcmp.gt.f32.partialorder %v5432_v11, 0.0  ;;  %v5616_v26 = vmul.f32 0.2, %v5432_v11  ;;  %v5434_v43 = vadd.f32 %v5433_v13, %v5241_v58  ;;  %5958 = vmatmul.mubr.bf16.gmra.mxu0 %v5728_v25  ;;  %v5679_v31 = vsel %vm5551_vm9, %v5430_v44, %v5615_v4 }
 0x416   : > { %v5437_v59 = vpop.f32.mrf.mxu1  ;;  %v5259_v44 = vadd.f32 %v9990_v2, %v9980_v48  ;;  %v5261_v58 = vadd.f32 %v9997_v10, %v9976_v27 }
 0x417   : > { %vm5553_vm11 = vcmp.gt.f32.partialorder %v5434_v43, 0.0  ;;  %v5617_v21 = vmul.f32 0.2, %v5434_v43  ;;  %v5680_v32 = vsel %vm5552_vm8, %v5432_v11, %v5616_v26  ;;  %v5438_v30 = vadd.f32 %v5437_v59, %v5245_v39 }
 0x418   : > { %v5439_v56 = vpop.f32.mrf.mxu1  ;;  %v5730_v0 = vpack.c.bf16 %v5680_v32, %v5678_v34  ;;  %v5267_v59 = vadd.f32 %v10008_v3, %v9976_v27 }
 0x419   : > { %v5440_v8 = vadd.f32 %v5439_v56, %v5247_v46  ;;  %v5681_v14 = vsel %vm5553_vm11, %v5434_v43, %v5617_v21  ;;  %v5618_v63 = vmul.f32 0.2, %v5438_v30  ;;  %vm5554_vm14 = vcmp.gt.f32.partialorder %v5438_v30, 0.0  ;;  %v10092_v21 = vpop.f32.mrf.mxu0 }
 0x41a   : > { %v5441_v52 = vpop.f32.mrf.mxu1  ;;  %v5731_v60 = vpack.c.bf16 %v5681_v14, %v5679_v31  ;;  %v5265_v46 = vadd.f32 %v10002_v29, %v9980_v48  ;;  %v5269_v56 = vadd.f32 %v10014_v40, %v9980_v48 }
 0x41b   : > { %v5442_v57 = vadd.f32 %v5441_v52, %v5249_v7  ;;  %v5619_v15 = vmul.f32 0.2, %v5440_v8  ;;  %vm5555_vm13 = vcmp.gt.f32.partialorder %v5440_v8, 0.0  ;;  %v5682_v61 = vsel %vm5554_vm14, %v5438_v30, %v5618_v63  ;;  %v10098_v29 = vpop.f32.mrf.mxu0 }
 0x41c   : > { %v5443_v17 = vpop.f32.mrf.mxu1  ;;  %5965 = vmatprep.mubr.bf16.mxu0 %v5731_v60  ;;  %v5271_v52 = vadd.f32 %v10020_v9, %v9976_v27  ;;  %v5275_v63 = vadd.f32 %v10026_v45, %v9980_v48 }
 0x41d   : > { %vm5556_vm12 = vcmp.gt.f32.partialorder %v5442_v57, 0.0  ;;  %v5620_v42 = vmul.f32 0.2, %v5442_v57  ;;  %v5444_v55 = vadd.f32 %v5443_v17, %v5251_v24  ;;  %5966 = vmatmul.mubr.bf16.gmra.mxu0 %v5730_v0  ;;  %v5683_v5 = vsel %vm5555_vm13, %v5440_v8, %v5619_v15 }
 0x41e   : > { %v5447_v19 = vpop.f32.mrf.mxu1 }
 0x41f   : > { %vm5557_vm15 = vcmp.gt.f32.partialorder %v5444_v55, 0.0  ;;  %v5621_v38 = vmul.f32 0.2, %v5444_v55  ;;  %v5684_v54 = vsel %vm5556_vm12, %v5442_v57, %v5620_v42  ;;  %v5448_v6 = vadd.f32 %v5447_v19, %v5255_v53  ;;  %v10104_v19 = vpop.f32.mrf.mxu0 }
 0x420   : > { %v5449_v50 = vpop.f32.mrf.mxu1  ;;  %v5732_v25 = vpack.c.bf16 %v5684_v54, %v5682_v61  ;;  %v5279_v53 = vadd.f32 %v10038_v22, %v9980_v48  ;;  %v5281_v61 = vadd.f32 %v10044_v41, %v9976_v27 }
 0x421   : > { %v5450_v18 = vadd.f32 %v5449_v50, %v5257_v23  ;;  %v5685_v33 = vsel %vm5557_vm15, %v5444_v55, %v5621_v38  ;;  %v5622_v43 = vmul.f32 0.2, %v5448_v6  ;;  %vm5558_vm2 = vcmp.gt.f32.partialorder %v5448_v6, 0.0  ;;  %v10110_v45 = vpop.f32.mrf.mxu0 }
 0x422   : > { %v5451_v20 = vpop.f32.mrf.mxu1  ;;  %v5733_v12 = vpack.c.bf16 %v5685_v33, %v5683_v5  ;;  %v5277_v55 = vadd.f32 %v10032_v49, %v9976_v27 }
 0x423   : > { %v5452_v11 = vadd.f32 %v5451_v20, %v5259_v44  ;;  %v5623_v4 = vmul.f32 0.2, %v5450_v18  ;;  %vm5559_vm1 = vcmp.gt.f32.partialorder %v5450_v18, 0.0  ;;  %v5686_v14 = vsel %vm5558_vm2, %v5448_v6, %v5622_v43 }
 0x424   : > { %v5453_v13 = vpop.f32.mrf.mxu1  ;;  %5973 = vmatprep.mubr.bf16.mxu0 %v5733_v12 }
 0x425   : > { %vm5560_vm0 = vcmp.gt.f32.partialorder %v5452_v11, 0.0  ;;  %v5624_v26 = vmul.f32 0.2, %v5452_v11  ;;  %v5454_v2 = vadd.f32 %v5453_v13, %v5261_v58  ;;  %5974 = vmatmul.mubr.bf16.gmra.mxu0 %v5732_v25  ;;  %v5687_v8 = vsel %vm5559_vm1, %v5450_v18, %v5623_v4 }
 0x426   : > { %v5457_v1 = vpop.f32.mrf.mxu1  ;;  %v5287_v4 = vadd.f32 %v10056_v28, %v9976_v27 }
 0x427   : > { %vm5561_vm3 = vcmp.gt.f32.partialorder %v5454_v2, 0.0  ;;  %v5625_v10 = vmul.f32 0.2, %v5454_v2  ;;  %v5688_v39 = vsel %vm5560_vm0, %v5452_v11, %v5624_v26  ;;  %v5458_v34 = vadd.f32 %v5457_v1, %v5265_v46 }
 0x428   : > { %v5459_v32 = vpop.f32.mrf.mxu1  ;;  %v5734_v60 = vpack.c.bf16 %v5688_v39, %v5686_v14  ;;  %v5285_v26 = vadd.f32 %v10050_v37, %v9980_v48 }
 0x429   : > { %v5460_v7 = vadd.f32 %v5459_v32, %v5267_v59  ;;  %v5689_v31 = vsel %vm5561_vm3, %v5454_v2, %v5625_v10  ;;  %v5626_v15 = vmul.f32 0.2, %v5458_v34  ;;  %vm5562_vm6 = vcmp.gt.f32.partialorder %v5458_v34, 0.0  ;;  %v10116_v2 = vpop.f32.mrf.mxu0 }
 0x42a   : > { %v5461_v30 = vpop.f32.mrf.mxu1  ;;  %v5735_v3 = vpack.c.bf16 %v5689_v31, %v5687_v8  ;;  %v5289_v59 = vadd.f32 %v10062_v47, %v9980_v48  ;;  %v5291_v8 = vadd.f32 %v10068_v62, %v9976_v27 }
 0x42b   : > { %v5462_v24 = vadd.f32 %v5461_v30, %v5269_v56  ;;  %v5627_v57 = vmul.f32 0.2, %v5460_v7  ;;  %vm5563_vm5 = vcmp.gt.f32.partialorder %v5460_v7, 0.0  ;;  %v5690_v18 = vsel %vm5562_vm6, %v5458_v34, %v5626_v15  ;;  %v10122_v37 = vpop.f32.mrf.mxu0 }
 0x42c   : > { %v5463_v0 = vpop.f32.mrf.mxu1  ;;  %5981 = vmatprep.mubr.bf16.mxu0 %v5735_v3  ;;  %v5299_v15 = vadd.f32 %v10086_v35, %v9980_v48 }
 0x42d   : > { %vm5564_vm4 = vcmp.gt.f32.partialorder %v5462_v24, 0.0  ;;  %v5628_v17 = vmul.f32 0.2, %v5462_v24  ;;  %v5464_v40 = vadd.f32 %v5463_v0, %v5271_v52  ;;  %5982 = vmatmul.mubr.bf16.gmra.mxu0 %v5734_v60  ;;  %v5691_v50 = vsel %vm5563_vm5, %v5460_v7, %v5627_v57  ;;  %v5316_v57 = vpop.f32.mrf.mxu0 }
 0x42e   : > { %v5467_v42 = vpop.f32.mrf.mxu1  ;;  %v5295_v0 = vadd.f32 %v10074_v16, %v9980_v48 }
 0x42f   : > { %vm5565_vm7 = vcmp.gt.f32.partialorder %v5464_v40, 0.0  ;;  %v5629_v9 = vmul.f32 0.2, %v5464_v40  ;;  %v5692_v23 = vsel %vm5564_vm4, %v5462_v24, %v5628_v17  ;;  %v5468_v5 = vadd.f32 %v5467_v42, %v5275_v63 }
 0x430   : > { %v5469_v38 = vpop.f32.mrf.mxu1  ;;  %v5736_v6 = vpack.c.bf16 %v5692_v23, %v5690_v18  ;;  %v5297_v24 = vadd.f32 %v10080_v51, %v9976_v27  ;;  %v5301_v51 = vadd.f32 %v10092_v21, %v9976_v27  ;;  %v5305_v21 = vadd.f32 %v10098_v29, %v9980_v48 }
 0x431   : > { %v5470_v54 = vadd.f32 %v5469_v38, %v5277_v55  ;;  %v5693_v44 = vsel %vm5565_vm7, %v5464_v40, %v5629_v9  ;;  %v5630_v11 = vmul.f32 0.2, %v5468_v5  ;;  %vm5566_vm10 = vcmp.gt.f32.partialorder %v5468_v5, 0.0 }
 0x432   : > { %v5471_v33 = vpop.f32.mrf.mxu1  ;;  %v5737_v49 = vpack.c.bf16 %v5693_v44, %v5691_v50  ;;  %v5318_v44 = vpop.f32.mrf.mxu0 }
 0x433   : > { %v5472_v20 = vadd.f32 %v5471_v33, %v5279_v53  ;;  %v5631_v58 = vmul.f32 0.2, %v5470_v54  ;;  %vm5567_vm9 = vcmp.gt.f32.partialorder %v5470_v54, 0.0  ;;  %v5694_v32 = vsel %vm5566_vm10, %v5468_v5, %v5630_v11 }
 0x434   : > { %v5473_v12 = vpop.f32.mrf.mxu1  ;;  %5989 = vmatprep.mubr.bf16.mxu0 %v5737_v49 }
 0x435   : > { %vm5568_vm8 = vcmp.gt.f32.partialorder %v5472_v20, 0.0  ;;  %v5632_v25 = vmul.f32 0.2, %v5472_v20  ;;  %v5474_v22 = vadd.f32 %v5473_v12, %v5281_v61  ;;  %5990 = vmatmul.mubr.bf16.gmra.mxu0 %v5736_v6  ;;  %v5695_v46 = vsel %vm5567_vm9, %v5470_v54, %v5631_v58 }
 0x436   : > { %v5477_v13 = vpop.f32.mrf.mxu1  ;;  %v5307_v61 = vadd.f32 %v10104_v19, %v9976_v27  ;;  %v5311_v19 = vadd.f32 %v10116_v2, %v9976_v27 }
 0x437   : > { %vm5569_vm11 = vcmp.gt.f32.partialorder %v5474_v22, 0.0  ;;  %v5633_v41 = vmul.f32 0.2, %v5474_v22  ;;  %v5696_v43 = vsel %vm5568_vm8, %v5472_v20, %v5632_v25  ;;  %v5478_v56 = vadd.f32 %v5477_v13, %v5285_v26  ;;  %v5320_v20 = vpop.f32.mrf.mxu0 }
 0x438   : > { %v5479_v1 = vpop.f32.mrf.mxu1  ;;  %v5738_v31 = vpack.c.bf16 %v5696_v43, %v5694_v32  ;;  %v5309_v25 = vadd.f32 %v10110_v45, %v9980_v48 }
 0x439   : > { %v5480_v10 = vadd.f32 %v5479_v1, %v5287_v4  ;;  %v5697_v39 = vsel %vm5569_vm11, %v5474_v22, %v5633_v41  ;;  %v5634_v52 = vmul.f32 0.2, %v5478_v56  ;;  %vm5570_vm14 = vcmp.gt.f32.partialorder %v5478_v56, 0.0  ;;  %v5324_v29 = vpop.f32.mrf.mxu0 }
 0x43a   : > { %v5481_v7 = vpop.f32.mrf.mxu1  ;;  %v5739_v28 = vpack.c.bf16 %v5697_v39, %v5695_v46 }
 0x43b   : > { %v5482_v14 = vadd.f32 %v5481_v7, %v5289_v59  ;;  %v5635_v30 = vmul.f32 0.2, %v5480_v10  ;;  %vm5571_vm13 = vcmp.gt.f32.partialorder %v5480_v10, 0.0  ;;  %v5698_v63 = vsel %vm5570_vm14, %v5478_v56, %v5634_v52 }
 0x43c   : > { %v5483_v34 = vpop.f32.mrf.mxu1  ;;  %5997 = vmatprep.mubr.bf16.mxu0 %v5739_v28  ;;  %v5317_v28 = vadd.f32 %v5316_v57, %v9976_v27  ;;  %v5321_v57 = vadd.f32 %v5320_v20, %v9976_v27 }
 0x43d   : > { %vm5572_vm12 = vcmp.gt.f32.partialorder %v5482_v14, 0.0  ;;  %v5636_v3 = vmul.f32 0.2, %v5482_v14  ;;  %v5484_v47 = vadd.f32 %v5483_v34, %v5291_v8  ;;  %5998 = vmatmul.mubr.bf16.gmra.mxu0 %v5738_v31  ;;  %v5699_v55 = vsel %vm5571_vm13, %v5480_v10, %v5635_v30  ;;  %v7863_v10 = vld [vmem:[#allocation11 + $0x30] sm:$0xff]   ;;  %v7864_v8 = vld [vmem:[#allocation11 + $0x28] sm:$0xff]  }
 0x43e   : > { %v5487_v60 = vpop.f32.mrf.mxu1  ;;  %v5315_v31 = vadd.f32 %v10122_v37, %v9980_v48  ;;  %v7865_v37 = vld [vmem:[#allocation11 + $0x20] sm:$0xff]  }
 0x43f   : > { %vm5573_vm15 = vcmp.gt.f32.partialorder %v5484_v47, 0.0  ;;  %v5637_v62 = vmul.f32 0.2, %v5484_v47  ;;  %v5700_v17 = vsel %vm5572_vm12, %v5482_v14, %v5636_v3  ;;  %v5488_v23 = vadd.f32 %v5487_v60, %v5295_v0  ;;  %v5326_v14 = vpop.f32.mrf.mxu0 }
 0x440   : > { %v5489_v40 = vpop.f32.mrf.mxu1  ;;  %v5740_v54 = vpack.c.bf16 %v5700_v17, %v5698_v63  ;;  %v5319_v3 = vadd.f32 %v5318_v44, %v9980_v48 }
 0x441   : > { %v5490_v42 = vadd.f32 %v5489_v40, %v5297_v24  ;;  %v5701_v9 = vsel %vm5573_vm15, %v5484_v47, %v5637_v62  ;;  %v5638_v35 = vmul.f32 0.2, %v5488_v23  ;;  %vm5574_vm2 = vcmp.gt.f32.partialorder %v5488_v23, 0.0 }
 0x442   : > { %v5491_v38 = vpop.f32.mrf.mxu1  ;;  %v5741_v53 = vpack.c.bf16 %v5701_v9, %v5699_v55 }
 0x443   : > { %v5492_v50 = vadd.f32 %v5491_v38, %v5299_v15  ;;  %v5639_v18 = vmul.f32 0.2, %v5490_v42  ;;  %vm5575_vm1 = vcmp.gt.f32.partialorder %v5490_v42, 0.0  ;;  %v5702_v4 = vsel %vm5574_vm2, %v5488_v23, %v5638_v35  ;;  %v5328_v15 = vpop.f32.mrf.mxu0 }
 0x444   : > { %v5493_v16 = vpop.f32.mrf.mxu1  ;;  %6005 = vmatprep.mubr.bf16.mxu0 %v5741_v53  ;;  %v5327_v53 = vadd.f32 %v5326_v14, %v9976_v27 }
 0x445   : > { %vm5576_vm0 = vcmp.gt.f32.partialorder %v5492_v50, 0.0  ;;  %v5640_v5 = vmul.f32 0.2, %v5492_v50  ;;  %v5494_v33 = vadd.f32 %v5493_v16, %v5301_v51  ;;  %6006 = vmatmul.mubr.bf16.gmra.mxu0 %v5740_v54  ;;  %v5703_v11 = vsel %vm5575_vm1, %v5490_v42, %v5639_v18  ;;  %v7866_v54 = vld [vmem:[#allocation11 + $0x18] sm:$0xff]   ;;  %v5330_v44 = vpop.f32.mrf.mxu0 }
 0x446   : > { %v5497_v49 = vpop.f32.mrf.mxu1 }
 0x447   : > { %vm5577_vm3 = vcmp.gt.f32.partialorder %v5494_v33, 0.0  ;;  %v5641_v6 = vmul.f32 0.2, %v5494_v33  ;;  %v5704_v12 = vsel %vm5576_vm0, %v5492_v50, %v5640_v5  ;;  %v5498_v41 = vadd.f32 %v5497_v49, %v5305_v21 }
 0x448   : > { %v5499_v58 = vpop.f32.mrf.mxu1  ;;  %v5742_v1 = vpack.c.bf16 %v5704_v12, %v5702_v4  ;;  %v5325_v50 = vadd.f32 %v5324_v29, %v9980_v48  ;;  %v5329_v5 = vadd.f32 %v5328_v15, %v9980_v48  ;;  %v5331_v12 = vadd.f32 %v5330_v44, %v9976_v27 }
 0x449   : > { %v5500_v22 = vadd.f32 %v5499_v58, %v5307_v61  ;;  %v5705_v13 = vsel %vm5577_vm3, %v5494_v33, %v5641_v6  ;;  %v5642_v56 = vmul.f32 0.2, %v5498_v41  ;;  %vm5578_vm6 = vcmp.gt.f32.partialorder %v5498_v41, 0.0 }
 0x44a   : > { %v5501_v26 = vpop.f32.mrf.mxu1  ;;  %v5743_v43 = vpack.c.bf16 %v5705_v13, %v5703_v11 }
 0x44b   : > { %v5502_v59 = vadd.f32 %v5501_v26, %v5309_v25  ;;  %v5643_v39 = vmul.f32 0.2, %v5500_v22  ;;  %vm5579_vm5 = vcmp.gt.f32.partialorder %v5500_v22, 0.0 }
 0x44c   : > { %v5503_v46 = vpop.f32.mrf.mxu1  ;;  %6013 = vmatprep.mubr.bf16.mxu1 %v5743_v43  ;;  %v7868_v43 = vld [vmem:[#allocation11 + $0x8] sm:$0xff]  }
 0x44d   : > { %vm5580_vm4 = vcmp.gt.f32.partialorder %v5502_v59, 0.0  ;;  %v5644_v32 = vmul.f32 0.2, %v5502_v59  ;;  %v5504_v45 = vadd.f32 %v5503_v46, %v5311_v19  ;;  %6014 = vmatmul.mubr.bf16.vlgmr.msra.gmra.mxu1 %v5742_v1  ;;  %v5707_v52 = vsel %vm5579_vm5, %v5500_v22, %v5643_v39  ;;  %v7867_v22 = vld [vmem:[#allocation11 + $0x10] sm:$0xff]   ;;  %v7869_v46 = vld [vmem:[#allocation11] sm:$0xff]  }
 0x44e   : > { %v5507_v7 = vpop.f32.mrf.mxu1  ;;  %7196 = vmatpush3.bf16.msra.mxu1 %v9992_v36  ;;  %v5706_v36 = vsel %vm5578_vm6, %v5498_v41, %v5642_v56 }
 0x44f   : > { %vm5581_vm7 = vcmp.gt.f32.partialorder %v5504_v45, 0.0  ;;  %v5645_v2 = vmul.f32 0.2, %v5504_v45  ;;  %7197 = vmatprep.subr.bf16.mxu1 %v7863_v10  ;;  %v5708_v34 = vsel %vm5580_vm4, %v5502_v59, %v5644_v32  ;;  %v5508_v24 = vadd.f32 %v5507_v7, %v5315_v31  ;;  %v10155_v32 = vld [vmem:[%s10317_s6] ss:$0 sm:$0xff] }
 0x450   : > { %v5509_v30 = vpop.f32.mrf.mxu1  ;;  %v5744_v17 = vpack.c.bf16 %v5708_v34, %v5706_v36 }
 0x451   : > { %v5510_v47 = vadd.f32 %v5509_v30, %v5317_v28  ;;  %v5709_v60 = vsel %vm5581_vm7, %v5504_v45, %v5645_v2  ;;  %v5646_v23 = vmul.f32 0.2, %v5508_v24  ;;  %vm5582_vm10 = vcmp.gt.f32.partialorder %v5508_v24, 0.0 }
 0x452   : > { %v5511_v62 = vpop.f32.mrf.mxu1  ;;  %v5745_v0 = vpack.c.bf16 %v5709_v60, %v5707_v52  ;;  %7198 = vmatpush3.bf16.msra.mxu1 %v7863_v10 }
 0x453   : > { %v5512_v40 = vadd.f32 %v5511_v62, %v5319_v3  ;;  %7199 = vmatprep.subr.bf16.mxu1 %v7864_v8  ;;  %v5647_v55 = vmul.f32 0.2, %v5510_v47  ;;  %vm5583_vm9 = vcmp.gt.f32.partialorder %v5510_v47, 0.0  ;;  %v5710_v61 = vsel %vm5582_vm10, %v5508_v24, %v5646_v23 }
 0x454   : > { %v5513_v42 = vpop.f32.mrf.mxu1  ;;  %6021 = vmatprep.mubr.bf16.mxu1 %v5745_v0 }
 0x455   : > { %vm5584_vm8 = vcmp.gt.f32.partialorder %v5512_v40, 0.0  ;;  %v5648_v9 = vmul.f32 0.2, %v5512_v40  ;;  %v5514_v63 = vadd.f32 %v5513_v42, %v5321_v57  ;;  %6022 = vmatmul.mubr.bf16.gmra.mxu1 %v5744_v17  ;;  %v5711_v35 = vsel %vm5583_vm9, %v5510_v47, %v5647_v55 }
 0x456   : > { %v5517_v38 = vpop.f32.mrf.mxu1  ;;  %7200 = vmatpush3.bf16.msra.mxu1 %v7864_v8 }
 0x457   : > { %vm5585_vm11 = vcmp.gt.f32.partialorder %v5514_v63, 0.0  ;;  %v5649_v51 = vmul.f32 0.2, %v5514_v63  ;;  %7201 = vmatprep.subr.bf16.mxu1 %v7865_v37  ;;  %v5712_v16 = vsel %vm5584_vm8, %v5512_v40, %v5648_v9  ;;  %v5518_v6 = vadd.f32 %v5517_v38, %v5325_v50 }
 0x458   : > { %v5519_v18 = vpop.f32.mrf.mxu1  ;;  %v5746_v58 = vpack.c.bf16 %v5712_v16, %v5710_v61 }
 0x459   : > { %v5520_v33 = vadd.f32 %v5519_v18, %v5327_v53  ;;  %v5713_v49 = vsel %vm5585_vm11, %v5514_v63, %v5649_v51  ;;  %v5650_v41 = vmul.f32 0.2, %v5518_v6  ;;  %vm5586_vm14 = vcmp.gt.f32.partialorder %v5518_v6, 0.0 }
 0x45a   : > { %v5521_v21 = vpop.f32.mrf.mxu1  ;;  %v5747_v20 = vpack.c.bf16 %v5713_v49, %v5711_v35  ;;  %7202 = vmatpush3.bf16.msra.mxu1 %v7865_v37 }
 0x45b   : > { %v5522_v25 = vadd.f32 %v5521_v21, %v5329_v5  ;;  %7203 = vmatprep.subr.bf16.mxu1 %v7866_v54  ;;  %v5651_v13 = vmul.f32 0.2, %v5520_v33  ;;  %vm5587_vm13 = vcmp.gt.f32.partialorder %v5520_v33, 0.0  ;;  %v5714_v59 = vsel %vm5586_vm14, %v5518_v6, %v5650_v41 }
 0x45c   : > { %v5523_v11 = vpop.f32.mrf.mxu1  ;;  %6029 = vmatprep.mubr.bf16.mxu1 %v5747_v20 }
 0x45d   : > { %vm5588_vm12 = vcmp.gt.f32.partialorder %v5522_v25, 0.0  ;;  %v5652_v4 = vmul.f32 0.2, %v5522_v25  ;;  %v5524_v48 = vadd.f32 %v5523_v11, %v5331_v12  ;;  %6030 = vmatmul.mubr.bf16.gmra.mxu1 %v5746_v58  ;;  %v5715_v19 = vsel %vm5587_vm13, %v5520_v33, %v5651_v13 }
 0x45e   : > { %7204 = vmatpush3.bf16.msra.mxu1 %v7866_v54 }
 0x45f   : > { %vm5589_vm15 = vcmp.gt.f32.partialorder %v5524_v48, 0.0  ;;  %v5653_v26 = vmul.f32 0.2, %v5524_v48  ;;  %7205 = vmatprep.subr.bf16.mxu1 %v7867_v22  ;;  %v5716_v27 = vsel %vm5588_vm12, %v5522_v25, %v5652_v4 }
 0x460   : > { %v5748_v29 = vpack.c.bf16 %v5716_v27, %v5714_v59 }
 0x461   : > { %v5717_v1 = vsel %vm5589_vm15, %v5524_v48, %v5653_v26 }
 0x462   : > { %v5749_v10 = vpack.c.bf16 %v5717_v1, %v5715_v19  ;;  %7206 = vmatpush3.bf16.msra.mxu1 %v7867_v22 }
 0x463   : > { %7207 = vmatprep.subr.bf16.mxu1 %v7868_v43 }
 0x464   : > { %6037 = vmatprep.mubr.bf16.mxu1 %v5749_v10 }
 0x465   : > { %6038 = vmatmul.mubr.bf16.gmra.mxu1 %v5748_v29 }
 0x466   : > { %7208 = vmatpush3.bf16.msra.mxu1 %v7868_v43 }
 0x467   : > { %7209 = vmatprep.subr.bf16.mxu1 %v7869_v46 }
 0x46a   : > { %7210 = vmatpush3.bf16.msra.mxu1 %v7869_v46 }
 0x4ad   : > { %v7075_v39 = vpop.f32.mrf.mxu0 }
 0x4af   : > { %v7076_v45 = vpop.f32.mrf.mxu0 }
 0x4b0   : > { %v7077_v56 = vadd.f32 %v7076_v45, %v7075_v39 }
 0x4b1   : > { %v7078_v7 = vpop.f32.mrf.mxu0 }
 0x4b2   : > { %v5920_v28 = vadd.f32 %v7077_v56, %v10155_v32 }
 0x4b3   : > { %v7079_v2 = vpop.f32.mrf.mxu0 }
 0x4b4   : > { %v7080_v8 = vadd.f32 %v7079_v2, %v7078_v7  ;;  %v6078_v14 = vmul.f32 0.2, %v5920_v28  ;;  %vm6046_vm0 = vcmp.gt.f32.partialorder %v5920_v28, 0.0 }
 0x4b5   : > { %v7081_v31 = vpop.f32.mrf.mxu0 }
 0x4b6   : > { %v5923_v34 = vadd.f32 %v7080_v8, %v10155_v32  ;;  %v6110_v36 = vsel %vm6046_vm0, %v5920_v28, %v6078_v14 }
 0x4b7   : > { %v7082_v30 = vpop.f32.mrf.mxu0 }
 0x4b8   : > { %vm6047_vm1 = vcmp.gt.f32.partialorder %v5923_v34, 0.0  ;;  %v6079_v3 = vmul.f32 0.2, %v5923_v34  ;;  %v7083_v47 = vadd.f32 %v7082_v30, %v7081_v31 }
 0x4b9   : > { %v7084_v52 = vpop.f32.mrf.mxu0 }
 0x4ba   : > { %v5928_v60 = vadd.f32 %v7083_v47, %v10155_v32  ;;  %v6111_v24 = vsel %vm6047_vm1, %v5923_v34, %v6079_v3 }
 0x4bb   : > { %v7085_v62 = vpop.f32.mrf.mxu0  ;;  %v6142_v0 = vpack.c.bf16 %v6111_v24, %v6110_v36 }
 0x4bc   : > { %v7086_v57 = vadd.f32 %v7085_v62, %v7084_v52  ;;  %v6080_v40 = vmul.f32 0.2, %v5928_v60  ;;  %vm6048_vm2 = vcmp.gt.f32.partialorder %v5928_v60, 0.0 }
 0x4bd   : > { %v7087_v17 = vpop.f32.mrf.mxu0  ;;  %7211 = vmatprep.mubr.bf16.mxu1 %v6142_v0 }
 0x4be   : > { %v5931_v37 = vadd.f32 %v7086_v57, %v10155_v32  ;;  %v6112_v63 = vsel %vm6048_vm2, %v5928_v60, %v6080_v40 }
 0x4bf   : > { %v7088_v15 = vpop.f32.mrf.mxu0 }
 0x4c0   : > { %vm6049_vm3 = vcmp.gt.f32.partialorder %v5931_v37, 0.0  ;;  %v6081_v42 = vmul.f32 0.2, %v5931_v37  ;;  %v7089_v55 = vadd.f32 %v7088_v15, %v7087_v17 }
 0x4c1   : > { %v7090_v9 = vpop.f32.mrf.mxu0 }
 0x4c2   : > { %v6113_v23 = vsel %vm6049_vm3, %v5931_v37, %v6081_v42  ;;  %v5936_v38 = vadd.f32 %v7089_v55, %v10155_v32 }
 0x4c3   : > { %v6143_v53 = vpack.c.bf16 %v6113_v23, %v6112_v63  ;;  %v7091_v51 = vpop.f32.mrf.mxu0 }
 0x4c4   : > { %v7092_v54 = vadd.f32 %v7091_v51, %v7090_v9  ;;  %v6082_v44 = vmul.f32 0.2, %v5936_v38  ;;  %vm6050_vm4 = vcmp.gt.f32.partialorder %v5936_v38, 0.0 }
 0x4c5   : > { %v7093_v50 = vpop.f32.mrf.mxu0  ;;  %7212 = vmatmul.mubr.bf16.vlgmr.msra.gmra.mxu1 %v6143_v53 }
 0x4c6   : > { %v5939_v16 = vadd.f32 %v7092_v54, %v10155_v32  ;;  %v6114_v61 = vsel %vm6050_vm4, %v5936_v38, %v6082_v44 }
 0x4c7   : > { %v7094_v18 = vpop.f32.mrf.mxu0 }
 0x4c8   : > { %vm6051_vm5 = vcmp.gt.f32.partialorder %v5939_v16, 0.0  ;;  %v6083_v5 = vmul.f32 0.2, %v5939_v16  ;;  %v7095_v33 = vadd.f32 %v7094_v18, %v7093_v50 }
 0x4c9   : > { %v7096_v35 = vpop.f32.mrf.mxu0 }
 0x4ca   : > { %v5944_v49 = vadd.f32 %v7095_v33, %v10155_v32  ;;  %v6115_v6 = vsel %vm6051_vm5, %v5939_v16, %v6083_v5 }
 0x4cb   : > { %v7097_v21 = vpop.f32.mrf.mxu0  ;;  %v6144_v20 = vpack.c.bf16 %v6115_v6, %v6114_v61 }
 0x4cc   : > { %v7098_v12 = vadd.f32 %v7097_v21, %v7096_v35  ;;  %v6084_v25 = vmul.f32 0.2, %v5944_v49  ;;  %vm6052_vm6 = vcmp.gt.f32.partialorder %v5944_v49, 0.0 }
 0x4cd   : > { %v7099_v58 = vpop.f32.mrf.mxu0  ;;  %7215 = vmatprep.mubr.bf16.mxu1 %v6144_v20 }
 0x4ce   : > { %v5947_v22 = vadd.f32 %v7098_v12, %v10155_v32  ;;  %v6116_v41 = vsel %vm6052_vm6, %v5944_v49, %v6084_v25 }
 0x4cf   : > { %v7100_v11 = vpop.f32.mrf.mxu0 }
 0x4d0   : > { %vm6053_vm7 = vcmp.gt.f32.partialorder %v5947_v22, 0.0  ;;  %v6085_v13 = vmul.f32 0.2, %v5947_v22  ;;  %v7101_v4 = vadd.f32 %v7100_v11, %v7099_v58 }
 0x4d1   : > { %v7102_v48 = vpop.f32.mrf.mxu0 }
 0x4d2   : > { %v6117_v26 = vsel %vm6053_vm7, %v5947_v22, %v6085_v13  ;;  %v5952_v43 = vadd.f32 %v7101_v4, %v10155_v32 }
 0x4d3   : > { %v7103_v27 = vpop.f32.mrf.mxu0  ;;  %v6145_v19 = vpack.c.bf16 %v6117_v26, %v6116_v41 }
 0x4d4   : > { %v7104_v1 = vadd.f32 %v7103_v27, %v7102_v48  ;;  %v6086_v10 = vmul.f32 0.2, %v5952_v43  ;;  %vm6054_vm8 = vcmp.gt.f32.partialorder %v5952_v43, 0.0 }
 0x4d5   : > { %v7105_v59 = vpop.f32.mrf.mxu0  ;;  %7216 = vmatmul.mubr.bf16.gmra.mxu1 %v6145_v19 }
 0x4d6   : > { %v5955_v29 = vadd.f32 %v7104_v1, %v10155_v32  ;;  %v6118_v28 = vsel %vm6054_vm8, %v5952_v43, %v6086_v10 }
 0x4d7   : > { %v7106_v46 = vpop.f32.mrf.mxu0 }
 0x4d8   : > { %vm6055_vm9 = vcmp.gt.f32.partialorder %v5955_v29, 0.0  ;;  %v6087_v39 = vmul.f32 0.2, %v5955_v29  ;;  %v7107_v45 = vadd.f32 %v7106_v46, %v7105_v59 }
 0x4d9   : > { %v7108_v56 = vpop.f32.mrf.mxu0 }
 0x4da   : > { %v5960_v7 = vadd.f32 %v7107_v45, %v10155_v32  ;;  %v6119_v2 = vsel %vm6055_vm9, %v5955_v29, %v6087_v39 }
 0x4db   : > { %v7109_v8 = vpop.f32.mrf.mxu0  ;;  %v6146_v31 = vpack.c.bf16 %v6119_v2, %v6118_v28 }
 0x4dc   : > { %v7110_v14 = vadd.f32 %v7109_v8, %v7108_v56  ;;  %v6088_v30 = vmul.f32 0.2, %v5960_v7  ;;  %vm6056_vm10 = vcmp.gt.f32.partialorder %v5960_v7, 0.0 }
 0x4dd   : > { %v7111_v34 = vpop.f32.mrf.mxu0  ;;  %7219 = vmatprep.mubr.bf16.mxu1 %v6146_v31 }
 0x4de   : > { %v5963_v3 = vadd.f32 %v7110_v14, %v10155_v32  ;;  %v6120_v24 = vsel %vm6056_vm10, %v5960_v7, %v6088_v30 }
 0x4df   : > { %v7112_v47 = vpop.f32.mrf.mxu0 }
 0x4e0   : > { %vm6057_vm11 = vcmp.gt.f32.partialorder %v5963_v3, 0.0  ;;  %v6089_v52 = vmul.f32 0.2, %v5963_v3  ;;  %v7113_v60 = vadd.f32 %v7112_v47, %v7111_v34 }
 0x4e1   : > { %v7114_v36 = vpop.f32.mrf.mxu0 }
 0x4e2   : > { %v6121_v62 = vsel %vm6057_vm11, %v5963_v3, %v6089_v52  ;;  %v5968_v0 = vadd.f32 %v7113_v60, %v10155_v32 }
 0x4e3   : > { %v7115_v57 = vpop.f32.mrf.mxu0  ;;  %v6147_v17 = vpack.c.bf16 %v6121_v62, %v6120_v24 }
 0x4e4   : > { %v7116_v40 = vadd.f32 %v7115_v57, %v7114_v36  ;;  %v6090_v15 = vmul.f32 0.2, %v5968_v0  ;;  %vm6058_vm12 = vcmp.gt.f32.partialorder %v5968_v0, 0.0 }
 0x4e5   : > { %v7117_v37 = vpop.f32.mrf.mxu0  ;;  %7220 = vmatmul.mubr.bf16.gmra.mxu1 %v6147_v17 }
 0x4e6   : > { %v5971_v42 = vadd.f32 %v7116_v40, %v10155_v32  ;;  %v6122_v53 = vsel %vm6058_vm12, %v5968_v0, %v6090_v15 }
 0x4e7   : > { %v7118_v55 = vpop.f32.mrf.mxu0 }
 0x4e8   : > { %vm6059_vm13 = vcmp.gt.f32.partialorder %v5971_v42, 0.0  ;;  %v6091_v9 = vmul.f32 0.2, %v5971_v42  ;;  %v7119_v63 = vadd.f32 %v7118_v55, %v7117_v37 }
 0x4e9   : > { %v7120_v23 = vpop.f32.mrf.mxu0 }
 0x4ea   : > { %v5976_v38 = vadd.f32 %v7119_v63, %v10155_v32  ;;  %v6123_v51 = vsel %vm6059_vm13, %v5971_v42, %v6091_v9 }
 0x4eb   : > { %v7121_v54 = vpop.f32.mrf.mxu0  ;;  %v6148_v50 = vpack.c.bf16 %v6123_v51, %v6122_v53 }
 0x4ec   : > { %v7122_v44 = vadd.f32 %v7121_v54, %v7120_v23  ;;  %v6092_v18 = vmul.f32 0.2, %v5976_v38  ;;  %vm6060_vm14 = vcmp.gt.f32.partialorder %v5976_v38, 0.0 }
 0x4ed   : > { %v7123_v16 = vpop.f32.mrf.mxu0  ;;  %7223 = vmatprep.mubr.bf16.mxu1 %v6148_v50 }
 0x4ee   : > { %v5979_v5 = vadd.f32 %v7122_v44, %v10155_v32  ;;  %v6124_v6 = vsel %vm6060_vm14, %v5976_v38, %v6092_v18 }
 0x4ef   : > { %v7124_v33 = vpop.f32.mrf.mxu0 }
 0x4f0   : > { %vm6061_vm15 = vcmp.gt.f32.partialorder %v5979_v5, 0.0  ;;  %v6093_v35 = vmul.f32 0.2, %v5979_v5  ;;  %v7125_v49 = vadd.f32 %v7124_v33, %v7123_v16 }
 0x4f1   : > { %v7126_v61 = vpop.f32.mrf.mxu0 }
 0x4f2   : > { %v6125_v21 = vsel %vm6061_vm15, %v5979_v5, %v6093_v35  ;;  %v5984_v20 = vadd.f32 %v7125_v49, %v10155_v32 }
 0x4f3   : > { %v7127_v12 = vpop.f32.mrf.mxu0  ;;  %v6149_v58 = vpack.c.bf16 %v6125_v21, %v6124_v6 }
 0x4f4   : > { %v7128_v25 = vadd.f32 %v7127_v12, %v7126_v61  ;;  %v6094_v11 = vmul.f32 0.2, %v5984_v20  ;;  %vm6062_vm0 = vcmp.gt.f32.partialorder %v5984_v20, 0.0 }
 0x4f5   : > { %v7129_v22 = vpop.f32.mrf.mxu0  ;;  %7224 = vmatmul.mubr.bf16.gmra.mxu1 %v6149_v58 }
 0x4f6   : > { %v5987_v13 = vadd.f32 %v7128_v25, %v10155_v32  ;;  %v6126_v27 = vsel %vm6062_vm0, %v5984_v20, %v6094_v11 }
 0x4f7   : > { %v7130_v4 = vpop.f32.mrf.mxu0 }
 0x4f8   : > { %vm6063_vm1 = vcmp.gt.f32.partialorder %v5987_v13, 0.0  ;;  %v6095_v48 = vmul.f32 0.2, %v5987_v13  ;;  %v7131_v41 = vadd.f32 %v7130_v4, %v7129_v22 }
 0x4f9   : > { %v7132_v26 = vpop.f32.mrf.mxu0 }
 0x4fa   : > { %v5992_v43 = vadd.f32 %v7131_v41, %v10155_v32  ;;  %v6127_v19 = vsel %vm6063_vm1, %v5987_v13, %v6095_v48 }
 0x4fb   : > { %v7133_v1 = vpop.f32.mrf.mxu0  ;;  %v6150_v59 = vpack.c.bf16 %v6127_v19, %v6126_v27 }
 0x4fc   : > { %v7134_v10 = vadd.f32 %v7133_v1, %v7132_v26  ;;  %v6096_v46 = vmul.f32 0.2, %v5992_v43  ;;  %vm6064_vm2 = vcmp.gt.f32.partialorder %v5992_v43, 0.0 }
 0x4fd   : > { %v7135_v29 = vpop.f32.mrf.mxu0  ;;  %7227 = vmatprep.mubr.bf16.mxu1 %v6150_v59 }
 0x4fe   : > { %v5995_v39 = vadd.f32 %v7134_v10, %v10155_v32  ;;  %v6128_v2 = vsel %vm6064_vm2, %v5992_v43, %v6096_v46 }
 0x4ff   : > { %v7136_v45 = vpop.f32.mrf.mxu0 }
 0x500   : > { %vm6065_vm3 = vcmp.gt.f32.partialorder %v5995_v39, 0.0  ;;  %v6097_v56 = vmul.f32 0.2, %v5995_v39  ;;  %v7137_v7 = vadd.f32 %v7136_v45, %v7135_v29 }
 0x501   : > { %v7138_v28 = vpop.f32.mrf.mxu0 }
 0x502   : > { %v6129_v8 = vsel %vm6065_vm3, %v5995_v39, %v6097_v56  ;;  %v6000_v31 = vadd.f32 %v7137_v7, %v10155_v32 }
 0x503   : > { %v7139_v14 = vpop.f32.mrf.mxu0  ;;  %v6151_v34 = vpack.c.bf16 %v6129_v8, %v6128_v2 }
 0x504   : > { %v7140_v30 = vadd.f32 %v7139_v14, %v7138_v28  ;;  %v6098_v47 = vmul.f32 0.2, %v6000_v31  ;;  %vm6066_vm4 = vcmp.gt.f32.partialorder %v6000_v31, 0.0 }
 0x505   : > { %v7141_v3 = vpop.f32.mrf.mxu0  ;;  %7228 = vmatmul.mubr.bf16.gmra.mxu1 %v6151_v34 }
 0x506   : > { %v6003_v52 = vadd.f32 %v7140_v30, %v10155_v32  ;;  %v6130_v57 = vsel %vm6066_vm4, %v6000_v31, %v6098_v47 }
 0x507   : > { %v7142_v60 = vpop.f32.mrf.mxu0 }
 0x508   : > { %vm6067_vm5 = vcmp.gt.f32.partialorder %v6003_v52, 0.0  ;;  %v6099_v36 = vmul.f32 0.2, %v6003_v52  ;;  %v7143_v24 = vadd.f32 %v7142_v60, %v7141_v3 }
 0x509   : > { %v7144_v62 = vpop.f32.mrf.mxu0 }
 0x50a   : > { %v6008_v0 = vadd.f32 %v7143_v24, %v10155_v32  ;;  %v6131_v17 = vsel %vm6067_vm5, %v6003_v52, %v6099_v36 }
 0x50b   : > { %v7145_v40 = vpop.f32.mrf.mxu0  ;;  %v6152_v37 = vpack.c.bf16 %v6131_v17, %v6130_v57  ;;  %v10193_v57 = vld [vmem:[%s10319_s8] ss:$0 sm:$0xff] }
 0x50c   : > { %v7146_v15 = vadd.f32 %v7145_v40, %v7144_v62  ;;  %v6100_v55 = vmul.f32 0.2, %v6008_v0  ;;  %vm6068_vm6 = vcmp.gt.f32.partialorder %v6008_v0, 0.0 }
 0x50d   : > { %v7147_v42 = vpop.f32.mrf.mxu1  ;;  %7231 = vmatprep.mubr.bf16.mxu1 %v6152_v37 }
 0x50e   : > { %v6011_v9 = vadd.f32 %v7146_v15, %v10155_v32  ;;  %v6132_v51 = vsel %vm6068_vm6, %v6008_v0, %v6100_v55 }
 0x50f   : > { %v7148_v63 = vpop.f32.mrf.mxu1 }
 0x510   : > { %vm6069_vm7 = vcmp.gt.f32.partialorder %v6011_v9, 0.0  ;;  %v6101_v23 = vmul.f32 0.2, %v6011_v9  ;;  %v7149_v38 = vadd.f32 %v7148_v63, %v7147_v42 }
 0x511   : > { %v7150_v53 = vpop.f32.mrf.mxu1 }
 0x512   : > { %v6133_v54 = vsel %vm6069_vm7, %v6011_v9, %v6101_v23  ;;  %v6016_v50 = vadd.f32 %v7149_v38, %v10155_v32 }
 0x513   : > { %v7151_v44 = vpop.f32.mrf.mxu1  ;;  %v6153_v16 = vpack.c.bf16 %v6133_v54, %v6132_v51 }
 0x514   : > { %v7152_v18 = vadd.f32 %v7151_v44, %v7150_v53  ;;  %v6102_v33 = vmul.f32 0.2, %v6016_v50  ;;  %vm6070_vm8 = vcmp.gt.f32.partialorder %v6016_v50, 0.0 }
 0x515   : > { %v7153_v5 = vpop.f32.mrf.mxu1  ;;  %7232 = vmatmul.mubr.bf16.gmra.mxu1 %v6153_v16 }
 0x516   : > { %v6019_v35 = vadd.f32 %v7152_v18, %v10155_v32  ;;  %v6134_v12 = vsel %vm6070_vm8, %v6016_v50, %v6102_v33 }
 0x517   : > { %v7154_v49 = vpop.f32.mrf.mxu1 }
 0x518   : > { %vm6071_vm9 = vcmp.gt.f32.partialorder %v6019_v35, 0.0  ;;  %v6103_v61 = vmul.f32 0.2, %v6019_v35  ;;  %v7155_v6 = vadd.f32 %v7154_v49, %v7153_v5 }
 0x519   : > { %v7156_v21 = vpop.f32.mrf.mxu1 }
 0x51a   : > { %v6024_v20 = vadd.f32 %v7155_v6, %v10155_v32  ;;  %v6135_v58 = vsel %vm6071_vm9, %v6019_v35, %v6103_v61 }
 0x51b   : > { %v7157_v25 = vpop.f32.mrf.mxu1  ;;  %v6154_v22 = vpack.c.bf16 %v6135_v58, %v6134_v12 }
 0x51c   : > { %v7158_v11 = vadd.f32 %v7157_v25, %v7156_v21  ;;  %v6104_v4 = vmul.f32 0.2, %v6024_v20  ;;  %vm6072_vm10 = vcmp.gt.f32.partialorder %v6024_v20, 0.0 }
 0x51d   : > { %v7159_v13 = vpop.f32.mrf.mxu1  ;;  %7235 = vmatprep.mubr.bf16.mxu1 %v6154_v22 }
 0x51e   : > { %v6027_v48 = vadd.f32 %v7158_v11, %v10155_v32  ;;  %v6136_v19 = vsel %vm6072_vm10, %v6024_v20, %v6104_v4 }
 0x51f   : > { %v7160_v41 = vpop.f32.mrf.mxu1 }
 0x520   : > { %vm6073_vm11 = vcmp.gt.f32.partialorder %v6027_v48, 0.0  ;;  %v6105_v26 = vmul.f32 0.2, %v6027_v48  ;;  %v7161_v43 = vadd.f32 %v7160_v41, %v7159_v13 }
 0x521   : > { %v7162_v27 = vpop.f32.mrf.mxu1 }
 0x522   : > { %v6137_v1 = vsel %vm6073_vm11, %v6027_v48, %v6105_v26  ;;  %v6032_v59 = vadd.f32 %v7161_v43, %v10155_v32 }
 0x523   : > { %v7163_v10 = vpop.f32.mrf.mxu1  ;;  %v6155_v29 = vpack.c.bf16 %v6137_v1, %v6136_v19 }
 0x524   : > { %v7164_v46 = vadd.f32 %v7163_v10, %v7162_v27  ;;  %v6106_v45 = vmul.f32 0.2, %v6032_v59  ;;  %vm6074_vm12 = vcmp.gt.f32.partialorder %v6032_v59, 0.0 }
 0x525   : > { %v7165_v39 = vpop.f32.mrf.mxu1  ;;  %7236 = vmatmul.mubr.bf16.gmra.mxu1 %v6155_v29 }
 0x526   : > { %v6035_v56 = vadd.f32 %v7164_v46, %v10155_v32  ;;  %v6138_v14 = vsel %vm6074_vm12, %v6032_v59, %v6106_v45 }
 0x527   : > { %v7166_v7 = vpop.f32.mrf.mxu1 }
 0x528   : > { %vm6075_vm13 = vcmp.gt.f32.partialorder %v6035_v56, 0.0  ;;  %v6107_v28 = vmul.f32 0.2, %v6035_v56  ;;  %v7167_v2 = vadd.f32 %v7166_v7, %v7165_v39 }
 0x529   : > { %v7168_v8 = vpop.f32.mrf.mxu1 }
 0x52a   : > { %v6040_v31 = vadd.f32 %v7167_v2, %v10155_v32  ;;  %v6139_v34 = vsel %vm6075_vm13, %v6035_v56, %v6107_v28 }
 0x52b   : > { %v7169_v30 = vpop.f32.mrf.mxu1  ;;  %v6156_v3 = vpack.c.bf16 %v6139_v34, %v6138_v14 }
 0x52c   : > { %v7170_v47 = vadd.f32 %v7169_v30, %v7168_v8  ;;  %v6108_v52 = vmul.f32 0.2, %v6040_v31  ;;  %vm6076_vm14 = vcmp.gt.f32.partialorder %v6040_v31, 0.0 }
 0x52d   : > { %7239 = vmatprep.mubr.bf16.mxu1 %v6156_v3 }
 0x52e   : > { %v6043_v60 = vadd.f32 %v7170_v47, %v10155_v32  ;;  %v6140_v24 = vsel %vm6076_vm14, %v6040_v31, %v6108_v52 }
 0x530   : > { %vm6077_vm15 = vcmp.gt.f32.partialorder %v6043_v60, 0.0  ;;  %v6109_v36 = vmul.f32 0.2, %v6043_v60 }
 0x532   : > { %v6141_v62 = vsel %vm6077_vm15, %v6043_v60, %v6109_v36 }
 0x533   : > { %v6157_v0 = vpack.c.bf16 %v6141_v62, %v6140_v24 }
 0x535   : > { %7240 = vmatmul.mubr.bf16.gmra.mxu1 %v6157_v0 }
 0x585   : > { %v7213_v17 = vpop.f32.mrf.mxu1 }
 0x586   : > { %v6272_v40 = vadd.f32 %v7213_v17, %v10193_v57 }
 0x587   : > { %v6263_v37 = vpop.f32.mrf.mxu1 }
 0x588   : > { %6392 = vst [vmem:[%s10196_s28 + $0x10] sm:$0xff] %v6272_v40  ;;  %v6264_v32 = vadd.f32 %v10193_v57, %v6263_v37 }
 0x589   : > { %v7214_v15 = vpop.f32.mrf.mxu1 }
 0x58a   : > { %6390 = vst [vmem:[%s10196_s28] sm:$0xff] %v6264_v32  ;;  %v6275_v42 = vadd.f32 %v7214_v15, %v10193_v57 }
 0x58b   : > { %v6266_v55 = vpop.f32.mrf.mxu1 }
 0x58c   : > { %6393 = vst [vmem:[%s10196_s28 + $0x18] sm:$0xff] %v6275_v42  ;;  %v6267_v9 = vadd.f32 %v10193_v57, %v6266_v55 }
 0x58e   : > { %6391 = vst [vmem:[%s10196_s28 + $0x8] sm:$0xff] %v6267_v9 }
 0x595   : > { %v7217_v63 = vpop.f32.mrf.mxu1 }
 0x596   : > { %v6288_v23 = vadd.f32 %v7217_v63, %v10193_v57 }
 0x597   : > { %v6279_v38 = vpop.f32.mrf.mxu1 }
 0x598   : > { %6396 = vst [vmem:[%s10196_s28 + $0x30] sm:$0xff] %v6288_v23  ;;  %v6280_v53 = vadd.f32 %v10193_v57, %v6279_v38 }
 0x599   : > { %v7218_v51 = vpop.f32.mrf.mxu1 }
 0x59a   : > { %6394 = vst [vmem:[%s10196_s28 + $0x20] sm:$0xff] %v6280_v53  ;;  %v6291_v54 = vadd.f32 %v7218_v51, %v10193_v57 }
 0x59b   : > { %v6282_v50 = vpop.f32.mrf.mxu1 }
 0x59c   : > { %6397 = vst [vmem:[%s10196_s28 + $0x38] sm:$0xff] %v6291_v54  ;;  %v6283_v44 = vadd.f32 %v10193_v57, %v6282_v50 }
 0x59e   : > { %6395 = vst [vmem:[%s10196_s28 + $0x28] sm:$0xff] %v6283_v44 }
 0x5a5   : > { %v7221_v16 = vpop.f32.mrf.mxu1 }
 0x5a6   : > { %v6304_v18 = vadd.f32 %v7221_v16, %v10193_v57 }
 0x5a7   : > { %v6295_v5 = vpop.f32.mrf.mxu1 }
 0x5a8   : > { %6400 = vst [vmem:[%s10196_s28 + $0x50] sm:$0xff] %v6304_v18  ;;  %v6296_v33 = vadd.f32 %v10193_v57, %v6295_v5 }
 0x5a9   : > { %v7222_v35 = vpop.f32.mrf.mxu1 }
 0x5aa   : > { %6398 = vst [vmem:[%s10196_s28 + $0x40] sm:$0xff] %v6296_v33  ;;  %v6307_v49 = vadd.f32 %v7222_v35, %v10193_v57 }
 0x5ab   : > { %v6298_v61 = vpop.f32.mrf.mxu1 }
 0x5ac   : > { %6401 = vst [vmem:[%s10196_s28 + $0x58] sm:$0xff] %v6307_v49  ;;  %v6299_v6 = vadd.f32 %v10193_v57, %v6298_v61 }
 0x5ae   : > { %6399 = vst [vmem:[%s10196_s28 + $0x48] sm:$0xff] %v6299_v6 }
 0x5b5   : > { %v7225_v21 = vpop.f32.mrf.mxu1 }
 0x5b6   : > { %v6320_v20 = vadd.f32 %v7225_v21, %v10193_v57 }
 0x5b7   : > { %v6311_v12 = vpop.f32.mrf.mxu1 }
 0x5b8   : > { %6404 = vst [vmem:[%s10196_s28 + $0x70] sm:$0xff] %v6320_v20  ;;  %v6312_v58 = vadd.f32 %v10193_v57, %v6311_v12 }
 0x5b9   : > { %v7226_v25 = vpop.f32.mrf.mxu1 }
 0x5ba   : > { %6402 = vst [vmem:[%s10196_s28 + $0x60] sm:$0xff] %v6312_v58  ;;  %v6323_v22 = vadd.f32 %v7226_v25, %v10193_v57 }
 0x5bb   : > { %v6314_v11 = vpop.f32.mrf.mxu1 }
 0x5bc   : > { %6405 = vst [vmem:[%s10196_s28 + $0x78] sm:$0xff] %v6323_v22  ;;  %v6315_v13 = vadd.f32 %v10193_v57, %v6314_v11 }
 0x5be   : > { %6403 = vst [vmem:[%s10196_s28 + $0x68] sm:$0xff] %v6315_v13 }
 0x5c5   : > { %v7229_v4 = vpop.f32.mrf.mxu1 }
 0x5c6   : > { %v6336_v48 = vadd.f32 %v7229_v4, %v10193_v57 }
 0x5c7   : > { %v6327_v41 = vpop.f32.mrf.mxu1 }
 0x5c8   : > { %6408 = vst [vmem:[%s10196_s28 + $0x90] sm:$0xff] %v6336_v48  ;;  %v6328_v26 = vadd.f32 %v10193_v57, %v6327_v41 }
 0x5c9   : > { %v7230_v43 = vpop.f32.mrf.mxu1 }
 0x5ca   : > { %6406 = vst [vmem:[%s10196_s28 + $0x80] sm:$0xff] %v6328_v26  ;;  %v6339_v27 = vadd.f32 %v7230_v43, %v10193_v57 }
 0x5cb   : > { %v6330_v19 = vpop.f32.mrf.mxu1 }
 0x5cc   : > { %6409 = vst [vmem:[%s10196_s28 + $0x98] sm:$0xff] %v6339_v27  ;;  %v6331_v1 = vadd.f32 %v10193_v57, %v6330_v19 }
 0x5ce   : > { %6407 = vst [vmem:[%s10196_s28 + $0x88] sm:$0xff] %v6331_v1 }
 0x5d5   : > { %v7233_v59 = vpop.f32.mrf.mxu1 }
 0x5d6   : > { %v6352_v10 = vadd.f32 %v7233_v59, %v10193_v57 }
 0x5d7   : > { %v6343_v29 = vpop.f32.mrf.mxu1 }
 0x5d8   : > { %6412 = vst [vmem:[%s10196_s28 + $0xb0] sm:$0xff] %v6352_v10  ;;  %v6344_v46 = vadd.f32 %v10193_v57, %v6343_v29 }
 0x5d9   : > { %v7234_v39 = vpop.f32.mrf.mxu1 }
 0x5da   : > { %6410 = vst [vmem:[%s10196_s28 + $0xa0] sm:$0xff] %v6344_v46  ;;  %v6355_v45 = vadd.f32 %v7234_v39, %v10193_v57 }
 0x5db   : > { %v6346_v56 = vpop.f32.mrf.mxu1 }
 0x5dc   : > { %6413 = vst [vmem:[%s10196_s28 + $0xb8] sm:$0xff] %v6355_v45  ;;  %v6347_v7 = vadd.f32 %v10193_v57, %v6346_v56 }
 0x5de   : > { %6411 = vst [vmem:[%s10196_s28 + $0xa8] sm:$0xff] %v6347_v7 }
 0x5e5   : > { %v7237_v28 = vpop.f32.mrf.mxu1 }
 0x5e6   : > { %v6368_v2 = vadd.f32 %v7237_v28, %v10193_v57 }
 0x5e7   : > { %v6359_v8 = vpop.f32.mrf.mxu1 }
 0x5e8   : > { %6416 = vst [vmem:[%s10196_s28 + $0xd0] sm:$0xff] %v6368_v2  ;;  %v6360_v31 = vadd.f32 %v10193_v57, %v6359_v8 }
 0x5e9   : > { %v7238_v14 = vpop.f32.mrf.mxu1 }
 0x5ea   : > { %6414 = vst [vmem:[%s10196_s28 + $0xc0] sm:$0xff] %v6360_v31  ;;  %v6371_v34 = vadd.f32 %v7238_v14, %v10193_v57 }
 0x5eb   : > { %v6362_v30 = vpop.f32.mrf.mxu1 }
 0x5ec   : > { %6417 = vst [vmem:[%s10196_s28 + $0xd8] sm:$0xff] %v6371_v34  ;;  %v6363_v3 = vadd.f32 %v10193_v57, %v6362_v30 }
 0x5ee   : > { %6415 = vst [vmem:[%s10196_s28 + $0xc8] sm:$0xff] %v6363_v3 }
 0x5f5   : > { %v7241_v47 = vpop.f32.mrf.mxu1 }
 0x5f6   : > { %v6384_v52 = vadd.f32 %v7241_v47, %v10193_v57 }
 0x5f7   : > { %v6375_v60 = vpop.f32.mrf.mxu1 }
 0x5f8   : > { %6420 = vst [vmem:[%s10196_s28 + $0xf0] sm:$0xff] %v6384_v52  ;;  %v6376_v36 = vadd.f32 %v10193_v57, %v6375_v60 }
 0x5f9   : > { %v7242_v24 = vpop.f32.mrf.mxu1 }
 0x5fa   : > { %6418 = vst [vmem:[%s10196_s28 + $0xe0] sm:$0xff] %v6376_v36  ;;  %v6387_v62 = vadd.f32 %v7242_v24, %v10193_v57 }
 0x5fb   : > { %v6378_v0 = vpop.f32.mrf.mxu1 }
 0x5fc   : > { %6421 = vst [vmem:[%s10196_s28 + $0xf8] sm:$0xff] %v6387_v62  ;;  %v6379_v17 = vadd.f32 %v10193_v57, %v6378_v0 }
 0x5fe   : > { %6419 = vst [vmem:[%s10196_s28 + $0xe8] sm:$0xff] %v6379_v17 }
 0x5ff   : > { %8042 = shalt.err (!%p8039_p3)
}
 0x600   : > { %s8043_s24 = scalar_lea.hbm %s10263_s21, 4096  ;;  %s8047_s23 = scalar_lea.hbm %s10320_s9, 8192 }
 0x601   : > { %p8044_p10 = scmp.ne.s32.totalorder %s10263_s21, %s8043_s24  ;;  %p8048_p13 = scmp.lt.s32.totalorder %s10263_s21, %s10320_s9 }
 0x602   : > { %p8049_p0 = scmp.lt.s32.totalorder %s8047_s23, %s8043_s24 }
 0x603   : > { %p8045_p6 = pnand %p8044_p10, %p10898_p9 }
 0x604   : > { %p8050_p2 = por %p8049_p0, %p8048_p13 }
 0x605   : > { %p8046_p12 = pneg %p8045_p6 }
 0x607   : > { %p8051_p8 = pnand %p8050_p2, %p8046_p12 }
 0x609   : > { %8054 = shalt.err (!%p8051_p8)
}
 0x60a   : > { %s8122_s17 = smov 128   ;;  %s8123_s3 = smov 8  }
 0x60b   : > { %7281 = dma.vmem_to_hbm [thread:$0]  (%p10898_p9), %s10265_s1, 4096, %s10263_s21, %s6423_s15, %s8122_s17, %s8122_s17, %s8123_s3  }
 0x60c PF: > { %s6451_s14 = sand.u32 1, %s8093_s30   ;;  %p10899_p4 = scmp.ne.s32.totalorder %s10465_s29, 0 }
 0x60d   : > { %p10900_p11 = scmp.ge.s32.totalorder %s8105_s12, 2  ;;  %s6452_s16 = scalar_lea.sflag [#allocation4], %s6451_s14 }
 0x60f   : > { %p7304_p7 = pnand %p10900_p11, %p10899_p4 }
 0x611   : > { %p7305_p5 = pneg %p7304_p7 }
 0x613   : > { %8088 = dma.done.wait (%p7305_p5), %s6452_s16, 4096  }
 0x614   : > { %8090 = vsyncadd (%p7305_p5), %s6452_s16, 4294963200  ;;  %p25_p1 = scmp.ge.s32.totalorder %s8266_s19, 4   ;;  %s10901_s30 = smov %s8097_s10 }
 0x615   : > { %s10902_s10 = smov %s8101_s11  ;;  %s10903_s11 = smov %s8278_s18 }
 0x616   : > { %s10904_s12 = smov %s8266_s19  ;;  %27 = sbr.rel (!%p25_p1) target bundleno = 12 (0xc), region = 121 }
 0x61b   :  { %6457 = vsyncpa [#allocation3], 1 }
 0x61c   :  { %6459 = vsyncpa [#allocation3 + $0x1], 1 }
 0x61d   :  { %6460 = vsyncpa [#allocation6], 1 }
 0x61e   :  { %6461 = vsyncpa [#allocation9], 1 }
 0x61f   :  { %6462 = vsyncpa [#allocation12], 1 }
 0x620   :  { %6463 = vsyncpa [#allocation4], 1 }
 0x621   :  { %6465 = vsyncpa [#allocation4 + $0x1], 1 }

</bundles_post_ra>
